<compile_context>
chip_gen: v7x
topology: tpu7x:2x2x1
jax: 0.10.0
libtpu: 0.0.40
codegen_flags: <defaults>
</compile_context>

<pallas_src>
import functools
import math

import jax
import jax.numpy as jnp
import numpy as np
from jax.experimental import pallas as pl
from jax.experimental.pallas import tpu as pltpu

F32 = jnp.float32


def _round_up(x, m):
    return (x + m - 1) // m * m


def _full_spec(shape):
    nd = len(shape)

    def idx(*_):
        return (0,) * nd

    return pl.BlockSpec(shape, idx)


def _cumsum_rows(x, row):
    # Exact f32 inclusive cumsum along axis 0 (sublanes): log2(Lt) roll+mask+add steps
    # (XLU roll + VPU add). Replaces the old L x L tril MXU matmul.
    n = x.shape[0]
    d = 1
    while d < n:
        x = x + jnp.where(row >= d, pltpu.roll(x, shift=d, axis=0), 0.0)
        d *= 2
    return x


# ----------------------------------------------------------------------------
# Pallas kernels
# ----------------------------------------------------------------------------
def _mamba_layer_kernel(x_ref, gamma_ref, win_ref, wconv_ref, bconv_ref,
                        wxp_ref, wdt_ref, bdt_ref, aT_ref, dvec_ref, wout_ref,
                        out_ref, scar_ref, hcar_ref, xprev_ref):
    # One ResidualBlock:  x + MambaBlock(RMSNorm(x)), for one (batch, L-tile) block.
    t_idx = pl.program_id(1)
    x_in = x_ref[0]                                   # (Lt, d_model)
    Lt = x_in.shape[0]
    k, d_inner = wconv_ref.shape
    d_state = aT_ref.shape[0]
    RSEG = wdt_ref.shape[0]                           # 128-aligned dt-low segment width
    DPAD = win_ref.shape[1] - d_inner                 # 128-aligned offset of the res half
    row = jax.lax.broadcasted_iota(jnp.int32, (Lt, 1), 0)

    @pl.when(t_idx == 0)
    def _init():                                      # reset carries at the start of each sequence
        scar_ref[...] = jnp.zeros_like(scar_ref)
        hcar_ref[...] = jnp.zeros_like(hcar_ref)
        xprev_ref[...] = jnp.zeros_like(xprev_ref)

    # ---- RMSNorm -------------------------------------------------------------
    ms = jnp.mean(x_in * x_in, axis=-1, keepdims=True)
    xn = x_in * jax.lax.rsqrt(ms + 1e-5) * gamma_ref[...]

    # ---- fused in_proj (x | res), one MXU matmul, 128-aligned split ------------
    z = jnp.dot(xn, win_ref[...], preferred_element_type=F32)   # (Lt, DPAD + d_inner)
    xs = z[:, :d_inner]
    res = z[:, DPAD:]

    # ---- causal depthwise conv (k taps) with cross-tile history, then SiLU ----
    hist = xprev_ref[...]                             # (8, d_inner): tail of previous tile
    conv = bconv_ref[...] + xs * wconv_ref[k - 1:k, :]
    for s in range(1, k):                             # static unrolled taps
        cur = pltpu.roll(xs, shift=s, axis=0)
        prev = pltpu.roll(hist, shift=s, axis=0)      # rows t<s hold hist[8 - s + t]
        if Lt > 8:
            prev = jnp.concatenate([prev, jnp.zeros((Lt - 8, d_inner), F32)], axis=0)
        conv = conv + jnp.where(row < s, prev, cur) * wconv_ref[k - 1 - s:k - s, :]
    xprev_ref[...] = xs[Lt - 8:, :]                   # save tail for the next L tile
    u = conv * jax.nn.sigmoid(conv)                   # SiLU

    # ---- fused x_proj (dt-low | B | C) + dt_proj + softplus --------------------
    zp = jnp.dot(u, wxp_ref[...], preferred_element_type=F32)   # (Lt, RSEG + 2*d_state)
    dt = jax.nn.softplus(
        jnp.dot(zp[:, :RSEG], wdt_ref[...], preferred_element_type=F32) + bdt_ref[...])
    bc = zp[:, RSEG:]                                 # (Lt, 2*d_state): [B | C]
    n_iota = jax.lax.broadcasted_iota(jnp.int32, (Lt, 2 * d_state), 1)

    # ---- selective scan: static loop over d_state, all (Lt, d_inner) VPU/EUP work.
    # Cumsums are exact log-step roll/adds; prefixes carried across L tiles in scratch.
    dtu = dt * u
    first_row = (row == 0) & (t_idx == 0)
    y = u * dvec_ref[...]                             # D skip term
    for n in range(d_state):
        a_n = aT_ref[n:n + 1, :]                      # (1, d_inner)
        a_delta = jnp.exp(dt * a_n)                   # torch .clamp(min=-20) is a no-op here
        a_shift = jnp.where(first_row, 0.0, a_delta)
        s_old = scar_ref[n]                           # (1, d_inner) carried prefix sum
        s_loc = _cumsum_rows(a_shift, row) + s_old
        a_cs = jnp.exp(s_loc)
        b_n = jnp.sum(jnp.where(n_iota == n, bc, 0.0), axis=1, keepdims=True)
        c_n = jnp.sum(jnp.where(n_iota == d_state + n, bc, 0.0), axis=1, keepdims=True)
        h = (dtu * b_n) * pl.reciprocal(a_cs + 1e-12, approx=True)
        h_old = hcar_ref[n]                           # (1, d_inner) carried h prefix
        h_cs = _cumsum_rows(h, row) + h_old
        y = y + (h_cs * a_cs) * c_n
        scar_ref[n] = s_old + jnp.sum(a_shift, axis=0, keepdims=True)
        hcar_ref[n] = h_old + jnp.sum(h, axis=0, keepdims=True)

    # ---- gate + out_proj + residual --------------------------------------------
    g = y * (res * jax.nn.sigmoid(res))
    out_ref[0] = x_in + jnp.dot(g, wout_ref[...], preferred_element_type=F32)


def _head_kernel(x_ref, gamma_ref, whead_ref, out_ref):
    # Final RMSNorm + tied lm_head, one (row-tile, vocab-tile) block.
    x = x_ref[...]
    ms = jnp.mean(x * x, axis=-1, keepdims=True)
    xn = x * jax.lax.rsqrt(ms + 1e-5) * gamma_ref[...]
    out_ref[...] = jnp.dot(xn, whead_ref[...], preferred_element_type=F32)


# ----------------------------------------------------------------------------
# Wrappers
# ----------------------------------------------------------------------------
def mamba_layer_pallas(x, lp, l_tile):
    B, L, d_model = x.shape
    assert L % l_tile == 0 and l_tile % 8 == 0 and l_tile >= 8
    d_state, d_inner = lp["aT"].shape
    operands = [x, lp["gamma"], lp["win"], lp["wconv"], lp["bconv"],
                lp["wxp"], lp["wdt"], lp["bdt"], lp["aT"], lp["dvec"], lp["wout"]]
    in_specs = [pl.BlockSpec((1, l_tile, d_model), lambda b, t: (b, t, 0))]
    in_specs += [_full_spec(op.shape) for op in operands[1:]]
    return pl.pallas_call(
        _mamba_layer_kernel,
        out_shape=jax.ShapeDtypeStruct((B, L, d_model), F32),
        grid=(B, L // l_tile),
        in_specs=in_specs,
        out_specs=pl.BlockSpec((1, l_tile, d_model), lambda b, t: (b, t, 0)),
        scratch_shapes=[pltpu.VMEM((d_state, 1, d_inner), F32),   # running sum of A_delta
                        pltpu.VMEM((d_state, 1, d_inner), F32),   # running sum of h
                        pltpu.VMEM((8, d_inner), F32)],           # conv history (last 8 rows)
        input_output_aliases={0: 0},                              # residual written in place
        compiler_params=pltpu.CompilerParams(
            dimension_semantics=("parallel", "arbitrary"),
            vmem_limit_bytes=64 * 1024 * 1024),
    )(*operands)


def lm_head_pallas(x, gamma_f2d, whead, v_out):
    B, L, d_model = x.shape
    M = B * L
    V_pad = whead.shape[1]
    x2 = x.reshape(M, d_model)                        # batch the GEMM over B*L rows
    TM = M if M <= 512 else 256
    TV = 512 if (V_pad % 512 == 0 and V_pad > 512) else (V_pad if V_pad <= 512 else 128)
    assert M % TM == 0 and V_pad % TV == 0
    out = pl.pallas_call(
        _head_kernel,
        out_shape=jax.ShapeDtypeStruct((M, V_pad), F32),
        grid=(M // TM, V_pad // TV),
        in_specs=[pl.BlockSpec((TM, d_model), lambda m, v: (m, 0)),
                  _full_spec(gamma_f2d.shape),
                  pl.BlockSpec((d_model, TV), lambda m, v: (0, v))],
        out_specs=pl.BlockSpec((TM, TV), lambda m, v: (m, v)),
        compiler_params=pltpu.CompilerParams(
            dimension_semantics=("parallel", "parallel"),
            vmem_limit_bytes=64 * 1024 * 1024),
    )(x2, gamma_f2d, whead)
    return out.reshape(B, L, V_pad)[:, :, :v_out]


def mamba_forward_pallas(tokens, emb, klayers, gamma_f2d, whead, *, l_tile, v_out):
    x = emb[tokens]                                   # embedding gather: plain-JAX glue
    for lp in klayers:
        x = mamba_layer_pallas(x, lp, l_tile)
    return lm_head_pallas(x, gamma_f2d, whead, v_out)


# ----------------------------------------------------------------------------
# Deterministic parameter init (shapes from the PyTorch __init__)
# ----------------------------------------------------------------------------
def init_model(key, d_model, n_layers, vocab_size, d_state=16, expand=2, d_conv=4):
    vocab = vocab_size + (8 - vocab_size % 8) % 8
    d_inner = expand * d_model
    dt_rank = math.ceil(d_model / 16)
    keys = jax.random.split(key, n_layers + 1)
    emb = jax.random.normal(keys[0], (vocab, d_model), F32) * 0.02
    layers = []
    for i in range(n_layers):
        ks = jax.random.split(keys[i + 1], 6)
        layers.append(dict(
            gamma=jnp.ones((d_model,), F32),
            W_in=jax.random.normal(ks[0], (2 * d_inner, d_model), F32) / math.sqrt(d_model),
            conv_w=jax.random.normal(ks[1], (d_inner, d_conv), F32) * 0.3,
            conv_b=jax.random.normal(ks[2], (d_inner,), F32) * 0.1,
            W_xproj=jax.random.normal(ks[3], (dt_rank + 2 * d_state, d_inner), F32) / math.sqrt(d_inner),
            W_dt=jax.random.normal(ks[4], (d_inner, dt_rank), F32) / math.sqrt(dt_rank),
            b_dt=jnp.full((d_inner,), 0.05, F32),
            A_log=jnp.log(jnp.tile(jnp.arange(1, d_state + 1, dtype=F32), (d_inner, 1))),
            D=jnp.ones((d_inner,), F32),
            W_out=jax.random.normal(ks[5], (d_model, d_inner), F32) / math.sqrt(d_inner),
        ))
    dims = dict(vocab=vocab, d_inner=d_inner, dt_rank=dt_rank,
                d_state=d_state, d_conv=d_conv, d_model=d_model)
    return dict(emb=emb, layers=layers, gamma_f=jnp.ones((d_model,), F32)), dims


def prep_kernel_params(params, dims):
    d_model, d_inner = dims["d_model"], dims["d_inner"]
    d_state, dt_rank = dims["d_state"], dims["dt_rank"]
    DPAD = _round_up(d_inner, 128)                    # 128-aligned split point for in_proj
    RSEG = _round_up(max(dt_rank, 1), 128)            # 128-aligned dt-low segment for x_proj
    klayers = []
    for lp in params["layers"]:
        win = jnp.zeros((d_model, DPAD + d_inner), F32)
        win = win.at[:, :d_inner].set(lp["W_in"][:d_inner].T)        # x branch
        win = win.at[:, DPAD:].set(lp["W_in"][d_inner:].T)           # res branch
        wxp = jnp.zeros((d_inner, RSEG + 2 * d_state), F32)
        wxp = wxp.at[:, :dt_rank].set(lp["W_xproj"][:dt_rank].T)     # dt-low
        wxp = wxp.at[:, RSEG:].set(lp["W_xproj"][dt_rank:].T)        # [B | C]
        wdt = jnp.zeros((RSEG, d_inner), F32).at[:dt_rank, :].set(lp["W_dt"].T)
        klayers.append(dict(
            gamma=lp["gamma"][None, :],
            win=win,
            wconv=lp["conv_w"].T,                      # (d_conv, d_inner)
            bconv=lp["conv_b"][None, :],
            wxp=wxp,
            wdt=wdt,
            bdt=lp["b_dt"][None, :],
            aT=(-jnp.exp(lp["A_log"])).T,              # (d_state, d_inner)
            dvec=lp["D"][None, :],
            wout=lp["W_out"].T,                        # (d_inner, d_model)
        ))
    V = params["emb"].shape[0]
    V_pad = _round_up(V, 128)                          # lane-dense lm_head tiles
    whead = jnp.zeros((d_model, V_pad), F32).at[:, :V].set(params["emb"].T)
    return klayers, whead


# ----------------------------------------------------------------------------
# Pure-JAX reference mirroring the PyTorch code (for verification)
# ----------------------------------------------------------------------------
def _rmsnorm_ref(x, gamma, eps=1e-5):
    return x * jax.lax.rsqrt(jnp.mean(x * x, axis=-1, keepdims=True) + eps) * gamma


def _selective_scan_ref(u, dt, A, B, C, D):
    A_delta = jnp.maximum(jnp.exp(jnp.einsum("bld,dn->bldn", dt, A)), -20.0)
    Bdu = jnp.einsum("bld,bld,bln->bldn", dt, u, B)
    A_shift = A_delta.at[:, 0].set(0.0)
    A_cs = jnp.exp(jnp.cumsum(A_shift, axis=1))
    h = Bdu / (A_cs + 1e-12)
    y = jnp.einsum("bldn,bln->bld", jnp.cumsum(h, axis=1) * A_cs, C)
    return y + u * D


def _mamba_block_ref(x, lp, dims):
    d_inner, d_state, dt_rank, k = (dims["d_inner"], dims["d_state"],
                                    dims["dt_rank"], dims["d_conv"])
    L = x.shape[1]
    xz = x @ lp["W_in"].T
    xs, res = xz[..., :d_inner], xz[..., d_inner:]
    xp = jnp.pad(xs, ((0, 0), (k - 1, 0), (0, 0)))
    conv = lp["conv_b"][None, None, :]
    for j in range(k):
        conv = conv + lp["conv_w"][:, j][None, None, :] * xp[:, j:j + L, :]
    xs = jax.nn.silu(conv)
    proj = xs @ lp["W_xproj"].T
    dlow = proj[..., :dt_rank]
    Bm = proj[..., dt_rank:dt_rank + d_state]
    Cm = proj[..., dt_rank + d_state:]
    dt = jax.nn.softplus(dlow @ lp["W_dt"].T + lp["b_dt"])
    A = -jnp.exp(lp["A_log"])
    y = _selective_scan_ref(xs, dt, A, Bm, Cm, lp["D"])
    return (y * jax.nn.silu(res)) @ lp["W_out"].T


def mamba_forward_ref(tokens, params, dims):
    x = params["emb"][tokens]
    for lp in params["layers"]:
        x = x + _mamba_block_ref(_rmsnorm_ref(x, lp["gamma"]), lp, dims)
    return _rmsnorm_ref(x, params["gamma_f"]) @ params["emb"].T


# ----------------------------------------------------------------------------
if __name__ == "__main__":
    d_model, n_layers, vocab_size = 32, 2, 37      # vocab pads to 40 (module rule)
    B, L = 2, 8
    key = jax.random.PRNGKey(0)
    pkey, tkey = jax.random.split(key)

    params, dims = init_model(pkey, d_model, n_layers, vocab_size)
    klayers, whead = prep_kernel_params(params, dims)
    tokens = jax.random.randint(tkey, (B, L), 0, dims["vocab"], dtype=jnp.int32)

    # L-tile: 512-1024 fits v5e/v6e (128 MiB VMEM); use 128-256 on v7x (64 MiB).
    l_tile = min(L, 256)
    fwd = jax.jit(functools.partial(
        mamba_forward_pallas, l_tile=l_tile, v_out=dims["vocab"]))
    out = fwd(tokens, params["emb"], klayers, params["gamma_f"][None, :], whead)
    out = jax.block_until_ready(out)

    ref = mamba_forward_ref(tokens, params, dims)
    assert out.shape == (B, L, dims["vocab"]), out.shape
    np.testing.assert_allclose(np.asarray(out), np.asarray(ref), rtol=2e-2, atol=3e-3)

    print("KERNEL_OK")
</pallas_src>

<mosaic_0001>
module attributes {stable_mosaic.version = 11 : i64} {
  func.func @_head_kernel(%arg0: i32, %arg1: i32, %arg2: memref<16x32xf32, #tpu.memory_space<vmem>>, %arg3: memref<1x32xf32, #tpu.memory_space<vmem>>, %arg4: memref<32x128xf32, #tpu.memory_space<vmem>>, %arg5: memref<16x128xf32, #tpu.memory_space<vmem>>) attributes {dimension_semantics = [#tpu.dimension_semantics<parallel>, #tpu.dimension_semantics<parallel>], iteration_bounds = array<i64: 1, 1>, scalar_prefetch = 0 : i64, scratch_operands = 0 : i64, tpu.core_type = #tpu.core_type<tc>, window_params = [{transform_indices = @transform_0, window_bounds = array<i64: 16, 32>}, {pipeline_mode = #tpu.pipeline_mode<synchronous>, transform_indices = @transform_1, window_bounds = array<i64: 1, 32>}, {transform_indices = @transform_2, window_bounds = array<i64: 32, 128>}, {transform_indices = @transform_3, window_bounds = array<i64: 16, 128>}]} {
    %c0 = arith.constant 0 : index
    %c0_0 = arith.constant 0 : index
    %0 = vector.load %arg2[%c0, %c0_0] : memref<16x32xf32, #tpu.memory_space<vmem>>, vector<16x32xf32>
    %1 = arith.mulf %0, %0 : vector<16x32xf32>
    %cst = arith.constant dense<0.000000e+00> : vector<16xf32>
    %2 = vector.multi_reduction <add>, %1, %cst [1] : vector<16x32xf32> to vector<16xf32>
    %3 = vector.shape_cast %2 : vector<16xf32> to vector<16x1xf32>
    %cst_1 = arith.constant 3.200000e+01 : f32
    %4 = vector.broadcast %cst_1 : f32 to vector<16x1xf32>
    %5 = arith.divf %3, %4 : vector<16x1xf32>
    %cst_2 = arith.constant 9.99999974E-6 : f32
    %6 = vector.broadcast %cst_2 : f32 to vector<16x1xf32>
    %7 = arith.addf %5, %6 : vector<16x1xf32>
    %8 = math.rsqrt %7 : vector<16x1xf32>
    %9 = vector.broadcast %8 : vector<16x1xf32> to vector<16x32xf32>
    %10 = arith.mulf %0, %9 : vector<16x32xf32>
    %c0_3 = arith.constant 0 : index
    %c0_4 = arith.constant 0 : index
    %11 = vector.load %arg3[%c0_3, %c0_4] : memref<1x32xf32, #tpu.memory_space<vmem>>, vector<1x32xf32>
    %12 = vector.broadcast %11 : vector<1x32xf32> to vector<16x32xf32>
    %13 = arith.mulf %10, %12 : vector<16x32xf32>
    %c0_5 = arith.constant 0 : index
    %c0_6 = arith.constant 0 : index
    %14 = vector.load %arg4[%c0_5, %c0_6] : memref<32x128xf32, #tpu.memory_space<vmem>>, vector<32x128xf32>
    %cst_7 = arith.constant dense<0.000000e+00> : vector<16x128xf32>
    %15 = tpu.matmul %13, %14, %cst_7 {dimension_numbers = #tpu.dot_dimension_numbers<[1], [0], [0], [1], [0, 0, 1, 1], [], []>} : vector<16x32xf32>, vector<32x128xf32>, vector<16x128xf32> -> vector<16x128xf32>
    %c0_8 = arith.constant 0 : index
    %c0_9 = arith.constant 0 : index
    %16 = vector.load %arg5[%c0_8, %c0_9] : memref<16x128xf32, #tpu.memory_space<vmem>>, vector<16x128xf32>
    tpu.vector_store %arg5[%c0_8, %c0_9], %15 {strides = array<i32>} : memref<16x128xf32, #tpu.memory_space<vmem>>, vector<16x128xf32>,
    return
  }
  func.func @transform_0(%arg0: i32, %arg1: i32) -> (i32, i32) {
    %c0_i32 = arith.constant 0 : i32
    %c0_i32_0 = arith.constant 0 : i32
    return %arg0, %c0_i32 : i32, i32
  }
  func.func @transform_1(%arg0: i32, %arg1: i32) -> (i32, i32) {
    %c0_i32 = arith.constant 0 : i32
    %c0_i32_0 = arith.constant 0 : i32
    %c0_i32_1 = arith.constant 0 : i32
    return %c0_i32, %c0_i32_0 : i32, i32
  }
  func.func @transform_2(%arg0: i32, %arg1: i32) -> (i32, i32) {
    %c0_i32 = arith.constant 0 : i32
    %c0_i32_0 = arith.constant 0 : i32
    return %c0_i32, %arg1 : i32, i32
  }
  func.func @transform_3(%arg0: i32, %arg1: i32) -> (i32, i32) {
    %c0_i32 = arith.constant 0 : i32
    return %arg0, %arg1 : i32, i32
  }
}

module attributes {stable_mosaic.version = 11 : i64} {
  func.func @_mamba_layer_kernel(%arg0: i32, %arg1: i32, %arg2: memref<1x8x32xf32, #tpu.memory_space<vmem>>, %arg3: memref<1x32xf32, #tpu.memory_space<vmem>>, %arg4: memref<32x192xf32, #tpu.memory_space<vmem>>, %arg5: memref<4x64xf32, #tpu.memory_space<vmem>>, %arg6: memref<1x64xf32, #tpu.memory_space<vmem>>, %arg7: memref<64x160xf32, #tpu.memory_space<vmem>>, %arg8: memref<128x64xf32, #tpu.memory_space<vmem>>, %arg9: memref<1x64xf32, #tpu.memory_space<vmem>>, %arg10: memref<16x64xf32, #tpu.memory_space<vmem>>, %arg11: memref<1x64xf32, #tpu.memory_space<vmem>>, %arg12: memref<64x32xf32, #tpu.memory_space<vmem>>, %arg13: memref<1x8x32xf32, #tpu.memory_space<vmem>>, %arg14: memref<16x1x64xf32, #tpu.memory_space<vmem>>, %arg15: memref<16x1x64xf32, #tpu.memory_space<vmem>>, %arg16: memref<8x64xf32, #tpu.memory_space<vmem>>) attributes {dimension_semantics = [#tpu.dimension_semantics<parallel>, #tpu.dimension_semantics<arbitrary>], iteration_bounds = array<i64: 2, 1>, scalar_prefetch = 0 : i64, scratch_operands = 3 : i64, tpu.core_type = #tpu.core_type<tc>, window_params = [{transform_indices = @transform_0, window_bounds = array<i64: 1, 8, 32>}, {pipeline_mode = #tpu.pipeline_mode<synchronous>, transform_indices = @transform_1, window_bounds = array<i64: 1, 32>}, {pipeline_mode = #tpu.pipeline_mode<synchronous>, transform_indices = @transform_2, window_bounds = array<i64: 32, 192>}, {pipeline_mode = #tpu.pipeline_mode<synchronous>, transform_indices = @transform_3, window_bounds = array<i64: 4, 64>}, {pipeline_mode = #tpu.pipeline_mode<synchronous>, transform_indices = @transform_4, window_bounds = array<i64: 1, 64>}, {pipeline_mode = #tpu.pipeline_mode<synchronous>, transform_indices = @transform_5, window_bounds = array<i64: 64, 160>}, {pipeline_mode = #tpu.pipeline_mode<synchronous>, transform_indices = @transform_6, window_bounds = array<i64: 128, 64>}, {pipeline_mode = #tpu.pipeline_mode<synchronous>, transform_indices = @transform_7, window_bounds = array<i64: 1, 64>}, {pipeline_mode = #tpu.pipeline_mode<synchronous>, transform_indices = @transform_8, window_bounds = array<i64: 16, 64>}, {pipeline_mode = #tpu.pipeline_mode<synchronous>, transform_indices = @transform_9, window_bounds = array<i64: 1, 64>}, {pipeline_mode = #tpu.pipeline_mode<synchronous>, transform_indices = @transform_10, window_bounds = array<i64: 64, 32>}, {transform_indices = @transform_11, window_bounds = array<i64: 1, 8, 32>}]} {
    %c0 = arith.constant 0 : index
    %c0_0 = arith.constant 0 : index
    %c0_1 = arith.constant 0 : index
    %0 = vector.load %arg2[%c0, %c0_0, %c0_1] : memref<1x8x32xf32, #tpu.memory_space<vmem>>, vector<1x8x32xf32>
    %1 = vector.shape_cast %0 : vector<1x8x32xf32> to vector<8x32xf32>
    %2 = tpu.iota {dimensions = array<i32: 0>} : vector<8x1xi32>
    %c0_i32 = arith.constant 0 : i32
    %3 = arith.cmpi eq, %arg1, %c0_i32 : i32
    %4 = arith.extui %3 : i1 to i32
    %c0_i32_2 = arith.constant 0 : i32
    %5 = arith.cmpi ne, %4, %c0_i32_2 : i32
    scf.if %5 {
      %cst_681 = arith.constant 0.000000e+00 : f32
      %1700 = vector.broadcast %cst_681 : f32 to vector<16x1x64xf32>
      %c0_682 = arith.constant 0 : index
      %c0_683 = arith.constant 0 : index
      %c0_684 = arith.constant 0 : index
      %1701 = vector.load %arg14[%c0_682, %c0_683, %c0_684] : memref<16x1x64xf32, #tpu.memory_space<vmem>>, vector<16x1x64xf32>
      tpu.vector_store %arg14[%c0_682, %c0_683, %c0_684], %1700 {strides = array<i32>} : memref<16x1x64xf32, #tpu.memory_space<vmem>>, vector<16x1x64xf32>,
      %cst_685 = arith.constant 0.000000e+00 : f32
      %1702 = vector.broadcast %cst_685 : f32 to vector<16x1x64xf32>
      %c0_686 = arith.constant 0 : index
      %c0_687 = arith.constant 0 : index
      %c0_688 = arith.constant 0 : index
      %1703 = vector.load %arg15[%c0_686, %c0_687, %c0_688] : memref<16x1x64xf32, #tpu.memory_space<vmem>>, vector<16x1x64xf32>
      tpu.vector_store %arg15[%c0_686, %c0_687, %c0_688], %1702 {strides = array<i32>} : memref<16x1x64xf32, #tpu.memory_space<vmem>>, vector<16x1x64xf32>,
      %cst_689 = arith.constant 0.000000e+00 : f32
      %1704 = vector.broadcast %cst_689 : f32 to vector<8x64xf32>
      %c0_690 = arith.constant 0 : index
      %c0_691 = arith.constant 0 : index
      %1705 = vector.load %arg16[%c0_690, %c0_691] : memref<8x64xf32, #tpu.memory_space<vmem>>, vector<8x64xf32>
      tpu.vector_store %arg16[%c0_690, %c0_691], %1704 {strides = array<i32>} : memref<8x64xf32, #tpu.memory_space<vmem>>, vector<8x64xf32>,
    } else {
    }
    %6 = arith.mulf %1, %1 : vector<8x32xf32>
    %cst = arith.constant dense<0.000000e+00> : vector<8xf32>
    %7 = vector.multi_reduction <add>, %6, %cst [1] : vector<8x32xf32> to vector<8xf32>
    %8 = vector.shape_cast %7 : vector<8xf32> to vector<8x1xf32>
    %cst_3 = arith.constant 3.200000e+01 : f32
    %9 = vector.broadcast %cst_3 : f32 to vector<8x1xf32>
    %10 = arith.divf %8, %9 : vector<8x1xf32>
    %cst_4 = arith.constant 9.99999974E-6 : f32
    %11 = vector.broadcast %cst_4 : f32 to vector<8x1xf32>
    %12 = arith.addf %10, %11 : vector<8x1xf32>
    %13 = math.rsqrt %12 : vector<8x1xf32>
    %14 = vector.broadcast %13 : vector<8x1xf32> to vector<8x32xf32>
    %15 = arith.mulf %1, %14 : vector<8x32xf32>
    %c0_5 = arith.constant 0 : index
    %c0_6 = arith.constant 0 : index
    %16 = vector.load %arg3[%c0_5, %c0_6] : memref<1x32xf32, #tpu.memory_space<vmem>>, vector<1x32xf32>
    %17 = vector.broadcast %16 : vector<1x32xf32> to vector<8x32xf32>
    %18 = arith.mulf %15, %17 : vector<8x32xf32>
    %c0_7 = arith.constant 0 : index
    %c0_8 = arith.constant 0 : index
    %19 = vector.load %arg4[%c0_7, %c0_8] : memref<32x192xf32, #tpu.memory_space<vmem>>, vector<32x192xf32>
    %cst_9 = arith.constant dense<0.000000e+00> : vector<8x192xf32>
    %20 = tpu.matmul %18, %19, %cst_9 {dimension_numbers = #tpu.dot_dimension_numbers<[1], [0], [0], [1], [0, 0, 1, 1], [], []>} : vector<8x32xf32>, vector<32x192xf32>, vector<8x192xf32> -> vector<8x192xf32>
    %21 = vector.extract_strided_slice %20 {offsets = [0, 0], sizes = [8, 64], strides = [1, 1]} : vector<8x192xf32> to vector<8x64xf32>
    %22 = vector.extract_strided_slice %20 {offsets = [0, 128], sizes = [8, 64], strides = [1, 1]} : vector<8x192xf32> to vector<8x64xf32>
    %c0_10 = arith.constant 0 : index
    %c0_11 = arith.constant 0 : index
    %23 = vector.load %arg16[%c0_10, %c0_11] : memref<8x64xf32, #tpu.memory_space<vmem>>, vector<8x64xf32>
    %c0_12 = arith.constant 0 : index
    %c0_13 = arith.constant 0 : index
    %24 = vector.load %arg6[%c0_12, %c0_13] : memref<1x64xf32, #tpu.memory_space<vmem>>, vector<1x64xf32>
    %c3 = arith.constant 3 : index
    %c0_14 = arith.constant 0 : index
    %25 = vector.load %arg5[%c3, %c0_14] : memref<4x64xf32, #tpu.memory_space<vmem>>, vector<1x64xf32>
    %26 = vector.broadcast %25 : vector<1x64xf32> to vector<8x64xf32>
    %27 = arith.mulf %21, %26 : vector<8x64xf32>
    %28 = vector.broadcast %24 : vector<1x64xf32> to vector<8x64xf32>
    %29 = arith.addf %28, %27 : vector<8x64xf32>
    %c1_i32 = arith.constant 1 : i32
    %30 = tpu.dynamic_rotate %21 by %c1_i32 dim 0 : vector<8x64xf32>, i32 -> vector<8x64xf32>
    %c1_i32_15 = arith.constant 1 : i32
    %31 = tpu.dynamic_rotate %23 by %c1_i32_15 dim 0 : vector<8x64xf32>, i32 -> vector<8x64xf32>
    %c1_i32_16 = arith.constant 1 : i32
    %32 = vector.broadcast %c1_i32_16 : i32 to vector<8x1xi32>
    %33 = arith.cmpi slt, %2, %32 : vector<8x1xi32>
    %34 = vector.shape_cast %33 : vector<8x1xi1> to vector<8x1xi1>
    %35 = vector.broadcast %34 : vector<8x1xi1> to vector<8x64xi1>
    %36 = arith.select %35, %31, %30 : vector<8x64xi1>, vector<8x64xf32>
    %c2 = arith.constant 2 : index
    %c0_17 = arith.constant 0 : index
    %37 = vector.load %arg5[%c2, %c0_17] : memref<4x64xf32, #tpu.memory_space<vmem>>, vector<1x64xf32>
    %38 = vector.broadcast %37 : vector<1x64xf32> to vector<8x64xf32>
    %39 = arith.mulf %36, %38 : vector<8x64xf32>
    %40 = arith.addf %29, %39 : vector<8x64xf32>
    %c2_i32 = arith.constant 2 : i32
    %41 = tpu.dynamic_rotate %21 by %c2_i32 dim 0 : vector<8x64xf32>, i32 -> vector<8x64xf32>
    %c2_i32_18 = arith.constant 2 : i32
    %42 = tpu.dynamic_rotate %23 by %c2_i32_18 dim 0 : vector<8x64xf32>, i32 -> vector<8x64xf32>
    %c2_i32_19 = arith.constant 2 : i32
    %43 = vector.broadcast %c2_i32_19 : i32 to vector<8x1xi32>
    %44 = arith.cmpi slt, %2, %43 : vector<8x1xi32>
    %45 = vector.shape_cast %44 : vector<8x1xi1> to vector<8x1xi1>
    %46 = vector.broadcast %45 : vector<8x1xi1> to vector<8x64xi1>
    %47 = arith.select %46, %42, %41 : vector<8x64xi1>, vector<8x64xf32>
    %c1 = arith.constant 1 : index
    %c0_20 = arith.constant 0 : index
    %48 = vector.load %arg5[%c1, %c0_20] : memref<4x64xf32, #tpu.memory_space<vmem>>, vector<1x64xf32>
    %49 = vector.broadcast %48 : vector<1x64xf32> to vector<8x64xf32>
    %50 = arith.mulf %47, %49 : vector<8x64xf32>
    %51 = arith.addf %40, %50 : vector<8x64xf32>
    %c3_i32 = arith.constant 3 : i32
    %52 = tpu.dynamic_rotate %21 by %c3_i32 dim 0 : vector<8x64xf32>, i32 -> vector<8x64xf32>
    %c3_i32_21 = arith.constant 3 : i32
    %53 = tpu.dynamic_rotate %23 by %c3_i32_21 dim 0 : vector<8x64xf32>, i32 -> vector<8x64xf32>
    %c3_i32_22 = arith.constant 3 : i32
    %54 = vector.broadcast %c3_i32_22 : i32 to vector<8x1xi32>
    %55 = arith.cmpi slt, %2, %54 : vector<8x1xi32>
    %56 = vector.shape_cast %55 : vector<8x1xi1> to vector<8x1xi1>
    %57 = vector.broadcast %56 : vector<8x1xi1> to vector<8x64xi1>
    %58 = arith.select %57, %53, %52 : vector<8x64xi1>, vector<8x64xf32>
    %c0_23 = arith.constant 0 : index
    %c0_24 = arith.constant 0 : index
    %59 = vector.load %arg5[%c0_23, %c0_24] : memref<4x64xf32, #tpu.memory_space<vmem>>, vector<1x64xf32>
    %60 = vector.broadcast %59 : vector<1x64xf32> to vector<8x64xf32>
    %61 = arith.mulf %58, %60 : vector<8x64xf32>
    %62 = arith.addf %51, %61 : vector<8x64xf32>
    %c0_25 = arith.constant 0 : index
    %c0_26 = arith.constant 0 : index
    %63 = vector.load %arg16[%c0_25, %c0_26] : memref<8x64xf32, #tpu.memory_space<vmem>>, vector<8x64xf32>
    tpu.vector_store %arg16[%c0_25, %c0_26], %21 {strides = array<i32>} : memref<8x64xf32, #tpu.memory_space<vmem>>, vector<8x64xf32>,
    %64 = arith.negf %62 : vector<8x64xf32>
    %65 = math.exp %64 : vector<8x64xf32>
    %cst_27 = arith.constant 1.000000e+00 : f32
    %66 = vector.broadcast %cst_27 : f32 to vector<8x64xf32>
    %67 = arith.addf %66, %65 : vector<8x64xf32>
    %68 = arith.divf %66, %67 : vector<8x64xf32>
    %69 = arith.mulf %62, %68 : vector<8x64xf32>
    %c0_28 = arith.constant 0 : index
    %c0_29 = arith.constant 0 : index
    %70 = vector.load %arg7[%c0_28, %c0_29] : memref<64x160xf32, #tpu.memory_space<vmem>>, vector<64x160xf32>
    %cst_30 = arith.constant dense<0.000000e+00> : vector<8x160xf32>
    %71 = tpu.matmul %69, %70, %cst_30 {dimension_numbers = #tpu.dot_dimension_numbers<[1], [0], [0], [1], [0, 0, 1, 1], [], []>} : vector<8x64xf32>, vector<64x160xf32>, vector<8x160xf32> -> vector<8x160xf32>
    %72 = vector.extract_strided_slice %71 {offsets = [0, 0], sizes = [8, 128], strides = [1, 1]} : vector<8x160xf32> to vector<8x128xf32>
    %c0_31 = arith.constant 0 : index
    %c0_32 = arith.constant 0 : index
    %73 = vector.load %arg8[%c0_31, %c0_32] : memref<128x64xf32, #tpu.memory_space<vmem>>, vector<128x64xf32>
    %cst_33 = arith.constant dense<0.000000e+00> : vector<8x64xf32>
    %74 = tpu.matmul %72, %73, %cst_33 {dimension_numbers = #tpu.dot_dimension_numbers<[1], [0], [0], [1], [0, 0, 1, 1], [], []>} : vector<8x128xf32>, vector<128x64xf32>, vector<8x64xf32> -> vector<8x64xf32>
    %c0_34 = arith.constant 0 : index
    %c0_35 = arith.constant 0 : index
    %75 = vector.load %arg9[%c0_34, %c0_35] : memref<1x64xf32, #tpu.memory_space<vmem>>, vector<1x64xf32>
    %76 = vector.broadcast %75 : vector<1x64xf32> to vector<8x64xf32>
    %77 = arith.addf %74, %76 : vector<8x64xf32>
    %cst_36 = arith.constant 0.000000e+00 : f32
    %78 = vector.broadcast %cst_36 : f32 to vector<8x64xf32>
    %79 = arith.maximumf %77, %78 : vector<8x64xf32>
    %80 = vector.broadcast %cst_36 : f32 to vector<8x64xf32>
    %81 = arith.subf %77, %80 : vector<8x64xf32>
    %82 = arith.cmpf one, %81, %81 : vector<8x64xf32>
    %83 = vector.broadcast %cst_36 : f32 to vector<8x64xf32>
    %84 = arith.addf %77, %83 : vector<8x64xf32>
    %85 = math.absf %81 : vector<8x64xf32>
    %cst_37 = arith.constant 0.000000e+00 : f32
    %86 = vector.broadcast %cst_37 : f32 to vector<8x64xf32>
    %87 = arith.subf %86, %85 : vector<8x64xf32>
    %88 = math.exp %87 : vector<8x64xf32>
    %89 = math.log1p %88 : vector<8x64xf32>
    %90 = arith.addf %79, %89 : vector<8x64xf32>
    %91 = arith.select %82, %84, %90 : vector<8x64xi1>, vector<8x64xf32>
    %92 = vector.extract_strided_slice %71 {offsets = [0, 128], sizes = [8, 32], strides = [1, 1]} : vector<8x160xf32> to vector<8x32xf32>
    %93 = tpu.iota {dimensions = array<i32: 1>} : vector<8x32xi32>
    %94 = arith.mulf %91, %69 : vector<8x64xf32>
    %c0_i32_38 = arith.constant 0 : i32
    %95 = vector.broadcast %c0_i32_38 : i32 to vector<8x1xi32>
    %96 = arith.cmpi eq, %2, %95 : vector<8x1xi32>
    %c0_i32_39 = arith.constant 0 : i32
    %97 = arith.cmpi eq, %arg1, %c0_i32_39 : i32
    %98 = vector.broadcast %97 : i1 to vector<8x1xi1>
    %99 = arith.andi %96, %98 : vector<8x1xi1>
    %c0_40 = arith.constant 0 : index
    %c0_41 = arith.constant 0 : index
    %100 = vector.load %arg11[%c0_40, %c0_41] : memref<1x64xf32, #tpu.memory_space<vmem>>, vector<1x64xf32>
    %101 = vector.broadcast %100 : vector<1x64xf32> to vector<8x64xf32>
    %102 = arith.mulf %69, %101 : vector<8x64xf32>
    %c0_42 = arith.constant 0 : index
    %c0_43 = arith.constant 0 : index
    %103 = vector.load %arg10[%c0_42, %c0_43] : memref<16x64xf32, #tpu.memory_space<vmem>>, vector<1x64xf32>
    %104 = vector.broadcast %103 : vector<1x64xf32> to vector<8x64xf32>
    %105 = arith.mulf %91, %104 : vector<8x64xf32>
    %106 = math.exp %105 : vector<8x64xf32>
    %cst_44 = arith.constant 0.000000e+00 : f32
    %107 = vector.shape_cast %99 : vector<8x1xi1> to vector<8x1xi1>
    %108 = vector.broadcast %107 : vector<8x1xi1> to vector<8x64xi1>
    %109 = vector.broadcast %cst_44 : f32 to vector<8x64xf32>
    %110 = arith.select %108, %109, %106 : vector<8x64xi1>, vector<8x64xf32>
    %c0_45 = arith.constant 0 : index
    %c0_46 = arith.constant 0 : index
    %c0_47 = arith.constant 0 : index
    %111 = vector.load %arg14[%c0_45, %c0_46, %c0_47] : memref<16x1x64xf32, #tpu.memory_space<vmem>>, vector<1x1x64xf32>
    %112 = vector.shape_cast %111 : vector<1x1x64xf32> to vector<1x64xf32>
    %c1_i32_48 = arith.constant 1 : i32
    %113 = vector.broadcast %c1_i32_48 : i32 to vector<8x1xi32>
    %114 = arith.cmpi sge, %2, %113 : vector<8x1xi32>
    %c1_i32_49 = arith.constant 1 : i32
    %115 = tpu.dynamic_rotate %110 by %c1_i32_49 dim 0 : vector<8x64xf32>, i32 -> vector<8x64xf32>
    %cst_50 = arith.constant 0.000000e+00 : f32
    %116 = vector.shape_cast %114 : vector<8x1xi1> to vector<8x1xi1>
    %117 = vector.broadcast %116 : vector<8x1xi1> to vector<8x64xi1>
    %118 = vector.broadcast %cst_50 : f32 to vector<8x64xf32>
    %119 = arith.select %117, %115, %118 : vector<8x64xi1>, vector<8x64xf32>
    %120 = arith.addf %110, %119 : vector<8x64xf32>
    %c2_i32_51 = arith.constant 2 : i32
    %121 = vector.broadcast %c2_i32_51 : i32 to vector<8x1xi32>
    %122 = arith.cmpi sge, %2, %121 : vector<8x1xi32>
    %c2_i32_52 = arith.constant 2 : i32
    %123 = tpu.dynamic_rotate %120 by %c2_i32_52 dim 0 : vector<8x64xf32>, i32 -> vector<8x64xf32>
    %cst_53 = arith.constant 0.000000e+00 : f32
    %124 = vector.shape_cast %122 : vector<8x1xi1> to vector<8x1xi1>
    %125 = vector.broadcast %124 : vector<8x1xi1> to vector<8x64xi1>
    %126 = vector.broadcast %cst_53 : f32 to vector<8x64xf32>
    %127 = arith.select %125, %123, %126 : vector<8x64xi1>, vector<8x64xf32>
    %128 = arith.addf %120, %127 : vector<8x64xf32>
    %c4_i32 = arith.constant 4 : i32
    %129 = vector.broadcast %c4_i32 : i32 to vector<8x1xi32>
    %130 = arith.cmpi sge, %2, %129 : vector<8x1xi32>
    %c4_i32_54 = arith.constant 4 : i32
    %131 = tpu.dynamic_rotate %128 by %c4_i32_54 dim 0 : vector<8x64xf32>, i32 -> vector<8x64xf32>
    %cst_55 = arith.constant 0.000000e+00 : f32
    %132 = vector.shape_cast %130 : vector<8x1xi1> to vector<8x1xi1>
    %133 = vector.broadcast %132 : vector<8x1xi1> to vector<8x64xi1>
    %134 = vector.broadcast %cst_55 : f32 to vector<8x64xf32>
    %135 = arith.select %133, %131, %134 : vector<8x64xi1>, vector<8x64xf32>
    %136 = arith.addf %128, %135 : vector<8x64xf32>
    %137 = vector.broadcast %112 : vector<1x64xf32> to vector<8x64xf32>
    %138 = arith.addf %136, %137 : vector<8x64xf32>
    %139 = math.exp %138 : vector<8x64xf32>
    %c0_i32_56 = arith.constant 0 : i32
    %140 = vector.broadcast %c0_i32_56 : i32 to vector<8x32xi32>
    %141 = arith.cmpi eq, %93, %140 : vector<8x32xi32>
    %cst_57 = arith.constant 0.000000e+00 : f32
    %142 = vector.broadcast %cst_57 : f32 to vector<8x32xf32>
    %143 = arith.select %141, %92, %142 : vector<8x32xi1>, vector<8x32xf32>
    %cst_58 = arith.constant dense<0.000000e+00> : vector<8xf32>
    %144 = vector.multi_reduction <add>, %143, %cst_58 [1] : vector<8x32xf32> to vector<8xf32>
    %145 = vector.shape_cast %144 : vector<8xf32> to vector<8x1xf32>
    %c16_i32 = arith.constant 16 : i32
    %146 = vector.broadcast %c16_i32 : i32 to vector<8x32xi32>
    %147 = arith.cmpi eq, %93, %146 : vector<8x32xi32>
    %cst_59 = arith.constant 0.000000e+00 : f32
    %148 = vector.broadcast %cst_59 : f32 to vector<8x32xf32>
    %149 = arith.select %147, %92, %148 : vector<8x32xi1>, vector<8x32xf32>
    %cst_60 = arith.constant dense<0.000000e+00> : vector<8xf32>
    %150 = vector.multi_reduction <add>, %149, %cst_60 [1] : vector<8x32xf32> to vector<8xf32>
    %151 = vector.shape_cast %150 : vector<8xf32> to vector<8x1xf32>
    %152 = vector.broadcast %145 : vector<8x1xf32> to vector<8x64xf32>
    %153 = arith.mulf %94, %152 : vector<8x64xf32>
    %cst_61 = arith.constant 9.99999996E-13 : f32
    %154 = vector.broadcast %cst_61 : f32 to vector<8x64xf32>
    %155 = arith.addf %139, %154 : vector<8x64xf32>
    %156 = tpu.reciprocal %155 {approx = true} : vector<8x64xf32> -> vector<8x64xf32>
    %157 = arith.mulf %153, %156 : vector<8x64xf32>
    %c0_62 = arith.constant 0 : index
    %c0_63 = arith.constant 0 : index
    %c0_64 = arith.constant 0 : index
    %158 = vector.load %arg15[%c0_62, %c0_63, %c0_64] : memref<16x1x64xf32, #tpu.memory_space<vmem>>, vector<1x1x64xf32>
    %159 = vector.shape_cast %158 : vector<1x1x64xf32> to vector<1x64xf32>
    %c1_i32_65 = arith.constant 1 : i32
    %160 = vector.broadcast %c1_i32_65 : i32 to vector<8x1xi32>
    %161 = arith.cmpi sge, %2, %160 : vector<8x1xi32>
    %c1_i32_66 = arith.constant 1 : i32
    %162 = tpu.dynamic_rotate %157 by %c1_i32_66 dim 0 : vector<8x64xf32>, i32 -> vector<8x64xf32>
    %cst_67 = arith.constant 0.000000e+00 : f32
    %163 = vector.shape_cast %161 : vector<8x1xi1> to vector<8x1xi1>
    %164 = vector.broadcast %163 : vector<8x1xi1> to vector<8x64xi1>
    %165 = vector.broadcast %cst_67 : f32 to vector<8x64xf32>
    %166 = arith.select %164, %162, %165 : vector<8x64xi1>, vector<8x64xf32>
    %167 = arith.addf %157, %166 : vector<8x64xf32>
    %c2_i32_68 = arith.constant 2 : i32
    %168 = vector.broadcast %c2_i32_68 : i32 to vector<8x1xi32>
    %169 = arith.cmpi sge, %2, %168 : vector<8x1xi32>
    %c2_i32_69 = arith.constant 2 : i32
    %170 = tpu.dynamic_rotate %167 by %c2_i32_69 dim 0 : vector<8x64xf32>, i32 -> vector<8x64xf32>
    %cst_70 = arith.constant 0.000000e+00 : f32
    %171 = vector.shape_cast %169 : vector<8x1xi1> to vector<8x1xi1>
    %172 = vector.broadcast %171 : vector<8x1xi1> to vector<8x64xi1>
    %173 = vector.broadcast %cst_70 : f32 to vector<8x64xf32>
    %174 = arith.select %172, %170, %173 : vector<8x64xi1>, vector<8x64xf32>
    %175 = arith.addf %167, %174 : vector<8x64xf32>
    %c4_i32_71 = arith.constant 4 : i32
    %176 = vector.broadcast %c4_i32_71 : i32 to vector<8x1xi32>
    %177 = arith.cmpi sge, %2, %176 : vector<8x1xi32>
    %c4_i32_72 = arith.constant 4 : i32
    %178 = tpu.dynamic_rotate %175 by %c4_i32_72 dim 0 : vector<8x64xf32>, i32 -> vector<8x64xf32>
    %cst_73 = arith.constant 0.000000e+00 : f32
    %179 = vector.shape_cast %177 : vector<8x1xi1> to vector<8x1xi1>
    %180 = vector.broadcast %179 : vector<8x1xi1> to vector<8x64xi1>
    %181 = vector.broadcast %cst_73 : f32 to vector<8x64xf32>
    %182 = arith.select %180, %178, %181 : vector<8x64xi1>, vector<8x64xf32>
    %183 = arith.addf %175, %182 : vector<8x64xf32>
    %184 = vector.broadcast %159 : vector<1x64xf32> to vector<8x64xf32>
    %185 = arith.addf %183, %184 : vector<8x64xf32>
    %186 = arith.mulf %185, %139 : vector<8x64xf32>
    %187 = vector.broadcast %151 : vector<8x1xf32> to vector<8x64xf32>
    %188 = arith.mulf %186, %187 : vector<8x64xf32>
    %189 = arith.addf %102, %188 : vector<8x64xf32>
    %cst_74 = arith.constant dense<0.000000e+00> : vector<64xf32>
    %190 = vector.multi_reduction <add>, %110, %cst_74 [0] : vector<8x64xf32> to vector<64xf32>
    %191 = vector.shape_cast %190 : vector<64xf32> to vector<1x64xf32>
    %192 = arith.addf %112, %191 : vector<1x64xf32>
    %c0_75 = arith.constant 0 : index
    %c0_76 = arith.constant 0 : index
    %c0_77 = arith.constant 0 : index
    %193 = vector.load %arg14[%c0_75, %c0_76, %c0_77] : memref<16x1x64xf32, #tpu.memory_space<vmem>>, vector<1x1x64xf32>
    %194 = vector.shape_cast %193 : vector<1x1x64xf32> to vector<1x64xf32>
    %195 = vector.shape_cast %192 : vector<1x64xf32> to vector<1x1x64xf32>
    tpu.vector_store %arg14[%c0_75, %c0_76, %c0_77], %195 {strides = array<i32>} : memref<16x1x64xf32, #tpu.memory_space<vmem>>, vector<1x1x64xf32>,
    %cst_78 = arith.constant dense<0.000000e+00> : vector<64xf32>
    %196 = vector.multi_reduction <add>, %157, %cst_78 [0] : vector<8x64xf32> to vector<64xf32>
    %197 = vector.shape_cast %196 : vector<64xf32> to vector<1x64xf32>
    %198 = arith.addf %159, %197 : vector<1x64xf32>
    %c0_79 = arith.constant 0 : index
    %c0_80 = arith.constant 0 : index
    %c0_81 = arith.constant 0 : index
    %199 = vector.load %arg15[%c0_79, %c0_80, %c0_81] : memref<16x1x64xf32, #tpu.memory_space<vmem>>, vector<1x1x64xf32>
    %200 = vector.shape_cast %199 : vector<1x1x64xf32> to vector<1x64xf32>
    %201 = vector.shape_cast %198 : vector<1x64xf32> to vector<1x1x64xf32>
    tpu.vector_store %arg15[%c0_79, %c0_80, %c0_81], %201 {strides = array<i32>} : memref<16x1x64xf32, #tpu.memory_space<vmem>>, vector<1x1x64xf32>,
    %c1_82 = arith.constant 1 : index
    %c0_83 = arith.constant 0 : index
    %202 = vector.load %arg10[%c1_82, %c0_83] : memref<16x64xf32, #tpu.memory_space<vmem>>, vector<1x64xf32>
    %203 = vector.broadcast %202 : vector<1x64xf32> to vector<8x64xf32>
    %204 = arith.mulf %91, %203 : vector<8x64xf32>
    %205 = math.exp %204 : vector<8x64xf32>
    %cst_84 = arith.constant 0.000000e+00 : f32
    %206 = vector.shape_cast %99 : vector<8x1xi1> to vector<8x1xi1>
    %207 = vector.broadcast %206 : vector<8x1xi1> to vector<8x64xi1>
    %208 = vector.broadcast %cst_84 : f32 to vector<8x64xf32>
    %209 = arith.select %207, %208, %205 : vector<8x64xi1>, vector<8x64xf32>
    %c1_85 = arith.constant 1 : index
    %c0_86 = arith.constant 0 : index
    %c0_87 = arith.constant 0 : index
    %210 = vector.load %arg14[%c1_85, %c0_86, %c0_87] : memref<16x1x64xf32, #tpu.memory_space<vmem>>, vector<1x1x64xf32>
    %211 = vector.shape_cast %210 : vector<1x1x64xf32> to vector<1x64xf32>
    %c1_i32_88 = arith.constant 1 : i32
    %212 = vector.broadcast %c1_i32_88 : i32 to vector<8x1xi32>
    %213 = arith.cmpi sge, %2, %212 : vector<8x1xi32>
    %c1_i32_89 = arith.constant 1 : i32
    %214 = tpu.dynamic_rotate %209 by %c1_i32_89 dim 0 : vector<8x64xf32>, i32 -> vector<8x64xf32>
    %cst_90 = arith.constant 0.000000e+00 : f32
    %215 = vector.shape_cast %213 : vector<8x1xi1> to vector<8x1xi1>
    %216 = vector.broadcast %215 : vector<8x1xi1> to vector<8x64xi1>
    %217 = vector.broadcast %cst_90 : f32 to vector<8x64xf32>
    %218 = arith.select %216, %214, %217 : vector<8x64xi1>, vector<8x64xf32>
    %219 = arith.addf %209, %218 : vector<8x64xf32>
    %c2_i32_91 = arith.constant 2 : i32
    %220 = vector.broadcast %c2_i32_91 : i32 to vector<8x1xi32>
    %221 = arith.cmpi sge, %2, %220 : vector<8x1xi32>
    %c2_i32_92 = arith.constant 2 : i32
    %222 = tpu.dynamic_rotate %219 by %c2_i32_92 dim 0 : vector<8x64xf32>, i32 -> vector<8x64xf32>
    %cst_93 = arith.constant 0.000000e+00 : f32
    %223 = vector.shape_cast %221 : vector<8x1xi1> to vector<8x1xi1>
    %224 = vector.broadcast %223 : vector<8x1xi1> to vector<8x64xi1>
    %225 = vector.broadcast %cst_93 : f32 to vector<8x64xf32>
    %226 = arith.select %224, %222, %225 : vector<8x64xi1>, vector<8x64xf32>
    %227 = arith.addf %219, %226 : vector<8x64xf32>
    %c4_i32_94 = arith.constant 4 : i32
    %228 = vector.broadcast %c4_i32_94 : i32 to vector<8x1xi32>
    %229 = arith.cmpi sge, %2, %228 : vector<8x1xi32>
    %c4_i32_95 = arith.constant 4 : i32
    %230 = tpu.dynamic_rotate %227 by %c4_i32_95 dim 0 : vector<8x64xf32>, i32 -> vector<8x64xf32>
    %cst_96 = arith.constant 0.000000e+00 : f32
    %231 = vector.shape_cast %229 : vector<8x1xi1> to vector<8x1xi1>
    %232 = vector.broadcast %231 : vector<8x1xi1> to vector<8x64xi1>
    %233 = vector.broadcast %cst_96 : f32 to vector<8x64xf32>
    %234 = arith.select %232, %230, %233 : vector<8x64xi1>, vector<8x64xf32>
    %235 = arith.addf %227, %234 : vector<8x64xf32>
    %236 = vector.broadcast %211 : vector<1x64xf32> to vector<8x64xf32>
    %237 = arith.addf %235, %236 : vector<8x64xf32>
    %238 = math.exp %237 : vector<8x64xf32>
    %c1_i32_97 = arith.constant 1 : i32
    %239 = vector.broadcast %c1_i32_97 : i32 to vector<8x32xi32>
    %240 = arith.cmpi eq, %93, %239 : vector<8x32xi32>
    %cst_98 = arith.constant 0.000000e+00 : f32
    %241 = vector.broadcast %cst_98 : f32 to vector<8x32xf32>
    %242 = arith.select %240, %92, %241 : vector<8x32xi1>, vector<8x32xf32>
    %cst_99 = arith.constant dense<0.000000e+00> : vector<8xf32>
    %243 = vector.multi_reduction <add>, %242, %cst_99 [1] : vector<8x32xf32> to vector<8xf32>
    %244 = vector.shape_cast %243 : vector<8xf32> to vector<8x1xf32>
    %c17_i32 = arith.constant 17 : i32
    %245 = vector.broadcast %c17_i32 : i32 to vector<8x32xi32>
    %246 = arith.cmpi eq, %93, %245 : vector<8x32xi32>
    %cst_100 = arith.constant 0.000000e+00 : f32
    %247 = vector.broadcast %cst_100 : f32 to vector<8x32xf32>
    %248 = arith.select %246, %92, %247 : vector<8x32xi1>, vector<8x32xf32>
    %cst_101 = arith.constant dense<0.000000e+00> : vector<8xf32>
    %249 = vector.multi_reduction <add>, %248, %cst_101 [1] : vector<8x32xf32> to vector<8xf32>
    %250 = vector.shape_cast %249 : vector<8xf32> to vector<8x1xf32>
    %251 = vector.broadcast %244 : vector<8x1xf32> to vector<8x64xf32>
    %252 = arith.mulf %94, %251 : vector<8x64xf32>
    %cst_102 = arith.constant 9.99999996E-13 : f32
    %253 = vector.broadcast %cst_102 : f32 to vector<8x64xf32>
    %254 = arith.addf %238, %253 : vector<8x64xf32>
    %255 = tpu.reciprocal %254 {approx = true} : vector<8x64xf32> -> vector<8x64xf32>
    %256 = arith.mulf %252, %255 : vector<8x64xf32>
    %c1_103 = arith.constant 1 : index
    %c0_104 = arith.constant 0 : index
    %c0_105 = arith.constant 0 : index
    %257 = vector.load %arg15[%c1_103, %c0_104, %c0_105] : memref<16x1x64xf32, #tpu.memory_space<vmem>>, vector<1x1x64xf32>
    %258 = vector.shape_cast %257 : vector<1x1x64xf32> to vector<1x64xf32>
    %c1_i32_106 = arith.constant 1 : i32
    %259 = vector.broadcast %c1_i32_106 : i32 to vector<8x1xi32>
    %260 = arith.cmpi sge, %2, %259 : vector<8x1xi32>
    %c1_i32_107 = arith.constant 1 : i32
    %261 = tpu.dynamic_rotate %256 by %c1_i32_107 dim 0 : vector<8x64xf32>, i32 -> vector<8x64xf32>
    %cst_108 = arith.constant 0.000000e+00 : f32
    %262 = vector.shape_cast %260 : vector<8x1xi1> to vector<8x1xi1>
    %263 = vector.broadcast %262 : vector<8x1xi1> to vector<8x64xi1>
    %264 = vector.broadcast %cst_108 : f32 to vector<8x64xf32>
    %265 = arith.select %263, %261, %264 : vector<8x64xi1>, vector<8x64xf32>
    %266 = arith.addf %256, %265 : vector<8x64xf32>
    %c2_i32_109 = arith.constant 2 : i32
    %267 = vector.broadcast %c2_i32_109 : i32 to vector<8x1xi32>
    %268 = arith.cmpi sge, %2, %267 : vector<8x1xi32>
    %c2_i32_110 = arith.constant 2 : i32
    %269 = tpu.dynamic_rotate %266 by %c2_i32_110 dim 0 : vector<8x64xf32>, i32 -> vector<8x64xf32>
    %cst_111 = arith.constant 0.000000e+00 : f32
    %270 = vector.shape_cast %268 : vector<8x1xi1> to vector<8x1xi1>
    %271 = vector.broadcast %270 : vector<8x1xi1> to vector<8x64xi1>
    %272 = vector.broadcast %cst_111 : f32 to vector<8x64xf32>
    %273 = arith.select %271, %269, %272 : vector<8x64xi1>, vector<8x64xf32>
    %274 = arith.addf %266, %273 : vector<8x64xf32>
    %c4_i32_112 = arith.constant 4 : i32
    %275 = vector.broadcast %c4_i32_112 : i32 to vector<8x1xi32>
    %276 = arith.cmpi sge, %2, %275 : vector<8x1xi32>
    %c4_i32_113 = arith.constant 4 : i32
    %277 = tpu.dynamic_rotate %274 by %c4_i32_113 dim 0 : vector<8x64xf32>, i32 -> vector<8x64xf32>
    %cst_114 = arith.constant 0.000000e+00 : f32
    %278 = vector.shape_cast %276 : vector<8x1xi1> to vector<8x1xi1>
    %279 = vector.broadcast %278 : vector<8x1xi1> to vector<8x64xi1>
    %280 = vector.broadcast %cst_114 : f32 to vector<8x64xf32>
    %281 = arith.select %279, %277, %280 : vector<8x64xi1>, vector<8x64xf32>
    %282 = arith.addf %274, %281 : vector<8x64xf32>
    %283 = vector.broadcast %258 : vector<1x64xf32> to vector<8x64xf32>
    %284 = arith.addf %282, %283 : vector<8x64xf32>
    %285 = arith.mulf %284, %238 : vector<8x64xf32>
    %286 = vector.broadcast %250 : vector<8x1xf32> to vector<8x64xf32>
    %287 = arith.mulf %285, %286 : vector<8x64xf32>
    %288 = arith.addf %189, %287 : vector<8x64xf32>
    %cst_115 = arith.constant dense<0.000000e+00> : vector<64xf32>
    %289 = vector.multi_reduction <add>, %209, %cst_115 [0] : vector<8x64xf32> to vector<64xf32>
    %290 = vector.shape_cast %289 : vector<64xf32> to vector<1x64xf32>
    %291 = arith.addf %211, %290 : vector<1x64xf32>
    %c1_116 = arith.constant 1 : index
    %c0_117 = arith.constant 0 : index
    %c0_118 = arith.constant 0 : index
    %292 = vector.load %arg14[%c1_116, %c0_117, %c0_118] : memref<16x1x64xf32, #tpu.memory_space<vmem>>, vector<1x1x64xf32>
    %293 = vector.shape_cast %292 : vector<1x1x64xf32> to vector<1x64xf32>
    %294 = vector.shape_cast %291 : vector<1x64xf32> to vector<1x1x64xf32>
    tpu.vector_store %arg14[%c1_116, %c0_117, %c0_118], %294 {strides = array<i32>} : memref<16x1x64xf32, #tpu.memory_space<vmem>>, vector<1x1x64xf32>,
    %cst_119 = arith.constant dense<0.000000e+00> : vector<64xf32>
    %295 = vector.multi_reduction <add>, %256, %cst_119 [0] : vector<8x64xf32> to vector<64xf32>
    %296 = vector.shape_cast %295 : vector<64xf32> to vector<1x64xf32>
    %297 = arith.addf %258, %296 : vector<1x64xf32>
    %c1_120 = arith.constant 1 : index
    %c0_121 = arith.constant 0 : index
    %c0_122 = arith.constant 0 : index
    %298 = vector.load %arg15[%c1_120, %c0_121, %c0_122] : memref<16x1x64xf32, #tpu.memory_space<vmem>>, vector<1x1x64xf32>
    %299 = vector.shape_cast %298 : vector<1x1x64xf32> to vector<1x64xf32>
    %300 = vector.shape_cast %297 : vector<1x64xf32> to vector<1x1x64xf32>
    tpu.vector_store %arg15[%c1_120, %c0_121, %c0_122], %300 {strides = array<i32>} : memref<16x1x64xf32, #tpu.memory_space<vmem>>, vector<1x1x64xf32>,
    %c2_123 = arith.constant 2 : index
    %c0_124 = arith.constant 0 : index
    %301 = vector.load %arg10[%c2_123, %c0_124] : memref<16x64xf32, #tpu.memory_space<vmem>>, vector<1x64xf32>
    %302 = vector.broadcast %301 : vector<1x64xf32> to vector<8x64xf32>
    %303 = arith.mulf %91, %302 : vector<8x64xf32>
    %304 = math.exp %303 : vector<8x64xf32>
    %cst_125 = arith.constant 0.000000e+00 : f32
    %305 = vector.shape_cast %99 : vector<8x1xi1> to vector<8x1xi1>
    %306 = vector.broadcast %305 : vector<8x1xi1> to vector<8x64xi1>
    %307 = vector.broadcast %cst_125 : f32 to vector<8x64xf32>
    %308 = arith.select %306, %307, %304 : vector<8x64xi1>, vector<8x64xf32>
    %c2_126 = arith.constant 2 : index
    %c0_127 = arith.constant 0 : index
    %c0_128 = arith.constant 0 : index
    %309 = vector.load %arg14[%c2_126, %c0_127, %c0_128] : memref<16x1x64xf32, #tpu.memory_space<vmem>>, vector<1x1x64xf32>
    %310 = vector.shape_cast %309 : vector<1x1x64xf32> to vector<1x64xf32>
    %c1_i32_129 = arith.constant 1 : i32
    %311 = vector.broadcast %c1_i32_129 : i32 to vector<8x1xi32>
    %312 = arith.cmpi sge, %2, %311 : vector<8x1xi32>
    %c1_i32_130 = arith.constant 1 : i32
    %313 = tpu.dynamic_rotate %308 by %c1_i32_130 dim 0 : vector<8x64xf32>, i32 -> vector<8x64xf32>
    %cst_131 = arith.constant 0.000000e+00 : f32
    %314 = vector.shape_cast %312 : vector<8x1xi1> to vector<8x1xi1>
    %315 = vector.broadcast %314 : vector<8x1xi1> to vector<8x64xi1>
    %316 = vector.broadcast %cst_131 : f32 to vector<8x64xf32>
    %317 = arith.select %315, %313, %316 : vector<8x64xi1>, vector<8x64xf32>
    %318 = arith.addf %308, %317 : vector<8x64xf32>
    %c2_i32_132 = arith.constant 2 : i32
    %319 = vector.broadcast %c2_i32_132 : i32 to vector<8x1xi32>
    %320 = arith.cmpi sge, %2, %319 : vector<8x1xi32>
    %c2_i32_133 = arith.constant 2 : i32
    %321 = tpu.dynamic_rotate %318 by %c2_i32_133 dim 0 : vector<8x64xf32>, i32 -> vector<8x64xf32>
    %cst_134 = arith.constant 0.000000e+00 : f32
    %322 = vector.shape_cast %320 : vector<8x1xi1> to vector<8x1xi1>
    %323 = vector.broadcast %322 : vector<8x1xi1> to vector<8x64xi1>
    %324 = vector.broadcast %cst_134 : f32 to vector<8x64xf32>
    %325 = arith.select %323, %321, %324 : vector<8x64xi1>, vector<8x64xf32>
    %326 = arith.addf %318, %325 : vector<8x64xf32>
    %c4_i32_135 = arith.constant 4 : i32
    %327 = vector.broadcast %c4_i32_135 : i32 to vector<8x1xi32>
    %328 = arith.cmpi sge, %2, %327 : vector<8x1xi32>
    %c4_i32_136 = arith.constant 4 : i32
    %329 = tpu.dynamic_rotate %326 by %c4_i32_136 dim 0 : vector<8x64xf32>, i32 -> vector<8x64xf32>
    %cst_137 = arith.constant 0.000000e+00 : f32
    %330 = vector.shape_cast %328 : vector<8x1xi1> to vector<8x1xi1>
    %331 = vector.broadcast %330 : vector<8x1xi1> to vector<8x64xi1>
    %332 = vector.broadcast %cst_137 : f32 to vector<8x64xf32>
    %333 = arith.select %331, %329, %332 : vector<8x64xi1>, vector<8x64xf32>
    %334 = arith.addf %326, %333 : vector<8x64xf32>
    %335 = vector.broadcast %310 : vector<1x64xf32> to vector<8x64xf32>
    %336 = arith.addf %334, %335 : vector<8x64xf32>
    %337 = math.exp %336 : vector<8x64xf32>
    %c2_i32_138 = arith.constant 2 : i32
    %338 = vector.broadcast %c2_i32_138 : i32 to vector<8x32xi32>
    %339 = arith.cmpi eq, %93, %338 : vector<8x32xi32>
    %cst_139 = arith.constant 0.000000e+00 : f32
    %340 = vector.broadcast %cst_139 : f32 to vector<8x32xf32>
    %341 = arith.select %339, %92, %340 : vector<8x32xi1>, vector<8x32xf32>
    %cst_140 = arith.constant dense<0.000000e+00> : vector<8xf32>
    %342 = vector.multi_reduction <add>, %341, %cst_140 [1] : vector<8x32xf32> to vector<8xf32>
    %343 = vector.shape_cast %342 : vector<8xf32> to vector<8x1xf32>
    %c18_i32 = arith.constant 18 : i32
    %344 = vector.broadcast %c18_i32 : i32 to vector<8x32xi32>
    %345 = arith.cmpi eq, %93, %344 : vector<8x32xi32>
    %cst_141 = arith.constant 0.000000e+00 : f32
    %346 = vector.broadcast %cst_141 : f32 to vector<8x32xf32>
    %347 = arith.select %345, %92, %346 : vector<8x32xi1>, vector<8x32xf32>
    %cst_142 = arith.constant dense<0.000000e+00> : vector<8xf32>
    %348 = vector.multi_reduction <add>, %347, %cst_142 [1] : vector<8x32xf32> to vector<8xf32>
    %349 = vector.shape_cast %348 : vector<8xf32> to vector<8x1xf32>
    %350 = vector.broadcast %343 : vector<8x1xf32> to vector<8x64xf32>
    %351 = arith.mulf %94, %350 : vector<8x64xf32>
    %cst_143 = arith.constant 9.99999996E-13 : f32
    %352 = vector.broadcast %cst_143 : f32 to vector<8x64xf32>
    %353 = arith.addf %337, %352 : vector<8x64xf32>
    %354 = tpu.reciprocal %353 {approx = true} : vector<8x64xf32> -> vector<8x64xf32>
    %355 = arith.mulf %351, %354 : vector<8x64xf32>
    %c2_144 = arith.constant 2 : index
    %c0_145 = arith.constant 0 : index
    %c0_146 = arith.constant 0 : index
    %356 = vector.load %arg15[%c2_144, %c0_145, %c0_146] : memref<16x1x64xf32, #tpu.memory_space<vmem>>, vector<1x1x64xf32>
    %357 = vector.shape_cast %356 : vector<1x1x64xf32> to vector<1x64xf32>
    %c1_i32_147 = arith.constant 1 : i32
    %358 = vector.broadcast %c1_i32_147 : i32 to vector<8x1xi32>
    %359 = arith.cmpi sge, %2, %358 : vector<8x1xi32>
    %c1_i32_148 = arith.constant 1 : i32
    %360 = tpu.dynamic_rotate %355 by %c1_i32_148 dim 0 : vector<8x64xf32>, i32 -> vector<8x64xf32>
    %cst_149 = arith.constant 0.000000e+00 : f32
    %361 = vector.shape_cast %359 : vector<8x1xi1> to vector<8x1xi1>
    %362 = vector.broadcast %361 : vector<8x1xi1> to vector<8x64xi1>
    %363 = vector.broadcast %cst_149 : f32 to vector<8x64xf32>
    %364 = arith.select %362, %360, %363 : vector<8x64xi1>, vector<8x64xf32>
    %365 = arith.addf %355, %364 : vector<8x64xf32>
    %c2_i32_150 = arith.constant 2 : i32
    %366 = vector.broadcast %c2_i32_150 : i32 to vector<8x1xi32>
    %367 = arith.cmpi sge, %2, %366 : vector<8x1xi32>
    %c2_i32_151 = arith.constant 2 : i32
    %368 = tpu.dynamic_rotate %365 by %c2_i32_151 dim 0 : vector<8x64xf32>, i32 -> vector<8x64xf32>
    %cst_152 = arith.constant 0.000000e+00 : f32
    %369 = vector.shape_cast %367 : vector<8x1xi1> to vector<8x1xi1>
    %370 = vector.broadcast %369 : vector<8x1xi1> to vector<8x64xi1>
    %371 = vector.broadcast %cst_152 : f32 to vector<8x64xf32>
    %372 = arith.select %370, %368, %371 : vector<8x64xi1>, vector<8x64xf32>
    %373 = arith.addf %365, %372 : vector<8x64xf32>
    %c4_i32_153 = arith.constant 4 : i32
    %374 = vector.broadcast %c4_i32_153 : i32 to vector<8x1xi32>
    %375 = arith.cmpi sge, %2, %374 : vector<8x1xi32>
    %c4_i32_154 = arith.constant 4 : i32
    %376 = tpu.dynamic_rotate %373 by %c4_i32_154 dim 0 : vector<8x64xf32>, i32 -> vector<8x64xf32>
    %cst_155 = arith.constant 0.000000e+00 : f32
    %377 = vector.shape_cast %375 : vector<8x1xi1> to vector<8x1xi1>
    %378 = vector.broadcast %377 : vector<8x1xi1> to vector<8x64xi1>
    %379 = vector.broadcast %cst_155 : f32 to vector<8x64xf32>
    %380 = arith.select %378, %376, %379 : vector<8x64xi1>, vector<8x64xf32>
    %381 = arith.addf %373, %380 : vector<8x64xf32>
    %382 = vector.broadcast %357 : vector<1x64xf32> to vector<8x64xf32>
    %383 = arith.addf %381, %382 : vector<8x64xf32>
    %384 = arith.mulf %383, %337 : vector<8x64xf32>
    %385 = vector.broadcast %349 : vector<8x1xf32> to vector<8x64xf32>
    %386 = arith.mulf %384, %385 : vector<8x64xf32>
    %387 = arith.addf %288, %386 : vector<8x64xf32>
    %cst_156 = arith.constant dense<0.000000e+00> : vector<64xf32>
    %388 = vector.multi_reduction <add>, %308, %cst_156 [0] : vector<8x64xf32> to vector<64xf32>
    %389 = vector.shape_cast %388 : vector<64xf32> to vector<1x64xf32>
    %390 = arith.addf %310, %389 : vector<1x64xf32>
    %c2_157 = arith.constant 2 : index
    %c0_158 = arith.constant 0 : index
    %c0_159 = arith.constant 0 : index
    %391 = vector.load %arg14[%c2_157, %c0_158, %c0_159] : memref<16x1x64xf32, #tpu.memory_space<vmem>>, vector<1x1x64xf32>
    %392 = vector.shape_cast %391 : vector<1x1x64xf32> to vector<1x64xf32>
    %393 = vector.shape_cast %390 : vector<1x64xf32> to vector<1x1x64xf32>
    tpu.vector_store %arg14[%c2_157, %c0_158, %c0_159], %393 {strides = array<i32>} : memref<16x1x64xf32, #tpu.memory_space<vmem>>, vector<1x1x64xf32>,
    %cst_160 = arith.constant dense<0.000000e+00> : vector<64xf32>
    %394 = vector.multi_reduction <add>, %355, %cst_160 [0] : vector<8x64xf32> to vector<64xf32>
    %395 = vector.shape_cast %394 : vector<64xf32> to vector<1x64xf32>
    %396 = arith.addf %357, %395 : vector<1x64xf32>
    %c2_161 = arith.constant 2 : index
    %c0_162 = arith.constant 0 : index
    %c0_163 = arith.constant 0 : index
    %397 = vector.load %arg15[%c2_161, %c0_162, %c0_163] : memref<16x1x64xf32, #tpu.memory_space<vmem>>, vector<1x1x64xf32>
    %398 = vector.shape_cast %397 : vector<1x1x64xf32> to vector<1x64xf32>
    %399 = vector.shape_cast %396 : vector<1x64xf32> to vector<1x1x64xf32>
    tpu.vector_store %arg15[%c2_161, %c0_162, %c0_163], %399 {strides = array<i32>} : memref<16x1x64xf32, #tpu.memory_space<vmem>>, vector<1x1x64xf32>,
    %c3_164 = arith.constant 3 : index
    %c0_165 = arith.constant 0 : index
    %400 = vector.load %arg10[%c3_164, %c0_165] : memref<16x64xf32, #tpu.memory_space<vmem>>, vector<1x64xf32>
    %401 = vector.broadcast %400 : vector<1x64xf32> to vector<8x64xf32>
    %402 = arith.mulf %91, %401 : vector<8x64xf32>
    %403 = math.exp %402 : vector<8x64xf32>
    %cst_166 = arith.constant 0.000000e+00 : f32
    %404 = vector.shape_cast %99 : vector<8x1xi1> to vector<8x1xi1>
    %405 = vector.broadcast %404 : vector<8x1xi1> to vector<8x64xi1>
    %406 = vector.broadcast %cst_166 : f32 to vector<8x64xf32>
    %407 = arith.select %405, %406, %403 : vector<8x64xi1>, vector<8x64xf32>
    %c3_167 = arith.constant 3 : index
    %c0_168 = arith.constant 0 : index
    %c0_169 = arith.constant 0 : index
    %408 = vector.load %arg14[%c3_167, %c0_168, %c0_169] : memref<16x1x64xf32, #tpu.memory_space<vmem>>, vector<1x1x64xf32>
    %409 = vector.shape_cast %408 : vector<1x1x64xf32> to vector<1x64xf32>
    %c1_i32_170 = arith.constant 1 : i32
    %410 = vector.broadcast %c1_i32_170 : i32 to vector<8x1xi32>
    %411 = arith.cmpi sge, %2, %410 : vector<8x1xi32>
    %c1_i32_171 = arith.constant 1 : i32
    %412 = tpu.dynamic_rotate %407 by %c1_i32_171 dim 0 : vector<8x64xf32>, i32 -> vector<8x64xf32>
    %cst_172 = arith.constant 0.000000e+00 : f32
    %413 = vector.shape_cast %411 : vector<8x1xi1> to vector<8x1xi1>
    %414 = vector.broadcast %413 : vector<8x1xi1> to vector<8x64xi1>
    %415 = vector.broadcast %cst_172 : f32 to vector<8x64xf32>
    %416 = arith.select %414, %412, %415 : vector<8x64xi1>, vector<8x64xf32>
    %417 = arith.addf %407, %416 : vector<8x64xf32>
    %c2_i32_173 = arith.constant 2 : i32
    %418 = vector.broadcast %c2_i32_173 : i32 to vector<8x1xi32>
    %419 = arith.cmpi sge, %2, %418 : vector<8x1xi32>
    %c2_i32_174 = arith.constant 2 : i32
    %420 = tpu.dynamic_rotate %417 by %c2_i32_174 dim 0 : vector<8x64xf32>, i32 -> vector<8x64xf32>
    %cst_175 = arith.constant 0.000000e+00 : f32
    %421 = vector.shape_cast %419 : vector<8x1xi1> to vector<8x1xi1>
    %422 = vector.broadcast %421 : vector<8x1xi1> to vector<8x64xi1>
    %423 = vector.broadcast %cst_175 : f32 to vector<8x64xf32>
    %424 = arith.select %422, %420, %423 : vector<8x64xi1>, vector<8x64xf32>
    %425 = arith.addf %417, %424 : vector<8x64xf32>
    %c4_i32_176 = arith.constant 4 : i32
    %426 = vector.broadcast %c4_i32_176 : i32 to vector<8x1xi32>
    %427 = arith.cmpi sge, %2, %426 : vector<8x1xi32>
    %c4_i32_177 = arith.constant 4 : i32
    %428 = tpu.dynamic_rotate %425 by %c4_i32_177 dim 0 : vector<8x64xf32>, i32 -> vector<8x64xf32>
    %cst_178 = arith.constant 0.000000e+00 : f32
    %429 = vector.shape_cast %427 : vector<8x1xi1> to vector<8x1xi1>
    %430 = vector.broadcast %429 : vector<8x1xi1> to vector<8x64xi1>
    %431 = vector.broadcast %cst_178 : f32 to vector<8x64xf32>
    %432 = arith.select %430, %428, %431 : vector<8x64xi1>, vector<8x64xf32>
    %433 = arith.addf %425, %432 : vector<8x64xf32>
    %434 = vector.broadcast %409 : vector<1x64xf32> to vector<8x64xf32>
    %435 = arith.addf %433, %434 : vector<8x64xf32>
    %436 = math.exp %435 : vector<8x64xf32>
    %c3_i32_179 = arith.constant 3 : i32
    %437 = vector.broadcast %c3_i32_179 : i32 to vector<8x32xi32>
    %438 = arith.cmpi eq, %93, %437 : vector<8x32xi32>
    %cst_180 = arith.constant 0.000000e+00 : f32
    %439 = vector.broadcast %cst_180 : f32 to vector<8x32xf32>
    %440 = arith.select %438, %92, %439 : vector<8x32xi1>, vector<8x32xf32>
    %cst_181 = arith.constant dense<0.000000e+00> : vector<8xf32>
    %441 = vector.multi_reduction <add>, %440, %cst_181 [1] : vector<8x32xf32> to vector<8xf32>
    %442 = vector.shape_cast %441 : vector<8xf32> to vector<8x1xf32>
    %c19_i32 = arith.constant 19 : i32
    %443 = vector.broadcast %c19_i32 : i32 to vector<8x32xi32>
    %444 = arith.cmpi eq, %93, %443 : vector<8x32xi32>
    %cst_182 = arith.constant 0.000000e+00 : f32
    %445 = vector.broadcast %cst_182 : f32 to vector<8x32xf32>
    %446 = arith.select %444, %92, %445 : vector<8x32xi1>, vector<8x32xf32>
    %cst_183 = arith.constant dense<0.000000e+00> : vector<8xf32>
    %447 = vector.multi_reduction <add>, %446, %cst_183 [1] : vector<8x32xf32> to vector<8xf32>
    %448 = vector.shape_cast %447 : vector<8xf32> to vector<8x1xf32>
    %449 = vector.broadcast %442 : vector<8x1xf32> to vector<8x64xf32>
    %450 = arith.mulf %94, %449 : vector<8x64xf32>
    %cst_184 = arith.constant 9.99999996E-13 : f32
    %451 = vector.broadcast %cst_184 : f32 to vector<8x64xf32>
    %452 = arith.addf %436, %451 : vector<8x64xf32>
    %453 = tpu.reciprocal %452 {approx = true} : vector<8x64xf32> -> vector<8x64xf32>
    %454 = arith.mulf %450, %453 : vector<8x64xf32>
    %c3_185 = arith.constant 3 : index
    %c0_186 = arith.constant 0 : index
    %c0_187 = arith.constant 0 : index
    %455 = vector.load %arg15[%c3_185, %c0_186, %c0_187] : memref<16x1x64xf32, #tpu.memory_space<vmem>>, vector<1x1x64xf32>
    %456 = vector.shape_cast %455 : vector<1x1x64xf32> to vector<1x64xf32>
    %c1_i32_188 = arith.constant 1 : i32
    %457 = vector.broadcast %c1_i32_188 : i32 to vector<8x1xi32>
    %458 = arith.cmpi sge, %2, %457 : vector<8x1xi32>
    %c1_i32_189 = arith.constant 1 : i32
    %459 = tpu.dynamic_rotate %454 by %c1_i32_189 dim 0 : vector<8x64xf32>, i32 -> vector<8x64xf32>
    %cst_190 = arith.constant 0.000000e+00 : f32
    %460 = vector.shape_cast %458 : vector<8x1xi1> to vector<8x1xi1>
    %461 = vector.broadcast %460 : vector<8x1xi1> to vector<8x64xi1>
    %462 = vector.broadcast %cst_190 : f32 to vector<8x64xf32>
    %463 = arith.select %461, %459, %462 : vector<8x64xi1>, vector<8x64xf32>
    %464 = arith.addf %454, %463 : vector<8x64xf32>
    %c2_i32_191 = arith.constant 2 : i32
    %465 = vector.broadcast %c2_i32_191 : i32 to vector<8x1xi32>
    %466 = arith.cmpi sge, %2, %465 : vector<8x1xi32>
    %c2_i32_192 = arith.constant 2 : i32
    %467 = tpu.dynamic_rotate %464 by %c2_i32_192 dim 0 : vector<8x64xf32>, i32 -> vector<8x64xf32>
    %cst_193 = arith.constant 0.000000e+00 : f32
    %468 = vector.shape_cast %466 : vector<8x1xi1> to vector<8x1xi1>
    %469 = vector.broadcast %468 : vector<8x1xi1> to vector<8x64xi1>
    %470 = vector.broadcast %cst_193 : f32 to vector<8x64xf32>
    %471 = arith.select %469, %467, %470 : vector<8x64xi1>, vector<8x64xf32>
    %472 = arith.addf %464, %471 : vector<8x64xf32>
    %c4_i32_194 = arith.constant 4 : i32
    %473 = vector.broadcast %c4_i32_194 : i32 to vector<8x1xi32>
    %474 = arith.cmpi sge, %2, %473 : vector<8x1xi32>
    %c4_i32_195 = arith.constant 4 : i32
    %475 = tpu.dynamic_rotate %472 by %c4_i32_195 dim 0 : vector<8x64xf32>, i32 -> vector<8x64xf32>
    %cst_196 = arith.constant 0.000000e+00 : f32
    %476 = vector.shape_cast %474 : vector<8x1xi1> to vector<8x1xi1>
    %477 = vector.broadcast %476 : vector<8x1xi1> to vector<8x64xi1>
    %478 = vector.broadcast %cst_196 : f32 to vector<8x64xf32>
    %479 = arith.select %477, %475, %478 : vector<8x64xi1>, vector<8x64xf32>
    %480 = arith.addf %472, %479 : vector<8x64xf32>
    %481 = vector.broadcast %456 : vector<1x64xf32> to vector<8x64xf32>
    %482 = arith.addf %480, %481 : vector<8x64xf32>
    %483 = arith.mulf %482, %436 : vector<8x64xf32>
    %484 = vector.broadcast %448 : vector<8x1xf32> to vector<8x64xf32>
    %485 = arith.mulf %483, %484 : vector<8x64xf32>
    %486 = arith.addf %387, %485 : vector<8x64xf32>
    %cst_197 = arith.constant dense<0.000000e+00> : vector<64xf32>
    %487 = vector.multi_reduction <add>, %407, %cst_197 [0] : vector<8x64xf32> to vector<64xf32>
    %488 = vector.shape_cast %487 : vector<64xf32> to vector<1x64xf32>
    %489 = arith.addf %409, %488 : vector<1x64xf32>
    %c3_198 = arith.constant 3 : index
    %c0_199 = arith.constant 0 : index
    %c0_200 = arith.constant 0 : index
    %490 = vector.load %arg14[%c3_198, %c0_199, %c0_200] : memref<16x1x64xf32, #tpu.memory_space<vmem>>, vector<1x1x64xf32>
    %491 = vector.shape_cast %490 : vector<1x1x64xf32> to vector<1x64xf32>
    %492 = vector.shape_cast %489 : vector<1x64xf32> to vector<1x1x64xf32>
    tpu.vector_store %arg14[%c3_198, %c0_199, %c0_200], %492 {strides = array<i32>} : memref<16x1x64xf32, #tpu.memory_space<vmem>>, vector<1x1x64xf32>,
    %cst_201 = arith.constant dense<0.000000e+00> : vector<64xf32>
    %493 = vector.multi_reduction <add>, %454, %cst_201 [0] : vector<8x64xf32> to vector<64xf32>
    %494 = vector.shape_cast %493 : vector<64xf32> to vector<1x64xf32>
    %495 = arith.addf %456, %494 : vector<1x64xf32>
    %c3_202 = arith.constant 3 : index
    %c0_203 = arith.constant 0 : index
    %c0_204 = arith.constant 0 : index
    %496 = vector.load %arg15[%c3_202, %c0_203, %c0_204] : memref<16x1x64xf32, #tpu.memory_space<vmem>>, vector<1x1x64xf32>
    %497 = vector.shape_cast %496 : vector<1x1x64xf32> to vector<1x64xf32>
    %498 = vector.shape_cast %495 : vector<1x64xf32> to vector<1x1x64xf32>
    tpu.vector_store %arg15[%c3_202, %c0_203, %c0_204], %498 {strides = array<i32>} : memref<16x1x64xf32, #tpu.memory_space<vmem>>, vector<1x1x64xf32>,
    %c4 = arith.constant 4 : index
    %c0_205 = arith.constant 0 : index
    %499 = vector.load %arg10[%c4, %c0_205] : memref<16x64xf32, #tpu.memory_space<vmem>>, vector<1x64xf32>
    %500 = vector.broadcast %499 : vector<1x64xf32> to vector<8x64xf32>
    %501 = arith.mulf %91, %500 : vector<8x64xf32>
    %502 = math.exp %501 : vector<8x64xf32>
    %cst_206 = arith.constant 0.000000e+00 : f32
    %503 = vector.shape_cast %99 : vector<8x1xi1> to vector<8x1xi1>
    %504 = vector.broadcast %503 : vector<8x1xi1> to vector<8x64xi1>
    %505 = vector.broadcast %cst_206 : f32 to vector<8x64xf32>
    %506 = arith.select %504, %505, %502 : vector<8x64xi1>, vector<8x64xf32>
    %c4_207 = arith.constant 4 : index
    %c0_208 = arith.constant 0 : index
    %c0_209 = arith.constant 0 : index
    %507 = vector.load %arg14[%c4_207, %c0_208, %c0_209] : memref<16x1x64xf32, #tpu.memory_space<vmem>>, vector<1x1x64xf32>
    %508 = vector.shape_cast %507 : vector<1x1x64xf32> to vector<1x64xf32>
    %c1_i32_210 = arith.constant 1 : i32
    %509 = vector.broadcast %c1_i32_210 : i32 to vector<8x1xi32>
    %510 = arith.cmpi sge, %2, %509 : vector<8x1xi32>
    %c1_i32_211 = arith.constant 1 : i32
    %511 = tpu.dynamic_rotate %506 by %c1_i32_211 dim 0 : vector<8x64xf32>, i32 -> vector<8x64xf32>
    %cst_212 = arith.constant 0.000000e+00 : f32
    %512 = vector.shape_cast %510 : vector<8x1xi1> to vector<8x1xi1>
    %513 = vector.broadcast %512 : vector<8x1xi1> to vector<8x64xi1>
    %514 = vector.broadcast %cst_212 : f32 to vector<8x64xf32>
    %515 = arith.select %513, %511, %514 : vector<8x64xi1>, vector<8x64xf32>
    %516 = arith.addf %506, %515 : vector<8x64xf32>
    %c2_i32_213 = arith.constant 2 : i32
    %517 = vector.broadcast %c2_i32_213 : i32 to vector<8x1xi32>
    %518 = arith.cmpi sge, %2, %517 : vector<8x1xi32>
    %c2_i32_214 = arith.constant 2 : i32
    %519 = tpu.dynamic_rotate %516 by %c2_i32_214 dim 0 : vector<8x64xf32>, i32 -> vector<8x64xf32>
    %cst_215 = arith.constant 0.000000e+00 : f32
    %520 = vector.shape_cast %518 : vector<8x1xi1> to vector<8x1xi1>
    %521 = vector.broadcast %520 : vector<8x1xi1> to vector<8x64xi1>
    %522 = vector.broadcast %cst_215 : f32 to vector<8x64xf32>
    %523 = arith.select %521, %519, %522 : vector<8x64xi1>, vector<8x64xf32>
    %524 = arith.addf %516, %523 : vector<8x64xf32>
    %c4_i32_216 = arith.constant 4 : i32
    %525 = vector.broadcast %c4_i32_216 : i32 to vector<8x1xi32>
    %526 = arith.cmpi sge, %2, %525 : vector<8x1xi32>
    %c4_i32_217 = arith.constant 4 : i32
    %527 = tpu.dynamic_rotate %524 by %c4_i32_217 dim 0 : vector<8x64xf32>, i32 -> vector<8x64xf32>
    %cst_218 = arith.constant 0.000000e+00 : f32
    %528 = vector.shape_cast %526 : vector<8x1xi1> to vector<8x1xi1>
    %529 = vector.broadcast %528 : vector<8x1xi1> to vector<8x64xi1>
    %530 = vector.broadcast %cst_218 : f32 to vector<8x64xf32>
    %531 = arith.select %529, %527, %530 : vector<8x64xi1>, vector<8x64xf32>
    %532 = arith.addf %524, %531 : vector<8x64xf32>
    %533 = vector.broadcast %508 : vector<1x64xf32> to vector<8x64xf32>
    %534 = arith.addf %532, %533 : vector<8x64xf32>
    %535 = math.exp %534 : vector<8x64xf32>
    %c4_i32_219 = arith.constant 4 : i32
    %536 = vector.broadcast %c4_i32_219 : i32 to vector<8x32xi32>
    %537 = arith.cmpi eq, %93, %536 : vector<8x32xi32>
    %cst_220 = arith.constant 0.000000e+00 : f32
    %538 = vector.broadcast %cst_220 : f32 to vector<8x32xf32>
    %539 = arith.select %537, %92, %538 : vector<8x32xi1>, vector<8x32xf32>
    %cst_221 = arith.constant dense<0.000000e+00> : vector<8xf32>
    %540 = vector.multi_reduction <add>, %539, %cst_221 [1] : vector<8x32xf32> to vector<8xf32>
    %541 = vector.shape_cast %540 : vector<8xf32> to vector<8x1xf32>
    %c20_i32 = arith.constant 20 : i32
    %542 = vector.broadcast %c20_i32 : i32 to vector<8x32xi32>
    %543 = arith.cmpi eq, %93, %542 : vector<8x32xi32>
    %cst_222 = arith.constant 0.000000e+00 : f32
    %544 = vector.broadcast %cst_222 : f32 to vector<8x32xf32>
    %545 = arith.select %543, %92, %544 : vector<8x32xi1>, vector<8x32xf32>
    %cst_223 = arith.constant dense<0.000000e+00> : vector<8xf32>
    %546 = vector.multi_reduction <add>, %545, %cst_223 [1] : vector<8x32xf32> to vector<8xf32>
    %547 = vector.shape_cast %546 : vector<8xf32> to vector<8x1xf32>
    %548 = vector.broadcast %541 : vector<8x1xf32> to vector<8x64xf32>
    %549 = arith.mulf %94, %548 : vector<8x64xf32>
    %cst_224 = arith.constant 9.99999996E-13 : f32
    %550 = vector.broadcast %cst_224 : f32 to vector<8x64xf32>
    %551 = arith.addf %535, %550 : vector<8x64xf32>
    %552 = tpu.reciprocal %551 {approx = true} : vector<8x64xf32> -> vector<8x64xf32>
    %553 = arith.mulf %549, %552 : vector<8x64xf32>
    %c4_225 = arith.constant 4 : index
    %c0_226 = arith.constant 0 : index
    %c0_227 = arith.constant 0 : index
    %554 = vector.load %arg15[%c4_225, %c0_226, %c0_227] : memref<16x1x64xf32, #tpu.memory_space<vmem>>, vector<1x1x64xf32>
    %555 = vector.shape_cast %554 : vector<1x1x64xf32> to vector<1x64xf32>
    %c1_i32_228 = arith.constant 1 : i32
    %556 = vector.broadcast %c1_i32_228 : i32 to vector<8x1xi32>
    %557 = arith.cmpi sge, %2, %556 : vector<8x1xi32>
    %c1_i32_229 = arith.constant 1 : i32
    %558 = tpu.dynamic_rotate %553 by %c1_i32_229 dim 0 : vector<8x64xf32>, i32 -> vector<8x64xf32>
    %cst_230 = arith.constant 0.000000e+00 : f32
    %559 = vector.shape_cast %557 : vector<8x1xi1> to vector<8x1xi1>
    %560 = vector.broadcast %559 : vector<8x1xi1> to vector<8x64xi1>
    %561 = vector.broadcast %cst_230 : f32 to vector<8x64xf32>
    %562 = arith.select %560, %558, %561 : vector<8x64xi1>, vector<8x64xf32>
    %563 = arith.addf %553, %562 : vector<8x64xf32>
    %c2_i32_231 = arith.constant 2 : i32
    %564 = vector.broadcast %c2_i32_231 : i32 to vector<8x1xi32>
    %565 = arith.cmpi sge, %2, %564 : vector<8x1xi32>
    %c2_i32_232 = arith.constant 2 : i32
    %566 = tpu.dynamic_rotate %563 by %c2_i32_232 dim 0 : vector<8x64xf32>, i32 -> vector<8x64xf32>
    %cst_233 = arith.constant 0.000000e+00 : f32
    %567 = vector.shape_cast %565 : vector<8x1xi1> to vector<8x1xi1>
    %568 = vector.broadcast %567 : vector<8x1xi1> to vector<8x64xi1>
    %569 = vector.broadcast %cst_233 : f32 to vector<8x64xf32>
    %570 = arith.select %568, %566, %569 : vector<8x64xi1>, vector<8x64xf32>
    %571 = arith.addf %563, %570 : vector<8x64xf32>
    %c4_i32_234 = arith.constant 4 : i32
    %572 = vector.broadcast %c4_i32_234 : i32 to vector<8x1xi32>
    %573 = arith.cmpi sge, %2, %572 : vector<8x1xi32>
    %c4_i32_235 = arith.constant 4 : i32
    %574 = tpu.dynamic_rotate %571 by %c4_i32_235 dim 0 : vector<8x64xf32>, i32 -> vector<8x64xf32>
    %cst_236 = arith.constant 0.000000e+00 : f32
    %575 = vector.shape_cast %573 : vector<8x1xi1> to vector<8x1xi1>
    %576 = vector.broadcast %575 : vector<8x1xi1> to vector<8x64xi1>
    %577 = vector.broadcast %cst_236 : f32 to vector<8x64xf32>
    %578 = arith.select %576, %574, %577 : vector<8x64xi1>, vector<8x64xf32>
    %579 = arith.addf %571, %578 : vector<8x64xf32>
    %580 = vector.broadcast %555 : vector<1x64xf32> to vector<8x64xf32>
    %581 = arith.addf %579, %580 : vector<8x64xf32>
    %582 = arith.mulf %581, %535 : vector<8x64xf32>
    %583 = vector.broadcast %547 : vector<8x1xf32> to vector<8x64xf32>
    %584 = arith.mulf %582, %583 : vector<8x64xf32>
    %585 = arith.addf %486, %584 : vector<8x64xf32>
    %cst_237 = arith.constant dense<0.000000e+00> : vector<64xf32>
    %586 = vector.multi_reduction <add>, %506, %cst_237 [0] : vector<8x64xf32> to vector<64xf32>
    %587 = vector.shape_cast %586 : vector<64xf32> to vector<1x64xf32>
    %588 = arith.addf %508, %587 : vector<1x64xf32>
    %c4_238 = arith.constant 4 : index
    %c0_239 = arith.constant 0 : index
    %c0_240 = arith.constant 0 : index
    %589 = vector.load %arg14[%c4_238, %c0_239, %c0_240] : memref<16x1x64xf32, #tpu.memory_space<vmem>>, vector<1x1x64xf32>
    %590 = vector.shape_cast %589 : vector<1x1x64xf32> to vector<1x64xf32>
    %591 = vector.shape_cast %588 : vector<1x64xf32> to vector<1x1x64xf32>
    tpu.vector_store %arg14[%c4_238, %c0_239, %c0_240], %591 {strides = array<i32>} : memref<16x1x64xf32, #tpu.memory_space<vmem>>, vector<1x1x64xf32>,
    %cst_241 = arith.constant dense<0.000000e+00> : vector<64xf32>
    %592 = vector.multi_reduction <add>, %553, %cst_241 [0] : vector<8x64xf32> to vector<64xf32>
    %593 = vector.shape_cast %592 : vector<64xf32> to vector<1x64xf32>
    %594 = arith.addf %555, %593 : vector<1x64xf32>
    %c4_242 = arith.constant 4 : index
    %c0_243 = arith.constant 0 : index
    %c0_244 = arith.constant 0 : index
    %595 = vector.load %arg15[%c4_242, %c0_243, %c0_244] : memref<16x1x64xf32, #tpu.memory_space<vmem>>, vector<1x1x64xf32>
    %596 = vector.shape_cast %595 : vector<1x1x64xf32> to vector<1x64xf32>
    %597 = vector.shape_cast %594 : vector<1x64xf32> to vector<1x1x64xf32>
    tpu.vector_store %arg15[%c4_242, %c0_243, %c0_244], %597 {strides = array<i32>} : memref<16x1x64xf32, #tpu.memory_space<vmem>>, vector<1x1x64xf32>,
    %c5 = arith.constant 5 : index
    %c0_245 = arith.constant 0 : index
    %598 = vector.load %arg10[%c5, %c0_245] : memref<16x64xf32, #tpu.memory_space<vmem>>, vector<1x64xf32>
    %599 = vector.broadcast %598 : vector<1x64xf32> to vector<8x64xf32>
    %600 = arith.mulf %91, %599 : vector<8x64xf32>
    %601 = math.exp %600 : vector<8x64xf32>
    %cst_246 = arith.constant 0.000000e+00 : f32
    %602 = vector.shape_cast %99 : vector<8x1xi1> to vector<8x1xi1>
    %603 = vector.broadcast %602 : vector<8x1xi1> to vector<8x64xi1>
    %604 = vector.broadcast %cst_246 : f32 to vector<8x64xf32>
    %605 = arith.select %603, %604, %601 : vector<8x64xi1>, vector<8x64xf32>
    %c5_247 = arith.constant 5 : index
    %c0_248 = arith.constant 0 : index
    %c0_249 = arith.constant 0 : index
    %606 = vector.load %arg14[%c5_247, %c0_248, %c0_249] : memref<16x1x64xf32, #tpu.memory_space<vmem>>, vector<1x1x64xf32>
    %607 = vector.shape_cast %606 : vector<1x1x64xf32> to vector<1x64xf32>
    %c1_i32_250 = arith.constant 1 : i32
    %608 = vector.broadcast %c1_i32_250 : i32 to vector<8x1xi32>
    %609 = arith.cmpi sge, %2, %608 : vector<8x1xi32>
    %c1_i32_251 = arith.constant 1 : i32
    %610 = tpu.dynamic_rotate %605 by %c1_i32_251 dim 0 : vector<8x64xf32>, i32 -> vector<8x64xf32>
    %cst_252 = arith.constant 0.000000e+00 : f32
    %611 = vector.shape_cast %609 : vector<8x1xi1> to vector<8x1xi1>
    %612 = vector.broadcast %611 : vector<8x1xi1> to vector<8x64xi1>
    %613 = vector.broadcast %cst_252 : f32 to vector<8x64xf32>
    %614 = arith.select %612, %610, %613 : vector<8x64xi1>, vector<8x64xf32>
    %615 = arith.addf %605, %614 : vector<8x64xf32>
    %c2_i32_253 = arith.constant 2 : i32
    %616 = vector.broadcast %c2_i32_253 : i32 to vector<8x1xi32>
    %617 = arith.cmpi sge, %2, %616 : vector<8x1xi32>
    %c2_i32_254 = arith.constant 2 : i32
    %618 = tpu.dynamic_rotate %615 by %c2_i32_254 dim 0 : vector<8x64xf32>, i32 -> vector<8x64xf32>
    %cst_255 = arith.constant 0.000000e+00 : f32
    %619 = vector.shape_cast %617 : vector<8x1xi1> to vector<8x1xi1>
    %620 = vector.broadcast %619 : vector<8x1xi1> to vector<8x64xi1>
    %621 = vector.broadcast %cst_255 : f32 to vector<8x64xf32>
    %622 = arith.select %620, %618, %621 : vector<8x64xi1>, vector<8x64xf32>
    %623 = arith.addf %615, %622 : vector<8x64xf32>
    %c4_i32_256 = arith.constant 4 : i32
    %624 = vector.broadcast %c4_i32_256 : i32 to vector<8x1xi32>
    %625 = arith.cmpi sge, %2, %624 : vector<8x1xi32>
    %c4_i32_257 = arith.constant 4 : i32
    %626 = tpu.dynamic_rotate %623 by %c4_i32_257 dim 0 : vector<8x64xf32>, i32 -> vector<8x64xf32>
    %cst_258 = arith.constant 0.000000e+00 : f32
    %627 = vector.shape_cast %625 : vector<8x1xi1> to vector<8x1xi1>
    %628 = vector.broadcast %627 : vector<8x1xi1> to vector<8x64xi1>
    %629 = vector.broadcast %cst_258 : f32 to vector<8x64xf32>
    %630 = arith.select %628, %626, %629 : vector<8x64xi1>, vector<8x64xf32>
    %631 = arith.addf %623, %630 : vector<8x64xf32>
    %632 = vector.broadcast %607 : vector<1x64xf32> to vector<8x64xf32>
    %633 = arith.addf %631, %632 : vector<8x64xf32>
    %634 = math.exp %633 : vector<8x64xf32>
    %c5_i32 = arith.constant 5 : i32
    %635 = vector.broadcast %c5_i32 : i32 to vector<8x32xi32>
    %636 = arith.cmpi eq, %93, %635 : vector<8x32xi32>
    %cst_259 = arith.constant 0.000000e+00 : f32
    %637 = vector.broadcast %cst_259 : f32 to vector<8x32xf32>
    %638 = arith.select %636, %92, %637 : vector<8x32xi1>, vector<8x32xf32>
    %cst_260 = arith.constant dense<0.000000e+00> : vector<8xf32>
    %639 = vector.multi_reduction <add>, %638, %cst_260 [1] : vector<8x32xf32> to vector<8xf32>
    %640 = vector.shape_cast %639 : vector<8xf32> to vector<8x1xf32>
    %c21_i32 = arith.constant 21 : i32
    %641 = vector.broadcast %c21_i32 : i32 to vector<8x32xi32>
    %642 = arith.cmpi eq, %93, %641 : vector<8x32xi32>
    %cst_261 = arith.constant 0.000000e+00 : f32
    %643 = vector.broadcast %cst_261 : f32 to vector<8x32xf32>
    %644 = arith.select %642, %92, %643 : vector<8x32xi1>, vector<8x32xf32>
    %cst_262 = arith.constant dense<0.000000e+00> : vector<8xf32>
    %645 = vector.multi_reduction <add>, %644, %cst_262 [1] : vector<8x32xf32> to vector<8xf32>
    %646 = vector.shape_cast %645 : vector<8xf32> to vector<8x1xf32>
    %647 = vector.broadcast %640 : vector<8x1xf32> to vector<8x64xf32>
    %648 = arith.mulf %94, %647 : vector<8x64xf32>
    %cst_263 = arith.constant 9.99999996E-13 : f32
    %649 = vector.broadcast %cst_263 : f32 to vector<8x64xf32>
    %650 = arith.addf %634, %649 : vector<8x64xf32>
    %651 = tpu.reciprocal %650 {approx = true} : vector<8x64xf32> -> vector<8x64xf32>
    %652 = arith.mulf %648, %651 : vector<8x64xf32>
    %c5_264 = arith.constant 5 : index
    %c0_265 = arith.constant 0 : index
    %c0_266 = arith.constant 0 : index
    %653 = vector.load %arg15[%c5_264, %c0_265, %c0_266] : memref<16x1x64xf32, #tpu.memory_space<vmem>>, vector<1x1x64xf32>
    %654 = vector.shape_cast %653 : vector<1x1x64xf32> to vector<1x64xf32>
    %c1_i32_267 = arith.constant 1 : i32
    %655 = vector.broadcast %c1_i32_267 : i32 to vector<8x1xi32>
    %656 = arith.cmpi sge, %2, %655 : vector<8x1xi32>
    %c1_i32_268 = arith.constant 1 : i32
    %657 = tpu.dynamic_rotate %652 by %c1_i32_268 dim 0 : vector<8x64xf32>, i32 -> vector<8x64xf32>
    %cst_269 = arith.constant 0.000000e+00 : f32
    %658 = vector.shape_cast %656 : vector<8x1xi1> to vector<8x1xi1>
    %659 = vector.broadcast %658 : vector<8x1xi1> to vector<8x64xi1>
    %660 = vector.broadcast %cst_269 : f32 to vector<8x64xf32>
    %661 = arith.select %659, %657, %660 : vector<8x64xi1>, vector<8x64xf32>
    %662 = arith.addf %652, %661 : vector<8x64xf32>
    %c2_i32_270 = arith.constant 2 : i32
    %663 = vector.broadcast %c2_i32_270 : i32 to vector<8x1xi32>
    %664 = arith.cmpi sge, %2, %663 : vector<8x1xi32>
    %c2_i32_271 = arith.constant 2 : i32
    %665 = tpu.dynamic_rotate %662 by %c2_i32_271 dim 0 : vector<8x64xf32>, i32 -> vector<8x64xf32>
    %cst_272 = arith.constant 0.000000e+00 : f32
    %666 = vector.shape_cast %664 : vector<8x1xi1> to vector<8x1xi1>
    %667 = vector.broadcast %666 : vector<8x1xi1> to vector<8x64xi1>
    %668 = vector.broadcast %cst_272 : f32 to vector<8x64xf32>
    %669 = arith.select %667, %665, %668 : vector<8x64xi1>, vector<8x64xf32>
    %670 = arith.addf %662, %669 : vector<8x64xf32>
    %c4_i32_273 = arith.constant 4 : i32
    %671 = vector.broadcast %c4_i32_273 : i32 to vector<8x1xi32>
    %672 = arith.cmpi sge, %2, %671 : vector<8x1xi32>
    %c4_i32_274 = arith.constant 4 : i32
    %673 = tpu.dynamic_rotate %670 by %c4_i32_274 dim 0 : vector<8x64xf32>, i32 -> vector<8x64xf32>
    %cst_275 = arith.constant 0.000000e+00 : f32
    %674 = vector.shape_cast %672 : vector<8x1xi1> to vector<8x1xi1>
    %675 = vector.broadcast %674 : vector<8x1xi1> to vector<8x64xi1>
    %676 = vector.broadcast %cst_275 : f32 to vector<8x64xf32>
    %677 = arith.select %675, %673, %676 : vector<8x64xi1>, vector<8x64xf32>
    %678 = arith.addf %670, %677 : vector<8x64xf32>
    %679 = vector.broadcast %654 : vector<1x64xf32> to vector<8x64xf32>
    %680 = arith.addf %678, %679 : vector<8x64xf32>
    %681 = arith.mulf %680, %634 : vector<8x64xf32>
    %682 = vector.broadcast %646 : vector<8x1xf32> to vector<8x64xf32>
    %683 = arith.mulf %681, %682 : vector<8x64xf32>
    %684 = arith.addf %585, %683 : vector<8x64xf32>
    %cst_276 = arith.constant dense<0.000000e+00> : vector<64xf32>
    %685 = vector.multi_reduction <add>, %605, %cst_276 [0] : vector<8x64xf32> to vector<64xf32>
    %686 = vector.shape_cast %685 : vector<64xf32> to vector<1x64xf32>
    %687 = arith.addf %607, %686 : vector<1x64xf32>
    %c5_277 = arith.constant 5 : index
    %c0_278 = arith.constant 0 : index
    %c0_279 = arith.constant 0 : index
    %688 = vector.load %arg14[%c5_277, %c0_278, %c0_279] : memref<16x1x64xf32, #tpu.memory_space<vmem>>, vector<1x1x64xf32>
    %689 = vector.shape_cast %688 : vector<1x1x64xf32> to vector<1x64xf32>
    %690 = vector.shape_cast %687 : vector<1x64xf32> to vector<1x1x64xf32>
    tpu.vector_store %arg14[%c5_277, %c0_278, %c0_279], %690 {strides = array<i32>} : memref<16x1x64xf32, #tpu.memory_space<vmem>>, vector<1x1x64xf32>,
    %cst_280 = arith.constant dense<0.000000e+00> : vector<64xf32>
    %691 = vector.multi_reduction <add>, %652, %cst_280 [0] : vector<8x64xf32> to vector<64xf32>
    %692 = vector.shape_cast %691 : vector<64xf32> to vector<1x64xf32>
    %693 = arith.addf %654, %692 : vector<1x64xf32>
    %c5_281 = arith.constant 5 : index
    %c0_282 = arith.constant 0 : index
    %c0_283 = arith.constant 0 : index
    %694 = vector.load %arg15[%c5_281, %c0_282, %c0_283] : memref<16x1x64xf32, #tpu.memory_space<vmem>>, vector<1x1x64xf32>
    %695 = vector.shape_cast %694 : vector<1x1x64xf32> to vector<1x64xf32>
    %696 = vector.shape_cast %693 : vector<1x64xf32> to vector<1x1x64xf32>
    tpu.vector_store %arg15[%c5_281, %c0_282, %c0_283], %696 {strides = array<i32>} : memref<16x1x64xf32, #tpu.memory_space<vmem>>, vector<1x1x64xf32>,
    %c6 = arith.constant 6 : index
    %c0_284 = arith.constant 0 : index
    %697 = vector.load %arg10[%c6, %c0_284] : memref<16x64xf32, #tpu.memory_space<vmem>>, vector<1x64xf32>
    %698 = vector.broadcast %697 : vector<1x64xf32> to vector<8x64xf32>
    %699 = arith.mulf %91, %698 : vector<8x64xf32>
    %700 = math.exp %699 : vector<8x64xf32>
    %cst_285 = arith.constant 0.000000e+00 : f32
    %701 = vector.shape_cast %99 : vector<8x1xi1> to vector<8x1xi1>
    %702 = vector.broadcast %701 : vector<8x1xi1> to vector<8x64xi1>
    %703 = vector.broadcast %cst_285 : f32 to vector<8x64xf32>
    %704 = arith.select %702, %703, %700 : vector<8x64xi1>, vector<8x64xf32>
    %c6_286 = arith.constant 6 : index
    %c0_287 = arith.constant 0 : index
    %c0_288 = arith.constant 0 : index
    %705 = vector.load %arg14[%c6_286, %c0_287, %c0_288] : memref<16x1x64xf32, #tpu.memory_space<vmem>>, vector<1x1x64xf32>
    %706 = vector.shape_cast %705 : vector<1x1x64xf32> to vector<1x64xf32>
    %c1_i32_289 = arith.constant 1 : i32
    %707 = vector.broadcast %c1_i32_289 : i32 to vector<8x1xi32>
    %708 = arith.cmpi sge, %2, %707 : vector<8x1xi32>
    %c1_i32_290 = arith.constant 1 : i32
    %709 = tpu.dynamic_rotate %704 by %c1_i32_290 dim 0 : vector<8x64xf32>, i32 -> vector<8x64xf32>
    %cst_291 = arith.constant 0.000000e+00 : f32
    %710 = vector.shape_cast %708 : vector<8x1xi1> to vector<8x1xi1>
    %711 = vector.broadcast %710 : vector<8x1xi1> to vector<8x64xi1>
    %712 = vector.broadcast %cst_291 : f32 to vector<8x64xf32>
    %713 = arith.select %711, %709, %712 : vector<8x64xi1>, vector<8x64xf32>
    %714 = arith.addf %704, %713 : vector<8x64xf32>
    %c2_i32_292 = arith.constant 2 : i32
    %715 = vector.broadcast %c2_i32_292 : i32 to vector<8x1xi32>
    %716 = arith.cmpi sge, %2, %715 : vector<8x1xi32>
    %c2_i32_293 = arith.constant 2 : i32
    %717 = tpu.dynamic_rotate %714 by %c2_i32_293 dim 0 : vector<8x64xf32>, i32 -> vector<8x64xf32>
    %cst_294 = arith.constant 0.000000e+00 : f32
    %718 = vector.shape_cast %716 : vector<8x1xi1> to vector<8x1xi1>
    %719 = vector.broadcast %718 : vector<8x1xi1> to vector<8x64xi1>
    %720 = vector.broadcast %cst_294 : f32 to vector<8x64xf32>
    %721 = arith.select %719, %717, %720 : vector<8x64xi1>, vector<8x64xf32>
    %722 = arith.addf %714, %721 : vector<8x64xf32>
    %c4_i32_295 = arith.constant 4 : i32
    %723 = vector.broadcast %c4_i32_295 : i32 to vector<8x1xi32>
    %724 = arith.cmpi sge, %2, %723 : vector<8x1xi32>
    %c4_i32_296 = arith.constant 4 : i32
    %725 = tpu.dynamic_rotate %722 by %c4_i32_296 dim 0 : vector<8x64xf32>, i32 -> vector<8x64xf32>
    %cst_297 = arith.constant 0.000000e+00 : f32
    %726 = vector.shape_cast %724 : vector<8x1xi1> to vector<8x1xi1>
    %727 = vector.broadcast %726 : vector<8x1xi1> to vector<8x64xi1>
    %728 = vector.broadcast %cst_297 : f32 to vector<8x64xf32>
    %729 = arith.select %727, %725, %728 : vector<8x64xi1>, vector<8x64xf32>
    %730 = arith.addf %722, %729 : vector<8x64xf32>
    %731 = vector.broadcast %706 : vector<1x64xf32> to vector<8x64xf32>
    %732 = arith.addf %730, %731 : vector<8x64xf32>
    %733 = math.exp %732 : vector<8x64xf32>
    %c6_i32 = arith.constant 6 : i32
    %734 = vector.broadcast %c6_i32 : i32 to vector<8x32xi32>
    %735 = arith.cmpi eq, %93, %734 : vector<8x32xi32>
    %cst_298 = arith.constant 0.000000e+00 : f32
    %736 = vector.broadcast %cst_298 : f32 to vector<8x32xf32>
    %737 = arith.select %735, %92, %736 : vector<8x32xi1>, vector<8x32xf32>
    %cst_299 = arith.constant dense<0.000000e+00> : vector<8xf32>
    %738 = vector.multi_reduction <add>, %737, %cst_299 [1] : vector<8x32xf32> to vector<8xf32>
    %739 = vector.shape_cast %738 : vector<8xf32> to vector<8x1xf32>
    %c22_i32 = arith.constant 22 : i32
    %740 = vector.broadcast %c22_i32 : i32 to vector<8x32xi32>
    %741 = arith.cmpi eq, %93, %740 : vector<8x32xi32>
    %cst_300 = arith.constant 0.000000e+00 : f32
    %742 = vector.broadcast %cst_300 : f32 to vector<8x32xf32>
    %743 = arith.select %741, %92, %742 : vector<8x32xi1>, vector<8x32xf32>
    %cst_301 = arith.constant dense<0.000000e+00> : vector<8xf32>
    %744 = vector.multi_reduction <add>, %743, %cst_301 [1] : vector<8x32xf32> to vector<8xf32>
    %745 = vector.shape_cast %744 : vector<8xf32> to vector<8x1xf32>
    %746 = vector.broadcast %739 : vector<8x1xf32> to vector<8x64xf32>
    %747 = arith.mulf %94, %746 : vector<8x64xf32>
    %cst_302 = arith.constant 9.99999996E-13 : f32
    %748 = vector.broadcast %cst_302 : f32 to vector<8x64xf32>
    %749 = arith.addf %733, %748 : vector<8x64xf32>
    %750 = tpu.reciprocal %749 {approx = true} : vector<8x64xf32> -> vector<8x64xf32>
    %751 = arith.mulf %747, %750 : vector<8x64xf32>
    %c6_303 = arith.constant 6 : index
    %c0_304 = arith.constant 0 : index
    %c0_305 = arith.constant 0 : index
    %752 = vector.load %arg15[%c6_303, %c0_304, %c0_305] : memref<16x1x64xf32, #tpu.memory_space<vmem>>, vector<1x1x64xf32>
    %753 = vector.shape_cast %752 : vector<1x1x64xf32> to vector<1x64xf32>
    %c1_i32_306 = arith.constant 1 : i32
    %754 = vector.broadcast %c1_i32_306 : i32 to vector<8x1xi32>
    %755 = arith.cmpi sge, %2, %754 : vector<8x1xi32>
    %c1_i32_307 = arith.constant 1 : i32
    %756 = tpu.dynamic_rotate %751 by %c1_i32_307 dim 0 : vector<8x64xf32>, i32 -> vector<8x64xf32>
    %cst_308 = arith.constant 0.000000e+00 : f32
    %757 = vector.shape_cast %755 : vector<8x1xi1> to vector<8x1xi1>
    %758 = vector.broadcast %757 : vector<8x1xi1> to vector<8x64xi1>
    %759 = vector.broadcast %cst_308 : f32 to vector<8x64xf32>
    %760 = arith.select %758, %756, %759 : vector<8x64xi1>, vector<8x64xf32>
    %761 = arith.addf %751, %760 : vector<8x64xf32>
    %c2_i32_309 = arith.constant 2 : i32
    %762 = vector.broadcast %c2_i32_309 : i32 to vector<8x1xi32>
    %763 = arith.cmpi sge, %2, %762 : vector<8x1xi32>
    %c2_i32_310 = arith.constant 2 : i32
    %764 = tpu.dynamic_rotate %761 by %c2_i32_310 dim 0 : vector<8x64xf32>, i32 -> vector<8x64xf32>
    %cst_311 = arith.constant 0.000000e+00 : f32
    %765 = vector.shape_cast %763 : vector<8x1xi1> to vector<8x1xi1>
    %766 = vector.broadcast %765 : vector<8x1xi1> to vector<8x64xi1>
    %767 = vector.broadcast %cst_311 : f32 to vector<8x64xf32>
    %768 = arith.select %766, %764, %767 : vector<8x64xi1>, vector<8x64xf32>
    %769 = arith.addf %761, %768 : vector<8x64xf32>
    %c4_i32_312 = arith.constant 4 : i32
    %770 = vector.broadcast %c4_i32_312 : i32 to vector<8x1xi32>
    %771 = arith.cmpi sge, %2, %770 : vector<8x1xi32>
    %c4_i32_313 = arith.constant 4 : i32
    %772 = tpu.dynamic_rotate %769 by %c4_i32_313 dim 0 : vector<8x64xf32>, i32 -> vector<8x64xf32>
    %cst_314 = arith.constant 0.000000e+00 : f32
    %773 = vector.shape_cast %771 : vector<8x1xi1> to vector<8x1xi1>
    %774 = vector.broadcast %773 : vector<8x1xi1> to vector<8x64xi1>
    %775 = vector.broadcast %cst_314 : f32 to vector<8x64xf32>
    %776 = arith.select %774, %772, %775 : vector<8x64xi1>, vector<8x64xf32>
    %777 = arith.addf %769, %776 : vector<8x64xf32>
    %778 = vector.broadcast %753 : vector<1x64xf32> to vector<8x64xf32>
    %779 = arith.addf %777, %778 : vector<8x64xf32>
    %780 = arith.mulf %779, %733 : vector<8x64xf32>
    %781 = vector.broadcast %745 : vector<8x1xf32> to vector<8x64xf32>
    %782 = arith.mulf %780, %781 : vector<8x64xf32>
    %783 = arith.addf %684, %782 : vector<8x64xf32>
    %cst_315 = arith.constant dense<0.000000e+00> : vector<64xf32>
    %784 = vector.multi_reduction <add>, %704, %cst_315 [0] : vector<8x64xf32> to vector<64xf32>
    %785 = vector.shape_cast %784 : vector<64xf32> to vector<1x64xf32>
    %786 = arith.addf %706, %785 : vector<1x64xf32>
    %c6_316 = arith.constant 6 : index
    %c0_317 = arith.constant 0 : index
    %c0_318 = arith.constant 0 : index
    %787 = vector.load %arg14[%c6_316, %c0_317, %c0_318] : memref<16x1x64xf32, #tpu.memory_space<vmem>>, vector<1x1x64xf32>
    %788 = vector.shape_cast %787 : vector<1x1x64xf32> to vector<1x64xf32>
    %789 = vector.shape_cast %786 : vector<1x64xf32> to vector<1x1x64xf32>
    tpu.vector_store %arg14[%c6_316, %c0_317, %c0_318], %789 {strides = array<i32>} : memref<16x1x64xf32, #tpu.memory_space<vmem>>, vector<1x1x64xf32>,
    %cst_319 = arith.constant dense<0.000000e+00> : vector<64xf32>
    %790 = vector.multi_reduction <add>, %751, %cst_319 [0] : vector<8x64xf32> to vector<64xf32>
    %791 = vector.shape_cast %790 : vector<64xf32> to vector<1x64xf32>
    %792 = arith.addf %753, %791 : vector<1x64xf32>
    %c6_320 = arith.constant 6 : index
    %c0_321 = arith.constant 0 : index
    %c0_322 = arith.constant 0 : index
    %793 = vector.load %arg15[%c6_320, %c0_321, %c0_322] : memref<16x1x64xf32, #tpu.memory_space<vmem>>, vector<1x1x64xf32>
    %794 = vector.shape_cast %793 : vector<1x1x64xf32> to vector<1x64xf32>
    %795 = vector.shape_cast %792 : vector<1x64xf32> to vector<1x1x64xf32>
    tpu.vector_store %arg15[%c6_320, %c0_321, %c0_322], %795 {strides = array<i32>} : memref<16x1x64xf32, #tpu.memory_space<vmem>>, vector<1x1x64xf32>,
    %c7 = arith.constant 7 : index
    %c0_323 = arith.constant 0 : index
    %796 = vector.load %arg10[%c7, %c0_323] : memref<16x64xf32, #tpu.memory_space<vmem>>, vector<1x64xf32>
    %797 = vector.broadcast %796 : vector<1x64xf32> to vector<8x64xf32>
    %798 = arith.mulf %91, %797 : vector<8x64xf32>
    %799 = math.exp %798 : vector<8x64xf32>
    %cst_324 = arith.constant 0.000000e+00 : f32
    %800 = vector.shape_cast %99 : vector<8x1xi1> to vector<8x1xi1>
    %801 = vector.broadcast %800 : vector<8x1xi1> to vector<8x64xi1>
    %802 = vector.broadcast %cst_324 : f32 to vector<8x64xf32>
    %803 = arith.select %801, %802, %799 : vector<8x64xi1>, vector<8x64xf32>
    %c7_325 = arith.constant 7 : index
    %c0_326 = arith.constant 0 : index
    %c0_327 = arith.constant 0 : index
    %804 = vector.load %arg14[%c7_325, %c0_326, %c0_327] : memref<16x1x64xf32, #tpu.memory_space<vmem>>, vector<1x1x64xf32>
    %805 = vector.shape_cast %804 : vector<1x1x64xf32> to vector<1x64xf32>
    %c1_i32_328 = arith.constant 1 : i32
    %806 = vector.broadcast %c1_i32_328 : i32 to vector<8x1xi32>
    %807 = arith.cmpi sge, %2, %806 : vector<8x1xi32>
    %c1_i32_329 = arith.constant 1 : i32
    %808 = tpu.dynamic_rotate %803 by %c1_i32_329 dim 0 : vector<8x64xf32>, i32 -> vector<8x64xf32>
    %cst_330 = arith.constant 0.000000e+00 : f32
    %809 = vector.shape_cast %807 : vector<8x1xi1> to vector<8x1xi1>
    %810 = vector.broadcast %809 : vector<8x1xi1> to vector<8x64xi1>
    %811 = vector.broadcast %cst_330 : f32 to vector<8x64xf32>
    %812 = arith.select %810, %808, %811 : vector<8x64xi1>, vector<8x64xf32>
    %813 = arith.addf %803, %812 : vector<8x64xf32>
    %c2_i32_331 = arith.constant 2 : i32
    %814 = vector.broadcast %c2_i32_331 : i32 to vector<8x1xi32>
    %815 = arith.cmpi sge, %2, %814 : vector<8x1xi32>
    %c2_i32_332 = arith.constant 2 : i32
    %816 = tpu.dynamic_rotate %813 by %c2_i32_332 dim 0 : vector<8x64xf32>, i32 -> vector<8x64xf32>
    %cst_333 = arith.constant 0.000000e+00 : f32
    %817 = vector.shape_cast %815 : vector<8x1xi1> to vector<8x1xi1>
    %818 = vector.broadcast %817 : vector<8x1xi1> to vector<8x64xi1>
    %819 = vector.broadcast %cst_333 : f32 to vector<8x64xf32>
    %820 = arith.select %818, %816, %819 : vector<8x64xi1>, vector<8x64xf32>
    %821 = arith.addf %813, %820 : vector<8x64xf32>
    %c4_i32_334 = arith.constant 4 : i32
    %822 = vector.broadcast %c4_i32_334 : i32 to vector<8x1xi32>
    %823 = arith.cmpi sge, %2, %822 : vector<8x1xi32>
    %c4_i32_335 = arith.constant 4 : i32
    %824 = tpu.dynamic_rotate %821 by %c4_i32_335 dim 0 : vector<8x64xf32>, i32 -> vector<8x64xf32>
    %cst_336 = arith.constant 0.000000e+00 : f32
    %825 = vector.shape_cast %823 : vector<8x1xi1> to vector<8x1xi1>
    %826 = vector.broadcast %825 : vector<8x1xi1> to vector<8x64xi1>
    %827 = vector.broadcast %cst_336 : f32 to vector<8x64xf32>
    %828 = arith.select %826, %824, %827 : vector<8x64xi1>, vector<8x64xf32>
    %829 = arith.addf %821, %828 : vector<8x64xf32>
    %830 = vector.broadcast %805 : vector<1x64xf32> to vector<8x64xf32>
    %831 = arith.addf %829, %830 : vector<8x64xf32>
    %832 = math.exp %831 : vector<8x64xf32>
    %c7_i32 = arith.constant 7 : i32
    %833 = vector.broadcast %c7_i32 : i32 to vector<8x32xi32>
    %834 = arith.cmpi eq, %93, %833 : vector<8x32xi32>
    %cst_337 = arith.constant 0.000000e+00 : f32
    %835 = vector.broadcast %cst_337 : f32 to vector<8x32xf32>
    %836 = arith.select %834, %92, %835 : vector<8x32xi1>, vector<8x32xf32>
    %cst_338 = arith.constant dense<0.000000e+00> : vector<8xf32>
    %837 = vector.multi_reduction <add>, %836, %cst_338 [1] : vector<8x32xf32> to vector<8xf32>
    %838 = vector.shape_cast %837 : vector<8xf32> to vector<8x1xf32>
    %c23_i32 = arith.constant 23 : i32
    %839 = vector.broadcast %c23_i32 : i32 to vector<8x32xi32>
    %840 = arith.cmpi eq, %93, %839 : vector<8x32xi32>
    %cst_339 = arith.constant 0.000000e+00 : f32
    %841 = vector.broadcast %cst_339 : f32 to vector<8x32xf32>
    %842 = arith.select %840, %92, %841 : vector<8x32xi1>, vector<8x32xf32>
    %cst_340 = arith.constant dense<0.000000e+00> : vector<8xf32>
    %843 = vector.multi_reduction <add>, %842, %cst_340 [1] : vector<8x32xf32> to vector<8xf32>
    %844 = vector.shape_cast %843 : vector<8xf32> to vector<8x1xf32>
    %845 = vector.broadcast %838 : vector<8x1xf32> to vector<8x64xf32>
    %846 = arith.mulf %94, %845 : vector<8x64xf32>
    %cst_341 = arith.constant 9.99999996E-13 : f32
    %847 = vector.broadcast %cst_341 : f32 to vector<8x64xf32>
    %848 = arith.addf %832, %847 : vector<8x64xf32>
    %849 = tpu.reciprocal %848 {approx = true} : vector<8x64xf32> -> vector<8x64xf32>
    %850 = arith.mulf %846, %849 : vector<8x64xf32>
    %c7_342 = arith.constant 7 : index
    %c0_343 = arith.constant 0 : index
    %c0_344 = arith.constant 0 : index
    %851 = vector.load %arg15[%c7_342, %c0_343, %c0_344] : memref<16x1x64xf32, #tpu.memory_space<vmem>>, vector<1x1x64xf32>
    %852 = vector.shape_cast %851 : vector<1x1x64xf32> to vector<1x64xf32>
    %c1_i32_345 = arith.constant 1 : i32
    %853 = vector.broadcast %c1_i32_345 : i32 to vector<8x1xi32>
    %854 = arith.cmpi sge, %2, %853 : vector<8x1xi32>
    %c1_i32_346 = arith.constant 1 : i32
    %855 = tpu.dynamic_rotate %850 by %c1_i32_346 dim 0 : vector<8x64xf32>, i32 -> vector<8x64xf32>
    %cst_347 = arith.constant 0.000000e+00 : f32
    %856 = vector.shape_cast %854 : vector<8x1xi1> to vector<8x1xi1>
    %857 = vector.broadcast %856 : vector<8x1xi1> to vector<8x64xi1>
    %858 = vector.broadcast %cst_347 : f32 to vector<8x64xf32>
    %859 = arith.select %857, %855, %858 : vector<8x64xi1>, vector<8x64xf32>
    %860 = arith.addf %850, %859 : vector<8x64xf32>
    %c2_i32_348 = arith.constant 2 : i32
    %861 = vector.broadcast %c2_i32_348 : i32 to vector<8x1xi32>
    %862 = arith.cmpi sge, %2, %861 : vector<8x1xi32>
    %c2_i32_349 = arith.constant 2 : i32
    %863 = tpu.dynamic_rotate %860 by %c2_i32_349 dim 0 : vector<8x64xf32>, i32 -> vector<8x64xf32>
    %cst_350 = arith.constant 0.000000e+00 : f32
    %864 = vector.shape_cast %862 : vector<8x1xi1> to vector<8x1xi1>
    %865 = vector.broadcast %864 : vector<8x1xi1> to vector<8x64xi1>
    %866 = vector.broadcast %cst_350 : f32 to vector<8x64xf32>
    %867 = arith.select %865, %863, %866 : vector<8x64xi1>, vector<8x64xf32>
    %868 = arith.addf %860, %867 : vector<8x64xf32>
    %c4_i32_351 = arith.constant 4 : i32
    %869 = vector.broadcast %c4_i32_351 : i32 to vector<8x1xi32>
    %870 = arith.cmpi sge, %2, %869 : vector<8x1xi32>
    %c4_i32_352 = arith.constant 4 : i32
    %871 = tpu.dynamic_rotate %868 by %c4_i32_352 dim 0 : vector<8x64xf32>, i32 -> vector<8x64xf32>
    %cst_353 = arith.constant 0.000000e+00 : f32
    %872 = vector.shape_cast %870 : vector<8x1xi1> to vector<8x1xi1>
    %873 = vector.broadcast %872 : vector<8x1xi1> to vector<8x64xi1>
    %874 = vector.broadcast %cst_353 : f32 to vector<8x64xf32>
    %875 = arith.select %873, %871, %874 : vector<8x64xi1>, vector<8x64xf32>
    %876 = arith.addf %868, %875 : vector<8x64xf32>
    %877 = vector.broadcast %852 : vector<1x64xf32> to vector<8x64xf32>
    %878 = arith.addf %876, %877 : vector<8x64xf32>
    %879 = arith.mulf %878, %832 : vector<8x64xf32>
    %880 = vector.broadcast %844 : vector<8x1xf32> to vector<8x64xf32>
    %881 = arith.mulf %879, %880 : vector<8x64xf32>
    %882 = arith.addf %783, %881 : vector<8x64xf32>
    %cst_354 = arith.constant dense<0.000000e+00> : vector<64xf32>
    %883 = vector.multi_reduction <add>, %803, %cst_354 [0] : vector<8x64xf32> to vector<64xf32>
    %884 = vector.shape_cast %883 : vector<64xf32> to vector<1x64xf32>
    %885 = arith.addf %805, %884 : vector<1x64xf32>
    %c7_355 = arith.constant 7 : index
    %c0_356 = arith.constant 0 : index
    %c0_357 = arith.constant 0 : index
    %886 = vector.load %arg14[%c7_355, %c0_356, %c0_357] : memref<16x1x64xf32, #tpu.memory_space<vmem>>, vector<1x1x64xf32>
    %887 = vector.shape_cast %886 : vector<1x1x64xf32> to vector<1x64xf32>
    %888 = vector.shape_cast %885 : vector<1x64xf32> to vector<1x1x64xf32>
    tpu.vector_store %arg14[%c7_355, %c0_356, %c0_357], %888 {strides = array<i32>} : memref<16x1x64xf32, #tpu.memory_space<vmem>>, vector<1x1x64xf32>,
    %cst_358 = arith.constant dense<0.000000e+00> : vector<64xf32>
    %889 = vector.multi_reduction <add>, %850, %cst_358 [0] : vector<8x64xf32> to vector<64xf32>
    %890 = vector.shape_cast %889 : vector<64xf32> to vector<1x64xf32>
    %891 = arith.addf %852, %890 : vector<1x64xf32>
    %c7_359 = arith.constant 7 : index
    %c0_360 = arith.constant 0 : index
    %c0_361 = arith.constant 0 : index
    %892 = vector.load %arg15[%c7_359, %c0_360, %c0_361] : memref<16x1x64xf32, #tpu.memory_space<vmem>>, vector<1x1x64xf32>
    %893 = vector.shape_cast %892 : vector<1x1x64xf32> to vector<1x64xf32>
    %894 = vector.shape_cast %891 : vector<1x64xf32> to vector<1x1x64xf32>
    tpu.vector_store %arg15[%c7_359, %c0_360, %c0_361], %894 {strides = array<i32>} : memref<16x1x64xf32, #tpu.memory_space<vmem>>, vector<1x1x64xf32>,
    %c8 = arith.constant 8 : index
    %c0_362 = arith.constant 0 : index
    %895 = vector.load %arg10[%c8, %c0_362] : memref<16x64xf32, #tpu.memory_space<vmem>>, vector<1x64xf32>
    %896 = vector.broadcast %895 : vector<1x64xf32> to vector<8x64xf32>
    %897 = arith.mulf %91, %896 : vector<8x64xf32>
    %898 = math.exp %897 : vector<8x64xf32>
    %cst_363 = arith.constant 0.000000e+00 : f32
    %899 = vector.shape_cast %99 : vector<8x1xi1> to vector<8x1xi1>
    %900 = vector.broadcast %899 : vector<8x1xi1> to vector<8x64xi1>
    %901 = vector.broadcast %cst_363 : f32 to vector<8x64xf32>
    %902 = arith.select %900, %901, %898 : vector<8x64xi1>, vector<8x64xf32>
    %c8_364 = arith.constant 8 : index
    %c0_365 = arith.constant 0 : index
    %c0_366 = arith.constant 0 : index
    %903 = vector.load %arg14[%c8_364, %c0_365, %c0_366] : memref<16x1x64xf32, #tpu.memory_space<vmem>>, vector<1x1x64xf32>
    %904 = vector.shape_cast %903 : vector<1x1x64xf32> to vector<1x64xf32>
    %c1_i32_367 = arith.constant 1 : i32
    %905 = vector.broadcast %c1_i32_367 : i32 to vector<8x1xi32>
    %906 = arith.cmpi sge, %2, %905 : vector<8x1xi32>
    %c1_i32_368 = arith.constant 1 : i32
    %907 = tpu.dynamic_rotate %902 by %c1_i32_368 dim 0 : vector<8x64xf32>, i32 -> vector<8x64xf32>
    %cst_369 = arith.constant 0.000000e+00 : f32
    %908 = vector.shape_cast %906 : vector<8x1xi1> to vector<8x1xi1>
    %909 = vector.broadcast %908 : vector<8x1xi1> to vector<8x64xi1>
    %910 = vector.broadcast %cst_369 : f32 to vector<8x64xf32>
    %911 = arith.select %909, %907, %910 : vector<8x64xi1>, vector<8x64xf32>
    %912 = arith.addf %902, %911 : vector<8x64xf32>
    %c2_i32_370 = arith.constant 2 : i32
    %913 = vector.broadcast %c2_i32_370 : i32 to vector<8x1xi32>
    %914 = arith.cmpi sge, %2, %913 : vector<8x1xi32>
    %c2_i32_371 = arith.constant 2 : i32
    %915 = tpu.dynamic_rotate %912 by %c2_i32_371 dim 0 : vector<8x64xf32>, i32 -> vector<8x64xf32>
    %cst_372 = arith.constant 0.000000e+00 : f32
    %916 = vector.shape_cast %914 : vector<8x1xi1> to vector<8x1xi1>
    %917 = vector.broadcast %916 : vector<8x1xi1> to vector<8x64xi1>
    %918 = vector.broadcast %cst_372 : f32 to vector<8x64xf32>
    %919 = arith.select %917, %915, %918 : vector<8x64xi1>, vector<8x64xf32>
    %920 = arith.addf %912, %919 : vector<8x64xf32>
    %c4_i32_373 = arith.constant 4 : i32
    %921 = vector.broadcast %c4_i32_373 : i32 to vector<8x1xi32>
    %922 = arith.cmpi sge, %2, %921 : vector<8x1xi32>
    %c4_i32_374 = arith.constant 4 : i32
    %923 = tpu.dynamic_rotate %920 by %c4_i32_374 dim 0 : vector<8x64xf32>, i32 -> vector<8x64xf32>
    %cst_375 = arith.constant 0.000000e+00 : f32
    %924 = vector.shape_cast %922 : vector<8x1xi1> to vector<8x1xi1>
    %925 = vector.broadcast %924 : vector<8x1xi1> to vector<8x64xi1>
    %926 = vector.broadcast %cst_375 : f32 to vector<8x64xf32>
    %927 = arith.select %925, %923, %926 : vector<8x64xi1>, vector<8x64xf32>
    %928 = arith.addf %920, %927 : vector<8x64xf32>
    %929 = vector.broadcast %904 : vector<1x64xf32> to vector<8x64xf32>
    %930 = arith.addf %928, %929 : vector<8x64xf32>
    %931 = math.exp %930 : vector<8x64xf32>
    %c8_i32 = arith.constant 8 : i32
    %932 = vector.broadcast %c8_i32 : i32 to vector<8x32xi32>
    %933 = arith.cmpi eq, %93, %932 : vector<8x32xi32>
    %cst_376 = arith.constant 0.000000e+00 : f32
    %934 = vector.broadcast %cst_376 : f32 to vector<8x32xf32>
    %935 = arith.select %933, %92, %934 : vector<8x32xi1>, vector<8x32xf32>
    %cst_377 = arith.constant dense<0.000000e+00> : vector<8xf32>
    %936 = vector.multi_reduction <add>, %935, %cst_377 [1] : vector<8x32xf32> to vector<8xf32>
    %937 = vector.shape_cast %936 : vector<8xf32> to vector<8x1xf32>
    %c24_i32 = arith.constant 24 : i32
    %938 = vector.broadcast %c24_i32 : i32 to vector<8x32xi32>
    %939 = arith.cmpi eq, %93, %938 : vector<8x32xi32>
    %cst_378 = arith.constant 0.000000e+00 : f32
    %940 = vector.broadcast %cst_378 : f32 to vector<8x32xf32>
    %941 = arith.select %939, %92, %940 : vector<8x32xi1>, vector<8x32xf32>
    %cst_379 = arith.constant dense<0.000000e+00> : vector<8xf32>
    %942 = vector.multi_reduction <add>, %941, %cst_379 [1] : vector<8x32xf32> to vector<8xf32>
    %943 = vector.shape_cast %942 : vector<8xf32> to vector<8x1xf32>
    %944 = vector.broadcast %937 : vector<8x1xf32> to vector<8x64xf32>
    %945 = arith.mulf %94, %944 : vector<8x64xf32>
    %cst_380 = arith.constant 9.99999996E-13 : f32
    %946 = vector.broadcast %cst_380 : f32 to vector<8x64xf32>
    %947 = arith.addf %931, %946 : vector<8x64xf32>
    %948 = tpu.reciprocal %947 {approx = true} : vector<8x64xf32> -> vector<8x64xf32>
    %949 = arith.mulf %945, %948 : vector<8x64xf32>
    %c8_381 = arith.constant 8 : index
    %c0_382 = arith.constant 0 : index
    %c0_383 = arith.constant 0 : index
    %950 = vector.load %arg15[%c8_381, %c0_382, %c0_383] : memref<16x1x64xf32, #tpu.memory_space<vmem>>, vector<1x1x64xf32>
    %951 = vector.shape_cast %950 : vector<1x1x64xf32> to vector<1x64xf32>
    %c1_i32_384 = arith.constant 1 : i32
    %952 = vector.broadcast %c1_i32_384 : i32 to vector<8x1xi32>
    %953 = arith.cmpi sge, %2, %952 : vector<8x1xi32>
    %c1_i32_385 = arith.constant 1 : i32
    %954 = tpu.dynamic_rotate %949 by %c1_i32_385 dim 0 : vector<8x64xf32>, i32 -> vector<8x64xf32>
    %cst_386 = arith.constant 0.000000e+00 : f32
    %955 = vector.shape_cast %953 : vector<8x1xi1> to vector<8x1xi1>
    %956 = vector.broadcast %955 : vector<8x1xi1> to vector<8x64xi1>
    %957 = vector.broadcast %cst_386 : f32 to vector<8x64xf32>
    %958 = arith.select %956, %954, %957 : vector<8x64xi1>, vector<8x64xf32>
    %959 = arith.addf %949, %958 : vector<8x64xf32>
    %c2_i32_387 = arith.constant 2 : i32
    %960 = vector.broadcast %c2_i32_387 : i32 to vector<8x1xi32>
    %961 = arith.cmpi sge, %2, %960 : vector<8x1xi32>
    %c2_i32_388 = arith.constant 2 : i32
    %962 = tpu.dynamic_rotate %959 by %c2_i32_388 dim 0 : vector<8x64xf32>, i32 -> vector<8x64xf32>
    %cst_389 = arith.constant 0.000000e+00 : f32
    %963 = vector.shape_cast %961 : vector<8x1xi1> to vector<8x1xi1>
    %964 = vector.broadcast %963 : vector<8x1xi1> to vector<8x64xi1>
    %965 = vector.broadcast %cst_389 : f32 to vector<8x64xf32>
    %966 = arith.select %964, %962, %965 : vector<8x64xi1>, vector<8x64xf32>
    %967 = arith.addf %959, %966 : vector<8x64xf32>
    %c4_i32_390 = arith.constant 4 : i32
    %968 = vector.broadcast %c4_i32_390 : i32 to vector<8x1xi32>
    %969 = arith.cmpi sge, %2, %968 : vector<8x1xi32>
    %c4_i32_391 = arith.constant 4 : i32
    %970 = tpu.dynamic_rotate %967 by %c4_i32_391 dim 0 : vector<8x64xf32>, i32 -> vector<8x64xf32>
    %cst_392 = arith.constant 0.000000e+00 : f32
    %971 = vector.shape_cast %969 : vector<8x1xi1> to vector<8x1xi1>
    %972 = vector.broadcast %971 : vector<8x1xi1> to vector<8x64xi1>
    %973 = vector.broadcast %cst_392 : f32 to vector<8x64xf32>
    %974 = arith.select %972, %970, %973 : vector<8x64xi1>, vector<8x64xf32>
    %975 = arith.addf %967, %974 : vector<8x64xf32>
    %976 = vector.broadcast %951 : vector<1x64xf32> to vector<8x64xf32>
    %977 = arith.addf %975, %976 : vector<8x64xf32>
    %978 = arith.mulf %977, %931 : vector<8x64xf32>
    %979 = vector.broadcast %943 : vector<8x1xf32> to vector<8x64xf32>
    %980 = arith.mulf %978, %979 : vector<8x64xf32>
    %981 = arith.addf %882, %980 : vector<8x64xf32>
    %cst_393 = arith.constant dense<0.000000e+00> : vector<64xf32>
    %982 = vector.multi_reduction <add>, %902, %cst_393 [0] : vector<8x64xf32> to vector<64xf32>
    %983 = vector.shape_cast %982 : vector<64xf32> to vector<1x64xf32>
    %984 = arith.addf %904, %983 : vector<1x64xf32>
    %c8_394 = arith.constant 8 : index
    %c0_395 = arith.constant 0 : index
    %c0_396 = arith.constant 0 : index
    %985 = vector.load %arg14[%c8_394, %c0_395, %c0_396] : memref<16x1x64xf32, #tpu.memory_space<vmem>>, vector<1x1x64xf32>
    %986 = vector.shape_cast %985 : vector<1x1x64xf32> to vector<1x64xf32>
    %987 = vector.shape_cast %984 : vector<1x64xf32> to vector<1x1x64xf32>
    tpu.vector_store %arg14[%c8_394, %c0_395, %c0_396], %987 {strides = array<i32>} : memref<16x1x64xf32, #tpu.memory_space<vmem>>, vector<1x1x64xf32>,
    %cst_397 = arith.constant dense<0.000000e+00> : vector<64xf32>
    %988 = vector.multi_reduction <add>, %949, %cst_397 [0] : vector<8x64xf32> to vector<64xf32>
    %989 = vector.shape_cast %988 : vector<64xf32> to vector<1x64xf32>
    %990 = arith.addf %951, %989 : vector<1x64xf32>
    %c8_398 = arith.constant 8 : index
    %c0_399 = arith.constant 0 : index
    %c0_400 = arith.constant 0 : index
    %991 = vector.load %arg15[%c8_398, %c0_399, %c0_400] : memref<16x1x64xf32, #tpu.memory_space<vmem>>, vector<1x1x64xf32>
    %992 = vector.shape_cast %991 : vector<1x1x64xf32> to vector<1x64xf32>
    %993 = vector.shape_cast %990 : vector<1x64xf32> to vector<1x1x64xf32>
    tpu.vector_store %arg15[%c8_398, %c0_399, %c0_400], %993 {strides = array<i32>} : memref<16x1x64xf32, #tpu.memory_space<vmem>>, vector<1x1x64xf32>,
    %c9 = arith.constant 9 : index
    %c0_401 = arith.constant 0 : index
    %994 = vector.load %arg10[%c9, %c0_401] : memref<16x64xf32, #tpu.memory_space<vmem>>, vector<1x64xf32>
    %995 = vector.broadcast %994 : vector<1x64xf32> to vector<8x64xf32>
    %996 = arith.mulf %91, %995 : vector<8x64xf32>
    %997 = math.exp %996 : vector<8x64xf32>
    %cst_402 = arith.constant 0.000000e+00 : f32
    %998 = vector.shape_cast %99 : vector<8x1xi1> to vector<8x1xi1>
    %999 = vector.broadcast %998 : vector<8x1xi1> to vector<8x64xi1>
    %1000 = vector.broadcast %cst_402 : f32 to vector<8x64xf32>
    %1001 = arith.select %999, %1000, %997 : vector<8x64xi1>, vector<8x64xf32>
    %c9_403 = arith.constant 9 : index
    %c0_404 = arith.constant 0 : index
    %c0_405 = arith.constant 0 : index
    %1002 = vector.load %arg14[%c9_403, %c0_404, %c0_405] : memref<16x1x64xf32, #tpu.memory_space<vmem>>, vector<1x1x64xf32>
    %1003 = vector.shape_cast %1002 : vector<1x1x64xf32> to vector<1x64xf32>
    %c1_i32_406 = arith.constant 1 : i32
    %1004 = vector.broadcast %c1_i32_406 : i32 to vector<8x1xi32>
    %1005 = arith.cmpi sge, %2, %1004 : vector<8x1xi32>
    %c1_i32_407 = arith.constant 1 : i32
    %1006 = tpu.dynamic_rotate %1001 by %c1_i32_407 dim 0 : vector<8x64xf32>, i32 -> vector<8x64xf32>
    %cst_408 = arith.constant 0.000000e+00 : f32
    %1007 = vector.shape_cast %1005 : vector<8x1xi1> to vector<8x1xi1>
    %1008 = vector.broadcast %1007 : vector<8x1xi1> to vector<8x64xi1>
    %1009 = vector.broadcast %cst_408 : f32 to vector<8x64xf32>
    %1010 = arith.select %1008, %1006, %1009 : vector<8x64xi1>, vector<8x64xf32>
    %1011 = arith.addf %1001, %1010 : vector<8x64xf32>
    %c2_i32_409 = arith.constant 2 : i32
    %1012 = vector.broadcast %c2_i32_409 : i32 to vector<8x1xi32>
    %1013 = arith.cmpi sge, %2, %1012 : vector<8x1xi32>
    %c2_i32_410 = arith.constant 2 : i32
    %1014 = tpu.dynamic_rotate %1011 by %c2_i32_410 dim 0 : vector<8x64xf32>, i32 -> vector<8x64xf32>
    %cst_411 = arith.constant 0.000000e+00 : f32
    %1015 = vector.shape_cast %1013 : vector<8x1xi1> to vector<8x1xi1>
    %1016 = vector.broadcast %1015 : vector<8x1xi1> to vector<8x64xi1>
    %1017 = vector.broadcast %cst_411 : f32 to vector<8x64xf32>
    %1018 = arith.select %1016, %1014, %1017 : vector<8x64xi1>, vector<8x64xf32>
    %1019 = arith.addf %1011, %1018 : vector<8x64xf32>
    %c4_i32_412 = arith.constant 4 : i32
    %1020 = vector.broadcast %c4_i32_412 : i32 to vector<8x1xi32>
    %1021 = arith.cmpi sge, %2, %1020 : vector<8x1xi32>
    %c4_i32_413 = arith.constant 4 : i32
    %1022 = tpu.dynamic_rotate %1019 by %c4_i32_413 dim 0 : vector<8x64xf32>, i32 -> vector<8x64xf32>
    %cst_414 = arith.constant 0.000000e+00 : f32
    %1023 = vector.shape_cast %1021 : vector<8x1xi1> to vector<8x1xi1>
    %1024 = vector.broadcast %1023 : vector<8x1xi1> to vector<8x64xi1>
    %1025 = vector.broadcast %cst_414 : f32 to vector<8x64xf32>
    %1026 = arith.select %1024, %1022, %1025 : vector<8x64xi1>, vector<8x64xf32>
    %1027 = arith.addf %1019, %1026 : vector<8x64xf32>
    %1028 = vector.broadcast %1003 : vector<1x64xf32> to vector<8x64xf32>
    %1029 = arith.addf %1027, %1028 : vector<8x64xf32>
    %1030 = math.exp %1029 : vector<8x64xf32>
    %c9_i32 = arith.constant 9 : i32
    %1031 = vector.broadcast %c9_i32 : i32 to vector<8x32xi32>
    %1032 = arith.cmpi eq, %93, %1031 : vector<8x32xi32>
    %cst_415 = arith.constant 0.000000e+00 : f32
    %1033 = vector.broadcast %cst_415 : f32 to vector<8x32xf32>
    %1034 = arith.select %1032, %92, %1033 : vector<8x32xi1>, vector<8x32xf32>
    %cst_416 = arith.constant dense<0.000000e+00> : vector<8xf32>
    %1035 = vector.multi_reduction <add>, %1034, %cst_416 [1] : vector<8x32xf32> to vector<8xf32>
    %1036 = vector.shape_cast %1035 : vector<8xf32> to vector<8x1xf32>
    %c25_i32 = arith.constant 25 : i32
    %1037 = vector.broadcast %c25_i32 : i32 to vector<8x32xi32>
    %1038 = arith.cmpi eq, %93, %1037 : vector<8x32xi32>
    %cst_417 = arith.constant 0.000000e+00 : f32
    %1039 = vector.broadcast %cst_417 : f32 to vector<8x32xf32>
    %1040 = arith.select %1038, %92, %1039 : vector<8x32xi1>, vector<8x32xf32>
    %cst_418 = arith.constant dense<0.000000e+00> : vector<8xf32>
    %1041 = vector.multi_reduction <add>, %1040, %cst_418 [1] : vector<8x32xf32> to vector<8xf32>
    %1042 = vector.shape_cast %1041 : vector<8xf32> to vector<8x1xf32>
    %1043 = vector.broadcast %1036 : vector<8x1xf32> to vector<8x64xf32>
    %1044 = arith.mulf %94, %1043 : vector<8x64xf32>
    %cst_419 = arith.constant 9.99999996E-13 : f32
    %1045 = vector.broadcast %cst_419 : f32 to vector<8x64xf32>
    %1046 = arith.addf %1030, %1045 : vector<8x64xf32>
    %1047 = tpu.reciprocal %1046 {approx = true} : vector<8x64xf32> -> vector<8x64xf32>
    %1048 = arith.mulf %1044, %1047 : vector<8x64xf32>
    %c9_420 = arith.constant 9 : index
    %c0_421 = arith.constant 0 : index
    %c0_422 = arith.constant 0 : index
    %1049 = vector.load %arg15[%c9_420, %c0_421, %c0_422] : memref<16x1x64xf32, #tpu.memory_space<vmem>>, vector<1x1x64xf32>
    %1050 = vector.shape_cast %1049 : vector<1x1x64xf32> to vector<1x64xf32>
    %c1_i32_423 = arith.constant 1 : i32
    %1051 = vector.broadcast %c1_i32_423 : i32 to vector<8x1xi32>
    %1052 = arith.cmpi sge, %2, %1051 : vector<8x1xi32>
    %c1_i32_424 = arith.constant 1 : i32
    %1053 = tpu.dynamic_rotate %1048 by %c1_i32_424 dim 0 : vector<8x64xf32>, i32 -> vector<8x64xf32>
    %cst_425 = arith.constant 0.000000e+00 : f32
    %1054 = vector.shape_cast %1052 : vector<8x1xi1> to vector<8x1xi1>
    %1055 = vector.broadcast %1054 : vector<8x1xi1> to vector<8x64xi1>
    %1056 = vector.broadcast %cst_425 : f32 to vector<8x64xf32>
    %1057 = arith.select %1055, %1053, %1056 : vector<8x64xi1>, vector<8x64xf32>
    %1058 = arith.addf %1048, %1057 : vector<8x64xf32>
    %c2_i32_426 = arith.constant 2 : i32
    %1059 = vector.broadcast %c2_i32_426 : i32 to vector<8x1xi32>
    %1060 = arith.cmpi sge, %2, %1059 : vector<8x1xi32>
    %c2_i32_427 = arith.constant 2 : i32
    %1061 = tpu.dynamic_rotate %1058 by %c2_i32_427 dim 0 : vector<8x64xf32>, i32 -> vector<8x64xf32>
    %cst_428 = arith.constant 0.000000e+00 : f32
    %1062 = vector.shape_cast %1060 : vector<8x1xi1> to vector<8x1xi1>
    %1063 = vector.broadcast %1062 : vector<8x1xi1> to vector<8x64xi1>
    %1064 = vector.broadcast %cst_428 : f32 to vector<8x64xf32>
    %1065 = arith.select %1063, %1061, %1064 : vector<8x64xi1>, vector<8x64xf32>
    %1066 = arith.addf %1058, %1065 : vector<8x64xf32>
    %c4_i32_429 = arith.constant 4 : i32
    %1067 = vector.broadcast %c4_i32_429 : i32 to vector<8x1xi32>
    %1068 = arith.cmpi sge, %2, %1067 : vector<8x1xi32>
    %c4_i32_430 = arith.constant 4 : i32
    %1069 = tpu.dynamic_rotate %1066 by %c4_i32_430 dim 0 : vector<8x64xf32>, i32 -> vector<8x64xf32>
    %cst_431 = arith.constant 0.000000e+00 : f32
    %1070 = vector.shape_cast %1068 : vector<8x1xi1> to vector<8x1xi1>
    %1071 = vector.broadcast %1070 : vector<8x1xi1> to vector<8x64xi1>
    %1072 = vector.broadcast %cst_431 : f32 to vector<8x64xf32>
    %1073 = arith.select %1071, %1069, %1072 : vector<8x64xi1>, vector<8x64xf32>
    %1074 = arith.addf %1066, %1073 : vector<8x64xf32>
    %1075 = vector.broadcast %1050 : vector<1x64xf32> to vector<8x64xf32>
    %1076 = arith.addf %1074, %1075 : vector<8x64xf32>
    %1077 = arith.mulf %1076, %1030 : vector<8x64xf32>
    %1078 = vector.broadcast %1042 : vector<8x1xf32> to vector<8x64xf32>
    %1079 = arith.mulf %1077, %1078 : vector<8x64xf32>
    %1080 = arith.addf %981, %1079 : vector<8x64xf32>
    %cst_432 = arith.constant dense<0.000000e+00> : vector<64xf32>
    %1081 = vector.multi_reduction <add>, %1001, %cst_432 [0] : vector<8x64xf32> to vector<64xf32>
    %1082 = vector.shape_cast %1081 : vector<64xf32> to vector<1x64xf32>
    %1083 = arith.addf %1003, %1082 : vector<1x64xf32>
    %c9_433 = arith.constant 9 : index
    %c0_434 = arith.constant 0 : index
    %c0_435 = arith.constant 0 : index
    %1084 = vector.load %arg14[%c9_433, %c0_434, %c0_435] : memref<16x1x64xf32, #tpu.memory_space<vmem>>, vector<1x1x64xf32>
    %1085 = vector.shape_cast %1084 : vector<1x1x64xf32> to vector<1x64xf32>
    %1086 = vector.shape_cast %1083 : vector<1x64xf32> to vector<1x1x64xf32>
    tpu.vector_store %arg14[%c9_433, %c0_434, %c0_435], %1086 {strides = array<i32>} : memref<16x1x64xf32, #tpu.memory_space<vmem>>, vector<1x1x64xf32>,
    %cst_436 = arith.constant dense<0.000000e+00> : vector<64xf32>
    %1087 = vector.multi_reduction <add>, %1048, %cst_436 [0] : vector<8x64xf32> to vector<64xf32>
    %1088 = vector.shape_cast %1087 : vector<64xf32> to vector<1x64xf32>
    %1089 = arith.addf %1050, %1088 : vector<1x64xf32>
    %c9_437 = arith.constant 9 : index
    %c0_438 = arith.constant 0 : index
    %c0_439 = arith.constant 0 : index
    %1090 = vector.load %arg15[%c9_437, %c0_438, %c0_439] : memref<16x1x64xf32, #tpu.memory_space<vmem>>, vector<1x1x64xf32>
    %1091 = vector.shape_cast %1090 : vector<1x1x64xf32> to vector<1x64xf32>
    %1092 = vector.shape_cast %1089 : vector<1x64xf32> to vector<1x1x64xf32>
    tpu.vector_store %arg15[%c9_437, %c0_438, %c0_439], %1092 {strides = array<i32>} : memref<16x1x64xf32, #tpu.memory_space<vmem>>, vector<1x1x64xf32>,
    %c10 = arith.constant 10 : index
    %c0_440 = arith.constant 0 : index
    %1093 = vector.load %arg10[%c10, %c0_440] : memref<16x64xf32, #tpu.memory_space<vmem>>, vector<1x64xf32>
    %1094 = vector.broadcast %1093 : vector<1x64xf32> to vector<8x64xf32>
    %1095 = arith.mulf %91, %1094 : vector<8x64xf32>
    %1096 = math.exp %1095 : vector<8x64xf32>
    %cst_441 = arith.constant 0.000000e+00 : f32
    %1097 = vector.shape_cast %99 : vector<8x1xi1> to vector<8x1xi1>
    %1098 = vector.broadcast %1097 : vector<8x1xi1> to vector<8x64xi1>
    %1099 = vector.broadcast %cst_441 : f32 to vector<8x64xf32>
    %1100 = arith.select %1098, %1099, %1096 : vector<8x64xi1>, vector<8x64xf32>
    %c10_442 = arith.constant 10 : index
    %c0_443 = arith.constant 0 : index
    %c0_444 = arith.constant 0 : index
    %1101 = vector.load %arg14[%c10_442, %c0_443, %c0_444] : memref<16x1x64xf32, #tpu.memory_space<vmem>>, vector<1x1x64xf32>
    %1102 = vector.shape_cast %1101 : vector<1x1x64xf32> to vector<1x64xf32>
    %c1_i32_445 = arith.constant 1 : i32
    %1103 = vector.broadcast %c1_i32_445 : i32 to vector<8x1xi32>
    %1104 = arith.cmpi sge, %2, %1103 : vector<8x1xi32>
    %c1_i32_446 = arith.constant 1 : i32
    %1105 = tpu.dynamic_rotate %1100 by %c1_i32_446 dim 0 : vector<8x64xf32>, i32 -> vector<8x64xf32>
    %cst_447 = arith.constant 0.000000e+00 : f32
    %1106 = vector.shape_cast %1104 : vector<8x1xi1> to vector<8x1xi1>
    %1107 = vector.broadcast %1106 : vector<8x1xi1> to vector<8x64xi1>
    %1108 = vector.broadcast %cst_447 : f32 to vector<8x64xf32>
    %1109 = arith.select %1107, %1105, %1108 : vector<8x64xi1>, vector<8x64xf32>
    %1110 = arith.addf %1100, %1109 : vector<8x64xf32>
    %c2_i32_448 = arith.constant 2 : i32
    %1111 = vector.broadcast %c2_i32_448 : i32 to vector<8x1xi32>
    %1112 = arith.cmpi sge, %2, %1111 : vector<8x1xi32>
    %c2_i32_449 = arith.constant 2 : i32
    %1113 = tpu.dynamic_rotate %1110 by %c2_i32_449 dim 0 : vector<8x64xf32>, i32 -> vector<8x64xf32>
    %cst_450 = arith.constant 0.000000e+00 : f32
    %1114 = vector.shape_cast %1112 : vector<8x1xi1> to vector<8x1xi1>
    %1115 = vector.broadcast %1114 : vector<8x1xi1> to vector<8x64xi1>
    %1116 = vector.broadcast %cst_450 : f32 to vector<8x64xf32>
    %1117 = arith.select %1115, %1113, %1116 : vector<8x64xi1>, vector<8x64xf32>
    %1118 = arith.addf %1110, %1117 : vector<8x64xf32>
    %c4_i32_451 = arith.constant 4 : i32
    %1119 = vector.broadcast %c4_i32_451 : i32 to vector<8x1xi32>
    %1120 = arith.cmpi sge, %2, %1119 : vector<8x1xi32>
    %c4_i32_452 = arith.constant 4 : i32
    %1121 = tpu.dynamic_rotate %1118 by %c4_i32_452 dim 0 : vector<8x64xf32>, i32 -> vector<8x64xf32>
    %cst_453 = arith.constant 0.000000e+00 : f32
    %1122 = vector.shape_cast %1120 : vector<8x1xi1> to vector<8x1xi1>
    %1123 = vector.broadcast %1122 : vector<8x1xi1> to vector<8x64xi1>
    %1124 = vector.broadcast %cst_453 : f32 to vector<8x64xf32>
    %1125 = arith.select %1123, %1121, %1124 : vector<8x64xi1>, vector<8x64xf32>
    %1126 = arith.addf %1118, %1125 : vector<8x64xf32>
    %1127 = vector.broadcast %1102 : vector<1x64xf32> to vector<8x64xf32>
    %1128 = arith.addf %1126, %1127 : vector<8x64xf32>
    %1129 = math.exp %1128 : vector<8x64xf32>
    %c10_i32 = arith.constant 10 : i32
    %1130 = vector.broadcast %c10_i32 : i32 to vector<8x32xi32>
    %1131 = arith.cmpi eq, %93, %1130 : vector<8x32xi32>
    %cst_454 = arith.constant 0.000000e+00 : f32
    %1132 = vector.broadcast %cst_454 : f32 to vector<8x32xf32>
    %1133 = arith.select %1131, %92, %1132 : vector<8x32xi1>, vector<8x32xf32>
    %cst_455 = arith.constant dense<0.000000e+00> : vector<8xf32>
    %1134 = vector.multi_reduction <add>, %1133, %cst_455 [1] : vector<8x32xf32> to vector<8xf32>
    %1135 = vector.shape_cast %1134 : vector<8xf32> to vector<8x1xf32>
    %c26_i32 = arith.constant 26 : i32
    %1136 = vector.broadcast %c26_i32 : i32 to vector<8x32xi32>
    %1137 = arith.cmpi eq, %93, %1136 : vector<8x32xi32>
    %cst_456 = arith.constant 0.000000e+00 : f32
    %1138 = vector.broadcast %cst_456 : f32 to vector<8x32xf32>
    %1139 = arith.select %1137, %92, %1138 : vector<8x32xi1>, vector<8x32xf32>
    %cst_457 = arith.constant dense<0.000000e+00> : vector<8xf32>
    %1140 = vector.multi_reduction <add>, %1139, %cst_457 [1] : vector<8x32xf32> to vector<8xf32>
    %1141 = vector.shape_cast %1140 : vector<8xf32> to vector<8x1xf32>
    %1142 = vector.broadcast %1135 : vector<8x1xf32> to vector<8x64xf32>
    %1143 = arith.mulf %94, %1142 : vector<8x64xf32>
    %cst_458 = arith.constant 9.99999996E-13 : f32
    %1144 = vector.broadcast %cst_458 : f32 to vector<8x64xf32>
    %1145 = arith.addf %1129, %1144 : vector<8x64xf32>
    %1146 = tpu.reciprocal %1145 {approx = true} : vector<8x64xf32> -> vector<8x64xf32>
    %1147 = arith.mulf %1143, %1146 : vector<8x64xf32>
    %c10_459 = arith.constant 10 : index
    %c0_460 = arith.constant 0 : index
    %c0_461 = arith.constant 0 : index
    %1148 = vector.load %arg15[%c10_459, %c0_460, %c0_461] : memref<16x1x64xf32, #tpu.memory_space<vmem>>, vector<1x1x64xf32>
    %1149 = vector.shape_cast %1148 : vector<1x1x64xf32> to vector<1x64xf32>
    %c1_i32_462 = arith.constant 1 : i32
    %1150 = vector.broadcast %c1_i32_462 : i32 to vector<8x1xi32>
    %1151 = arith.cmpi sge, %2, %1150 : vector<8x1xi32>
    %c1_i32_463 = arith.constant 1 : i32
    %1152 = tpu.dynamic_rotate %1147 by %c1_i32_463 dim 0 : vector<8x64xf32>, i32 -> vector<8x64xf32>
    %cst_464 = arith.constant 0.000000e+00 : f32
    %1153 = vector.shape_cast %1151 : vector<8x1xi1> to vector<8x1xi1>
    %1154 = vector.broadcast %1153 : vector<8x1xi1> to vector<8x64xi1>
    %1155 = vector.broadcast %cst_464 : f32 to vector<8x64xf32>
    %1156 = arith.select %1154, %1152, %1155 : vector<8x64xi1>, vector<8x64xf32>
    %1157 = arith.addf %1147, %1156 : vector<8x64xf32>
    %c2_i32_465 = arith.constant 2 : i32
    %1158 = vector.broadcast %c2_i32_465 : i32 to vector<8x1xi32>
    %1159 = arith.cmpi sge, %2, %1158 : vector<8x1xi32>
    %c2_i32_466 = arith.constant 2 : i32
    %1160 = tpu.dynamic_rotate %1157 by %c2_i32_466 dim 0 : vector<8x64xf32>, i32 -> vector<8x64xf32>
    %cst_467 = arith.constant 0.000000e+00 : f32
    %1161 = vector.shape_cast %1159 : vector<8x1xi1> to vector<8x1xi1>
    %1162 = vector.broadcast %1161 : vector<8x1xi1> to vector<8x64xi1>
    %1163 = vector.broadcast %cst_467 : f32 to vector<8x64xf32>
    %1164 = arith.select %1162, %1160, %1163 : vector<8x64xi1>, vector<8x64xf32>
    %1165 = arith.addf %1157, %1164 : vector<8x64xf32>
    %c4_i32_468 = arith.constant 4 : i32
    %1166 = vector.broadcast %c4_i32_468 : i32 to vector<8x1xi32>
    %1167 = arith.cmpi sge, %2, %1166 : vector<8x1xi32>
    %c4_i32_469 = arith.constant 4 : i32
    %1168 = tpu.dynamic_rotate %1165 by %c4_i32_469 dim 0 : vector<8x64xf32>, i32 -> vector<8x64xf32>
    %cst_470 = arith.constant 0.000000e+00 : f32
    %1169 = vector.shape_cast %1167 : vector<8x1xi1> to vector<8x1xi1>
    %1170 = vector.broadcast %1169 : vector<8x1xi1> to vector<8x64xi1>
    %1171 = vector.broadcast %cst_470 : f32 to vector<8x64xf32>
    %1172 = arith.select %1170, %1168, %1171 : vector<8x64xi1>, vector<8x64xf32>
    %1173 = arith.addf %1165, %1172 : vector<8x64xf32>
    %1174 = vector.broadcast %1149 : vector<1x64xf32> to vector<8x64xf32>
    %1175 = arith.addf %1173, %1174 : vector<8x64xf32>
    %1176 = arith.mulf %1175, %1129 : vector<8x64xf32>
    %1177 = vector.broadcast %1141 : vector<8x1xf32> to vector<8x64xf32>
    %1178 = arith.mulf %1176, %1177 : vector<8x64xf32>
    %1179 = arith.addf %1080, %1178 : vector<8x64xf32>
    %cst_471 = arith.constant dense<0.000000e+00> : vector<64xf32>
    %1180 = vector.multi_reduction <add>, %1100, %cst_471 [0] : vector<8x64xf32> to vector<64xf32>
    %1181 = vector.shape_cast %1180 : vector<64xf32> to vector<1x64xf32>
    %1182 = arith.addf %1102, %1181 : vector<1x64xf32>
    %c10_472 = arith.constant 10 : index
    %c0_473 = arith.constant 0 : index
    %c0_474 = arith.constant 0 : index
    %1183 = vector.load %arg14[%c10_472, %c0_473, %c0_474] : memref<16x1x64xf32, #tpu.memory_space<vmem>>, vector<1x1x64xf32>
    %1184 = vector.shape_cast %1183 : vector<1x1x64xf32> to vector<1x64xf32>
    %1185 = vector.shape_cast %1182 : vector<1x64xf32> to vector<1x1x64xf32>
    tpu.vector_store %arg14[%c10_472, %c0_473, %c0_474], %1185 {strides = array<i32>} : memref<16x1x64xf32, #tpu.memory_space<vmem>>, vector<1x1x64xf32>,
    %cst_475 = arith.constant dense<0.000000e+00> : vector<64xf32>
    %1186 = vector.multi_reduction <add>, %1147, %cst_475 [0] : vector<8x64xf32> to vector<64xf32>
    %1187 = vector.shape_cast %1186 : vector<64xf32> to vector<1x64xf32>
    %1188 = arith.addf %1149, %1187 : vector<1x64xf32>
    %c10_476 = arith.constant 10 : index
    %c0_477 = arith.constant 0 : index
    %c0_478 = arith.constant 0 : index
    %1189 = vector.load %arg15[%c10_476, %c0_477, %c0_478] : memref<16x1x64xf32, #tpu.memory_space<vmem>>, vector<1x1x64xf32>
    %1190 = vector.shape_cast %1189 : vector<1x1x64xf32> to vector<1x64xf32>
    %1191 = vector.shape_cast %1188 : vector<1x64xf32> to vector<1x1x64xf32>
    tpu.vector_store %arg15[%c10_476, %c0_477, %c0_478], %1191 {strides = array<i32>} : memref<16x1x64xf32, #tpu.memory_space<vmem>>, vector<1x1x64xf32>,
    %c11 = arith.constant 11 : index
    %c0_479 = arith.constant 0 : index
    %1192 = vector.load %arg10[%c11, %c0_479] : memref<16x64xf32, #tpu.memory_space<vmem>>, vector<1x64xf32>
    %1193 = vector.broadcast %1192 : vector<1x64xf32> to vector<8x64xf32>
    %1194 = arith.mulf %91, %1193 : vector<8x64xf32>
    %1195 = math.exp %1194 : vector<8x64xf32>
    %cst_480 = arith.constant 0.000000e+00 : f32
    %1196 = vector.shape_cast %99 : vector<8x1xi1> to vector<8x1xi1>
    %1197 = vector.broadcast %1196 : vector<8x1xi1> to vector<8x64xi1>
    %1198 = vector.broadcast %cst_480 : f32 to vector<8x64xf32>
    %1199 = arith.select %1197, %1198, %1195 : vector<8x64xi1>, vector<8x64xf32>
    %c11_481 = arith.constant 11 : index
    %c0_482 = arith.constant 0 : index
    %c0_483 = arith.constant 0 : index
    %1200 = vector.load %arg14[%c11_481, %c0_482, %c0_483] : memref<16x1x64xf32, #tpu.memory_space<vmem>>, vector<1x1x64xf32>
    %1201 = vector.shape_cast %1200 : vector<1x1x64xf32> to vector<1x64xf32>
    %c1_i32_484 = arith.constant 1 : i32
    %1202 = vector.broadcast %c1_i32_484 : i32 to vector<8x1xi32>
    %1203 = arith.cmpi sge, %2, %1202 : vector<8x1xi32>
    %c1_i32_485 = arith.constant 1 : i32
    %1204 = tpu.dynamic_rotate %1199 by %c1_i32_485 dim 0 : vector<8x64xf32>, i32 -> vector<8x64xf32>
    %cst_486 = arith.constant 0.000000e+00 : f32
    %1205 = vector.shape_cast %1203 : vector<8x1xi1> to vector<8x1xi1>
    %1206 = vector.broadcast %1205 : vector<8x1xi1> to vector<8x64xi1>
    %1207 = vector.broadcast %cst_486 : f32 to vector<8x64xf32>
    %1208 = arith.select %1206, %1204, %1207 : vector<8x64xi1>, vector<8x64xf32>
    %1209 = arith.addf %1199, %1208 : vector<8x64xf32>
    %c2_i32_487 = arith.constant 2 : i32
    %1210 = vector.broadcast %c2_i32_487 : i32 to vector<8x1xi32>
    %1211 = arith.cmpi sge, %2, %1210 : vector<8x1xi32>
    %c2_i32_488 = arith.constant 2 : i32
    %1212 = tpu.dynamic_rotate %1209 by %c2_i32_488 dim 0 : vector<8x64xf32>, i32 -> vector<8x64xf32>
    %cst_489 = arith.constant 0.000000e+00 : f32
    %1213 = vector.shape_cast %1211 : vector<8x1xi1> to vector<8x1xi1>
    %1214 = vector.broadcast %1213 : vector<8x1xi1> to vector<8x64xi1>
    %1215 = vector.broadcast %cst_489 : f32 to vector<8x64xf32>
    %1216 = arith.select %1214, %1212, %1215 : vector<8x64xi1>, vector<8x64xf32>
    %1217 = arith.addf %1209, %1216 : vector<8x64xf32>
    %c4_i32_490 = arith.constant 4 : i32
    %1218 = vector.broadcast %c4_i32_490 : i32 to vector<8x1xi32>
    %1219 = arith.cmpi sge, %2, %1218 : vector<8x1xi32>
    %c4_i32_491 = arith.constant 4 : i32
    %1220 = tpu.dynamic_rotate %1217 by %c4_i32_491 dim 0 : vector<8x64xf32>, i32 -> vector<8x64xf32>
    %cst_492 = arith.constant 0.000000e+00 : f32
    %1221 = vector.shape_cast %1219 : vector<8x1xi1> to vector<8x1xi1>
    %1222 = vector.broadcast %1221 : vector<8x1xi1> to vector<8x64xi1>
    %1223 = vector.broadcast %cst_492 : f32 to vector<8x64xf32>
    %1224 = arith.select %1222, %1220, %1223 : vector<8x64xi1>, vector<8x64xf32>
    %1225 = arith.addf %1217, %1224 : vector<8x64xf32>
    %1226 = vector.broadcast %1201 : vector<1x64xf32> to vector<8x64xf32>
    %1227 = arith.addf %1225, %1226 : vector<8x64xf32>
    %1228 = math.exp %1227 : vector<8x64xf32>
    %c11_i32 = arith.constant 11 : i32
    %1229 = vector.broadcast %c11_i32 : i32 to vector<8x32xi32>
    %1230 = arith.cmpi eq, %93, %1229 : vector<8x32xi32>
    %cst_493 = arith.constant 0.000000e+00 : f32
    %1231 = vector.broadcast %cst_493 : f32 to vector<8x32xf32>
    %1232 = arith.select %1230, %92, %1231 : vector<8x32xi1>, vector<8x32xf32>
    %cst_494 = arith.constant dense<0.000000e+00> : vector<8xf32>
    %1233 = vector.multi_reduction <add>, %1232, %cst_494 [1] : vector<8x32xf32> to vector<8xf32>
    %1234 = vector.shape_cast %1233 : vector<8xf32> to vector<8x1xf32>
    %c27_i32 = arith.constant 27 : i32
    %1235 = vector.broadcast %c27_i32 : i32 to vector<8x32xi32>
    %1236 = arith.cmpi eq, %93, %1235 : vector<8x32xi32>
    %cst_495 = arith.constant 0.000000e+00 : f32
    %1237 = vector.broadcast %cst_495 : f32 to vector<8x32xf32>
    %1238 = arith.select %1236, %92, %1237 : vector<8x32xi1>, vector<8x32xf32>
    %cst_496 = arith.constant dense<0.000000e+00> : vector<8xf32>
    %1239 = vector.multi_reduction <add>, %1238, %cst_496 [1] : vector<8x32xf32> to vector<8xf32>
    %1240 = vector.shape_cast %1239 : vector<8xf32> to vector<8x1xf32>
    %1241 = vector.broadcast %1234 : vector<8x1xf32> to vector<8x64xf32>
    %1242 = arith.mulf %94, %1241 : vector<8x64xf32>
    %cst_497 = arith.constant 9.99999996E-13 : f32
    %1243 = vector.broadcast %cst_497 : f32 to vector<8x64xf32>
    %1244 = arith.addf %1228, %1243 : vector<8x64xf32>
    %1245 = tpu.reciprocal %1244 {approx = true} : vector<8x64xf32> -> vector<8x64xf32>
    %1246 = arith.mulf %1242, %1245 : vector<8x64xf32>
    %c11_498 = arith.constant 11 : index
    %c0_499 = arith.constant 0 : index
    %c0_500 = arith.constant 0 : index
    %1247 = vector.load %arg15[%c11_498, %c0_499, %c0_500] : memref<16x1x64xf32, #tpu.memory_space<vmem>>, vector<1x1x64xf32>
    %1248 = vector.shape_cast %1247 : vector<1x1x64xf32> to vector<1x64xf32>
    %c1_i32_501 = arith.constant 1 : i32
    %1249 = vector.broadcast %c1_i32_501 : i32 to vector<8x1xi32>
    %1250 = arith.cmpi sge, %2, %1249 : vector<8x1xi32>
    %c1_i32_502 = arith.constant 1 : i32
    %1251 = tpu.dynamic_rotate %1246 by %c1_i32_502 dim 0 : vector<8x64xf32>, i32 -> vector<8x64xf32>
    %cst_503 = arith.constant 0.000000e+00 : f32
    %1252 = vector.shape_cast %1250 : vector<8x1xi1> to vector<8x1xi1>
    %1253 = vector.broadcast %1252 : vector<8x1xi1> to vector<8x64xi1>
    %1254 = vector.broadcast %cst_503 : f32 to vector<8x64xf32>
    %1255 = arith.select %1253, %1251, %1254 : vector<8x64xi1>, vector<8x64xf32>
    %1256 = arith.addf %1246, %1255 : vector<8x64xf32>
    %c2_i32_504 = arith.constant 2 : i32
    %1257 = vector.broadcast %c2_i32_504 : i32 to vector<8x1xi32>
    %1258 = arith.cmpi sge, %2, %1257 : vector<8x1xi32>
    %c2_i32_505 = arith.constant 2 : i32
    %1259 = tpu.dynamic_rotate %1256 by %c2_i32_505 dim 0 : vector<8x64xf32>, i32 -> vector<8x64xf32>
    %cst_506 = arith.constant 0.000000e+00 : f32
    %1260 = vector.shape_cast %1258 : vector<8x1xi1> to vector<8x1xi1>
    %1261 = vector.broadcast %1260 : vector<8x1xi1> to vector<8x64xi1>
    %1262 = vector.broadcast %cst_506 : f32 to vector<8x64xf32>
    %1263 = arith.select %1261, %1259, %1262 : vector<8x64xi1>, vector<8x64xf32>
    %1264 = arith.addf %1256, %1263 : vector<8x64xf32>
    %c4_i32_507 = arith.constant 4 : i32
    %1265 = vector.broadcast %c4_i32_507 : i32 to vector<8x1xi32>
    %1266 = arith.cmpi sge, %2, %1265 : vector<8x1xi32>
    %c4_i32_508 = arith.constant 4 : i32
    %1267 = tpu.dynamic_rotate %1264 by %c4_i32_508 dim 0 : vector<8x64xf32>, i32 -> vector<8x64xf32>
    %cst_509 = arith.constant 0.000000e+00 : f32
    %1268 = vector.shape_cast %1266 : vector<8x1xi1> to vector<8x1xi1>
    %1269 = vector.broadcast %1268 : vector<8x1xi1> to vector<8x64xi1>
    %1270 = vector.broadcast %cst_509 : f32 to vector<8x64xf32>
    %1271 = arith.select %1269, %1267, %1270 : vector<8x64xi1>, vector<8x64xf32>
    %1272 = arith.addf %1264, %1271 : vector<8x64xf32>
    %1273 = vector.broadcast %1248 : vector<1x64xf32> to vector<8x64xf32>
    %1274 = arith.addf %1272, %1273 : vector<8x64xf32>
    %1275 = arith.mulf %1274, %1228 : vector<8x64xf32>
    %1276 = vector.broadcast %1240 : vector<8x1xf32> to vector<8x64xf32>
    %1277 = arith.mulf %1275, %1276 : vector<8x64xf32>
    %1278 = arith.addf %1179, %1277 : vector<8x64xf32>
    %cst_510 = arith.constant dense<0.000000e+00> : vector<64xf32>
    %1279 = vector.multi_reduction <add>, %1199, %cst_510 [0] : vector<8x64xf32> to vector<64xf32>
    %1280 = vector.shape_cast %1279 : vector<64xf32> to vector<1x64xf32>
    %1281 = arith.addf %1201, %1280 : vector<1x64xf32>
    %c11_511 = arith.constant 11 : index
    %c0_512 = arith.constant 0 : index
    %c0_513 = arith.constant 0 : index
    %1282 = vector.load %arg14[%c11_511, %c0_512, %c0_513] : memref<16x1x64xf32, #tpu.memory_space<vmem>>, vector<1x1x64xf32>
    %1283 = vector.shape_cast %1282 : vector<1x1x64xf32> to vector<1x64xf32>
    %1284 = vector.shape_cast %1281 : vector<1x64xf32> to vector<1x1x64xf32>
    tpu.vector_store %arg14[%c11_511, %c0_512, %c0_513], %1284 {strides = array<i32>} : memref<16x1x64xf32, #tpu.memory_space<vmem>>, vector<1x1x64xf32>,
    %cst_514 = arith.constant dense<0.000000e+00> : vector<64xf32>
    %1285 = vector.multi_reduction <add>, %1246, %cst_514 [0] : vector<8x64xf32> to vector<64xf32>
    %1286 = vector.shape_cast %1285 : vector<64xf32> to vector<1x64xf32>
    %1287 = arith.addf %1248, %1286 : vector<1x64xf32>
    %c11_515 = arith.constant 11 : index
    %c0_516 = arith.constant 0 : index
    %c0_517 = arith.constant 0 : index
    %1288 = vector.load %arg15[%c11_515, %c0_516, %c0_517] : memref<16x1x64xf32, #tpu.memory_space<vmem>>, vector<1x1x64xf32>
    %1289 = vector.shape_cast %1288 : vector<1x1x64xf32> to vector<1x64xf32>
    %1290 = vector.shape_cast %1287 : vector<1x64xf32> to vector<1x1x64xf32>
    tpu.vector_store %arg15[%c11_515, %c0_516, %c0_517], %1290 {strides = array<i32>} : memref<16x1x64xf32, #tpu.memory_space<vmem>>, vector<1x1x64xf32>,
    %c12 = arith.constant 12 : index
    %c0_518 = arith.constant 0 : index
    %1291 = vector.load %arg10[%c12, %c0_518] : memref<16x64xf32, #tpu.memory_space<vmem>>, vector<1x64xf32>
    %1292 = vector.broadcast %1291 : vector<1x64xf32> to vector<8x64xf32>
    %1293 = arith.mulf %91, %1292 : vector<8x64xf32>
    %1294 = math.exp %1293 : vector<8x64xf32>
    %cst_519 = arith.constant 0.000000e+00 : f32
    %1295 = vector.shape_cast %99 : vector<8x1xi1> to vector<8x1xi1>
    %1296 = vector.broadcast %1295 : vector<8x1xi1> to vector<8x64xi1>
    %1297 = vector.broadcast %cst_519 : f32 to vector<8x64xf32>
    %1298 = arith.select %1296, %1297, %1294 : vector<8x64xi1>, vector<8x64xf32>
    %c12_520 = arith.constant 12 : index
    %c0_521 = arith.constant 0 : index
    %c0_522 = arith.constant 0 : index
    %1299 = vector.load %arg14[%c12_520, %c0_521, %c0_522] : memref<16x1x64xf32, #tpu.memory_space<vmem>>, vector<1x1x64xf32>
    %1300 = vector.shape_cast %1299 : vector<1x1x64xf32> to vector<1x64xf32>
    %c1_i32_523 = arith.constant 1 : i32
    %1301 = vector.broadcast %c1_i32_523 : i32 to vector<8x1xi32>
    %1302 = arith.cmpi sge, %2, %1301 : vector<8x1xi32>
    %c1_i32_524 = arith.constant 1 : i32
    %1303 = tpu.dynamic_rotate %1298 by %c1_i32_524 dim 0 : vector<8x64xf32>, i32 -> vector<8x64xf32>
    %cst_525 = arith.constant 0.000000e+00 : f32
    %1304 = vector.shape_cast %1302 : vector<8x1xi1> to vector<8x1xi1>
    %1305 = vector.broadcast %1304 : vector<8x1xi1> to vector<8x64xi1>
    %1306 = vector.broadcast %cst_525 : f32 to vector<8x64xf32>
    %1307 = arith.select %1305, %1303, %1306 : vector<8x64xi1>, vector<8x64xf32>
    %1308 = arith.addf %1298, %1307 : vector<8x64xf32>
    %c2_i32_526 = arith.constant 2 : i32
    %1309 = vector.broadcast %c2_i32_526 : i32 to vector<8x1xi32>
    %1310 = arith.cmpi sge, %2, %1309 : vector<8x1xi32>
    %c2_i32_527 = arith.constant 2 : i32
    %1311 = tpu.dynamic_rotate %1308 by %c2_i32_527 dim 0 : vector<8x64xf32>, i32 -> vector<8x64xf32>
    %cst_528 = arith.constant 0.000000e+00 : f32
    %1312 = vector.shape_cast %1310 : vector<8x1xi1> to vector<8x1xi1>
    %1313 = vector.broadcast %1312 : vector<8x1xi1> to vector<8x64xi1>
    %1314 = vector.broadcast %cst_528 : f32 to vector<8x64xf32>
    %1315 = arith.select %1313, %1311, %1314 : vector<8x64xi1>, vector<8x64xf32>
    %1316 = arith.addf %1308, %1315 : vector<8x64xf32>
    %c4_i32_529 = arith.constant 4 : i32
    %1317 = vector.broadcast %c4_i32_529 : i32 to vector<8x1xi32>
    %1318 = arith.cmpi sge, %2, %1317 : vector<8x1xi32>
    %c4_i32_530 = arith.constant 4 : i32
    %1319 = tpu.dynamic_rotate %1316 by %c4_i32_530 dim 0 : vector<8x64xf32>, i32 -> vector<8x64xf32>
    %cst_531 = arith.constant 0.000000e+00 : f32
    %1320 = vector.shape_cast %1318 : vector<8x1xi1> to vector<8x1xi1>
    %1321 = vector.broadcast %1320 : vector<8x1xi1> to vector<8x64xi1>
    %1322 = vector.broadcast %cst_531 : f32 to vector<8x64xf32>
    %1323 = arith.select %1321, %1319, %1322 : vector<8x64xi1>, vector<8x64xf32>
    %1324 = arith.addf %1316, %1323 : vector<8x64xf32>
    %1325 = vector.broadcast %1300 : vector<1x64xf32> to vector<8x64xf32>
    %1326 = arith.addf %1324, %1325 : vector<8x64xf32>
    %1327 = math.exp %1326 : vector<8x64xf32>
    %c12_i32 = arith.constant 12 : i32
    %1328 = vector.broadcast %c12_i32 : i32 to vector<8x32xi32>
    %1329 = arith.cmpi eq, %93, %1328 : vector<8x32xi32>
    %cst_532 = arith.constant 0.000000e+00 : f32
    %1330 = vector.broadcast %cst_532 : f32 to vector<8x32xf32>
    %1331 = arith.select %1329, %92, %1330 : vector<8x32xi1>, vector<8x32xf32>
    %cst_533 = arith.constant dense<0.000000e+00> : vector<8xf32>
    %1332 = vector.multi_reduction <add>, %1331, %cst_533 [1] : vector<8x32xf32> to vector<8xf32>
    %1333 = vector.shape_cast %1332 : vector<8xf32> to vector<8x1xf32>
    %c28_i32 = arith.constant 28 : i32
    %1334 = vector.broadcast %c28_i32 : i32 to vector<8x32xi32>
    %1335 = arith.cmpi eq, %93, %1334 : vector<8x32xi32>
    %cst_534 = arith.constant 0.000000e+00 : f32
    %1336 = vector.broadcast %cst_534 : f32 to vector<8x32xf32>
    %1337 = arith.select %1335, %92, %1336 : vector<8x32xi1>, vector<8x32xf32>
    %cst_535 = arith.constant dense<0.000000e+00> : vector<8xf32>
    %1338 = vector.multi_reduction <add>, %1337, %cst_535 [1] : vector<8x32xf32> to vector<8xf32>
    %1339 = vector.shape_cast %1338 : vector<8xf32> to vector<8x1xf32>
    %1340 = vector.broadcast %1333 : vector<8x1xf32> to vector<8x64xf32>
    %1341 = arith.mulf %94, %1340 : vector<8x64xf32>
    %cst_536 = arith.constant 9.99999996E-13 : f32
    %1342 = vector.broadcast %cst_536 : f32 to vector<8x64xf32>
    %1343 = arith.addf %1327, %1342 : vector<8x64xf32>
    %1344 = tpu.reciprocal %1343 {approx = true} : vector<8x64xf32> -> vector<8x64xf32>
    %1345 = arith.mulf %1341, %1344 : vector<8x64xf32>
    %c12_537 = arith.constant 12 : index
    %c0_538 = arith.constant 0 : index
    %c0_539 = arith.constant 0 : index
    %1346 = vector.load %arg15[%c12_537, %c0_538, %c0_539] : memref<16x1x64xf32, #tpu.memory_space<vmem>>, vector<1x1x64xf32>
    %1347 = vector.shape_cast %1346 : vector<1x1x64xf32> to vector<1x64xf32>
    %c1_i32_540 = arith.constant 1 : i32
    %1348 = vector.broadcast %c1_i32_540 : i32 to vector<8x1xi32>
    %1349 = arith.cmpi sge, %2, %1348 : vector<8x1xi32>
    %c1_i32_541 = arith.constant 1 : i32
    %1350 = tpu.dynamic_rotate %1345 by %c1_i32_541 dim 0 : vector<8x64xf32>, i32 -> vector<8x64xf32>
    %cst_542 = arith.constant 0.000000e+00 : f32
    %1351 = vector.shape_cast %1349 : vector<8x1xi1> to vector<8x1xi1>
    %1352 = vector.broadcast %1351 : vector<8x1xi1> to vector<8x64xi1>
    %1353 = vector.broadcast %cst_542 : f32 to vector<8x64xf32>
    %1354 = arith.select %1352, %1350, %1353 : vector<8x64xi1>, vector<8x64xf32>
    %1355 = arith.addf %1345, %1354 : vector<8x64xf32>
    %c2_i32_543 = arith.constant 2 : i32
    %1356 = vector.broadcast %c2_i32_543 : i32 to vector<8x1xi32>
    %1357 = arith.cmpi sge, %2, %1356 : vector<8x1xi32>
    %c2_i32_544 = arith.constant 2 : i32
    %1358 = tpu.dynamic_rotate %1355 by %c2_i32_544 dim 0 : vector<8x64xf32>, i32 -> vector<8x64xf32>
    %cst_545 = arith.constant 0.000000e+00 : f32
    %1359 = vector.shape_cast %1357 : vector<8x1xi1> to vector<8x1xi1>
    %1360 = vector.broadcast %1359 : vector<8x1xi1> to vector<8x64xi1>
    %1361 = vector.broadcast %cst_545 : f32 to vector<8x64xf32>
    %1362 = arith.select %1360, %1358, %1361 : vector<8x64xi1>, vector<8x64xf32>
    %1363 = arith.addf %1355, %1362 : vector<8x64xf32>
    %c4_i32_546 = arith.constant 4 : i32
    %1364 = vector.broadcast %c4_i32_546 : i32 to vector<8x1xi32>
    %1365 = arith.cmpi sge, %2, %1364 : vector<8x1xi32>
    %c4_i32_547 = arith.constant 4 : i32
    %1366 = tpu.dynamic_rotate %1363 by %c4_i32_547 dim 0 : vector<8x64xf32>, i32 -> vector<8x64xf32>
    %cst_548 = arith.constant 0.000000e+00 : f32
    %1367 = vector.shape_cast %1365 : vector<8x1xi1> to vector<8x1xi1>
    %1368 = vector.broadcast %1367 : vector<8x1xi1> to vector<8x64xi1>
    %1369 = vector.broadcast %cst_548 : f32 to vector<8x64xf32>
    %1370 = arith.select %1368, %1366, %1369 : vector<8x64xi1>, vector<8x64xf32>
    %1371 = arith.addf %1363, %1370 : vector<8x64xf32>
    %1372 = vector.broadcast %1347 : vector<1x64xf32> to vector<8x64xf32>
    %1373 = arith.addf %1371, %1372 : vector<8x64xf32>
    %1374 = arith.mulf %1373, %1327 : vector<8x64xf32>
    %1375 = vector.broadcast %1339 : vector<8x1xf32> to vector<8x64xf32>
    %1376 = arith.mulf %1374, %1375 : vector<8x64xf32>
    %1377 = arith.addf %1278, %1376 : vector<8x64xf32>
    %cst_549 = arith.constant dense<0.000000e+00> : vector<64xf32>
    %1378 = vector.multi_reduction <add>, %1298, %cst_549 [0] : vector<8x64xf32> to vector<64xf32>
    %1379 = vector.shape_cast %1378 : vector<64xf32> to vector<1x64xf32>
    %1380 = arith.addf %1300, %1379 : vector<1x64xf32>
    %c12_550 = arith.constant 12 : index
    %c0_551 = arith.constant 0 : index
    %c0_552 = arith.constant 0 : index
    %1381 = vector.load %arg14[%c12_550, %c0_551, %c0_552] : memref<16x1x64xf32, #tpu.memory_space<vmem>>, vector<1x1x64xf32>
    %1382 = vector.shape_cast %1381 : vector<1x1x64xf32> to vector<1x64xf32>
    %1383 = vector.shape_cast %1380 : vector<1x64xf32> to vector<1x1x64xf32>
    tpu.vector_store %arg14[%c12_550, %c0_551, %c0_552], %1383 {strides = array<i32>} : memref<16x1x64xf32, #tpu.memory_space<vmem>>, vector<1x1x64xf32>,
    %cst_553 = arith.constant dense<0.000000e+00> : vector<64xf32>
    %1384 = vector.multi_reduction <add>, %1345, %cst_553 [0] : vector<8x64xf32> to vector<64xf32>
    %1385 = vector.shape_cast %1384 : vector<64xf32> to vector<1x64xf32>
    %1386 = arith.addf %1347, %1385 : vector<1x64xf32>
    %c12_554 = arith.constant 12 : index
    %c0_555 = arith.constant 0 : index
    %c0_556 = arith.constant 0 : index
    %1387 = vector.load %arg15[%c12_554, %c0_555, %c0_556] : memref<16x1x64xf32, #tpu.memory_space<vmem>>, vector<1x1x64xf32>
    %1388 = vector.shape_cast %1387 : vector<1x1x64xf32> to vector<1x64xf32>
    %1389 = vector.shape_cast %1386 : vector<1x64xf32> to vector<1x1x64xf32>
    tpu.vector_store %arg15[%c12_554, %c0_555, %c0_556], %1389 {strides = array<i32>} : memref<16x1x64xf32, #tpu.memory_space<vmem>>, vector<1x1x64xf32>,
    %c13 = arith.constant 13 : index
    %c0_557 = arith.constant 0 : index
    %1390 = vector.load %arg10[%c13, %c0_557] : memref<16x64xf32, #tpu.memory_space<vmem>>, vector<1x64xf32>
    %1391 = vector.broadcast %1390 : vector<1x64xf32> to vector<8x64xf32>
    %1392 = arith.mulf %91, %1391 : vector<8x64xf32>
    %1393 = math.exp %1392 : vector<8x64xf32>
    %cst_558 = arith.constant 0.000000e+00 : f32
    %1394 = vector.shape_cast %99 : vector<8x1xi1> to vector<8x1xi1>
    %1395 = vector.broadcast %1394 : vector<8x1xi1> to vector<8x64xi1>
    %1396 = vector.broadcast %cst_558 : f32 to vector<8x64xf32>
    %1397 = arith.select %1395, %1396, %1393 : vector<8x64xi1>, vector<8x64xf32>
    %c13_559 = arith.constant 13 : index
    %c0_560 = arith.constant 0 : index
    %c0_561 = arith.constant 0 : index
    %1398 = vector.load %arg14[%c13_559, %c0_560, %c0_561] : memref<16x1x64xf32, #tpu.memory_space<vmem>>, vector<1x1x64xf32>
    %1399 = vector.shape_cast %1398 : vector<1x1x64xf32> to vector<1x64xf32>
    %c1_i32_562 = arith.constant 1 : i32
    %1400 = vector.broadcast %c1_i32_562 : i32 to vector<8x1xi32>
    %1401 = arith.cmpi sge, %2, %1400 : vector<8x1xi32>
    %c1_i32_563 = arith.constant 1 : i32
    %1402 = tpu.dynamic_rotate %1397 by %c1_i32_563 dim 0 : vector<8x64xf32>, i32 -> vector<8x64xf32>
    %cst_564 = arith.constant 0.000000e+00 : f32
    %1403 = vector.shape_cast %1401 : vector<8x1xi1> to vector<8x1xi1>
    %1404 = vector.broadcast %1403 : vector<8x1xi1> to vector<8x64xi1>
    %1405 = vector.broadcast %cst_564 : f32 to vector<8x64xf32>
    %1406 = arith.select %1404, %1402, %1405 : vector<8x64xi1>, vector<8x64xf32>
    %1407 = arith.addf %1397, %1406 : vector<8x64xf32>
    %c2_i32_565 = arith.constant 2 : i32
    %1408 = vector.broadcast %c2_i32_565 : i32 to vector<8x1xi32>
    %1409 = arith.cmpi sge, %2, %1408 : vector<8x1xi32>
    %c2_i32_566 = arith.constant 2 : i32
    %1410 = tpu.dynamic_rotate %1407 by %c2_i32_566 dim 0 : vector<8x64xf32>, i32 -> vector<8x64xf32>
    %cst_567 = arith.constant 0.000000e+00 : f32
    %1411 = vector.shape_cast %1409 : vector<8x1xi1> to vector<8x1xi1>
    %1412 = vector.broadcast %1411 : vector<8x1xi1> to vector<8x64xi1>
    %1413 = vector.broadcast %cst_567 : f32 to vector<8x64xf32>
    %1414 = arith.select %1412, %1410, %1413 : vector<8x64xi1>, vector<8x64xf32>
    %1415 = arith.addf %1407, %1414 : vector<8x64xf32>
    %c4_i32_568 = arith.constant 4 : i32
    %1416 = vector.broadcast %c4_i32_568 : i32 to vector<8x1xi32>
    %1417 = arith.cmpi sge, %2, %1416 : vector<8x1xi32>
    %c4_i32_569 = arith.constant 4 : i32
    %1418 = tpu.dynamic_rotate %1415 by %c4_i32_569 dim 0 : vector<8x64xf32>, i32 -> vector<8x64xf32>
    %cst_570 = arith.constant 0.000000e+00 : f32
    %1419 = vector.shape_cast %1417 : vector<8x1xi1> to vector<8x1xi1>
    %1420 = vector.broadcast %1419 : vector<8x1xi1> to vector<8x64xi1>
    %1421 = vector.broadcast %cst_570 : f32 to vector<8x64xf32>
    %1422 = arith.select %1420, %1418, %1421 : vector<8x64xi1>, vector<8x64xf32>
    %1423 = arith.addf %1415, %1422 : vector<8x64xf32>
    %1424 = vector.broadcast %1399 : vector<1x64xf32> to vector<8x64xf32>
    %1425 = arith.addf %1423, %1424 : vector<8x64xf32>
    %1426 = math.exp %1425 : vector<8x64xf32>
    %c13_i32 = arith.constant 13 : i32
    %1427 = vector.broadcast %c13_i32 : i32 to vector<8x32xi32>
    %1428 = arith.cmpi eq, %93, %1427 : vector<8x32xi32>
    %cst_571 = arith.constant 0.000000e+00 : f32
    %1429 = vector.broadcast %cst_571 : f32 to vector<8x32xf32>
    %1430 = arith.select %1428, %92, %1429 : vector<8x32xi1>, vector<8x32xf32>
    %cst_572 = arith.constant dense<0.000000e+00> : vector<8xf32>
    %1431 = vector.multi_reduction <add>, %1430, %cst_572 [1] : vector<8x32xf32> to vector<8xf32>
    %1432 = vector.shape_cast %1431 : vector<8xf32> to vector<8x1xf32>
    %c29_i32 = arith.constant 29 : i32
    %1433 = vector.broadcast %c29_i32 : i32 to vector<8x32xi32>
    %1434 = arith.cmpi eq, %93, %1433 : vector<8x32xi32>
    %cst_573 = arith.constant 0.000000e+00 : f32
    %1435 = vector.broadcast %cst_573 : f32 to vector<8x32xf32>
    %1436 = arith.select %1434, %92, %1435 : vector<8x32xi1>, vector<8x32xf32>
    %cst_574 = arith.constant dense<0.000000e+00> : vector<8xf32>
    %1437 = vector.multi_reduction <add>, %1436, %cst_574 [1] : vector<8x32xf32> to vector<8xf32>
    %1438 = vector.shape_cast %1437 : vector<8xf32> to vector<8x1xf32>
    %1439 = vector.broadcast %1432 : vector<8x1xf32> to vector<8x64xf32>
    %1440 = arith.mulf %94, %1439 : vector<8x64xf32>
    %cst_575 = arith.constant 9.99999996E-13 : f32
    %1441 = vector.broadcast %cst_575 : f32 to vector<8x64xf32>
    %1442 = arith.addf %1426, %1441 : vector<8x64xf32>
    %1443 = tpu.reciprocal %1442 {approx = true} : vector<8x64xf32> -> vector<8x64xf32>
    %1444 = arith.mulf %1440, %1443 : vector<8x64xf32>
    %c13_576 = arith.constant 13 : index
    %c0_577 = arith.constant 0 : index
    %c0_578 = arith.constant 0 : index
    %1445 = vector.load %arg15[%c13_576, %c0_577, %c0_578] : memref<16x1x64xf32, #tpu.memory_space<vmem>>, vector<1x1x64xf32>
    %1446 = vector.shape_cast %1445 : vector<1x1x64xf32> to vector<1x64xf32>
    %c1_i32_579 = arith.constant 1 : i32
    %1447 = vector.broadcast %c1_i32_579 : i32 to vector<8x1xi32>
    %1448 = arith.cmpi sge, %2, %1447 : vector<8x1xi32>
    %c1_i32_580 = arith.constant 1 : i32
    %1449 = tpu.dynamic_rotate %1444 by %c1_i32_580 dim 0 : vector<8x64xf32>, i32 -> vector<8x64xf32>
    %cst_581 = arith.constant 0.000000e+00 : f32
    %1450 = vector.shape_cast %1448 : vector<8x1xi1> to vector<8x1xi1>
    %1451 = vector.broadcast %1450 : vector<8x1xi1> to vector<8x64xi1>
    %1452 = vector.broadcast %cst_581 : f32 to vector<8x64xf32>
    %1453 = arith.select %1451, %1449, %1452 : vector<8x64xi1>, vector<8x64xf32>
    %1454 = arith.addf %1444, %1453 : vector<8x64xf32>
    %c2_i32_582 = arith.constant 2 : i32
    %1455 = vector.broadcast %c2_i32_582 : i32 to vector<8x1xi32>
    %1456 = arith.cmpi sge, %2, %1455 : vector<8x1xi32>
    %c2_i32_583 = arith.constant 2 : i32
    %1457 = tpu.dynamic_rotate %1454 by %c2_i32_583 dim 0 : vector<8x64xf32>, i32 -> vector<8x64xf32>
    %cst_584 = arith.constant 0.000000e+00 : f32
    %1458 = vector.shape_cast %1456 : vector<8x1xi1> to vector<8x1xi1>
    %1459 = vector.broadcast %1458 : vector<8x1xi1> to vector<8x64xi1>
    %1460 = vector.broadcast %cst_584 : f32 to vector<8x64xf32>
    %1461 = arith.select %1459, %1457, %1460 : vector<8x64xi1>, vector<8x64xf32>
    %1462 = arith.addf %1454, %1461 : vector<8x64xf32>
    %c4_i32_585 = arith.constant 4 : i32
    %1463 = vector.broadcast %c4_i32_585 : i32 to vector<8x1xi32>
    %1464 = arith.cmpi sge, %2, %1463 : vector<8x1xi32>
    %c4_i32_586 = arith.constant 4 : i32
    %1465 = tpu.dynamic_rotate %1462 by %c4_i32_586 dim 0 : vector<8x64xf32>, i32 -> vector<8x64xf32>
    %cst_587 = arith.constant 0.000000e+00 : f32
    %1466 = vector.shape_cast %1464 : vector<8x1xi1> to vector<8x1xi1>
    %1467 = vector.broadcast %1466 : vector<8x1xi1> to vector<8x64xi1>
    %1468 = vector.broadcast %cst_587 : f32 to vector<8x64xf32>
    %1469 = arith.select %1467, %1465, %1468 : vector<8x64xi1>, vector<8x64xf32>
    %1470 = arith.addf %1462, %1469 : vector<8x64xf32>
    %1471 = vector.broadcast %1446 : vector<1x64xf32> to vector<8x64xf32>
    %1472 = arith.addf %1470, %1471 : vector<8x64xf32>
    %1473 = arith.mulf %1472, %1426 : vector<8x64xf32>
    %1474 = vector.broadcast %1438 : vector<8x1xf32> to vector<8x64xf32>
    %1475 = arith.mulf %1473, %1474 : vector<8x64xf32>
    %1476 = arith.addf %1377, %1475 : vector<8x64xf32>
    %cst_588 = arith.constant dense<0.000000e+00> : vector<64xf32>
    %1477 = vector.multi_reduction <add>, %1397, %cst_588 [0] : vector<8x64xf32> to vector<64xf32>
    %1478 = vector.shape_cast %1477 : vector<64xf32> to vector<1x64xf32>
    %1479 = arith.addf %1399, %1478 : vector<1x64xf32>
    %c13_589 = arith.constant 13 : index
    %c0_590 = arith.constant 0 : index
    %c0_591 = arith.constant 0 : index
    %1480 = vector.load %arg14[%c13_589, %c0_590, %c0_591] : memref<16x1x64xf32, #tpu.memory_space<vmem>>, vector<1x1x64xf32>
    %1481 = vector.shape_cast %1480 : vector<1x1x64xf32> to vector<1x64xf32>
    %1482 = vector.shape_cast %1479 : vector<1x64xf32> to vector<1x1x64xf32>
    tpu.vector_store %arg14[%c13_589, %c0_590, %c0_591], %1482 {strides = array<i32>} : memref<16x1x64xf32, #tpu.memory_space<vmem>>, vector<1x1x64xf32>,
    %cst_592 = arith.constant dense<0.000000e+00> : vector<64xf32>
    %1483 = vector.multi_reduction <add>, %1444, %cst_592 [0] : vector<8x64xf32> to vector<64xf32>
    %1484 = vector.shape_cast %1483 : vector<64xf32> to vector<1x64xf32>
    %1485 = arith.addf %1446, %1484 : vector<1x64xf32>
    %c13_593 = arith.constant 13 : index
    %c0_594 = arith.constant 0 : index
    %c0_595 = arith.constant 0 : index
    %1486 = vector.load %arg15[%c13_593, %c0_594, %c0_595] : memref<16x1x64xf32, #tpu.memory_space<vmem>>, vector<1x1x64xf32>
    %1487 = vector.shape_cast %1486 : vector<1x1x64xf32> to vector<1x64xf32>
    %1488 = vector.shape_cast %1485 : vector<1x64xf32> to vector<1x1x64xf32>
    tpu.vector_store %arg15[%c13_593, %c0_594, %c0_595], %1488 {strides = array<i32>} : memref<16x1x64xf32, #tpu.memory_space<vmem>>, vector<1x1x64xf32>,
    %c14 = arith.constant 14 : index
    %c0_596 = arith.constant 0 : index
    %1489 = vector.load %arg10[%c14, %c0_596] : memref<16x64xf32, #tpu.memory_space<vmem>>, vector<1x64xf32>
    %1490 = vector.broadcast %1489 : vector<1x64xf32> to vector<8x64xf32>
    %1491 = arith.mulf %91, %1490 : vector<8x64xf32>
    %1492 = math.exp %1491 : vector<8x64xf32>
    %cst_597 = arith.constant 0.000000e+00 : f32
    %1493 = vector.shape_cast %99 : vector<8x1xi1> to vector<8x1xi1>
    %1494 = vector.broadcast %1493 : vector<8x1xi1> to vector<8x64xi1>
    %1495 = vector.broadcast %cst_597 : f32 to vector<8x64xf32>
    %1496 = arith.select %1494, %1495, %1492 : vector<8x64xi1>, vector<8x64xf32>
    %c14_598 = arith.constant 14 : index
    %c0_599 = arith.constant 0 : index
    %c0_600 = arith.constant 0 : index
    %1497 = vector.load %arg14[%c14_598, %c0_599, %c0_600] : memref<16x1x64xf32, #tpu.memory_space<vmem>>, vector<1x1x64xf32>
    %1498 = vector.shape_cast %1497 : vector<1x1x64xf32> to vector<1x64xf32>
    %c1_i32_601 = arith.constant 1 : i32
    %1499 = vector.broadcast %c1_i32_601 : i32 to vector<8x1xi32>
    %1500 = arith.cmpi sge, %2, %1499 : vector<8x1xi32>
    %c1_i32_602 = arith.constant 1 : i32
    %1501 = tpu.dynamic_rotate %1496 by %c1_i32_602 dim 0 : vector<8x64xf32>, i32 -> vector<8x64xf32>
    %cst_603 = arith.constant 0.000000e+00 : f32
    %1502 = vector.shape_cast %1500 : vector<8x1xi1> to vector<8x1xi1>
    %1503 = vector.broadcast %1502 : vector<8x1xi1> to vector<8x64xi1>
    %1504 = vector.broadcast %cst_603 : f32 to vector<8x64xf32>
    %1505 = arith.select %1503, %1501, %1504 : vector<8x64xi1>, vector<8x64xf32>
    %1506 = arith.addf %1496, %1505 : vector<8x64xf32>
    %c2_i32_604 = arith.constant 2 : i32
    %1507 = vector.broadcast %c2_i32_604 : i32 to vector<8x1xi32>
    %1508 = arith.cmpi sge, %2, %1507 : vector<8x1xi32>
    %c2_i32_605 = arith.constant 2 : i32
    %1509 = tpu.dynamic_rotate %1506 by %c2_i32_605 dim 0 : vector<8x64xf32>, i32 -> vector<8x64xf32>
    %cst_606 = arith.constant 0.000000e+00 : f32
    %1510 = vector.shape_cast %1508 : vector<8x1xi1> to vector<8x1xi1>
    %1511 = vector.broadcast %1510 : vector<8x1xi1> to vector<8x64xi1>
    %1512 = vector.broadcast %cst_606 : f32 to vector<8x64xf32>
    %1513 = arith.select %1511, %1509, %1512 : vector<8x64xi1>, vector<8x64xf32>
    %1514 = arith.addf %1506, %1513 : vector<8x64xf32>
    %c4_i32_607 = arith.constant 4 : i32
    %1515 = vector.broadcast %c4_i32_607 : i32 to vector<8x1xi32>
    %1516 = arith.cmpi sge, %2, %1515 : vector<8x1xi32>
    %c4_i32_608 = arith.constant 4 : i32
    %1517 = tpu.dynamic_rotate %1514 by %c4_i32_608 dim 0 : vector<8x64xf32>, i32 -> vector<8x64xf32>
    %cst_609 = arith.constant 0.000000e+00 : f32
    %1518 = vector.shape_cast %1516 : vector<8x1xi1> to vector<8x1xi1>
    %1519 = vector.broadcast %1518 : vector<8x1xi1> to vector<8x64xi1>
    %1520 = vector.broadcast %cst_609 : f32 to vector<8x64xf32>
    %1521 = arith.select %1519, %1517, %1520 : vector<8x64xi1>, vector<8x64xf32>
    %1522 = arith.addf %1514, %1521 : vector<8x64xf32>
    %1523 = vector.broadcast %1498 : vector<1x64xf32> to vector<8x64xf32>
    %1524 = arith.addf %1522, %1523 : vector<8x64xf32>
    %1525 = math.exp %1524 : vector<8x64xf32>
    %c14_i32 = arith.constant 14 : i32
    %1526 = vector.broadcast %c14_i32 : i32 to vector<8x32xi32>
    %1527 = arith.cmpi eq, %93, %1526 : vector<8x32xi32>
    %cst_610 = arith.constant 0.000000e+00 : f32
    %1528 = vector.broadcast %cst_610 : f32 to vector<8x32xf32>
    %1529 = arith.select %1527, %92, %1528 : vector<8x32xi1>, vector<8x32xf32>
    %cst_611 = arith.constant dense<0.000000e+00> : vector<8xf32>
    %1530 = vector.multi_reduction <add>, %1529, %cst_611 [1] : vector<8x32xf32> to vector<8xf32>
    %1531 = vector.shape_cast %1530 : vector<8xf32> to vector<8x1xf32>
    %c30_i32 = arith.constant 30 : i32
    %1532 = vector.broadcast %c30_i32 : i32 to vector<8x32xi32>
    %1533 = arith.cmpi eq, %93, %1532 : vector<8x32xi32>
    %cst_612 = arith.constant 0.000000e+00 : f32
    %1534 = vector.broadcast %cst_612 : f32 to vector<8x32xf32>
    %1535 = arith.select %1533, %92, %1534 : vector<8x32xi1>, vector<8x32xf32>
    %cst_613 = arith.constant dense<0.000000e+00> : vector<8xf32>
    %1536 = vector.multi_reduction <add>, %1535, %cst_613 [1] : vector<8x32xf32> to vector<8xf32>
    %1537 = vector.shape_cast %1536 : vector<8xf32> to vector<8x1xf32>
    %1538 = vector.broadcast %1531 : vector<8x1xf32> to vector<8x64xf32>
    %1539 = arith.mulf %94, %1538 : vector<8x64xf32>
    %cst_614 = arith.constant 9.99999996E-13 : f32
    %1540 = vector.broadcast %cst_614 : f32 to vector<8x64xf32>
    %1541 = arith.addf %1525, %1540 : vector<8x64xf32>
    %1542 = tpu.reciprocal %1541 {approx = true} : vector<8x64xf32> -> vector<8x64xf32>
    %1543 = arith.mulf %1539, %1542 : vector<8x64xf32>
    %c14_615 = arith.constant 14 : index
    %c0_616 = arith.constant 0 : index
    %c0_617 = arith.constant 0 : index
    %1544 = vector.load %arg15[%c14_615, %c0_616, %c0_617] : memref<16x1x64xf32, #tpu.memory_space<vmem>>, vector<1x1x64xf32>
    %1545 = vector.shape_cast %1544 : vector<1x1x64xf32> to vector<1x64xf32>
    %c1_i32_618 = arith.constant 1 : i32
    %1546 = vector.broadcast %c1_i32_618 : i32 to vector<8x1xi32>
    %1547 = arith.cmpi sge, %2, %1546 : vector<8x1xi32>
    %c1_i32_619 = arith.constant 1 : i32
    %1548 = tpu.dynamic_rotate %1543 by %c1_i32_619 dim 0 : vector<8x64xf32>, i32 -> vector<8x64xf32>
    %cst_620 = arith.constant 0.000000e+00 : f32
    %1549 = vector.shape_cast %1547 : vector<8x1xi1> to vector<8x1xi1>
    %1550 = vector.broadcast %1549 : vector<8x1xi1> to vector<8x64xi1>
    %1551 = vector.broadcast %cst_620 : f32 to vector<8x64xf32>
    %1552 = arith.select %1550, %1548, %1551 : vector<8x64xi1>, vector<8x64xf32>
    %1553 = arith.addf %1543, %1552 : vector<8x64xf32>
    %c2_i32_621 = arith.constant 2 : i32
    %1554 = vector.broadcast %c2_i32_621 : i32 to vector<8x1xi32>
    %1555 = arith.cmpi sge, %2, %1554 : vector<8x1xi32>
    %c2_i32_622 = arith.constant 2 : i32
    %1556 = tpu.dynamic_rotate %1553 by %c2_i32_622 dim 0 : vector<8x64xf32>, i32 -> vector<8x64xf32>
    %cst_623 = arith.constant 0.000000e+00 : f32
    %1557 = vector.shape_cast %1555 : vector<8x1xi1> to vector<8x1xi1>
    %1558 = vector.broadcast %1557 : vector<8x1xi1> to vector<8x64xi1>
    %1559 = vector.broadcast %cst_623 : f32 to vector<8x64xf32>
    %1560 = arith.select %1558, %1556, %1559 : vector<8x64xi1>, vector<8x64xf32>
    %1561 = arith.addf %1553, %1560 : vector<8x64xf32>
    %c4_i32_624 = arith.constant 4 : i32
    %1562 = vector.broadcast %c4_i32_624 : i32 to vector<8x1xi32>
    %1563 = arith.cmpi sge, %2, %1562 : vector<8x1xi32>
    %c4_i32_625 = arith.constant 4 : i32
    %1564 = tpu.dynamic_rotate %1561 by %c4_i32_625 dim 0 : vector<8x64xf32>, i32 -> vector<8x64xf32>
    %cst_626 = arith.constant 0.000000e+00 : f32
    %1565 = vector.shape_cast %1563 : vector<8x1xi1> to vector<8x1xi1>
    %1566 = vector.broadcast %1565 : vector<8x1xi1> to vector<8x64xi1>
    %1567 = vector.broadcast %cst_626 : f32 to vector<8x64xf32>
    %1568 = arith.select %1566, %1564, %1567 : vector<8x64xi1>, vector<8x64xf32>
    %1569 = arith.addf %1561, %1568 : vector<8x64xf32>
    %1570 = vector.broadcast %1545 : vector<1x64xf32> to vector<8x64xf32>
    %1571 = arith.addf %1569, %1570 : vector<8x64xf32>
    %1572 = arith.mulf %1571, %1525 : vector<8x64xf32>
    %1573 = vector.broadcast %1537 : vector<8x1xf32> to vector<8x64xf32>
    %1574 = arith.mulf %1572, %1573 : vector<8x64xf32>
    %1575 = arith.addf %1476, %1574 : vector<8x64xf32>
    %cst_627 = arith.constant dense<0.000000e+00> : vector<64xf32>
    %1576 = vector.multi_reduction <add>, %1496, %cst_627 [0] : vector<8x64xf32> to vector<64xf32>
    %1577 = vector.shape_cast %1576 : vector<64xf32> to vector<1x64xf32>
    %1578 = arith.addf %1498, %1577 : vector<1x64xf32>
    %c14_628 = arith.constant 14 : index
    %c0_629 = arith.constant 0 : index
    %c0_630 = arith.constant 0 : index
    %1579 = vector.load %arg14[%c14_628, %c0_629, %c0_630] : memref<16x1x64xf32, #tpu.memory_space<vmem>>, vector<1x1x64xf32>
    %1580 = vector.shape_cast %1579 : vector<1x1x64xf32> to vector<1x64xf32>
    %1581 = vector.shape_cast %1578 : vector<1x64xf32> to vector<1x1x64xf32>
    tpu.vector_store %arg14[%c14_628, %c0_629, %c0_630], %1581 {strides = array<i32>} : memref<16x1x64xf32, #tpu.memory_space<vmem>>, vector<1x1x64xf32>,
    %cst_631 = arith.constant dense<0.000000e+00> : vector<64xf32>
    %1582 = vector.multi_reduction <add>, %1543, %cst_631 [0] : vector<8x64xf32> to vector<64xf32>
    %1583 = vector.shape_cast %1582 : vector<64xf32> to vector<1x64xf32>
    %1584 = arith.addf %1545, %1583 : vector<1x64xf32>
    %c14_632 = arith.constant 14 : index
    %c0_633 = arith.constant 0 : index
    %c0_634 = arith.constant 0 : index
    %1585 = vector.load %arg15[%c14_632, %c0_633, %c0_634] : memref<16x1x64xf32, #tpu.memory_space<vmem>>, vector<1x1x64xf32>
    %1586 = vector.shape_cast %1585 : vector<1x1x64xf32> to vector<1x64xf32>
    %1587 = vector.shape_cast %1584 : vector<1x64xf32> to vector<1x1x64xf32>
    tpu.vector_store %arg15[%c14_632, %c0_633, %c0_634], %1587 {strides = array<i32>} : memref<16x1x64xf32, #tpu.memory_space<vmem>>, vector<1x1x64xf32>,
    %c15 = arith.constant 15 : index
    %c0_635 = arith.constant 0 : index
    %1588 = vector.load %arg10[%c15, %c0_635] : memref<16x64xf32, #tpu.memory_space<vmem>>, vector<1x64xf32>
    %1589 = vector.broadcast %1588 : vector<1x64xf32> to vector<8x64xf32>
    %1590 = arith.mulf %91, %1589 : vector<8x64xf32>
    %1591 = math.exp %1590 : vector<8x64xf32>
    %cst_636 = arith.constant 0.000000e+00 : f32
    %1592 = vector.shape_cast %99 : vector<8x1xi1> to vector<8x1xi1>
    %1593 = vector.broadcast %1592 : vector<8x1xi1> to vector<8x64xi1>
    %1594 = vector.broadcast %cst_636 : f32 to vector<8x64xf32>
    %1595 = arith.select %1593, %1594, %1591 : vector<8x64xi1>, vector<8x64xf32>
    %c15_637 = arith.constant 15 : index
    %c0_638 = arith.constant 0 : index
    %c0_639 = arith.constant 0 : index
    %1596 = vector.load %arg14[%c15_637, %c0_638, %c0_639] : memref<16x1x64xf32, #tpu.memory_space<vmem>>, vector<1x1x64xf32>
    %1597 = vector.shape_cast %1596 : vector<1x1x64xf32> to vector<1x64xf32>
    %c1_i32_640 = arith.constant 1 : i32
    %1598 = vector.broadcast %c1_i32_640 : i32 to vector<8x1xi32>
    %1599 = arith.cmpi sge, %2, %1598 : vector<8x1xi32>
    %c1_i32_641 = arith.constant 1 : i32
    %1600 = tpu.dynamic_rotate %1595 by %c1_i32_641 dim 0 : vector<8x64xf32>, i32 -> vector<8x64xf32>
    %cst_642 = arith.constant 0.000000e+00 : f32
    %1601 = vector.shape_cast %1599 : vector<8x1xi1> to vector<8x1xi1>
    %1602 = vector.broadcast %1601 : vector<8x1xi1> to vector<8x64xi1>
    %1603 = vector.broadcast %cst_642 : f32 to vector<8x64xf32>
    %1604 = arith.select %1602, %1600, %1603 : vector<8x64xi1>, vector<8x64xf32>
    %1605 = arith.addf %1595, %1604 : vector<8x64xf32>
    %c2_i32_643 = arith.constant 2 : i32
    %1606 = vector.broadcast %c2_i32_643 : i32 to vector<8x1xi32>
    %1607 = arith.cmpi sge, %2, %1606 : vector<8x1xi32>
    %c2_i32_644 = arith.constant 2 : i32
    %1608 = tpu.dynamic_rotate %1605 by %c2_i32_644 dim 0 : vector<8x64xf32>, i32 -> vector<8x64xf32>
    %cst_645 = arith.constant 0.000000e+00 : f32
    %1609 = vector.shape_cast %1607 : vector<8x1xi1> to vector<8x1xi1>
    %1610 = vector.broadcast %1609 : vector<8x1xi1> to vector<8x64xi1>
    %1611 = vector.broadcast %cst_645 : f32 to vector<8x64xf32>
    %1612 = arith.select %1610, %1608, %1611 : vector<8x64xi1>, vector<8x64xf32>
    %1613 = arith.addf %1605, %1612 : vector<8x64xf32>
    %c4_i32_646 = arith.constant 4 : i32
    %1614 = vector.broadcast %c4_i32_646 : i32 to vector<8x1xi32>
    %1615 = arith.cmpi sge, %2, %1614 : vector<8x1xi32>
    %c4_i32_647 = arith.constant 4 : i32
    %1616 = tpu.dynamic_rotate %1613 by %c4_i32_647 dim 0 : vector<8x64xf32>, i32 -> vector<8x64xf32>
    %cst_648 = arith.constant 0.000000e+00 : f32
    %1617 = vector.shape_cast %1615 : vector<8x1xi1> to vector<8x1xi1>
    %1618 = vector.broadcast %1617 : vector<8x1xi1> to vector<8x64xi1>
    %1619 = vector.broadcast %cst_648 : f32 to vector<8x64xf32>
    %1620 = arith.select %1618, %1616, %1619 : vector<8x64xi1>, vector<8x64xf32>
    %1621 = arith.addf %1613, %1620 : vector<8x64xf32>
    %1622 = vector.broadcast %1597 : vector<1x64xf32> to vector<8x64xf32>
    %1623 = arith.addf %1621, %1622 : vector<8x64xf32>
    %1624 = math.exp %1623 : vector<8x64xf32>
    %c15_i32 = arith.constant 15 : i32
    %1625 = vector.broadcast %c15_i32 : i32 to vector<8x32xi32>
    %1626 = arith.cmpi eq, %93, %1625 : vector<8x32xi32>
    %cst_649 = arith.constant 0.000000e+00 : f32
    %1627 = vector.broadcast %cst_649 : f32 to vector<8x32xf32>
    %1628 = arith.select %1626, %92, %1627 : vector<8x32xi1>, vector<8x32xf32>
    %cst_650 = arith.constant dense<0.000000e+00> : vector<8xf32>
    %1629 = vector.multi_reduction <add>, %1628, %cst_650 [1] : vector<8x32xf32> to vector<8xf32>
    %1630 = vector.shape_cast %1629 : vector<8xf32> to vector<8x1xf32>
    %c31_i32 = arith.constant 31 : i32
    %1631 = vector.broadcast %c31_i32 : i32 to vector<8x32xi32>
    %1632 = arith.cmpi eq, %93, %1631 : vector<8x32xi32>
    %cst_651 = arith.constant 0.000000e+00 : f32
    %1633 = vector.broadcast %cst_651 : f32 to vector<8x32xf32>
    %1634 = arith.select %1632, %92, %1633 : vector<8x32xi1>, vector<8x32xf32>
    %cst_652 = arith.constant dense<0.000000e+00> : vector<8xf32>
    %1635 = vector.multi_reduction <add>, %1634, %cst_652 [1] : vector<8x32xf32> to vector<8xf32>
    %1636 = vector.shape_cast %1635 : vector<8xf32> to vector<8x1xf32>
    %1637 = vector.broadcast %1630 : vector<8x1xf32> to vector<8x64xf32>
    %1638 = arith.mulf %94, %1637 : vector<8x64xf32>
    %cst_653 = arith.constant 9.99999996E-13 : f32
    %1639 = vector.broadcast %cst_653 : f32 to vector<8x64xf32>
    %1640 = arith.addf %1624, %1639 : vector<8x64xf32>
    %1641 = tpu.reciprocal %1640 {approx = true} : vector<8x64xf32> -> vector<8x64xf32>
    %1642 = arith.mulf %1638, %1641 : vector<8x64xf32>
    %c15_654 = arith.constant 15 : index
    %c0_655 = arith.constant 0 : index
    %c0_656 = arith.constant 0 : index
    %1643 = vector.load %arg15[%c15_654, %c0_655, %c0_656] : memref<16x1x64xf32, #tpu.memory_space<vmem>>, vector<1x1x64xf32>
    %1644 = vector.shape_cast %1643 : vector<1x1x64xf32> to vector<1x64xf32>
    %c1_i32_657 = arith.constant 1 : i32
    %1645 = vector.broadcast %c1_i32_657 : i32 to vector<8x1xi32>
    %1646 = arith.cmpi sge, %2, %1645 : vector<8x1xi32>
    %c1_i32_658 = arith.constant 1 : i32
    %1647 = tpu.dynamic_rotate %1642 by %c1_i32_658 dim 0 : vector<8x64xf32>, i32 -> vector<8x64xf32>
    %cst_659 = arith.constant 0.000000e+00 : f32
    %1648 = vector.shape_cast %1646 : vector<8x1xi1> to vector<8x1xi1>
    %1649 = vector.broadcast %1648 : vector<8x1xi1> to vector<8x64xi1>
    %1650 = vector.broadcast %cst_659 : f32 to vector<8x64xf32>
    %1651 = arith.select %1649, %1647, %1650 : vector<8x64xi1>, vector<8x64xf32>
    %1652 = arith.addf %1642, %1651 : vector<8x64xf32>
    %c2_i32_660 = arith.constant 2 : i32
    %1653 = vector.broadcast %c2_i32_660 : i32 to vector<8x1xi32>
    %1654 = arith.cmpi sge, %2, %1653 : vector<8x1xi32>
    %c2_i32_661 = arith.constant 2 : i32
    %1655 = tpu.dynamic_rotate %1652 by %c2_i32_661 dim 0 : vector<8x64xf32>, i32 -> vector<8x64xf32>
    %cst_662 = arith.constant 0.000000e+00 : f32
    %1656 = vector.shape_cast %1654 : vector<8x1xi1> to vector<8x1xi1>
    %1657 = vector.broadcast %1656 : vector<8x1xi1> to vector<8x64xi1>
    %1658 = vector.broadcast %cst_662 : f32 to vector<8x64xf32>
    %1659 = arith.select %1657, %1655, %1658 : vector<8x64xi1>, vector<8x64xf32>
    %1660 = arith.addf %1652, %1659 : vector<8x64xf32>
    %c4_i32_663 = arith.constant 4 : i32
    %1661 = vector.broadcast %c4_i32_663 : i32 to vector<8x1xi32>
    %1662 = arith.cmpi sge, %2, %1661 : vector<8x1xi32>
    %c4_i32_664 = arith.constant 4 : i32
    %1663 = tpu.dynamic_rotate %1660 by %c4_i32_664 dim 0 : vector<8x64xf32>, i32 -> vector<8x64xf32>
    %cst_665 = arith.constant 0.000000e+00 : f32
    %1664 = vector.shape_cast %1662 : vector<8x1xi1> to vector<8x1xi1>
    %1665 = vector.broadcast %1664 : vector<8x1xi1> to vector<8x64xi1>
    %1666 = vector.broadcast %cst_665 : f32 to vector<8x64xf32>
    %1667 = arith.select %1665, %1663, %1666 : vector<8x64xi1>, vector<8x64xf32>
    %1668 = arith.addf %1660, %1667 : vector<8x64xf32>
    %1669 = vector.broadcast %1644 : vector<1x64xf32> to vector<8x64xf32>
    %1670 = arith.addf %1668, %1669 : vector<8x64xf32>
    %1671 = arith.mulf %1670, %1624 : vector<8x64xf32>
    %1672 = vector.broadcast %1636 : vector<8x1xf32> to vector<8x64xf32>
    %1673 = arith.mulf %1671, %1672 : vector<8x64xf32>
    %1674 = arith.addf %1575, %1673 : vector<8x64xf32>
    %cst_666 = arith.constant dense<0.000000e+00> : vector<64xf32>
    %1675 = vector.multi_reduction <add>, %1595, %cst_666 [0] : vector<8x64xf32> to vector<64xf32>
    %1676 = vector.shape_cast %1675 : vector<64xf32> to vector<1x64xf32>
    %1677 = arith.addf %1597, %1676 : vector<1x64xf32>
    %c15_667 = arith.constant 15 : index
    %c0_668 = arith.constant 0 : index
    %c0_669 = arith.constant 0 : index
    %1678 = vector.load %arg14[%c15_667, %c0_668, %c0_669] : memref<16x1x64xf32, #tpu.memory_space<vmem>>, vector<1x1x64xf32>
    %1679 = vector.shape_cast %1678 : vector<1x1x64xf32> to vector<1x64xf32>
    %1680 = vector.shape_cast %1677 : vector<1x64xf32> to vector<1x1x64xf32>
    tpu.vector_store %arg14[%c15_667, %c0_668, %c0_669], %1680 {strides = array<i32>} : memref<16x1x64xf32, #tpu.memory_space<vmem>>, vector<1x1x64xf32>,
    %cst_670 = arith.constant dense<0.000000e+00> : vector<64xf32>
    %1681 = vector.multi_reduction <add>, %1642, %cst_670 [0] : vector<8x64xf32> to vector<64xf32>
    %1682 = vector.shape_cast %1681 : vector<64xf32> to vector<1x64xf32>
    %1683 = arith.addf %1644, %1682 : vector<1x64xf32>
    %c15_671 = arith.constant 15 : index
    %c0_672 = arith.constant 0 : index
    %c0_673 = arith.constant 0 : index
    %1684 = vector.load %arg15[%c15_671, %c0_672, %c0_673] : memref<16x1x64xf32, #tpu.memory_space<vmem>>, vector<1x1x64xf32>
    %1685 = vector.shape_cast %1684 : vector<1x1x64xf32> to vector<1x64xf32>
    %1686 = vector.shape_cast %1683 : vector<1x64xf32> to vector<1x1x64xf32>
    tpu.vector_store %arg15[%c15_671, %c0_672, %c0_673], %1686 {strides = array<i32>} : memref<16x1x64xf32, #tpu.memory_space<vmem>>, vector<1x1x64xf32>,
    %1687 = arith.negf %22 : vector<8x64xf32>
    %1688 = math.exp %1687 : vector<8x64xf32>
    %cst_674 = arith.constant 1.000000e+00 : f32
    %1689 = vector.broadcast %cst_674 : f32 to vector<8x64xf32>
    %1690 = arith.addf %1689, %1688 : vector<8x64xf32>
    %1691 = arith.divf %1689, %1690 : vector<8x64xf32>
    %1692 = arith.mulf %22, %1691 : vector<8x64xf32>
    %1693 = arith.mulf %1674, %1692 : vector<8x64xf32>
    %c0_675 = arith.constant 0 : index
    %c0_676 = arith.constant 0 : index
    %1694 = vector.load %arg12[%c0_675, %c0_676] : memref<64x32xf32, #tpu.memory_space<vmem>>, vector<64x32xf32>
    %cst_677 = arith.constant dense<0.000000e+00> : vector<8x32xf32>
    %1695 = tpu.matmul %1693, %1694, %cst_677 {dimension_numbers = #tpu.dot_dimension_numbers<[1], [0], [0], [1], [0, 0, 1, 1], [], []>} : vector<8x64xf32>, vector<64x32xf32>, vector<8x32xf32> -> vector<8x32xf32>
    %1696 = arith.addf %1, %1695 : vector<8x32xf32>
    %c0_678 = arith.constant 0 : index
    %c0_679 = arith.constant 0 : index
    %c0_680 = arith.constant 0 : index
    %1697 = vector.load %arg13[%c0_678, %c0_679, %c0_680] : memref<1x8x32xf32, #tpu.memory_space<vmem>>, vector<1x8x32xf32>
    %1698 = vector.shape_cast %1697 : vector<1x8x32xf32> to vector<8x32xf32>
    %1699 = vector.shape_cast %1696 : vector<8x32xf32> to vector<1x8x32xf32>
    tpu.vector_store %arg13[%c0_678, %c0_679, %c0_680], %1699 {strides = array<i32>} : memref<1x8x32xf32, #tpu.memory_space<vmem>>, vector<1x8x32xf32>,
    return
  }
  func.func @transform_0(%arg0: i32, %arg1: i32) -> (i32, i32, i32) {
    %c0_i32 = arith.constant 0 : i32
    %c0_i32_0 = arith.constant 0 : i32
    return %arg0, %arg1, %c0_i32 : i32, i32, i32
  }
  func.func @transform_1(%arg0: i32, %arg1: i32) -> (i32, i32) {
    %c0_i32 = arith.constant 0 : i32
    %c0_i32_0 = arith.constant 0 : i32
    %c0_i32_1 = arith.constant 0 : i32
    return %c0_i32, %c0_i32_0 : i32, i32
  }
  func.func @transform_2(%arg0: i32, %arg1: i32) -> (i32, i32) {
    %c0_i32 = arith.constant 0 : i32
    %c0_i32_0 = arith.constant 0 : i32
    %c0_i32_1 = arith.constant 0 : i32
    return %c0_i32, %c0_i32_0 : i32, i32
  }
  func.func @transform_3(%arg0: i32, %arg1: i32) -> (i32, i32) {
    %c0_i32 = arith.constant 0 : i32
    %c0_i32_0 = arith.constant 0 : i32
    %c0_i32_1 = arith.constant 0 : i32
    return %c0_i32, %c0_i32_0 : i32, i32
  }
  func.func @transform_4(%arg0: i32, %arg1: i32) -> (i32, i32) {
    %c0_i32 = arith.constant 0 : i32
    %c0_i32_0 = arith.constant 0 : i32
    %c0_i32_1 = arith.constant 0 : i32
    return %c0_i32, %c0_i32_0 : i32, i32
  }
  func.func @transform_5(%arg0: i32, %arg1: i32) -> (i32, i32) {
    %c0_i32 = arith.constant 0 : i32
    %c0_i32_0 = arith.constant 0 : i32
    %c0_i32_1 = arith.constant 0 : i32
    return %c0_i32, %c0_i32_0 : i32, i32
  }
  func.func @transform_6(%arg0: i32, %arg1: i32) -> (i32, i32) {
    %c0_i32 = arith.constant 0 : i32
    %c0_i32_0 = arith.constant 0 : i32
    %c0_i32_1 = arith.constant 0 : i32
    return %c0_i32, %c0_i32_0 : i32, i32
  }
  func.func @transform_7(%arg0: i32, %arg1: i32) -> (i32, i32) {
    %c0_i32 = arith.constant 0 : i32
    %c0_i32_0 = arith.constant 0 : i32
    %c0_i32_1 = arith.constant 0 : i32
    return %c0_i32, %c0_i32_0 : i32, i32
  }
  func.func @transform_8(%arg0: i32, %arg1: i32) -> (i32, i32) {
    %c0_i32 = arith.constant 0 : i32
    %c0_i32_0 = arith.constant 0 : i32
    %c0_i32_1 = arith.constant 0 : i32
    return %c0_i32, %c0_i32_0 : i32, i32
  }
  func.func @transform_9(%arg0: i32, %arg1: i32) -> (i32, i32) {
    %c0_i32 = arith.constant 0 : i32
    %c0_i32_0 = arith.constant 0 : i32
    %c0_i32_1 = arith.constant 0 : i32
    return %c0_i32, %c0_i32_0 : i32, i32
  }
  func.func @transform_10(%arg0: i32, %arg1: i32) -> (i32, i32) {
    %c0_i32 = arith.constant 0 : i32
    %c0_i32_0 = arith.constant 0 : i32
    %c0_i32_1 = arith.constant 0 : i32
    return %c0_i32, %c0_i32_0 : i32, i32
  }
  func.func @transform_11(%arg0: i32, %arg1: i32) -> (i32, i32, i32) {
    %c0_i32 = arith.constant 0 : i32
    %c0_i32_0 = arith.constant 0 : i32
    return %arg0, %arg1, %c0_i32 : i32, i32, i32
  }
}

</mosaic_0001>

<bundles_post_ra>
// kernel: mamba_forward_pallas.5
= control target key start
LH: loop header
LB: loop body
LE: loop exit
PB: predicated region body
PF: predicated region fallthrough
CT: control target
= control target key end

     0   :  { %8 = vsyncpa [#allocation3], 0  ;;  %s414_s0 = inlined_call_operand.hbm [shape: f32[16,32], index: 0, kind: input, shape index: {}]   ;;  %s415_s1 = inlined_call_operand.hbm [shape: f32[1,32], index: 1, kind: input, shape index: {}]   ;;  %s416_s2 = inlined_call_operand.hbm [shape: f32[32,128], index: 2, kind: input, shape index: {}]   ;;  %s417_s3 = inlined_call_operand.hbm [shape: f32[16,128], index: 3, kind: output, shape index: {}]  }
   0x1   :  { %9 = vsyncpa [#allocation6], 0 }
   0x2   :  { %10 = vsyncpa [#allocation4], 0  ;;  %s320_s12 = smov [#allocation5]   ;;  %s321_s14 = smov [#allocation2]  }
   0x3   :  { %s29_s13 = sshll.u32 %s320_s12, 4  ;;  %s16_s15 = sshll.u32 %s321_s14, 4  ;;  %s30_s13 = int_to_ptr.vmem [resolvable:$true] %s29_s13  ;;  %s346_s15 = int_to_ptr.vmem [resolvable:$true] %s16_s15 }
   0x4   :  { %s226_s18 = scalar_lea.hbm %s415_s1, 16 }
   0x5   :  { %p227_p0 = scmp.ne.s32.totalorder %s415_s1, %s226_s18  ;;  %p230_p1 = scmp.lt.u32.totalorder %s226_s18, %s415_s1 }
   0x7   :  { %p232_p2 = pnand %p230_p1, %p227_p0 }
   0x9   :  { %235 = shalt.err (!%p232_p2)
}
   0xa   :  { %s236_s23 = scalar_lea.vmem %s30_s13, 16  ;;  %s240_s24 = scalar_lea.vmem %s30_s13, 32 }
   0xb   :  { %p237_p3 = scmp.ne.s32.totalorder %s30_s13, %s236_s23  ;;  %p241_p4 = scmp.lt.s32.totalorder %s30_s13, %s30_s13 }
   0xc   :  { %p242_p5 = scmp.lt.s32.totalorder %s240_s24, %s236_s23 }
   0xe   :  { %p243_p6 = por %p242_p5, %p241_p4 }
  0x10   :  { %p244_p7 = pnand %p243_p6, %p237_p3 }
  0x12   :  { %247 = shalt.err (!%p244_p7)
}
  0x13   :  { %32 = dma.hbm_to_vmem [thread:$0]  %s415_s1, 16, %s30_s13, [#allocation6]  }
  0x14   :  { %s248_s29 = scalar_lea.hbm %s414_s0, 256 }
  0x15   :  { %p249_p8 = scmp.ne.s32.totalorder %s414_s0, %s248_s29  ;;  %p252_p9 = scmp.lt.u32.totalorder %s248_s29, %s414_s0 }
  0x17   :  { %p254_p10 = pnand %p252_p9, %p249_p8 }
  0x19   :  { %257 = shalt.err (!%p254_p10)
}
  0x1a   :  { %s258_s7 = scalar_lea.vmem %s346_s15, 256  ;;  %p263_p12 = scmp.lt.s32.totalorder %s346_s15, %s346_s15 }
  0x1b   :  { %p259_p11 = scmp.ne.s32.totalorder %s346_s15, %s258_s7  ;;  %p264_p13 = scmp.lt.s32.totalorder %s258_s7, %s258_s7 }
  0x1d   :  { %p265_p0 = por %p264_p13, %p263_p12 }
  0x1f   :  { %p266_p1 = pnand %p265_p0, %p259_p11 }
  0x21   :  { %269 = shalt.err (!%p266_p1)
}
  0x22   :  { %s322_s1 = smov 128   ;;  %s323_s8 = smov 8  }
  0x23   :  { %22 = dma.hbm_to_vmem [thread:$0]  %s414_s0, 256, %s346_s15, [#allocation3], %s322_s1, %s322_s1, %s323_s8  }
  0x24   :  { %s324_s11 = smov [#allocation7]   ;;  %s270_s16 = scalar_lea.hbm %s416_s2, 512 }
  0x25   :  { %s38_s12 = sshll.u32 %s324_s11, 4  ;;  %p271_p2 = scmp.ne.s32.totalorder %s416_s2, %s270_s16  ;;  %s39_s12 = int_to_ptr.vmem [resolvable:$true] %s38_s12 }
  0x26   :  { %p274_p3 = scmp.lt.u32.totalorder %s270_s16, %s416_s2 }
  0x28   :  { %p276_p4 = pnand %p274_p3, %p271_p2 }
  0x2a   :  { %279 = shalt.err (!%p276_p4)
}
  0x2b   :  { %s280_s21 = scalar_lea.vmem %s39_s12, 512  ;;  %p285_p6 = scmp.lt.s32.totalorder %s39_s12, %s39_s12 }
  0x2c   :  { %p281_p5 = scmp.ne.s32.totalorder %s39_s12, %s280_s21  ;;  %p286_p7 = scmp.lt.s32.totalorder %s280_s21, %s280_s21 }
  0x2e   :  { %p287_p8 = por %p286_p7, %p285_p6 }
  0x30   :  { %p288_p9 = pnand %p287_p8, %p281_p5 }
  0x32   :  { %291 = shalt.err (!%p288_p9)
}
  0x33   :  { %44 = dma.hbm_to_vmem [thread:$0]  %s416_s2, 512, %s39_s12, [#allocation6], %s322_s1, %s322_s1, %s323_s8  }
  0x34   :  { %314 = dma.done.wait [#allocation3], 256  }
  0x35   :  { %315 = vsyncadd [#allocation3], 4294967040 }
  0x36   :  { %316 = dma.done.wait [#allocation6], 528  }
  0x37   :  { %317 = vsyncadd [#allocation6], 4294966768  ;;  %v54_v0 = vld [vmem:[#allocation2] sm:$0xff]  ;;  %vm58_vm0 = vcmask 261120   ;;  %v55_v1 = vld [vmem:[#allocation2 + $0x8] sm:$0xff]  ;;  %s325_s2 = smov [#allocation8]  }
  0x38   :  { %v56_v2 = vmul.f32 %v54_v0, %v54_v0  ;;  %v57_v3 = vmul.f32 %v55_v1, %v55_v1  ;;  %v83_v6 = vld [vmem:[#allocation7] sm:$0xff]  ;;  %v84_v7 = vld [vmem:[#allocation7 + $0x8] sm:$0xff]  ;;  %v85_v8 = vld [vmem:[#allocation7 + $0x10] sm:$0xff]  ;;  %s175_s22 = sshll.u32 %s325_s2, 4  ;;  %s176_s22 = int_to_ptr.vmem [resolvable:$true] %s175_s22 }
  0x39   :  { %v208_v9 = vpack.c.bf16 %v84_v7, %v83_v6  ;;  %v86_v10 = vld [vmem:[#allocation7 + $0x18] sm:$0xff]  ;;  %s292_s23 = scalar_lea.vmem %s176_s22, 256  ;;  %p297_p11 = scmp.lt.s32.totalorder %s176_s22, %s176_s22 }
  0x3a   :  { %v59_v4 = vsel %vm58_vm0, %v56_v2, 0.0  ;;  %v62_v5 = vsel %vm58_vm0, %v57_v3, 0.0  ;;  %v212_v11 = vpack.c.bf16 %v86_v10, %v85_v8  ;;  %v188_v19 = vld [vmem:[#allocation5] ss:$0 sm:$0xff]  ;;  %p293_p10 = scmp.ne.s32.totalorder %s176_s22, %s292_s23  ;;  %p298_p12 = scmp.lt.s32.totalorder %s292_s23, %s292_s23 }
  0x3b   :  { %60 = vadd.xlane.f32.xlu0 %v59_v4  ;;  %209 = vmatprep.subr.bf16.mxu0 %v208_v9 }
  0x3c   :  { %211 = vmatpush3.bf16.msra.mxu0 %v208_v9  ;;  %p299_p13 = por %p298_p12, %p297_p11 }
  0x3d   :  { %213 = vmatprep.subr.bf16.mxu0 %v212_v11 }
  0x3e   :  { %p300_p0 = pnand %p299_p13, %p293_p10 }
  0x3f   :  { %63 = vadd.xlane.f32.xlu0 %v62_v5 }
  0x40   :  { %215 = vmatpush3.bf16.msra.mxu0 %v212_v11 }
  0xc8   :  { %v61_v12 = vpop.xlane.xlu0 %60 }
  0xc9   :  { %v66_v13 = vmul.f32 0.03125, %v61_v12 }
  0xcb   :  { %v68_v14 = vadd.f32 1e-05, %v66_v13 }
  0xcc   :  { %v64_v15 = vpop.xlane.xlu0 %63 }
  0xcd   :  { %222 = vrsqrt.f32 %v68_v14  ;;  %v67_v16 = vmul.f32 0.03125, %v64_v15 }
  0xcf   :  { %v69_v17 = vadd.f32 1e-05, %v67_v16 }
  0xd1   :  { %224 = vrsqrt.f32 %v69_v17 }
  0xd7   :  { %v223_v18 = vpop.eup %222 }
  0xd8   :  { %v72_v20 = vmul.f32 %v223_v18, %v54_v0 }
  0xda   :  { %v81_v21 = vmul.f32 %v188_v19, %v72_v20 }
  0xdb   :  { %v225_v22 = vpop.eup %224 }
  0xdc   :  { %v73_v23 = vmul.f32 %v225_v22, %v55_v1  ;;  %205 = vmatprep.mubr.msk.f32.mxu0 %vm58_vm0, %v81_v21 }
  0xde   :  { %v82_v24 = vmul.f32 %v188_v19, %v73_v23 }
  0xe0   :  { %206 = vmatmul.mubr.msk.f32.vlgmr.msra.gmra.mrb[0].mxu0 %vm58_vm0, %v82_v24 }
 0x1b3   :  { %v207_v25 = vpop.f32.mrb[0].mxu0 }
 0x1b4   :  { %169 = vst [vmem:[#allocation8 + $0x8] sm:$0xff] %v207_v25  ;;  %v159_v26 = vpop.f32.mrb[1].mxu0 }
 0x1b5   :  { %168 = vst [vmem:[#allocation8] sm:$0xff] %v159_v26 }
 0x1b6   :  { %303 = shalt.err (!%p300_p0)
}
 0x1b7   :  { %s304_s26 = scalar_lea.hbm %s417_s3, 256 }
 0x1b8   :  { %p305_p1 = scmp.ne.s32.totalorder %s417_s3, %s304_s26  ;;  %p308_p2 = scmp.lt.u32.totalorder %s304_s26, %s417_s3 }
 0x1ba   :  { %p310_p3 = pnand %p308_p2, %p305_p1 }
 0x1bc   :  { %313 = shalt.err (!%p310_p3)
}
 0x1bd   :  { %181 = dma.vmem_to_hbm [thread:$0]  %s176_s22, 256, %s417_s3, [#allocation4], %s322_s1, %s322_s1, %s323_s8  }
 0x1be   :  { %318 = dma.done.wait [#allocation4], 256  }
 0x1bf   :  { %319 = vsyncadd [#allocation4], 4294967040 }
 0x1c0   :  { %185 = vsyncpa [#allocation3], 1 }
 0x1c1   :  { %186 = vsyncpa [#allocation6], 1 }
 0x1c2   :  { %187 = vsyncpa [#allocation4], 1 }

// kernel: mamba_forward_pallas.3
= control target key start
LH: loop header
LB: loop body
LE: loop exit
PB: predicated region body
PF: predicated region fallthrough
CT: control target
= control target key end

     0   :  { %s4919_s0 = inlined_call_operand.hbm [shape: f32[2,8,32], index: 0, kind: input, shape index: {}, may-alias: {0,11}]   ;;  %s4920_s1 = inlined_call_operand.hbm [shape: f32[1,32], index: 1, kind: input, shape index: {}]   ;;  %s4921_s2 = inlined_call_operand.hbm [shape: f32[32,192], index: 2, kind: input, shape index: {}]   ;;  %s4922_s3 = inlined_call_operand.hbm [shape: f32[4,64], index: 3, kind: input, shape index: {}]   ;;  %s4923_s4 = inlined_call_operand.hbm [shape: f32[1,64], index: 4, kind: input, shape index: {}]   ;;  %s4924_s5 = inlined_call_operand.hbm [shape: f32[64,160], index: 5, kind: input, shape index: {}]   ;;  %s4925_s6 = inlined_call_operand.hbm [shape: f32[128,64], index: 6, kind: input, shape index: {}]   ;;  %s4926_s7 = inlined_call_operand.hbm [shape: f32[1,64], index: 7, kind: input, shape index: {}]   ;;  %s4927_s8 = inlined_call_operand.hbm [shape: f32[16,64], index: 8, kind: input, shape index: {}]   ;;  %s4928_s9 = inlined_call_operand.hbm [shape: f32[1,64], index: 9, kind: input, shape index: {}]   ;;  %s4929_s10 = inlined_call_operand.hbm [shape: f32[64,32], index: 10, kind: input, shape index: {}]   ;;  %s4930_s11 = inlined_call_operand.hbm [shape: f32[2,8,32], index: 11, kind: output, shape index: {}, may-alias: {0,11}]  }
   0x1   :  { %4946 = sst [smem:[#allocation44_spill]] %s4919_s0 }
   0x2   :  { %4947 = sst [smem:[#allocation45_spill]] %s4920_s1 }
   0x3   :  { %4948 = sst [smem:[#allocation46_spill]] %s4922_s3 }
   0x4   :  { %4949 = sst [smem:[#allocation47_spill]] %s4930_s11 }
   0x5   :  { %16 = vsyncpa [#allocation6], 0 }
   0x6   :  { %18 = vsyncpa [#allocation6 + $0x1], 0 }
   0x7   :  { %19 = vsyncpa [#allocation9], 0 }
   0x8   :  { %20 = vsyncpa [#allocation12], 0 }
   0x9   :  { %21 = vsyncpa [#allocation15], 0 }
   0xa   :  { %22 = vsyncpa [#allocation18], 0 }
   0xb   :  { %23 = vsyncpa [#allocation21], 0 }
   0xc   :  { %24 = vsyncpa [#allocation7], 0 }
   0xd   :  { %26 = vsyncpa [#allocation7 + $0x1], 0  ;;  %s3565_s17 = smov 0   ;;  %s3567_s18 = smov 0  }
   0xe   :  { %s3569_s19 = smov 0   ;;  %s3571_s20 = smov 0  }
   0xf   :  { %s3573_s21 = smov 0   ;;  %s3575_s22 = smov 0  }
  0x10 LB: > { %4950 = sst [smem:[#allocation31_spill]] %s3476_s20  ;;  %s4931_s23 = sadd.s32 4294967295, %s3484_s22   ;;  %s3484_s22 = sphi %s3575_s22, %s32_s22   ;;  %s3480_s21 = sphi %s3573_s21, %s5017_s21   ;;  %s3476_s20 = sphi %s3571_s20, %s5016_s20   ;;  %s3472_s19 = sphi %s3569_s19, %s5015_s19   ;;  %s3468_s18 = sphi %s3567_s18, %s5014_s18   ;;  %s3464_s17 = sphi %s3565_s17, %s5013_s17  }
  0x11   : > { %p2581_p0 = scmp.ge.s32.totalorder %s3484_s22, 1  ;;  %p3599_p1 = scmp.eq.s32.totalorder %s4931_s23, 0 }
  0x12   : > { %p315_p2 = scmp.lt.s32.totalorder %s3484_s22, 3  ;;  %s3486_s26 = smov [#allocation8]  }
  0x13   : > { %s4951_s24 = scalar_select %p3599_p1, 1, 0 }
  0x14   : > { %p3604_p3 = pnand %p2581_p0, %p315_p2  ;;  %s328_s27 = sshll.u32 %s3486_s26, 4  ;;  %s329_s27 = int_to_ptr.vmem [resolvable:$true] %s328_s27 }
  0x15   : > { %4952 = sst [smem:[#allocation32_spill]] %s4951_s24  ;;  %s3487_s28 = smov [#allocation11]  }
  0x16   : > { %s4953_s25 = scalar_select %p3604_p3, 1, 0 }
  0x17   : > { %p2825_p5 = pneg %p3604_p3  ;;  %s352_s29 = sshll.u32 %s3487_s28, 4  ;;  %s3617_s29 = int_to_ptr.vmem [resolvable:$true] %s352_s29 }
  0x18   : > { %4954 = sst [smem:[#allocation33_spill]] %s4953_s25  ;;  %s3488_s12 = smov [#allocation14]  }
  0x19   : > { %p3613_p6 = pnand %p2825_p5, %p3599_p1  ;;  %s3619_s13 = sshll.u32 %s3488_s12, 4  ;;  %s374_s13 = int_to_ptr.vmem [resolvable:$true] %s3619_s13 }
  0x1a   : > { %s4956_s1 = sld [smem:[#allocation45_spill]] }
  0x1b   : > { %p3629_p8 = pneg %p3613_p6 }
  0x20   : > { %s3072_s16 = scalar_lea.hbm %s4956_s1, 16 }
  0x21   : > { %p3073_p7 = scmp.ne.s32.totalorder %s4956_s1, %s3072_s16  ;;  %p3079_p11 = scmp.lt.u32.totalorder %s3072_s16, %s4956_s1 }
  0x23   : > { %p3075_p9 = pnand %p3629_p8, %p3073_p7 }
  0x25   : > { %p3076_p10 = pneg %p3075_p9 }
  0x27   : > { %p3081_p12 = pnand %p3079_p11, %p3076_p10 }
  0x29   : > { %3084 = shalt.err (!%p3081_p12)
}
  0x2a   : > { %s3085_s14 = scalar_lea.vmem %s329_s27, 16  ;;  %s3092_s23 = scalar_lea.vmem %s329_s27, 32 }
  0x2b   : > { %p3086_p13 = scmp.ne.s32.totalorder %s329_s27, %s3085_s14  ;;  %p3093_p5 = scmp.lt.s32.totalorder %s329_s27, %s329_s27 }
  0x2c   : > { %p3094_p4 = scmp.lt.s32.totalorder %s3092_s23, %s3085_s14 }
  0x2d   : > { %p3088_p0 = pnand %p3086_p13, %p3629_p8 }
  0x2e   : > { %p3095_p3 = por %p3094_p4, %p3093_p5 }
  0x2f   : > { %p3089_p2 = pneg %p3088_p0 }
  0x31   : > { %p3096_p1 = pnand %p3095_p3, %p3089_p2 }
  0x33   : > { %3099 = shalt.err (!%p3096_p1)
}
  0x34   : > { %2828 = dma.hbm_to_vmem [thread:$0]  (!%p3613_p6), %s4956_s1, 16, %s329_s27, [#allocation9]  }
  0x35   : > { %s4958_s3 = sld [smem:[#allocation46_spill]] }
  0x3b   : > { %s3100_s12 = scalar_lea.hbm %s4958_s3, 64 }
  0x3c   : > { %p3101_p7 = scmp.ne.s32.totalorder %s4958_s3, %s3100_s12  ;;  %p3107_p1 = scmp.lt.u32.totalorder %s3100_s12, %s4958_s3 }
  0x3e   : > { %p3103_p9 = pnand %p3101_p7, %p3629_p8 }
  0x40   : > { %p3104_p4 = pneg %p3103_p9 }
  0x42   : > { %p3109_p3 = pnand %p3107_p1, %p3104_p4 }
  0x44   : > { %3112 = shalt.err (!%p3109_p3)
}
  0x45   : > { %s3113_s27 = scalar_lea.vmem %s3617_s29, 64  ;;  %p3121_p13 = scmp.lt.s32.totalorder %s3617_s29, %s3617_s29 }
  0x46   : > { %p3114_p10 = scmp.ne.s32.totalorder %s3617_s29, %s3113_s27  ;;  %p3122_p0 = scmp.lt.s32.totalorder %s3113_s27, %s3113_s27 }
  0x48   : > { %p3116_p11 = pnand %p3114_p10, %p3629_p8  ;;  %p3123_p2 = por %p3122_p0, %p3121_p13 }
  0x4a   : > { %p3117_p12 = pneg %p3116_p11 }
  0x4c   : > { %p3124_p5 = pnand %p3123_p2, %p3117_p12 }
  0x4e   : > { %3127 = shalt.err (!%p3124_p5)
}
  0x4f   : > { %2834 = dma.hbm_to_vmem [thread:$0]  (!%p3613_p6), %s4958_s3, 64, %s3617_s29, [#allocation12]  }
  0x50   : > { %s3128_s11 = scalar_lea.hbm %s4924_s5, 2048 }
  0x51   : > { %p3129_p7 = scmp.ne.s32.totalorder %s4924_s5, %s3128_s11  ;;  %p3135_p1 = scmp.lt.u32.totalorder %s3128_s11, %s4924_s5 }
  0x53   : > { %p3131_p9 = pnand %p3129_p7, %p3629_p8 }
  0x55   : > { %p3132_p4 = pneg %p3131_p9 }
  0x57   : > { %p3137_p3 = pnand %p3135_p1, %p3132_p4 }
  0x59   : > { %3140 = shalt.err (!%p3137_p3)
}
  0x5a   : > { %s3141_s27 = scalar_lea.vmem %s374_s13, 2048  ;;  %p3149_p13 = scmp.lt.s32.totalorder %s374_s13, %s374_s13 }
  0x5b   : > { %p3142_p10 = scmp.ne.s32.totalorder %s374_s13, %s3141_s27  ;;  %p3150_p0 = scmp.lt.s32.totalorder %s3141_s27, %s3141_s27 }
  0x5d   : > { %p3144_p11 = pnand %p3142_p10, %p3629_p8  ;;  %p3151_p2 = por %p3150_p0, %p3149_p13 }
  0x5f   : > { %p3145_p12 = pneg %p3144_p11 }
  0x61   : > { %p3152_p5 = pnand %p3151_p2, %p3145_p12 }
  0x63   : > { %3155 = shalt.err (!%p3152_p5)
}
  0x64   : > { %s3489_s29 = smov 256   ;;  %s3490_s20 = smov 16  }
  0x65   : > { %2840 = dma.hbm_to_vmem [thread:$0]  (!%p3613_p6), %s4924_s5, 2048, %s374_s13, [#allocation15], %s3489_s29, %s3489_s29, %s3490_s20  }
  0x66   : > { %s3491_s26 = smov [#allocation17]   ;;  %s3492_s16 = smov [#allocation20]  }
  0x67   : > { %s400_s11 = sshll.u32 %s3491_s26, 4  ;;  %s424_s12 = sshll.u32 %s3492_s16, 4  ;;  %s401_s11 = int_to_ptr.vmem [resolvable:$true] %s400_s11  ;;  %s425_s12 = int_to_ptr.vmem [resolvable:$true] %s424_s12 }
  0x68   : > { %s3156_s27 = scalar_lea.hbm %s4926_s7, 16 }
  0x69   : > { %p3157_p7 = scmp.ne.s32.totalorder %s4926_s7, %s3156_s27  ;;  %p3163_p1 = scmp.lt.u32.totalorder %s3156_s27, %s4926_s7 }
  0x6b   : > { %p3159_p9 = pnand %p3157_p7, %p3629_p8 }
  0x6d   : > { %p3160_p4 = pneg %p3159_p9 }
  0x6f   : > { %p3165_p3 = pnand %p3163_p1, %p3160_p4 }
  0x71   : > { %3168 = shalt.err (!%p3165_p3)
}
  0x72   : > { %s3169_s13 = scalar_lea.vmem %s401_s11, 16  ;;  %s3176_s25 = scalar_lea.vmem %s401_s11, 32 }
  0x73   : > { %p3170_p10 = scmp.ne.s32.totalorder %s401_s11, %s3169_s13  ;;  %p3177_p13 = scmp.lt.s32.totalorder %s401_s11, %s401_s11 }
  0x74   : > { %p3178_p0 = scmp.lt.s32.totalorder %s3176_s25, %s3169_s13 }
  0x75   : > { %p3172_p11 = pnand %p3170_p10, %p3629_p8 }
  0x76   : > { %p3179_p2 = por %p3178_p0, %p3177_p13 }
  0x77   : > { %p3173_p12 = pneg %p3172_p11 }
  0x79   : > { %p3180_p5 = pnand %p3179_p2, %p3173_p12 }
  0x7b   : > { %3183 = shalt.err (!%p3180_p5)
}
  0x7c   : > { %2846 = dma.hbm_to_vmem [thread:$0]  (!%p3613_p6), %s4926_s7, 16, %s401_s11, [#allocation18]  }
  0x7d   : > { %s3184_s15 = scalar_lea.hbm %s4928_s9, 16 }
  0x7e   : > { %p3185_p7 = scmp.ne.s32.totalorder %s4928_s9, %s3184_s15  ;;  %p3191_p1 = scmp.lt.u32.totalorder %s3184_s15, %s4928_s9 }
  0x80   : > { %p3187_p9 = pnand %p3185_p7, %p3629_p8 }
  0x82   : > { %p3188_p4 = pneg %p3187_p9 }
  0x84   : > { %p3193_p3 = pnand %p3191_p1, %p3188_p4 }
  0x86   : > { %3196 = shalt.err (!%p3193_p3)
}
  0x87   : > { %s3197_s27 = scalar_lea.vmem %s425_s12, 16  ;;  %s3204_s11 = scalar_lea.vmem %s425_s12, 32 }
  0x88   : > { %p3198_p10 = scmp.ne.s32.totalorder %s425_s12, %s3197_s27  ;;  %p3205_p13 = scmp.lt.s32.totalorder %s425_s12, %s425_s12 }
  0x89   : > { %p3206_p0 = scmp.lt.s32.totalorder %s3204_s11, %s3197_s27 }
  0x8a   : > { %p3200_p11 = pnand %p3198_p10, %p3629_p8 }
  0x8b   : > { %p3207_p2 = por %p3206_p0, %p3205_p13 }
  0x8c   : > { %p3201_p12 = pneg %p3200_p11 }
  0x8e   : > { %p3208_p5 = pnand %p3207_p2, %p3201_p12 }
  0x90   : > { %3211 = shalt.err (!%p3208_p5)
}
  0x91   : > { %2852 = dma.hbm_to_vmem [thread:$0]  (!%p3613_p6), %s4928_s9, 16, %s425_s12, [#allocation21]  }
  0x92   : > { %s3493_s1 = smov [#allocation10]   ;;  %s3494_s0 = smov [#allocation13]  }
  0x93   : > { %s338_s3 = sshll.u32 %s3493_s1, 4  ;;  %s363_s24 = sshll.u32 %s3494_s0, 4  ;;  %s339_s3 = int_to_ptr.vmem [resolvable:$true] %s338_s3  ;;  %s364_s24 = int_to_ptr.vmem [resolvable:$true] %s363_s24 }
  0x94   : > { %s3212_s16 = scalar_lea.hbm %s4921_s2, 1024 }
  0x95   : > { %p3213_p7 = scmp.ne.s32.totalorder %s4921_s2, %s3212_s16  ;;  %p3219_p1 = scmp.lt.u32.totalorder %s3212_s16, %s4921_s2 }
  0x97   : > { %p3215_p9 = pnand %p3213_p7, %p3629_p8 }
  0x99   : > { %p3216_p4 = pneg %p3215_p9 }
  0x9b   : > { %p3221_p3 = pnand %p3219_p1, %p3216_p4 }
  0x9d   : > { %3224 = shalt.err (!%p3221_p3)
}
  0x9e   : > { %s3225_s12 = scalar_lea.vmem %s339_s3, 1024  ;;  %p3233_p13 = scmp.lt.s32.totalorder %s339_s3, %s339_s3 }
  0x9f   : > { %p3226_p10 = scmp.ne.s32.totalorder %s339_s3, %s3225_s12  ;;  %p3234_p0 = scmp.lt.s32.totalorder %s3225_s12, %s3225_s12 }
  0xa1   : > { %p3228_p11 = pnand %p3226_p10, %p3629_p8  ;;  %p3235_p2 = por %p3234_p0, %p3233_p13 }
  0xa3   : > { %p3229_p12 = pneg %p3228_p11 }
  0xa5   : > { %p3236_p5 = pnand %p3235_p2, %p3229_p12 }
  0xa7   : > { %3239 = shalt.err (!%p3236_p5)
}
  0xa8   : > { %2831 = dma.hbm_to_vmem [thread:$0]  (!%p3613_p6), %s4921_s2, 1024, %s339_s3, [#allocation9], %s3489_s29, %s3489_s29, %s3490_s20  }
  0xa9   : > { %s3240_s15 = scalar_lea.hbm %s4923_s4, 16 }
  0xaa   : > { %p3241_p7 = scmp.ne.s32.totalorder %s4923_s4, %s3240_s15  ;;  %p3247_p1 = scmp.lt.u32.totalorder %s3240_s15, %s4923_s4 }
  0xac   : > { %p3243_p9 = pnand %p3241_p7, %p3629_p8 }
  0xae   : > { %p3244_p4 = pneg %p3243_p9 }
  0xb0   : > { %p3249_p3 = pnand %p3247_p1, %p3244_p4 }
  0xb2   : > { %3252 = shalt.err (!%p3249_p3)
}
  0xb3   : > { %s3253_s27 = scalar_lea.vmem %s364_s24, 16  ;;  %s3260_s29 = scalar_lea.vmem %s364_s24, 32 }
  0xb4   : > { %p3254_p10 = scmp.ne.s32.totalorder %s364_s24, %s3253_s27  ;;  %p3261_p13 = scmp.lt.s32.totalorder %s364_s24, %s364_s24 }
  0xb5   : > { %p3262_p0 = scmp.lt.s32.totalorder %s3260_s29, %s3253_s27 }
  0xb6   : > { %p3256_p11 = pnand %p3254_p10, %p3629_p8 }
  0xb7   : > { %p3263_p2 = por %p3262_p0, %p3261_p13 }
  0xb8   : > { %p3257_p12 = pneg %p3256_p11 }
  0xba   : > { %p3264_p5 = pnand %p3263_p2, %p3257_p12 }
  0xbc   : > { %3267 = shalt.err (!%p3264_p5)
}
  0xbd   : > { %2837 = dma.hbm_to_vmem [thread:$0]  (!%p3613_p6), %s4923_s4, 16, %s364_s24, [#allocation12]  }
  0xbe   : > { %s3495_s11 = smov [#allocation16]   ;;  %s3268_s1 = scalar_lea.hbm %s4925_s6, 2048 }
  0xbf   : > { %s386_s12 = sshll.u32 %s3495_s11, 4  ;;  %p3269_p7 = scmp.ne.s32.totalorder %s4925_s6, %s3268_s1  ;;  %s387_s12 = int_to_ptr.vmem [resolvable:$true] %s386_s12 }
  0xc0   : > { %p3275_p1 = scmp.lt.u32.totalorder %s3268_s1, %s4925_s6 }
  0xc1   : > { %p3271_p9 = pnand %p3269_p7, %p3629_p8 }
  0xc3   : > { %p3272_p4 = pneg %p3271_p9 }
  0xc5   : > { %p3277_p3 = pnand %p3275_p1, %p3272_p4 }
  0xc7   : > { %3280 = shalt.err (!%p3277_p3)
}
  0xc8   : > { %s3281_s24 = scalar_lea.vmem %s387_s12, 2048  ;;  %p3289_p13 = scmp.lt.s32.totalorder %s387_s12, %s387_s12 }
  0xc9   : > { %p3282_p10 = scmp.ne.s32.totalorder %s387_s12, %s3281_s24  ;;  %p3290_p0 = scmp.lt.s32.totalorder %s3281_s24, %s3281_s24 }
  0xcb   : > { %p3284_p11 = pnand %p3282_p10, %p3629_p8  ;;  %p3291_p2 = por %p3290_p0, %p3289_p13 }
  0xcd   : > { %p3285_p12 = pneg %p3284_p11 }
  0xcf   : > { %p3292_p5 = pnand %p3291_p2, %p3285_p12 }
  0xd1   : > { %3295 = shalt.err (!%p3292_p5)
}
  0xd2   : > { %s3496_s14 = smov 128   ;;  %s3497_s23 = smov 8  }
  0xd3   : > { %2843 = dma.hbm_to_vmem [thread:$0]  (!%p3613_p6), %s4925_s6, 2048, %s387_s12, [#allocation15], %s3496_s14, %s3496_s14, %s3497_s23  }
  0xd4   : > { %s3498_s20 = smov [#allocation19]   ;;  %s3499_s11 = smov [#allocation22]  }
  0xd5   : > { %s410_s3 = sshll.u32 %s3498_s20, 4  ;;  %s434_s13 = sshll.u32 %s3499_s11, 4  ;;  %s411_s3 = int_to_ptr.vmem [resolvable:$true] %s410_s3  ;;  %s3786_s13 = int_to_ptr.vmem [resolvable:$true] %s434_s13 }
  0xd6   : > { %s3296_s0 = scalar_lea.hbm %s4927_s8, 256 }
  0xd7   : > { %p3297_p7 = scmp.ne.s32.totalorder %s4927_s8, %s3296_s0  ;;  %p3303_p1 = scmp.lt.u32.totalorder %s3296_s0, %s4927_s8 }
  0xd9   : > { %p3299_p9 = pnand %p3297_p7, %p3629_p8 }
  0xdb   : > { %p3300_p4 = pneg %p3299_p9 }
  0xdd   : > { %p3305_p3 = pnand %p3303_p1, %p3300_p4 }
  0xdf   : > { %3308 = shalt.err (!%p3305_p3)
}
  0xe0   : > { %s3309_s24 = scalar_lea.vmem %s411_s3, 256  ;;  %p3317_p13 = scmp.lt.s32.totalorder %s411_s3, %s411_s3 }
  0xe1   : > { %p3310_p10 = scmp.ne.s32.totalorder %s411_s3, %s3309_s24  ;;  %p3318_p0 = scmp.lt.s32.totalorder %s3309_s24, %s3309_s24 }
  0xe3   : > { %p3312_p11 = pnand %p3310_p10, %p3629_p8  ;;  %p3319_p2 = por %p3318_p0, %p3317_p13 }
  0xe5   : > { %p3313_p12 = pneg %p3312_p11 }
  0xe7   : > { %p3320_p5 = pnand %p3319_p2, %p3313_p12 }
  0xe9   : > { %3323 = shalt.err (!%p3320_p5)
}
  0xea   : > { %2849 = dma.hbm_to_vmem [thread:$0]  (!%p3613_p6), %s4927_s8, 256, %s411_s3, [#allocation18], %s3496_s14, %s3496_s14, %s3497_s23  }
  0xeb   : > { %s3324_s25 = scalar_lea.hbm %s4929_s10, 1024 }
  0xec   : > { %p3325_p7 = scmp.ne.s32.totalorder %s4929_s10, %s3324_s25  ;;  %p3331_p1 = scmp.lt.u32.totalorder %s3324_s25, %s4929_s10 }
  0xee   : > { %p3327_p9 = pnand %p3325_p7, %p3629_p8 }
  0xf0   : > { %p3328_p4 = pneg %p3327_p9 }
  0xf2   : > { %p3333_p3 = pnand %p3331_p1, %p3328_p4 }
  0xf4   : > { %3336 = shalt.err (!%p3333_p3)
}
  0xf5   : > { %s3337_s3 = scalar_lea.vmem %s3786_s13, 1024  ;;  %p3345_p13 = scmp.lt.s32.totalorder %s3786_s13, %s3786_s13 }
  0xf6   : > { %p3338_p10 = scmp.ne.s32.totalorder %s3786_s13, %s3337_s3  ;;  %p3346_p0 = scmp.lt.s32.totalorder %s3337_s3, %s3337_s3 }
  0xf8   : > { %p3340_p11 = pnand %p3338_p10, %p3629_p8  ;;  %p3347_p2 = por %p3346_p0, %p3345_p13 }
  0xfa   : > { %p3341_p12 = pneg %p3340_p11 }
  0xfc   : > { %p3348_p5 = pnand %p3347_p2, %p3341_p12 }
  0xfe   : > { %3351 = shalt.err (!%p3348_p5)
}
  0xff   : > { %s4959_s28 = sld [smem:[#allocation32_spill]]  ;;  %s2580_s30 = sadd.s32 4294967294, %s3484_s22  }
 0x100   : > { %2855 = dma.hbm_to_vmem [thread:$0]  (!%p3613_p6), %s4929_s10, 1024, %s3786_s13, [#allocation21], %s3496_s14, %s3496_s14, %s3497_s23  }
 0x101   : > { %s44_s24 = sadd.s32 1, %s3480_s21  ;;  %s53_s27 = sadd.s32 1, %s3472_s19 }
 0x102   : > { %p46_p8 = scmp.ge.s32.totalorder %s44_s24, 2  ;;  %p60_p7 = scmp.ne.s32.totalorder %s3472_s19, %s3468_s18 }
 0x103   : > { %p61_p9 = scmp.eq.s32.totalorder %s3484_s22, 0  ;;  %p66_p1 = scmp.ne.s32.totalorder %s3468_s18, %s3464_s17 }
 0x104   : > { %s5019_s24 = smov (%p46_p8, %s44_s24), 0  ;;  %s4961_s23 = sadd.s32 4294967295, %s3484_s22  }
 0x105   : > { %p3843_p4 = por %p61_p9, %p60_p7  ;;  %s48_s14 = ssub.s32 %s3480_s21, %s5019_s24 }
 0x106   : > { %p302_p6 = scmp.eq.s32.totalorder %s4961_s23, 1  ;;  %p51_p3 = scmp.eq.s32.totalorder %s48_s14, 0 }
 0x107   : > { %p4962_p10 = scmp.ne.s32.totalorder %s4959_s28, 0  ;;  %p308_p13 = scmp.eq.s32.totalorder %s2580_s30, 1 }
 0x108   : > { %p3859_p12 = por %p302_p6, %p60_p7  ;;  %p2874_p2 = scmp.lt.s32.totalorder %s3484_s22, 2 }
 0x109   : > { %p3855_p11 = por %p4962_p10, %p66_p1  ;;  %p3866_p0 = por %p308_p13, %p66_p1 }
 0x10a   : > { %s4964_s20 = scalar_select %p3859_p12, 1, 0 }
 0x10b   : > { %s3864_s11 = scalar_select %p51_p3, %s3472_s19, %s53_s27  }
 0x10c   : > { %s4965_s25 = scalar_select %p3866_p0, 1, 0 }
 0x10d   : > { %s448_s1 = sand.u32 1, %s3472_s19   ;;  %s2594_s0 = sshll.u32 %s3480_s21, 7 }
 0x10e   : > { %s2593_s15 = sshll.u32 %s448_s1, 3  ;;  %s4966_s16 = sld [smem:[#allocation44_spill]] }
 0x10f   : > { %s452_s28 = scalar_lea.vmem [#allocation5], %s2593_s15  ;;  %p3880_p5 = pnand %p2874_p2, %p3843_p4 }
 0x110   : > { %s460_s30 = sshll.u32 %s452_s28, 4  ;;  %s449_s14 = scalar_lea.sflag [#allocation6], %s448_s1  ;;  %s3884_s30 = int_to_ptr.vmem [resolvable:$true] %s460_s30 }
 0x111   : > { %p3354_p7 = pneg %p3880_p5 }
 0x114   : > { %s3876_s12 = scalar_lea.hbm %s4966_s16, %s2594_s0  ;;  %s3357_s29 = scalar_lea.hbm %s4966_s16, 256 }
 0x115   : > { %s3352_s23 = scalar_lea.hbm %s3876_s12, 128  ;;  %p3358_p4 = scmp.lt.u32.totalorder %s3876_s12, %s4966_s16 }
 0x116   : > { %p3353_p8 = scmp.ne.s32.totalorder %s3876_s12, %s3352_s23  ;;  %p3359_p6 = scmp.lt.u32.totalorder %s3357_s29, %s3352_s23 }
 0x117   : > { %p3361_p10 = scmp.lt.u32.totalorder %s3352_s23, %s3876_s12 }
 0x118   : > { %p3355_p9 = pnand %p3354_p7, %p3353_p8  ;;  %p3360_p3 = por %p3359_p6, %p3358_p4 }
 0x11a   : > { %p3356_p1 = pneg %p3355_p9  ;;  %p3362_p13 = por %p3361_p10, %p3360_p3 }
 0x11c   : > { %p3363_p2 = pnand %p3362_p13, %p3356_p1 }
 0x11e   : > { %3366 = shalt.err (!%p3363_p2)
}
 0x11f   : > { %s3367_s1 = scalar_lea.vmem %s3884_s30, 128  ;;  %s3500_s28 = smov [#allocation5]  }
 0x120   : > { %p3368_p8 = scmp.ne.s32.totalorder %s3884_s30, %s3367_s1  ;;  %s3372_s0 = sshll.u32 %s3500_s28, 4  ;;  %s3373_s0 = int_to_ptr.vmem [resolvable:$false] %s3372_s0 }
 0x121   : > { %s3374_s15 = scalar_lea.vmem %s3373_s0, 256  ;;  %p3375_p12 = scmp.lt.s32.totalorder %s3884_s30, %s3373_s0 }
 0x122   : > { %p3370_p9 = pnand %p3368_p8, %p3354_p7  ;;  %p3376_p4 = scmp.lt.s32.totalorder %s3374_s15, %s3367_s1 }
 0x124   : > { %p3371_p0 = pneg %p3370_p9  ;;  %p3377_p6 = por %p3376_p4, %p3375_p12 }
 0x126   : > { %p3378_p3 = pnand %p3377_p6, %p3371_p0 }
 0x128   : > { %3381 = shalt.err (!%p3378_p3)
}
 0x129   : > { %2859 = dma.hbm_to_vmem [thread:$0]  (!%p3880_p5), %s3876_s12, 128, %s3884_s30, %s449_s14  }
 0x12a   : > { %s4968_s23 = sld [smem:[#allocation33_spill]] }
 0x130   : > { %p4969_p1 = scmp.ne.s32.totalorder %s4968_s23, 0 }
 0x132   : > { %469 = sbr.rel (%p4969_p1) target bundleno = 1681 (0x691), region = 64 }
 0x139   : > { %s3914_s29 = sand.u32 1, %s3468_s18  }
 0x13a   : > { %s2596_s26 = sshll.u32 %s3914_s29, 3  ;;  %s472_s3 = scalar_lea.sflag [#allocation6], %s3914_s29 }
 0x13b   : > { %s3920_s1 = scalar_lea.vmem [#allocation5], %s2596_s26 }
 0x13c   : > { %3435 = dma.done.wait (%p3855_p11), %s472_s3, 128  }
 0x13d   : > { %3437 = vsyncadd (%p3855_p11), %s472_s3, 4294967168  ;;  %s4970_s12 = sld [smem:[#allocation32_spill]] }
 0x143   : > { %p4971_p12 = scmp.ne.s32.totalorder %s4970_s12, 0 }
 0x145   : > { %3439 = dma.done.wait (%p4971_p12), [#allocation9], 1040  }
 0x146   : > { %3441 = vsyncadd (%p4971_p12), [#allocation9], 4294966256 }
 0x147   : > { %3443 = dma.done.wait (%p4971_p12), [#allocation12], 80  }
 0x148   : > { %3445 = vsyncadd (%p4971_p12), [#allocation12], 4294967216 }
 0x149   : > { %3447 = dma.done.wait (%p4971_p12), [#allocation15], 4096  }
 0x14a   : > { %3449 = vsyncadd (%p4971_p12), [#allocation15], 4294963200 }
 0x14b   : > { %3451 = dma.done.wait (%p4971_p12), [#allocation18], 272  }
 0x14c   : > { %3453 = vsyncadd (%p4971_p12), [#allocation18], 4294967024 }
 0x14d   : > { %3455 = dma.done.wait (%p4971_p12), [#allocation21], 1040  }
 0x14e   : > { %3457 = vsyncadd (%p4971_p12), [#allocation21], 4294966256  ;;  %v554_v0 = vld [vmem:[%s3920_s1] sm:$0xff]  ;;  %vm597_vm0 = vcmask 261120   ;;  %v614_v5 = vld [vmem:[#allocation10] sm:$0xff]  ;;  %v3501_v10 = vmov 0.0  }
 0x14f   : > { %v596_v1 = vmul.f32 %v554_v0, %v554_v0  ;;  %v615_v3 = vld [vmem:[#allocation10 + $0x8] sm:$0xff]  ;;  %v617_v4 = vld [vmem:[#allocation10 + $0x18] sm:$0xff]  ;;  %v616_v7 = vld [vmem:[#allocation10 + $0x10] sm:$0xff]  ;;  %689 = vmatprep.mubr.f32.mxu0 %v3501_v10  ;;  %842 = vmatprep.mubr.f32.mxu1 %v3501_v10  ;;  %vm594_vm1 = vcmask 523264   ;;  %v3502_v50 = vmov 0.0|0.0   ;;  %vm3503_vm5 = vmmov 0  }
 0x150   : > { %v2721_v6 = vpack.c.bf16 %v617_v4, %v615_v3  ;;  %v619_v8 = vld [vmem:[#allocation10 + $0x28] sm:$0xff]  ;;  %v621_v9 = vld [vmem:[#allocation10 + $0x38] sm:$0xff]  ;;  %v2723_v11 = vpack.c.bf16 %v616_v7, %v614_v5  ;;  %v618_v13 = vld [vmem:[#allocation10 + $0x20] sm:$0xff]  ;;  %595 = vst.msk [vmem:[#allocation4] sm:$0xff] %vm594_vm1, %v3501_v10  ;;  %s5008_s13 = sld [smem:[#allocation31_spill]]  ;;  %s553_s27 = scalar_lea.vmem [#allocation23], %s2596_s26 }
 0x151   : > { %v598_v2 = vsel %vm597_vm0, %v596_v1, 0.0  ;;  %v2725_v12 = vpack.c.bf16 %v621_v9, %v619_v8  ;;  %v620_v14 = vld [vmem:[#allocation10 + $0x30] sm:$0xff]  ;;  %v2608_v20 = vld [vmem:[#allocation8] ss:$0 sm:$0xff]  ;;  %v759_v26 = vld [vmem:[#allocation14] sm:$0xff]  ;;  %v555_v8 = vlaneseq  ;;  %s2404_s14 = sshll.u32 %s553_s27, 4  ;;  %s4871_s14 = int_to_ptr.vmem [resolvable:$true] %s2404_s14 }
 0x152   : > { %599 = vadd.xlane.f32.xlu0 %v598_v2  ;;  %2722 = vmatprep.subr.bf16.mxu0 %v2721_v6  ;;  %v2727_v15 = vpack.c.bf16 %v620_v14, %v618_v13  ;;  %v760_v23 = vld [vmem:[#allocation14 + $0x8] sm:$0xff]  ;;  %v762_v24 = vld [vmem:[#allocation14 + $0x18] sm:$0xff]  ;;  %v761_v27 = vld [vmem:[#allocation14 + $0x10] sm:$0xff]  ;;  %s5009_s15 = sld [smem:[#allocation47_spill]]  ;;  %s2390_s3 = scalar_lea.sflag [#allocation7], %s3914_s29 }
 0x153   : > { %2724 = vmatpush1.bf16.msra.mxu0 %v2723_v11  ;;  %v2729_v25 = vpack.c.bf16 %v762_v24, %v760_v23  ;;  %v2731_v28 = vpack.c.bf16 %v761_v27, %v759_v26  ;;  %v764_v29 = vld [vmem:[#allocation14 + $0x28] sm:$0xff]  ;;  %v766_v30 = vld [vmem:[#allocation14 + $0x38] sm:$0xff]  ;;  %v763_v32 = vld [vmem:[#allocation14 + $0x20] sm:$0xff]  ;;  %v3962_v9 = vshrl.u32 %v555_v8, 7  ;;  %s3382_s12 = scalar_lea.vmem %s4871_s14, 128  ;;  %p5010_p0 = scmp.ne.s32.totalorder %s4964_s20, 0 }
 0x154   : > { %2726 = vmatprep.subr.bf16.mxu0 %v2725_v12  ;;  %v2733_v31 = vpack.c.bf16 %v766_v30, %v764_v29  ;;  %v765_v33 = vld [vmem:[#allocation14 + $0x30] sm:$0xff]  ;;  %v768_v35 = vld [vmem:[#allocation14 + $0x48] sm:$0xff]  ;;  %v770_v36 = vld [vmem:[#allocation14 + $0x58] sm:$0xff]  ;;  %p3383_p11 = scmp.ne.s32.totalorder %s4871_s14, %s3382_s12  ;;  %s3504_s26 = smov [#allocation23]  }
 0x155   : > { %2730 = vmatprep.subr.bf16.mxu1 %v2729_v25  ;;  %v2735_v34 = vpack.c.bf16 %v765_v33, %v763_v32  ;;  %v767_v37 = vld [vmem:[#allocation14 + $0x40] sm:$0xff]  ;;  %v2737_v38 = vpack.c.bf16 %v770_v36, %v768_v35  ;;  %v769_v39 = vld [vmem:[#allocation14 + $0x50] sm:$0xff]  ;;  %v772_v40 = vld [vmem:[#allocation14 + $0x68] sm:$0xff]  ;;  %vm713_vm2 = vcmp.lt.s32.totalorder %v3962_v9, 1  ;;  %vm726_vm3 = vcmp.lt.s32.totalorder %v3962_v9, 2 }
 0x156   : > { %2732 = vmatpush1.bf16.msra.mxu1 %v2731_v28  ;;  %v774_v41 = vld [vmem:[#allocation14 + $0x78] sm:$0xff]  ;;  %v2739_v42 = vpack.c.bf16 %v769_v39, %v767_v37  ;;  %v771_v44 = vld [vmem:[#allocation14 + $0x60] sm:$0xff]  ;;  %v773_v45 = vld [vmem:[#allocation14 + $0x70] sm:$0xff]  ;;  %vm739_vm4 = vcmp.lt.s32.totalorder %v3962_v9, 3  ;;  %s2638_s30 = sshll.u32 %s5008_s13, 7  ;;  %p3384_p5 = pnand %p3383_p11, %p5010_p0 }
 0x157   : > { %2728 = vmatpush1.bf16.msra.mxu0 %v2727_v15  ;;  %2734 = vmatprep.subr.bf16.mxu1 %v2733_v31  ;;  %v2741_v43 = vpack.c.bf16 %v774_v41, %v772_v40  ;;  %v2743_v46 = vpack.c.bf16 %v773_v45, %v771_v44  ;;  %v849_v47 = vld [vmem:[#allocation16] sm:$0xff]  ;;  %v850_v48 = vld [vmem:[#allocation16 + $0x8] sm:$0xff]  ;;  %v851_v49 = vld [vmem:[#allocation16 + $0x10] sm:$0xff]  ;;  %v3976_v41 = vand.u32 127, %v555_v8 }
 0x158   : > { %2745 = vmatprep.subr.bf16.mxu0 %v3502_v50  ;;  %v2746_v51 = vpack.c.bf16 %v850_v48, %v849_v47  ;;  %v852_v52 = vld [vmem:[#allocation16 + $0x18] sm:$0xff]  ;;  %v853_v54 = vld [vmem:[#allocation16 + $0x20] sm:$0xff]  ;;  %v854_v55 = vld [vmem:[#allocation16 + $0x28] sm:$0xff]  ;;  %s4869_s23 = scalar_lea.hbm %s5009_s15, %s2638_s30  ;;  %p3385_p7 = pneg %p3384_p5 }
 0x159   : > { %v2749_v53 = vpack.c.bf16 %v852_v52, %v851_v49  ;;  %v2752_v56 = vpack.c.bf16 %v854_v55, %v853_v54  ;;  %v855_v57 = vld [vmem:[#allocation16 + $0x30] sm:$0xff]  ;;  %v856_v58 = vld [vmem:[#allocation16 + $0x38] sm:$0xff]  ;;  %v857_v60 = vld [vmem:[#allocation16 + $0x40] sm:$0xff]  ;;  %vm1097_vm6 = vcmp.eq.s32.totalorder %v3976_v41, 1  ;;  %vm1015_vm7 = vcmp.eq.s32.totalorder %v3976_v41, 0 }
 0x15a   : > { %2736 = vmatpush1.bf16.msra.mxu1 %v2735_v34  ;;  %v2755_v59 = vpack.c.bf16 %v856_v58, %v855_v57  ;;  %v858_v61 = vld [vmem:[#allocation16 + $0x48] sm:$0xff]  ;;  %v859_v63 = vld [vmem:[#allocation16 + $0x50] sm:$0xff]  ;;  %v861_v2 = vld [vmem:[#allocation16 + $0x60] sm:$0xff]  ;;  %vm1179_vm8 = vcmp.eq.s32.totalorder %v3976_v41, 2  ;;  %vm1261_vm9 = vcmp.eq.s32.totalorder %v3976_v41, 3  ;;  %vm1343_vm10 = vcmp.eq.s32.totalorder %v3976_v41, 4 }
 0x15b   : > { %2738 = vmatprep.subr.bf16.mxu1 %v2737_v38  ;;  %v2758_v62 = vpack.c.bf16 %v858_v61, %v857_v60  ;;  %v862_v3 = vld [vmem:[#allocation16 + $0x68] sm:$0xff]  ;;  %v863_v5 = vld [vmem:[#allocation16 + $0x70] sm:$0xff]  ;;  %v864_v6 = vld [vmem:[#allocation16 + $0x78] sm:$0xff]  ;;  %vm1425_vm11 = vcmp.eq.s32.totalorder %v3976_v41, 5  ;;  %vm1507_vm12 = vcmp.eq.s32.totalorder %v3976_v41, 6  ;;  %vm1589_vm13 = vcmp.eq.s32.totalorder %v3976_v41, 7 }
 0x15c   : > { %v2764_v4 = vpack.c.bf16 %v862_v3, %v861_v2  ;;  %v2767_v7 = vpack.c.bf16 %v864_v6, %v863_v5  ;;  %v696_v11 = vld [vmem:[#allocation4] sm:$0xff]  ;;  %v2610_v12 = vld [vmem:[#allocation11 + $0x3] ss:$0 sm:$0xff]  ;;  %v2613_v27 = vld [vmem:[#allocation11 + $0x1] ss:$0 sm:$0xff]  ;;  %vm1671_vm14 = vcmp.eq.s32.totalorder %v3976_v41, 8 }
 0x15d   : > { %v712_v13 = vrot.slane %v696_v11, 7  ;;  %v725_v14 = vrot.slane %v696_v11, 6  ;;  %v2614_v30 = vld [vmem:[#allocation11] ss:$0 sm:$0xff]  ;;  %vm1753_vm15 = vcmp.eq.s32.totalorder %v3976_v41, 9 }
 0x15e   : > { %2740 = vmatpush1.bf16.msra.mxu1 %v2739_v42 }
 0x15f   : > { %2742 = vmatprep.subr.bf16.mxu1 %v2741_v43 }
 0x162   : > { %2744 = vmatpush1.bf16.msra.mxu1 %v2743_v46 }
 0x163   : > { %2769 = vmatprep.subr.bf16.mxu1 %v3502_v50 }
 0x1df   : > { %v600_v16 = vpop.xlane.xlu0 %599 }
 0x1e0   : > { %v602_v17 = vmul.f32 0.03125, %v600_v16  ;;  %v2611_v16 = vld [vmem:[#allocation13] ss:$0 sm:$0xff] }
 0x1e2   : > { %v603_v18 = vadd.f32 1e-05, %v602_v17  ;;  %v738_v17 = vrot.slane %v696_v11, 5 }
 0x1e4   : > { %2951 = vrsqrt.f32 %v603_v18 }
 0x1ee   : > { %v2952_v19 = vpop.eup %2951 }
 0x1ef   : > { %v605_v21 = vmul.f32 %v2952_v19, %v554_v0  ;;  %v860_v0 = vld [vmem:[#allocation16 + $0x58] sm:$0xff] }
 0x1f0   : > { %v2761_v1 = vpack.c.bf16 %v860_v0, %v859_v63 }
 0x1f1   : > { %v613_v22 = vmul.f32 %v2608_v20, %v605_v21  ;;  %v2612_v20 = vld [vmem:[#allocation11 + $0x2] ss:$0 sm:$0xff] }
 0x1f3   : > { %2609 = vmatmul.mubr.msk.f32.vlgmr.msra.gmra.mrb[0].mxu0 %vm597_vm0, %v613_v22 }
 0x1f4   : > { %2747 = vmatpush3.bf16.msra.mxu0 %v2746_v51  ;;  %2699 = vmatprep.mubr.msk.f32.mxu0 %vm3503_vm5, %v3501_v10 }
 0x1f5   : > { %2748 = vmatprep.subr.bf16.mxu0 %v3502_v50 }
 0x1f8   : > { %2750 = vmatpush3.bf16.msra.mxu0 %v2749_v53 }
 0x1f9   : > { %2751 = vmatprep.subr.bf16.mxu0 %v3502_v50 }
 0x1fc   : > { %2753 = vmatpush3.bf16.msra.mxu0 %v2752_v56 }
 0x1fd   : > { %2754 = vmatprep.subr.bf16.mxu0 %v3502_v50 }
 0x200   : > { %2756 = vmatpush3.bf16.msra.mxu0 %v2755_v59 }
 0x201   : > { %2757 = vmatprep.subr.bf16.mxu0 %v3502_v50 }
 0x204   : > { %2759 = vmatpush3.bf16.msra.mxu0 %v2758_v62 }
 0x205   : > { %2760 = vmatprep.subr.bf16.mxu0 %v3502_v50 }
 0x208   : > { %2762 = vmatpush3.bf16.msra.mxu0 %v2761_v1 }
 0x209   : > { %2763 = vmatprep.subr.bf16.mxu0 %v3502_v50 }
 0x20c   : > { %2765 = vmatpush3.bf16.msra.mxu0 %v2764_v4 }
 0x20d   : > { %2766 = vmatprep.subr.bf16.mxu0 %v3502_v50 }
 0x210   : > { %2768 = vmatpush3.bf16.msra.mxu0 %v2767_v7 }
 0x2c6   : > { %v691_v15 = vpop.f32.mrb[0].mxu0 }
 0x2c7   : > { %v703_v18 = vmul.f32 %v2610_v12, %v691_v15  ;;  %v711_v19 = vrot.slane %v691_v15, 7  ;;  %v724_v21 = vrot.slane %v691_v15, 6  ;;  %v737_v22 = vrot.slane %v691_v15, 5  ;;  %751 = vst.msk [vmem:[#allocation4] sm:$0xff] %vm594_vm1, %v691_v15  ;;  %v3967_v23 = vpop.f32.mrb[1].mxu0 }
 0x2c8   : > { %4972 = vst [vmem:[#allocation34_spill] sm:$0xff] %v3967_v23 }
 0x2c9   : > { %v710_v24 = vadd.f32 %v2611_v16, %v703_v18  ;;  %v716_v25 = vsel %vm713_vm2, %v712_v13, %v711_v19  ;;  %v729_v26 = vsel %vm726_vm3, %v725_v14, %v724_v21  ;;  %v742_v29 = vsel %vm739_vm4, %v738_v17, %v737_v22 }
 0x2ca   : > { %v722_v28 = vmul.f32 %v2612_v20, %v716_v25  ;;  %v735_v32 = vmul.f32 %v2613_v27, %v729_v26  ;;  %v748_v34 = vmul.f32 %v2614_v30, %v742_v29  ;;  %vm1835_vm2 = vcmp.eq.s32.totalorder %v3976_v41, 10 }
 0x2cb   : > { %vm1917_vm3 = vcmp.eq.s32.totalorder %v3976_v41, 11  ;;  %vm1020_vm4 = vcmp.eq.s32.totalorder %v3976_v41, 16 }
 0x2cc   : > { %v723_v31 = vadd.f32 %v722_v28, %v710_v24 }
 0x2ce   : > { %v736_v33 = vadd.f32 %v735_v32, %v723_v31 }
 0x2d0   : > { %v749_v35 = vadd.f32 %v748_v34, %v736_v33 }
 0x2d2   : > { %v2615_v36 = vmul.f32 -1.442695, %v749_v35 }
 0x2d4   : > { %2953 = vpow2.f32 %v2615_v36 }
 0x2de   : > { %v2954_v37 = vpop.eup %2953 }
 0x2df   : > { %v755_v38 = vadd.f32 1.0, %v2954_v37 }
 0x2e1   : > { %2955 = vrcp.f32 %v755_v38 }
 0x2eb   : > { %v2956_v39 = vpop.eup %2955 }
 0x2ec   : > { %v3970_v40 = vmul.f32 %v2956_v39, %v749_v35 }
 0x2ee   : > { %2616 = vmatmul.mubr.msk.f32.vlgmr.msra.gmra.mrb[0].mxu1 %vm594_vm1, %v3970_v40 }
 0x2ef   : > { %2718 = vmatprep.mubr.msk.f32.mxu1 %vm3503_vm5, %v3501_v10  ;;  %vm1999_vm5 = vcmp.eq.s32.totalorder %v3976_v41, 12 }
 0x3c1   : > { %v844_v42 = vpop.f32.mrb[0].mxu1 }
 0x3c2   : > { %v3980_v43 = vpop.f32.mrb[1].mxu1  ;;  %2700 = vmatmul.mubr.f32.vlgmr.msra.gmra.mrb[2].mxu0 %v844_v42 }
 0x3c3   : > { %v1098_v44 = vsel %vm1097_vm6, %v3980_v43, 0.0  ;;  %v1016_v45 = vsel %vm1015_vm7, %v3980_v43, 0.0  ;;  %v1180_v48 = vsel %vm1179_vm8, %v3980_v43, 0.0  ;;  %v1262_v49 = vsel %vm1261_vm9, %v3980_v43, 0.0 }
 0x3c4   : > { %v1099_v46 = vsel %vm597_vm0, %v1098_v44, 0.0  ;;  %v1017_v47 = vsel %vm597_vm0, %v1016_v45, 0.0  ;;  %v1181_v51 = vsel %vm597_vm0, %v1180_v48, 0.0  ;;  %v1263_v52 = vsel %vm597_vm0, %v1262_v49, 0.0 }
 0x3c5   : > { %1100 = vadd.xlane.f32.xlu1 %v1099_v46  ;;  %1018 = vadd.xlane.f32.xlu0 %v1017_v47  ;;  %v1344_v53 = vsel %vm1343_vm10, %v3980_v43, 0.0  ;;  %v1426_v54 = vsel %vm1425_vm11, %v3980_v43, 0.0  ;;  %v1508_v57 = vsel %vm1507_vm12, %v3980_v43, 0.0  ;;  %v1590_v58 = vsel %vm1589_vm13, %v3980_v43, 0.0 }
 0x3c6   : > { %v1345_v55 = vsel %vm597_vm0, %v1344_v53, 0.0  ;;  %v1427_v56 = vsel %vm597_vm0, %v1426_v54, 0.0  ;;  %v1509_v59 = vsel %vm597_vm0, %v1508_v57, 0.0  ;;  %v1591_v60 = vsel %vm597_vm0, %v1590_v58, 0.0  ;;  %v2307_v53 = vld [vmem:[#allocation22 + $0x8] sm:$0xff]  ;;  %v2308_v54 = vld [vmem:[#allocation22 + $0x10] sm:$0xff] }
 0x3c7   : > { %v1672_v61 = vsel %vm1671_vm14, %v3980_v43, 0.0  ;;  %v1754_v62 = vsel %vm1753_vm15, %v3980_v43, 0.0  ;;  %v1836_v1 = vsel %vm1835_vm2, %v3980_v43, 0.0  ;;  %v1918_v2 = vsel %vm1917_vm3, %v3980_v43, 0.0  ;;  %v2311_v57 = vld [vmem:[#allocation22 + $0x28] sm:$0xff] }
 0x3c8   : > { %v1673_v63 = vsel %vm597_vm0, %v1672_v61, 0.0  ;;  %v1755_v0 = vsel %vm597_vm0, %v1754_v62, 0.0  ;;  %v1837_v3 = vsel %vm597_vm0, %v1836_v1, 0.0  ;;  %v1919_v4 = vsel %vm597_vm0, %v1918_v2, 0.0  ;;  %v2617_v62 = vld [vmem:[#allocation17] ss:$0 sm:$0xff] }
 0x3c9   : > { %1182 = vadd.xlane.f32.xlu1 %v1181_v51  ;;  %1264 = vadd.xlane.f32.xlu0 %v1263_v52  ;;  %v1021_v5 = vsel %vm1020_vm4, %v3980_v43, 0.0  ;;  %v2000_v6 = vsel %vm1999_vm5, %v3980_v43, 0.0  ;;  %vm1102_vm6 = vcmp.eq.s32.totalorder %v3976_v41, 17  ;;  %vm2081_vm7 = vcmp.eq.s32.totalorder %v3976_v41, 13  ;;  %v2306_v52 = vld [vmem:[#allocation22] sm:$0xff] }
 0x3ca   : > { %v1022_v7 = vsel %vm597_vm0, %v1021_v5, 0.0  ;;  %v2001_v8 = vsel %vm597_vm0, %v2000_v6, 0.0  ;;  %v1103_v11 = vsel %vm1102_vm6, %v3980_v43, 0.0  ;;  %v2082_v12 = vsel %vm2081_vm7, %v3980_v43, 0.0 }
 0x3cb   : > { %vm1184_vm8 = vcmp.eq.s32.totalorder %v3976_v41, 18  ;;  %vm2163_vm9 = vcmp.eq.s32.totalorder %v3976_v41, 14  ;;  %v1104_v13 = vsel %vm597_vm0, %v1103_v11, 0.0  ;;  %v2083_v14 = vsel %vm597_vm0, %v2082_v12, 0.0 }
 0x3cc   : > { %v1185_v15 = vsel %vm1184_vm8, %v3980_v43, 0.0  ;;  %v2164_v16 = vsel %vm2163_vm9, %v3980_v43, 0.0  ;;  %vm1266_vm10 = vcmp.eq.s32.totalorder %v3976_v41, 19  ;;  %vm2245_vm11 = vcmp.eq.s32.totalorder %v3976_v41, 15 }
 0x3cd   : > { %1346 = vadd.xlane.f32.xlu1 %v1345_v55  ;;  %1428 = vadd.xlane.f32.xlu0 %v1427_v56  ;;  %v1186_v17 = vsel %vm597_vm0, %v1185_v15, 0.0  ;;  %v2165_v18 = vsel %vm597_vm0, %v2164_v16, 0.0  ;;  %v1267_v19 = vsel %vm1266_vm10, %v3980_v43, 0.0  ;;  %v2246_v20 = vsel %vm2245_vm11, %v3980_v43, 0.0  ;;  %v2309_v55 = vld [vmem:[#allocation22 + $0x18] sm:$0xff]  ;;  %v2310_v56 = vld [vmem:[#allocation22 + $0x20] sm:$0xff] }
 0x3ce   : > { %vm1348_vm12 = vcmp.eq.s32.totalorder %v3976_v41, 20  ;;  %vm1430_vm13 = vcmp.eq.s32.totalorder %v3976_v41, 21  ;;  %v1268_v21 = vsel %vm597_vm0, %v1267_v19, 0.0  ;;  %v2247_v22 = vsel %vm597_vm0, %v2246_v20, 0.0 }
 0x3cf   : > { %v1349_v24 = vsel %vm1348_vm12, %v3980_v43, 0.0  ;;  %v1431_v25 = vsel %vm1430_vm13, %v3980_v43, 0.0  ;;  %vm1512_vm14 = vcmp.eq.s32.totalorder %v3976_v41, 22  ;;  %vm1594_vm15 = vcmp.eq.s32.totalorder %v3976_v41, 23 }
 0x3d0   : > { %v1350_v26 = vsel %vm597_vm0, %v1349_v24, 0.0  ;;  %v1432_v27 = vsel %vm597_vm0, %v1431_v25, 0.0  ;;  %v1513_v28 = vsel %vm1512_vm14, %v3980_v43, 0.0  ;;  %v1595_v29 = vsel %vm1594_vm15, %v3980_v43, 0.0 }
 0x3d1   : > { %1510 = vadd.xlane.f32.xlu1 %v1509_v59  ;;  %1592 = vadd.xlane.f32.xlu0 %v1591_v60  ;;  %vm1676_vm2 = vcmp.eq.s32.totalorder %v3976_v41, 24  ;;  %vm1758_vm3 = vcmp.eq.s32.totalorder %v3976_v41, 25  ;;  %v1514_v30 = vsel %vm597_vm0, %v1513_v28, 0.0  ;;  %v1596_v31 = vsel %vm597_vm0, %v1595_v29, 0.0  ;;  %v2312_v59 = vld [vmem:[#allocation22 + $0x30] sm:$0xff]  ;;  %v2313_v60 = vld [vmem:[#allocation22 + $0x38] sm:$0xff] }
 0x3d2   : > { %v1677_v32 = vsel %vm1676_vm2, %v3980_v43, 0.0  ;;  %v1759_v33 = vsel %vm1758_vm3, %v3980_v43, 0.0  ;;  %vm1840_vm4 = vcmp.eq.s32.totalorder %v3976_v41, 26  ;;  %vm1922_vm5 = vcmp.eq.s32.totalorder %v3976_v41, 27 }
 0x3d3   : > { %v1678_v34 = vsel %vm597_vm0, %v1677_v32, 0.0  ;;  %v1760_v35 = vsel %vm597_vm0, %v1759_v33, 0.0  ;;  %v1841_v36 = vsel %vm1840_vm4, %v3980_v43, 0.0  ;;  %v1923_v37 = vsel %vm1922_vm5, %v3980_v43, 0.0 }
 0x3d4   : > { %vm2004_vm6 = vcmp.eq.s32.totalorder %v3976_v41, 28  ;;  %vm2086_vm7 = vcmp.eq.s32.totalorder %v3976_v41, 29  ;;  %v1842_v38 = vsel %vm597_vm0, %v1841_v36, 0.0  ;;  %v1924_v39 = vsel %vm597_vm0, %v1923_v37, 0.0  ;;  %v2623_v37 = vld [vmem:[#allocation19 + $0x4] ss:$0 sm:$0xff] }
 0x3d5   : > { %1674 = vadd.xlane.f32.xlu1 %v1673_v63  ;;  %1756 = vadd.xlane.f32.xlu0 %v1755_v0  ;;  %v2005_v42 = vsel %vm2004_vm6, %v3980_v43, 0.0  ;;  %v2087_v44 = vsel %vm2086_vm7, %v3980_v43, 0.0  ;;  %vm2168_vm8 = vcmp.eq.s32.totalorder %v3976_v41, 30  ;;  %vm2250_vm9 = vcmp.eq.s32.totalorder %v3976_v41, 31 }
 0x3d6   : > { %v2006_v45 = vsel %vm597_vm0, %v2005_v42, 0.0  ;;  %v2088_v46 = vsel %vm597_vm0, %v2087_v44, 0.0  ;;  %v2169_v47 = vsel %vm2168_vm8, %v3980_v43, 0.0  ;;  %v2251_v48 = vsel %vm2250_vm9, %v3980_v43, 0.0 }
 0x3d7   : > { %v2170_v49 = vsel %vm597_vm0, %v2169_v47, 0.0  ;;  %v2252_v51 = vsel %vm597_vm0, %v2251_v48, 0.0  ;;  %vm561_vm10 = vcmask 516096   ;;  %v2770_v41 = vpack.c.bf16 %v2307_v53, %v2306_v52 }
 0x3d8   : > { %562 = vst.msk [vmem:[#allocation2] sm:$0x1] %vm561_vm10, %v3501_v10  ;;  %563 = vst.msk [vmem:[#allocation2 + $0x1] sm:$0x1] %vm561_vm10, %v3501_v10  ;;  %v2773_v43 = vpack.c.bf16 %v2309_v55, %v2308_v54  ;;  %v2776_v58 = vpack.c.bf16 %v2311_v57, %v2310_v56  ;;  %v2779_v61 = vpack.c.bf16 %v2313_v60, %v2312_v59  ;;  %vm963_vm13 = vcmp.eq.s32.totalorder %v3962_v9, 0 }
 0x3d9   : > { %1838 = vadd.xlane.f32.xlu1 %v1837_v3  ;;  %1920 = vadd.xlane.f32.xlu0 %v1919_v4  ;;  %564 = vst.msk [vmem:[#allocation2 + $0x2] sm:$0x1] %vm561_vm10, %v3501_v10  ;;  %565 = vst.msk [vmem:[#allocation2 + $0x3] sm:$0x1] %vm561_vm10, %v3501_v10  ;;  %vm988_vm14 = vcmp.ge.s32.totalorder %v3962_v9, 1  ;;  %vm994_vm15 = vcmp.ge.s32.totalorder %v3962_v9, 2 }
 0x3da   : > { %566 = vst.msk [vmem:[#allocation2 + $0x4] sm:$0x1] %vm561_vm10, %v3501_v10  ;;  %567 = vst.msk [vmem:[#allocation2 + $0x5] sm:$0x1] %vm561_vm10, %v3501_v10  ;;  %2771 = vmatpush3.bf16.msra.mxu1 %v2770_v41  ;;  %v2625_v41 = vld [vmem:[#allocation19 + $0x6] ss:$0 sm:$0xff] }
 0x3db   : > { %568 = vst.msk [vmem:[#allocation2 + $0x6] sm:$0x1] %vm561_vm10, %v3501_v10  ;;  %569 = vst.msk [vmem:[#allocation2 + $0x7] sm:$0x1] %vm561_vm10, %v3501_v10  ;;  %2772 = vmatprep.subr.bf16.mxu1 %v3502_v50  ;;  %vm1000_vm2 = vcmp.ge.s32.totalorder %v3962_v9, 4 }
 0x3dc   : > { %570 = vst.msk [vmem:[#allocation2 + $0x8] sm:$0x1] %vm561_vm10, %v3501_v10  ;;  %571 = vst.msk [vmem:[#allocation2 + $0x9] sm:$0x1] %vm561_vm10, %v3501_v10 }
 0x3dd   : > { %1023 = vadd.xlane.f32.xlu1 %v1022_v7  ;;  %2002 = vadd.xlane.f32.xlu0 %v2001_v8  ;;  %572 = vst.msk [vmem:[#allocation2 + $0xa] sm:$0x1] %vm561_vm10, %v3501_v10  ;;  %573 = vst.msk [vmem:[#allocation2 + $0xb] sm:$0x1] %vm561_vm10, %v3501_v10 }
 0x3de   : > { %574 = vst.msk [vmem:[#allocation2 + $0xc] sm:$0x1] %vm561_vm10, %v3501_v10  ;;  %575 = vst.msk [vmem:[#allocation2 + $0xd] sm:$0x1] %vm561_vm10, %v3501_v10  ;;  %2774 = vmatpush3.bf16.msra.mxu1 %v2773_v43 }
 0x3df   : > { %576 = vst.msk [vmem:[#allocation2 + $0xe] sm:$0x1] %vm561_vm10, %v3501_v10  ;;  %577 = vst.msk [vmem:[#allocation2 + $0xf] sm:$0x1] %vm561_vm10, %v3501_v10  ;;  %2775 = vmatprep.subr.bf16.mxu1 %v3502_v50  ;;  %v4156_v24 = vld [vmem:[#allocation2 + $0x1] sm:$0x1] }
 0x3e0   : > { %578 = vst.msk [vmem:[#allocation3] sm:$0x1] %vm561_vm10, %v3501_v10  ;;  %579 = vst.msk [vmem:[#allocation3 + $0x1] sm:$0x1] %vm561_vm10, %v3501_v10 }
 0x3e1   : > { %1105 = vadd.xlane.f32.xlu1 %v1104_v13  ;;  %2084 = vadd.xlane.f32.xlu0 %v2083_v14  ;;  %580 = vst.msk [vmem:[#allocation3 + $0x2] sm:$0x1] %vm561_vm10, %v3501_v10  ;;  %581 = vst.msk [vmem:[#allocation3 + $0x3] sm:$0x1] %vm561_vm10, %v3501_v10  ;;  %v4148_v13 = vsub.s32 0, %v3962_v9 }
 0x3e2   : > { %582 = vst.msk [vmem:[#allocation3 + $0x4] sm:$0x1] %vm561_vm10, %v3501_v10  ;;  %583 = vst.msk [vmem:[#allocation3 + $0x5] sm:$0x1] %vm561_vm10, %v3501_v10  ;;  %2777 = vmatpush3.bf16.msra.mxu1 %v2776_v58  ;;  %v2618_v14 = vld [vmem:[#allocation20] ss:$0 sm:$0xff] }
 0x3e3   : > { %584 = vst.msk [vmem:[#allocation3 + $0x6] sm:$0x1] %vm561_vm10, %v3501_v10  ;;  %585 = vst.msk [vmem:[#allocation3 + $0x7] sm:$0x1] %vm561_vm10, %v3501_v10  ;;  %2778 = vmatprep.subr.bf16.mxu1 %v3502_v50  ;;  %v4162_v28 = vld [vmem:[#allocation2 + $0x4] sm:$0x1]  ;;  %v4167_v33 = vmul.f32 %v2618_v14, %v3970_v40 }
 0x3e4   : > { %586 = vst.msk [vmem:[#allocation3 + $0x8] sm:$0x1] %vm561_vm10, %v3501_v10  ;;  %587 = vst.msk [vmem:[#allocation3 + $0x9] sm:$0x1] %vm561_vm10, %v3501_v10  ;;  %v4164_v32 = vld [vmem:[#allocation2 + $0x5] sm:$0x1] }
 0x3e5   : > { %1187 = vadd.xlane.f32.xlu1 %v1186_v17  ;;  %2166 = vadd.xlane.f32.xlu0 %v2165_v18  ;;  %588 = vst.msk [vmem:[#allocation3 + $0xa] sm:$0x1] %vm561_vm10, %v3501_v10  ;;  %589 = vst.msk [vmem:[#allocation3 + $0xb] sm:$0x1] %vm561_vm10, %v3501_v10  ;;  %v4150_v17 = vld [vmem:[#allocation2] sm:$0x1] }
 0x3e6   : > { %590 = vst.msk [vmem:[#allocation3 + $0xc] sm:$0x1] %vm561_vm10, %v3501_v10  ;;  %591 = vst.msk [vmem:[#allocation3 + $0xd] sm:$0x1] %vm561_vm10, %v3501_v10  ;;  %2780 = vmatpush3.bf16.msra.mxu1 %v2779_v61  ;;  %v4185_v47 = vld [vmem:[#allocation2 + $0x7] sm:$0x1] }
 0x3e7   : > { %592 = vst.msk [vmem:[#allocation3 + $0xe] sm:$0x1] %vm561_vm10, %v3501_v10  ;;  %593 = vst.msk [vmem:[#allocation3 + $0xf] sm:$0x1] %vm561_vm10, %v3501_v10 }
 0x3e8   : > { %v4192_v53 = vld [vmem:[#allocation3 + $0x2] sm:$0x1]  ;;  %v4203_v58 = vld [vmem:[#allocation3 + $0x3] sm:$0x1] }
 0x3e9   : > { %1269 = vadd.xlane.f32.xlu1 %v1268_v21  ;;  %2248 = vadd.xlane.f32.xlu0 %v2247_v22  ;;  %v2619_v21 = vld [vmem:[#allocation19] ss:$0 sm:$0xff]  ;;  %v2620_v22 = vld [vmem:[#allocation19 + $0x1] ss:$0 sm:$0xff]  ;;  %v4206_v60 = vld [vmem:[#allocation3 + $0x4] sm:$0x1] }
 0x3ed   : > { %1351 = vadd.xlane.f32.xlu1 %v1350_v26  ;;  %1433 = vadd.xlane.f32.xlu0 %v1432_v27  ;;  %v4158_v26 = vld [vmem:[#allocation2 + $0x2] sm:$0x1]  ;;  %v4160_v27 = vld [vmem:[#allocation2 + $0x3] sm:$0x1] }
 0x3f1   : > { %1515 = vadd.xlane.f32.xlu1 %v1514_v30  ;;  %1597 = vadd.xlane.f32.xlu0 %v1596_v31  ;;  %v2621_v30 = vld [vmem:[#allocation19 + $0x2] ss:$0 sm:$0xff]  ;;  %v2622_v31 = vld [vmem:[#allocation19 + $0x3] ss:$0 sm:$0xff] }
 0x3f5   : > { %1679 = vadd.xlane.f32.xlu1 %v1678_v34  ;;  %1761 = vadd.xlane.f32.xlu0 %v1760_v35  ;;  %v4171_v35 = vld [vmem:[#allocation3] sm:$0x1] }
 0x3f9   : > { %1843 = vadd.xlane.f32.xlu1 %v1842_v38  ;;  %1925 = vadd.xlane.f32.xlu0 %v1924_v39  ;;  %v4175_v38 = vld [vmem:[#allocation2 + $0x6] sm:$0x1] }
 0x3fd   : > { %2007 = vadd.xlane.f32.xlu1 %v2006_v45  ;;  %2089 = vadd.xlane.f32.xlu0 %v2088_v46  ;;  %v2624_v46 = vld [vmem:[#allocation19 + $0x5] ss:$0 sm:$0xff] }
 0x401   : > { %2171 = vadd.xlane.f32.xlu1 %v2170_v49  ;;  %2253 = vadd.xlane.f32.xlu0 %v2252_v51  ;;  %v4189_v51 = vld [vmem:[#allocation3 + $0x1] sm:$0x1] }
 0x452   : > { %v4143_v7 = vpop.xlane.xlu1 %1100  ;;  %v4145_v8 = vpop.xlane.xlu0 %1018 }
 0x456   : > { %v4152_v18 = vpop.xlane.xlu1 %1182  ;;  %v4154_v19 = vpop.xlane.xlu0 %1264 }
 0x45a   : > { %v4196_v55 = vpop.xlane.xlu1 %1346  ;;  %v4198_v43 = vpop.xlane.xlu0 %1428 }
 0x495   : > { %v938_v63 = vpop.f32.mrb[2].mxu0 }
 0x496   : > { %v939_v10 = vadd.f32 %v2617_v62, %v938_v63  ;;  %v2701_v0 = vpop.f32.mrb[3].mxu0  ;;  %v2626_v62 = vld [vmem:[#allocation19 + $0x7] ss:$0 sm:$0xff]  ;;  %v4210_v63 = vld [vmem:[#allocation2 + $0x8] sm:$0x1] }
 0x498   : > { %v945_v1 = vand.u32 2147483647, %v939_v10  ;;  %v942_v20 = vmax.f32 %v939_v10, 0.0  ;;  %vm943_vm12 = vcmp.ne.f32.partialorder %v939_v10, %v939_v10 }
 0x49a   : > { %v946_v2 = vsub.f32 0.0, %v945_v1 }
 0x49c   : > { %v947_v3 = vmul.f32 1.442695, %v946_v2 }
 0x49e   : > { %2957 = vpow2.f32 %v947_v3  ;;  %v4215_v3 = vld [vmem:[#allocation2 + $0x9] sm:$0x1] }
 0x4a8   : > { %v2958_v4 = vpop.eup %2957 }
 0x4a9   : > { %v949_v5 = vadd.f32 1.0, %v2958_v4  ;;  %v952_v6 = vmul.f32 -0.5, %v2958_v4  ;;  %v955_v12 = vand.u32 2147483647, %v2958_v4 }
 0x4ab   : > { %2959 = vlog2.f32 %v949_v5  ;;  %v953_v11 = vadd.f32 1.0, %v952_v6  ;;  %vm956_vm11 = vcmp.lt.f32.partialorder %v955_v12, 0.0004427343  ;;  %v2627_v12 = vld [vmem:[#allocation19 + $0x8] ss:$0 sm:$0xff] }
 0x4ad   : > { %v954_v16 = vmul.f32 %v2958_v4, %v953_v11 }
 0x4b5   : > { %v2960_v50 = vpop.eup %2959 }
 0x4b6   : > { %v951_v15 = vmul.f32 0.6931472, %v2960_v50 }
 0x4b8   : > { %v957_v25 = vsel %vm956_vm11, %v954_v16, %v951_v15  ;;  %v2628_v16 = vld [vmem:[#allocation19 + $0x9] ss:$0 sm:$0xff] }
 0x4b9   : > { %v958_v29 = vadd.f32 %v957_v25, %v942_v20  ;;  %v2629_v20 = vld [vmem:[#allocation19 + $0xa] ss:$0 sm:$0xff]  ;;  %v4229_v25 = vld [vmem:[#allocation3 + $0x5] sm:$0x1] }
 0x4bb   : > { %v4177_v39 = vsel %vm943_vm12, %v939_v10, %v958_v29  ;;  %v4231_v29 = vld [vmem:[#allocation3 + $0x6] ss:$0 sm:$0xff] }
 0x4bc   : > { %4973 = vst [vmem:[#allocation35_spill] sm:$0xff] %v4177_v39  ;;  %v981_v48 = vmul.f32 %v2619_v21, %v4177_v39  ;;  %v1073_v49 = vmul.f32 %v2620_v22, %v4177_v39  ;;  %v1155_v52 = vmul.f32 %v2621_v30, %v4177_v39  ;;  %v1237_v57 = vmul.f32 %v2622_v31, %v4177_v39 }
 0x4bd   : > { %v1319_v59 = vmul.f32 %v2623_v37, %v4177_v39  ;;  %v1401_v1 = vmul.f32 %v2624_v46, %v4177_v39  ;;  %v1483_v11 = vmul.f32 %v2625_v41, %v4177_v39  ;;  %4974 = vst [vmem:[#allocation36_spill] sm:$0xff] %v4231_v29  ;;  %v1565_v37 = vmul.f32 %v2626_v62, %v4177_v39  ;;  %v1593_v41 = vpop.xlane.xlu0 %1592  ;;  %v4247_v62 = vld [vmem:[#allocation2 + $0xb] ss:$0 sm:$0xff] }
 0x4be   : > { %v982_v10 = vmul.f32 1.442695, %v981_v48  ;;  %v1074_v0 = vmul.f32 1.442695, %v1073_v49  ;;  %v1156_v5 = vmul.f32 1.442695, %v1155_v52  ;;  %v1647_v46 = vmul.f32 %v2627_v12, %v4177_v39  ;;  %v1511_v52 = vpop.xlane.xlu1 %1510 }
 0x4bf   : > { %v1238_v6 = vmul.f32 1.442695, %v1237_v57  ;;  %v1320_v21 = vmul.f32 1.442695, %v1319_v59  ;;  %v1402_v31 = vmul.f32 1.442695, %v1401_v1  ;;  %v4242_v57 = vmul.f32 %v4177_v39, %v3970_v40 }
 0x4c0   : > { %2961 = vpow2.f32 %v982_v10  ;;  %v4237_v48 = vld [vmem:[#allocation2 + $0xa] ss:$0 sm:$0xff]  ;;  %v2630_v49 = vld [vmem:[#allocation19 + $0xb] ss:$0 sm:$0xff]  ;;  %v1484_v59 = vmul.f32 1.442695, %v1483_v11  ;;  %v1811_v12 = vmul.f32 %v2629_v20, %v4177_v39 }
 0x4c1   : > { %2963 = vpow2.f32 %v1074_v0  ;;  %4975 = vst [vmem:[#allocation37_spill] sm:$0xff] %v4237_v48  ;;  %4976 = vst [vmem:[#allocation38_spill] sm:$0xff] %v4242_v57  ;;  %v4244_v10 = vld [vmem:[#allocation3 + $0x7] ss:$0 sm:$0xff]  ;;  %v1729_v0 = vmul.f32 %v2628_v16, %v4177_v39  ;;  %v1648_v30 = vmul.f32 1.442695, %v1647_v46  ;;  %v1893_v22 = vmul.f32 %v2630_v49, %v4177_v39 }
 0x4c2   : > { %2965 = vpow2.f32 %v1156_v5  ;;  %4977 = vst [vmem:[#allocation39_spill] sm:$0xff] %v4244_v10  ;;  %4978 = vst [vmem:[#allocation40_spill] sm:$0xff] %v4247_v62  ;;  %v1566_v5 = vmul.f32 1.442695, %v1565_v37  ;;  %v4259_v11 = vmul.f32 %v4143_v7, %v4242_v57  ;;  %v1812_v16 = vmul.f32 1.442695, %v1811_v12  ;;  %v1675_v46 = vpop.xlane.xlu1 %1674  ;;  %v1757_v7 = vpop.xlane.xlu0 %1756 }
 0x4c3   : > { %2967 = vpow2.f32 %v1238_v6  ;;  %v1730_v40 = vmul.f32 1.442695, %v1729_v0  ;;  %v4255_v6 = vmul.f32 %v4145_v8, %v4242_v57  ;;  %v4264_v20 = vmul.f32 %v4152_v18, %v4242_v57  ;;  %v2631_v37 = vld [vmem:[#allocation19 + $0xc] ss:$0 sm:$0xff] }
 0x4c4   : > { %2969 = vpow2.f32 %v1320_v21  ;;  %v4268_v21 = vmul.f32 %v4154_v19, %v4242_v57  ;;  %v1894_v8 = vmul.f32 1.442695, %v1893_v22  ;;  %v4274_v49 = vmul.f32 %v4196_v55, %v4242_v57 }
 0x4c5   : > { %2971 = vpow2.f32 %v1402_v31  ;;  %v4270_v31 = vld [vmem:[#allocation3 + $0x8] ss:$0 sm:$0xff]  ;;  %v4281_v18 = vmul.f32 %v1511_v52, %v4242_v57  ;;  %v4284_v0 = vmul.f32 %v1593_v41, %v4242_v57  ;;  %v4287_v22 = vmul.f32 %v1675_v46, %v4242_v57 }
 0x4c6   : > { %2973 = vpow2.f32 %v1484_v59  ;;  %4979 = vst [vmem:[#allocation41_spill] sm:$0xff] %v4270_v31  ;;  %v4278_v59 = vmul.f32 %v4198_v43, %v4242_v57  ;;  %v4295_v52 = vmul.f32 %v2631_v37, %v4177_v39 }
 0x4c7   : > { %2975 = vpow2.f32 %v1566_v5  ;;  %4980 = vst [vmem:[#allocation42_spill] sm:$0xff] %v4287_v22  ;;  %v4290_v5 = vmul.f32 %v1757_v7, %v4242_v57 }
 0x4c8   : > { %2977 = vpow2.f32 %v1648_v30 }
 0x4c9   : > { %2979 = vpow2.f32 %v1730_v40  ;;  %4981 = vst [vmem:[#allocation43_spill] sm:$0xff] %v4290_v5 }
 0x4ca   : > { %v2962_v19 = vpop.eup %2961  ;;  %2981 = vpow2.f32 %v1812_v16 }
 0x4cb   : > { %v2964_v55 = vpop.eup %2963  ;;  %v986_v43 = vsel %vm963_vm13, 0.0, %v2962_v19  ;;  %2983 = vpow2.f32 %v1894_v8 }
 0x4cc   : > { %v2966_v30 = vpop.eup %2965  ;;  %v989_v12 = vrot.slane %v986_v43, 7  ;;  %v1049_v41 = vsel %vm594_vm1, %v986_v43, 0.0  ;;  %v1076_v46 = vsel %vm963_vm13, 0.0, %v2964_v55 }
 0x4cd   : > { %v2968_v40 = vpop.eup %2967  ;;  %v1050_v7 = vrot.slane %v1049_v41, 4  ;;  %v1079_v1 = vrot.slane %v1076_v46, 7  ;;  %v1132_v15 = vsel %vm594_vm1, %v1076_v46, 0.0  ;;  %v1158_v16 = vsel %vm963_vm13, 0.0, %v2966_v30 }
 0x4ce   : > { %v992_v37 = vsel %vm988_vm14, %v989_v12, 0.0  ;;  %v1133_v19 = vrot.slane %v1132_v15, 4  ;;  %v1161_v14 = vrot.slane %v1158_v16, 7  ;;  %v1214_v2 = vsel %vm594_vm1, %v1158_v16, 0.0  ;;  %v4307_v50 = vpop.eup %2969 }
 0x4cf   : > { %v993_v8 = vadd.f32 %v992_v37, %v986_v43  ;;  %v1051_v55 = vadd.f32 %v1050_v7, %v1049_v41  ;;  %v1080_v4 = vsel %vm988_vm14, %v1079_v1, 0.0  ;;  %v1215_v56 = vrot.slane %v1214_v2, 4  ;;  %v2972_v61 = vpop.eup %2971 }
 0x4d0   : > { %v1081_v54 = vadd.f32 %v1080_v4, %v1076_v46  ;;  %v1134_v45 = vadd.f32 %v1133_v19, %v1132_v15  ;;  %v1162_v30 = vsel %vm988_vm14, %v1161_v14, 0.0  ;;  %v1240_v12 = vsel %vm963_vm13, 0.0, %v2968_v40  ;;  %v4315_v44 = vpop.eup %2973 }
 0x4d1   : > { %v995_v42 = vrot.slane %v993_v8, 6  ;;  %v1052_v36 = vrot.slane %v1051_v55, 2  ;;  %v1163_v34 = vadd.f32 %v1162_v30, %v1158_v16  ;;  %v1216_v43 = vadd.f32 %v1215_v56, %v1214_v2  ;;  %v4317_v41 = vpop.eup %2975 }
 0x4d2   : > { %v1082_v7 = vrot.slane %v1081_v54, 6  ;;  %v1135_v1 = vrot.slane %v1134_v45, 2  ;;  %v1243_v37 = vrot.slane %v1240_v12, 7  ;;  %v1296_v4 = vsel %vm594_vm1, %v1240_v12, 0.0  ;;  %v4320_v15 = vpop.eup %2977 }
 0x4d3   : > { %v998_v14 = vsel %vm994_vm15, %v995_v42, 0.0  ;;  %v1053_v46 = vadd.f32 %v1052_v36, %v1051_v55  ;;  %v1164_v40 = vrot.slane %v1163_v34, 6  ;;  %v1217_v19 = vrot.slane %v1216_v43, 2  ;;  %v4324_v23 = vpop.eup %2979 }
 0x4d4   : > { %v999_v57 = vadd.f32 %v998_v14, %v993_v8  ;;  %v1083_v56 = vsel %vm994_vm15, %v1082_v7, 0.0  ;;  %v1136_v2 = vadd.f32 %v1135_v1, %v1134_v45  ;;  %v1244_v16 = vsel %vm988_vm14, %v1243_v37, 0.0  ;;  %v4330_v30 = vpop.eup %2981 }
 0x4d5   : > { %v1054_v31 = vrot.slane %v1053_v46, 1  ;;  %v1084_v5 = vadd.f32 %v1083_v56, %v1081_v54  ;;  %v1165_v42 = vsel %vm994_vm15, %v1164_v40, 0.0  ;;  %v1218_v36 = vadd.f32 %v1217_v19, %v1216_v43  ;;  %v4334_v55 = vpop.eup %2983 }
 0x4d6   : > { %v1001_v62 = vrot.slane %v999_v57, 4  ;;  %v1137_v10 = vrot.slane %v1136_v2, 1  ;;  %v1166_v8 = vadd.f32 %v1165_v42, %v1163_v34  ;;  %v1245_v14 = vadd.f32 %v1244_v16, %v1240_v12 }
 0x4d7   : > { %v1055_v22 = vadd.f32 %v1054_v31, %v1053_v46  ;;  %v1085_v7 = vrot.slane %v1084_v5, 4  ;;  %v1219_v45 = vrot.slane %v1218_v36, 1  ;;  %v1297_v1 = vrot.slane %v1296_v4, 4 }
 0x4d8   : > { %v1004_v37 = vsel %vm1000_vm2, %v1001_v62, 0.0  ;;  %v1138_v48 = vadd.f32 %v1137_v10, %v1136_v2  ;;  %v1167_v29 = vrot.slane %v1166_v8, 4  ;;  %v1246_v54 = vrot.slane %v1245_v14, 6 }
 0x4d9   : > { %v1005_v56 = vadd.f32 %v1004_v37, %v999_v57  ;;  %v1056_v40 = vadd.f32 %v1055_v22, %v4150_v17  ;;  %v1086_v43 = vsel %vm1000_vm2, %v1085_v7, 0.0  ;;  %v1220_v19 = vadd.f32 %v1219_v45, %v1218_v36 }
 0x4da   : > { %v1087_v39 = vadd.f32 %v1086_v43, %v1084_v5  ;;  %v1139_v34 = vadd.f32 %v1138_v48, %v4156_v24  ;;  %v1168_v31 = vsel %vm1000_vm2, %v1167_v29, 0.0  ;;  %v1247_v12 = vsel %vm994_vm15, %v1246_v54, 0.0 }
 0x4db   : > { %v4982_v10 = vrot.slane %v4150_v17, %v4148_v13  ;;  %1058 = vst.msk [vmem:[#allocation2] sm:$0x1] %vm561_vm10, %v1056_v40  ;;  %v1169_v57 = vadd.f32 %v1168_v31, %v1166_v8  ;;  %v1221_v22 = vadd.f32 %v1220_v19, %v4158_v26  ;;  %v1248_v46 = vadd.f32 %v1247_v12, %v1245_v14 }
 0x4dc   : > { %v4983_v5 = vrot.slane %v4156_v24, %v4148_v13  ;;  %1140 = vst.msk [vmem:[#allocation2 + $0x1] sm:$0x1] %vm561_vm10, %v1139_v34  ;;  %v1298_v29 = vadd.f32 %v1297_v1, %v1296_v4  ;;  %v1322_v2 = vsel %vm963_vm13, 0.0, %v4307_v50  ;;  %v1404_v17 = vsel %vm963_vm13, 0.0, %v2972_v61 }
 0x4dd   : > { %v1012_v62 = vadd.f32 %v4982_v10, %v1005_v56  ;;  %v4984_v42 = vrot.slane %v4158_v26, %v4148_v13  ;;  %1222 = vst.msk [vmem:[#allocation2 + $0x2] sm:$0x1] %vm561_vm10, %v1221_v22  ;;  %v1249_v8 = vrot.slane %v1248_v46, 4  ;;  %v1325_v24 = vrot.slane %v1322_v2, 7 }
 0x4de   : > { %v1094_v48 = vadd.f32 %v4983_v5, %v1087_v39  ;;  %v1299_v14 = vrot.slane %v1298_v29, 2  ;;  %v1378_v4 = vsel %vm594_vm1, %v1322_v2, 0.0  ;;  %v1407_v7 = vrot.slane %v1404_v17, 7 }
 0x4df   : > { %v1013_v16 = vmul.f32 1.442695, %v1012_v62  ;;  %v1176_v36 = vadd.f32 %v4984_v42, %v1169_v57  ;;  %v1250_v50 = vsel %vm1000_vm2, %v1249_v8, 0.0  ;;  %v1326_v61 = vsel %vm988_vm14, %v1325_v24, 0.0 }
 0x4e0   : > { %v1095_v39 = vmul.f32 1.442695, %v1094_v48  ;;  %v1251_v26 = vadd.f32 %v1250_v50, %v1248_v46  ;;  %v1300_v1 = vadd.f32 %v1299_v14, %v1298_v29  ;;  %v1327_v37 = vadd.f32 %v1326_v61, %v1322_v2 }
 0x4e1   : > { %2985 = vpow2.f32 %v1013_v16  ;;  %v1177_v45 = vmul.f32 1.442695, %v1176_v36  ;;  %v1379_v54 = vrot.slane %v1378_v4, 4  ;;  %v1408_v56 = vsel %vm988_vm14, %v1407_v7, 0.0 }
 0x4e2   : > { %2987 = vpow2.f32 %v1095_v39  ;;  %v1460_v40 = vsel %vm594_vm1, %v1404_v17, 0.0  ;;  %v4985_v43 = vrot.slane %v4160_v27, %v4148_v13  ;;  %v1301_v34 = vrot.slane %v1300_v1, 1 }
 0x4e3   : > { %2989 = vpow2.f32 %v1177_v45  ;;  %v1328_v31 = vrot.slane %v1327_v37, 6  ;;  %v1409_v12 = vadd.f32 %v1408_v56, %v1404_v17  ;;  %v1380_v10 = vadd.f32 %v1379_v54, %v1378_v4 }
 0x4e4   : > { %v1258_v19 = vadd.f32 %v4985_v43, %v1251_v26  ;;  %v1461_v62 = vrot.slane %v1460_v40, 4  ;;  %v1486_v57 = vsel %vm963_vm13, 0.0, %v4315_v44  ;;  %v1568_v22 = vsel %vm963_vm13, 0.0, %v4317_v41 }
 0x4e5   : > { %v1302_v5 = vadd.f32 %v1301_v34, %v1300_v1  ;;  %v1329_v48 = vsel %vm994_vm15, %v1328_v31, 0.0  ;;  %v1410_v29 = vrot.slane %v1409_v12, 6  ;;  %v1381_v16 = vrot.slane %v1380_v10, 2 }
 0x4e6   : > { %v1259_v46 = vmul.f32 1.442695, %v1258_v19  ;;  %v1330_v2 = vadd.f32 %v1329_v48, %v1327_v37  ;;  %v1462_v42 = vadd.f32 %v1461_v62, %v1460_v40  ;;  %v1489_v17 = vrot.slane %v1486_v57, 7 }
 0x4e7   : > { %v1303_v36 = vadd.f32 %v1302_v5, %v4160_v27  ;;  %v1411_v44 = vsel %vm994_vm15, %v1410_v29, 0.0  ;;  %v1542_v8 = vsel %vm594_vm1, %v1486_v57, 0.0  ;;  %v1382_v41 = vadd.f32 %v1381_v16, %v1380_v10 }
 0x4e8   : > { %2991 = vpow2.f32 %v1259_v46  ;;  %v1331_v24 = vrot.slane %v1330_v2, 4  ;;  %v1412_v39 = vadd.f32 %v1411_v44, %v1409_v12  ;;  %v1463_v14 = vrot.slane %v1462_v42, 2 }
 0x4e9   : > { %1304 = vst.msk [vmem:[#allocation2 + $0x3] sm:$0x1] %vm561_vm10, %v1303_v36  ;;  %v1490_v4 = vsel %vm988_vm14, %v1489_v17, 0.0  ;;  %v1543_v7 = vrot.slane %v1542_v8, 4  ;;  %v1571_v45 = vrot.slane %v1568_v22, 7  ;;  %v1624_v50 = vsel %vm594_vm1, %v1568_v22, 0.0 }
 0x4ea   : > { %v1332_v27 = vsel %vm1000_vm2, %v1331_v24, 0.0  ;;  %v1383_v26 = vrot.slane %v1382_v41, 1  ;;  %v1413_v1 = vrot.slane %v1412_v39, 4  ;;  %v1464_v37 = vadd.f32 %v1463_v14, %v1462_v42 }
 0x4eb   : > { %v4391_v61 = vpop.eup %2985  ;;  %v1333_v40 = vadd.f32 %v1332_v27, %v1330_v2  ;;  %v1491_v43 = vadd.f32 %v1490_v4, %v1486_v57  ;;  %v1544_v19 = vadd.f32 %v1543_v7, %v1542_v8  ;;  %v4986_v5 = vrot.slane %v4162_v28, %v4148_v13 }
 0x4ec   : > { %v4395_v54 = vpop.eup %2987  ;;  %v1026_v56 = vadd.f32 1e-12, %v4391_v61  ;;  %v1384_v12 = vadd.f32 %v1383_v26, %v1382_v41  ;;  %v1414_v10 = vsel %vm1000_vm2, %v1413_v1, 0.0  ;;  %v1465_v62 = vrot.slane %v1464_v37, 1 }
 0x4ed   : > { %v4398_v34 = vpop.eup %2989  ;;  %v1108_v31 = vadd.f32 1e-12, %v4395_v54  ;;  %v1340_v48 = vadd.f32 %v4986_v5, %v1333_v40  ;;  %v1415_v29 = vadd.f32 %v1414_v10, %v1412_v39  ;;  %v1492_v16 = vrot.slane %v1491_v43, 6 }
 0x4ee   : > { %2993 = vrcp.f32 %v1026_v56  ;;  %v1190_v46 = vadd.f32 1e-12, %v4398_v34  ;;  %v1385_v57 = vadd.f32 %v1384_v12, %v4162_v28  ;;  %v1466_v2 = vadd.f32 %v1465_v62, %v1464_v37 }
 0x4ef   : > { %2995 = vrcp.f32 %v1108_v31  ;;  %v1341_v42 = vmul.f32 1.442695, %v1340_v48  ;;  %v4987_v17 = vrot.slane %v4164_v32, %v4148_v13  ;;  %v1545_v44 = vrot.slane %v1544_v19, 2 }
 0x4f0   : > { %2997 = vrcp.f32 %v1190_v46  ;;  %1386 = vst.msk [vmem:[#allocation2 + $0x4] sm:$0x1] %vm561_vm10, %v1385_v57  ;;  %v1467_v8 = vadd.f32 %v1466_v2, %v4164_v32  ;;  %v1493_v24 = vsel %vm994_vm15, %v1492_v16, 0.0  ;;  %v1572_v41 = vsel %vm988_vm14, %v1571_v45, 0.0 }
 0x4f1   : > { %v1422_v36 = vadd.f32 %v4987_v17, %v1415_v29  ;;  %v1625_v28 = vrot.slane %v1624_v50, 4  ;;  %2999 = vpow2.f32 %v1341_v42  ;;  %v1494_v4 = vadd.f32 %v1493_v24, %v1491_v43 }
 0x4f2   : > { %v4417_v39 = vpop.eup %2991  ;;  %v1546_v7 = vadd.f32 %v1545_v44, %v1544_v19  ;;  %1468 = vst.msk [vmem:[#allocation2 + $0x5] sm:$0x1] %vm561_vm10, %v1467_v8  ;;  %v1573_v26 = vadd.f32 %v1572_v41, %v1568_v22  ;;  %v1650_v32 = vsel %vm963_vm13, 0.0, %v4320_v15  ;;  %v4443_v2 = vsel %vm963_vm13, 0.0, %v4324_v23 }
 0x4f3   : > { %v1423_v14 = vmul.f32 1.442695, %v1422_v36  ;;  %v1272_v27 = vadd.f32 1e-12, %v4417_v39  ;;  %v1626_v1 = vadd.f32 %v1625_v28, %v1624_v50  ;;  %v1495_v37 = vrot.slane %v1494_v4, 4 }
 0x4f4   : > { %v1547_v45 = vrot.slane %v1546_v7, 1  ;;  %v1653_v56 = vrot.slane %v1650_v32, 7  ;;  %v1574_v40 = vrot.slane %v1573_v26, 6  ;;  %v1706_v43 = vsel %vm594_vm1, %v1650_v32, 0.0 }
 0x4f5   : > { %3001 = vpow2.f32 %v1423_v14  ;;  %v1627_v31 = vrot.slane %v1626_v1, 2  ;;  %v1496_v19 = vsel %vm1000_vm2, %v1495_v37, 0.0  ;;  %v1707_v50 = vrot.slane %v1706_v43, 4  ;;  %v4467_v37 = vpop.xlane.xlu1 %1838 }
 0x4f6   : > { %3003 = vrcp.f32 %v1272_v27  ;;  %v1548_v12 = vadd.f32 %v1547_v45, %v1546_v7  ;;  %v1654_v22 = vsel %vm988_vm14, %v1653_v56, 0.0  ;;  %v1497_v10 = vadd.f32 %v1496_v19, %v1494_v4 }
 0x4f7   : > { %v1575_v15 = vsel %vm994_vm15, %v1574_v40, 0.0  ;;  %v4431_v62 = vadd.f32 %v1627_v31, %v1626_v1  ;;  %v4433_v46 = vadd.f32 %v1654_v22, %v1650_v32  ;;  %v4438_v57 = vadd.f32 %v1707_v50, %v1706_v43 }
 0x4f8   : > { %v2994_v5 = vpop.eup %2993  ;;  %v1549_v48 = vadd.f32 %v1548_v12, %v4175_v38  ;;  %v4436_v29 = vadd.f32 %v1575_v15, %v1573_v26  ;;  %v4988_v17 = vrot.slane %v4175_v38, %v4148_v13  ;;  %v1735_v14 = vrot.slane %v4443_v2, 7 }
 0x4f9   : > { %v2996_v16 = vpop.eup %2995  ;;  %v1028_v42 = vmul.f32 %v2994_v5, %v4255_v6  ;;  %v1629_v44 = vrot.slane %v4431_v62, 1  ;;  %v1656_v8 = vrot.slane %v4433_v46, 6  ;;  %v1709_v23 = vrot.slane %v4438_v57, 2 }
 0x4fa   : > { %v1504_v36 = vadd.f32 %v4988_v17, %v1497_v10  ;;  %v2998_v24 = vpop.eup %2997  ;;  %v1110_v41 = vmul.f32 %v2996_v16, %v4259_v11  ;;  %1550 = vst.msk [vmem:[#allocation2 + $0x6] sm:$0x1] %vm561_vm10, %v1549_v48  ;;  %v1577_v28 = vrot.slane %v4436_v29, 4 }
 0x4fb   : > { %v1030_v6 = vrot.slane %v1028_v42, 7  ;;  %v1059_v4 = vsel %vm594_vm1, %v1028_v42, 0.0  ;;  %v1192_v38 = vmul.f32 %v2998_v24, %v4264_v20  ;;  %v4460_v27 = vpop.eup %2999 }
 0x4fc   : > { %v4458_v7 = vmul.f32 1.442695, %v1504_v36  ;;  %v1060_v26 = vrot.slane %v1059_v4, 4  ;;  %v1113_v1 = vrot.slane %v1110_v41, 7  ;;  %v1141_v11 = vsel %vm594_vm1, %v1110_v41, 0.0 }
 0x4fd   : > { %v4465_v32 = vsel %vm1000_vm2, %v1577_v28, 0.0  ;;  %v1031_v45 = vsel %vm988_vm14, %v1030_v6, 0.0  ;;  %v1142_v56 = vrot.slane %v1141_v11, 4  ;;  %v1195_v40 = vrot.slane %v1192_v38, 7 }
 0x4fe   : > { %v1223_v20 = vsel %vm594_vm1, %v1192_v38, 0.0  ;;  %v1032_v43 = vadd.f32 %v1031_v45, %v1028_v42  ;;  %v1061_v19 = vadd.f32 %v1060_v26, %v1059_v4  ;;  %v1114_v12 = vsel %vm988_vm14, %v1113_v1, 0.0 }
 0x4ff   : > { %v4472_v31 = vpop.eup %3001  ;;  %v1224_v22 = vrot.slane %v1223_v20, 4  ;;  %v1115_v10 = vadd.f32 %v1114_v12, %v1110_v41  ;;  %v1143_v15 = vadd.f32 %v1142_v56, %v1141_v11  ;;  %v1196_v5 = vsel %vm988_vm14, %v1195_v40, 0.0  ;;  %v1024_v11 = vpop.xlane.xlu1 %1023 }
 0x500   : > { %v3004_v50 = vpop.eup %3003  ;;  %v1354_v48 = vadd.f32 1e-12, %v4460_v27  ;;  %v1033_v16 = vrot.slane %v1032_v43, 6  ;;  %v1062_v17 = vrot.slane %v1061_v19, 2  ;;  %v1197_v36 = vadd.f32 %v1196_v5, %v1192_v38 }
 0x501   : > { %v1225_v24 = vadd.f32 %v1224_v22, %v1223_v20  ;;  %v1116_v28 = vrot.slane %v1115_v10, 6  ;;  %v1144_v6 = vrot.slane %v1143_v15, 2  ;;  %v1274_v42 = vmul.f32 %v3004_v50, %v4268_v21 }
 0x502   : > { %3005 = vrcp.f32 %v1354_v48  ;;  %v1034_v4 = vsel %vm994_vm15, %v1033_v16, 0.0  ;;  %v1063_v26 = vadd.f32 %v1062_v17, %v1061_v19  ;;  %v1198_v41 = vrot.slane %v1197_v36, 6 }
 0x503   : > { %v1226_v1 = vrot.slane %v1225_v24, 2  ;;  %v1035_v45 = vadd.f32 %v1034_v4, %v1032_v43  ;;  %v1117_v56 = vsel %vm994_vm15, %v1116_v28, 0.0  ;;  %v1145_v40 = vadd.f32 %v1144_v6, %v1143_v15 }
 0x504   : > { %v1277_v12 = vrot.slane %v1274_v42, 7  ;;  %v1064_v38 = vrot.slane %v1063_v26, 1  ;;  %v1118_v20 = vadd.f32 %v1117_v56, %v1115_v10  ;;  %v1199_v22 = vsel %vm994_vm15, %v1198_v41, 0.0 }
 0x505   : > { %v1227_v21 = vadd.f32 %v1226_v1, %v1225_v24  ;;  %v1036_v50 = vrot.slane %v1035_v45, 4  ;;  %v1146_v5 = vrot.slane %v1145_v40, 1  ;;  %v1200_v48 = vadd.f32 %v1199_v22, %v1197_v36  ;;  %v1106_v1 = vpop.xlane.xlu1 %1105 }
 0x506   : > { %v1278_v19 = vsel %vm988_vm14, %v1277_v12, 0.0  ;;  %v1065_v16 = vadd.f32 %v1064_v38, %v1063_v26  ;;  %v1119_v17 = vrot.slane %v1118_v20, 4  ;;  %v1305_v10 = vsel %vm594_vm1, %v1274_v42, 0.0 }
 0x507   : > { %v1228_v43 = vrot.slane %v1227_v21, 1  ;;  %v1279_v4 = vadd.f32 %v1278_v19, %v1274_v42  ;;  %v1037_v15 = vsel %vm1000_vm2, %v1036_v50, 0.0  ;;  %v1147_v28 = vadd.f32 %v1146_v5, %v1145_v40 }
 0x508   : > { %v1201_v6 = vrot.slane %v1200_v48, 4  ;;  %v1038_v56 = vadd.f32 %v1037_v15, %v1035_v45  ;;  %v1066_v24 = vadd.f32 %v1065_v16, %v4171_v35  ;;  %v1120_v36 = vsel %vm1000_vm2, %v1119_v17, 0.0 }
 0x509   : > { %v1229_v41 = vadd.f32 %v1228_v43, %v1227_v21  ;;  %v1121_v12 = vadd.f32 %v1120_v36, %v1118_v20  ;;  %v1148_v26 = vadd.f32 %v1147_v28, %v4189_v51  ;;  %v1280_v22 = vrot.slane %v1279_v4, 6 }
 0x50a   : > { %v1202_v38 = vsel %vm1000_vm2, %v1201_v6, 0.0  ;;  %v4989_v40 = vrot.slane %v4171_v35, %v4148_v13  ;;  %1067 = vst.msk [vmem:[#allocation3] sm:$0x1] %vm561_vm10, %v1066_v24  ;;  %v1306_v5 = vrot.slane %v1305_v10, 4  ;;  %v4990_v20 = vrot.slane %v4189_v51, %v4148_v13  ;;  %v4519_v24 = vpop.xlane.xlu0 %1920 }
 0x50b   : > { %v1203_v42 = vadd.f32 %v1202_v38, %v1200_v48  ;;  %v1230_v45 = vadd.f32 %v1229_v41, %v4192_v53  ;;  %1149 = vst.msk [vmem:[#allocation3 + $0x1] sm:$0x1] %vm561_vm10, %v1148_v26  ;;  %v1281_v16 = vsel %vm994_vm15, %v1280_v22, 0.0  ;;  %v1436_v17 = vadd.f32 1e-12, %v4472_v31  ;;  %v1188_v41 = vpop.xlane.xlu1 %1187 }
 0x50c   : > { %v1045_v50 = vadd.f32 %v4989_v40, %v1038_v56  ;;  %v3006_v19 = vpop.eup %3005  ;;  %v1128_v21 = vadd.f32 %v4990_v20, %v1121_v12  ;;  %3007 = vpow2.f32 %v4458_v7  ;;  %v4991_v48 = vrot.slane %v4192_v53, %v4148_v13 }
 0x50d   : > { %1231 = vst.msk [vmem:[#allocation3 + $0x2] sm:$0x1] %vm561_vm10, %v1230_v45  ;;  %v1282_v15 = vadd.f32 %v1281_v16, %v1279_v4  ;;  %v1307_v51 = vadd.f32 %v1306_v5, %v1305_v10  ;;  %v1356_v6 = vmul.f32 %v3006_v19, %v4274_v49  ;;  %3009 = vrcp.f32 %v1436_v17 }
 0x50e   : > { %v1046_v35 = vmul.f32 %v4391_v61, %v1045_v50  ;;  %v1210_v43 = vadd.f32 %v4991_v48, %v1203_v42  ;;  %v1129_v28 = vmul.f32 %v4395_v54, %v1128_v21  ;;  %v1579_v56 = vadd.f32 %v4465_v32, %v4436_v29  ;;  %v4541_v21 = vpop.xlane.xlu0 %2002 }
 0x50f   : > { %v1283_v36 = vrot.slane %v1282_v15, 4  ;;  %v1308_v53 = vrot.slane %v1307_v51, 2  ;;  %v1359_v26 = vrot.slane %v1356_v6, 7  ;;  %v1387_v4 = vsel %vm594_vm1, %v1356_v6, 0.0 }
 0x510   : > { %v1047_v7 = vmul.f32 %v1046_v35, %v1024_v11  ;;  %v1211_v61 = vmul.f32 %v4398_v34, %v1210_v43  ;;  %v1130_v12 = vmul.f32 %v1129_v28, %v1106_v1  ;;  %v4992_v54 = vrot.slane %v4185_v47, %v4148_v13  ;;  %v1270_v28 = vpop.xlane.xlu1 %1269 }
 0x511   : > { %v1284_v29 = vsel %vm1000_vm2, %v1283_v36, 0.0  ;;  %v1309_v32 = vadd.f32 %v1308_v53, %v1307_v51  ;;  %v1360_v34 = vsel %vm988_vm14, %v1359_v26, 0.0  ;;  %v1388_v22 = vrot.slane %v1387_v4, 4 }
 0x512   : > { %v1586_v49 = vadd.f32 %v4992_v54, %v1579_v56  ;;  %v1048_v10 = vadd.f32 %v1047_v7, %v4167_v33  ;;  %v1212_v38 = vmul.f32 %v1211_v61, %v1188_v41  ;;  %v1285_v11 = vadd.f32 %v1284_v29, %v1282_v15 }
 0x513   : > { %v1310_v50 = vrot.slane %v1309_v32, 1  ;;  %v1361_v42 = vadd.f32 %v1360_v34, %v1356_v6  ;;  %v1630_v45 = vadd.f32 %v1629_v44, %v4431_v62  ;;  %v4993_v33 = vrot.slane %v4203_v58, %v4148_v13 }
 0x514   : > { %v1587_v1 = vmul.f32 1.442695, %v1586_v49  ;;  %v1131_v40 = vadd.f32 %v1130_v12, %v1048_v10  ;;  %v1389_v19 = vadd.f32 %v1388_v22, %v1387_v4  ;;  %v1657_v20 = vsel %vm994_vm15, %v1656_v8, 0.0 }
 0x515   : > { %v1292_v5 = vadd.f32 %v4993_v33, %v1285_v11  ;;  %v1311_v17 = vadd.f32 %v1310_v50, %v1309_v32  ;;  %v1362_v35 = vrot.slane %v1361_v42, 6  ;;  %v1631_v48 = vadd.f32 %v1630_v45, %v4185_v47 }
 0x516   : > { %3011 = vpow2.f32 %v1587_v1  ;;  %v1213_v16 = vadd.f32 %v1212_v38, %v1131_v40  ;;  %v4544_v43 = vpop.eup %3007  ;;  %v1390_v44 = vrot.slane %v1389_v19, 2  ;;  %v1658_v15 = vadd.f32 %v1657_v20, %v4433_v46 }
 0x517   : > { %v1293_v62 = vmul.f32 %v4417_v39, %v1292_v5  ;;  %v1710_v51 = vadd.f32 %v1709_v23, %v4438_v57  ;;  %v1312_v8 = vadd.f32 %v1311_v17, %v4203_v58  ;;  %v1363_v6 = vsel %vm994_vm15, %v1362_v35, 0.0  ;;  %1632 = vst.msk [vmem:[#allocation2 + $0x7] sm:$0x1] %vm561_vm10, %v1631_v48  ;;  %v3010_v39 = vpop.eup %3009 }
 0x518   : > { %v1518_v56 = vadd.f32 1e-12, %v4544_v43  ;;  %v1736_v47 = vsel %vm988_vm14, %v1735_v14, 0.0  ;;  %v1364_v7 = vadd.f32 %v1363_v6, %v1361_v42  ;;  %v1391_v61 = vadd.f32 %v1390_v44, %v1389_v19  ;;  %v4565_v14 = vpop.xlane.xlu0 %2084 }
 0x519   : > { %v1294_v46 = vmul.f32 %v1293_v62, %v1270_v28  ;;  %v1659_v57 = vrot.slane %v1658_v15, 4  ;;  %1313 = vst.msk [vmem:[#allocation3 + $0x3] sm:$0x1] %vm561_vm10, %v1312_v8  ;;  %v1438_v58 = vmul.f32 %v3010_v39, %v4278_v59  ;;  %v1711_v23 = vrot.slane %v1710_v51, 1  ;;  %v1352_v8 = vpop.xlane.xlu1 %1351 }
 0x51a   : > { %3013 = vrcp.f32 %v1518_v56  ;;  %v1737_v36 = vadd.f32 %v1736_v47, %v4443_v2  ;;  %v1365_v41 = vrot.slane %v1364_v7, 4  ;;  %v1392_v12 = vrot.slane %v1391_v61, 1 }
 0x51b   : > { %v1295_v53 = vadd.f32 %v1294_v46, %v1213_v16  ;;  %v1660_v26 = vsel %vm1000_vm2, %v1659_v57, 0.0  ;;  %v1441_v4 = vrot.slane %v1438_v58, 7  ;;  %v1469_v54 = vsel %vm594_vm1, %v1438_v58, 0.0 }
 0x51c   : > { %v1661_v49 = vadd.f32 %v1660_v26, %v1658_v15  ;;  %v1712_v10 = vadd.f32 %v1711_v23, %v1710_v51  ;;  %v1366_v59 = vsel %vm1000_vm2, %v1365_v41, 0.0  ;;  %v1393_v38 = vadd.f32 %v1392_v12, %v1391_v61  ;;  %v4590_v15 = vpop.xlane.xlu0 %2166 }
 0x51d   : > { %v1470_v29 = vrot.slane %v1469_v54, 4  ;;  %v1738_v32 = vrot.slane %v1737_v36, 6  ;;  %v1367_v11 = vadd.f32 %v1366_v59, %v1364_v7  ;;  %v1442_v34 = vsel %vm988_vm14, %v1441_v4, 0.0 }
 0x51e   : > { %v4994_v22 = vrot.slane %v4210_v63, %v4148_v13  ;;  %v1713_v40 = vadd.f32 %v1712_v10, %v4210_v63  ;;  %v1394_v42 = vadd.f32 %v1393_v38, %v4206_v60  ;;  %v1443_v45 = vadd.f32 %v1442_v34, %v1438_v58 }
 0x51f   : > { %v1471_v33 = vadd.f32 %v1470_v29, %v1469_v54  ;;  %v1739_v5 = vsel %vm994_vm15, %v1738_v32, 0.0  ;;  %v4995_v19 = vrot.slane %v4206_v60, %v4148_v13  ;;  %v1788_v62 = vsel %vm594_vm1, %v4443_v2, 0.0 }
 0x520   : > { %v1668_v1 = vadd.f32 %v4994_v22, %v1661_v49  ;;  %v4576_v50 = vpop.eup %3011  ;;  %1714 = vst.msk [vmem:[#allocation2 + $0x8] sm:$0x1] %vm561_vm10, %v1713_v40  ;;  %v1740_v35 = vadd.f32 %v1739_v5, %v1737_v36  ;;  %1395 = vst.msk [vmem:[#allocation3 + $0x4] sm:$0x1] %vm561_vm10, %v1394_v42  ;;  %v1444_v63 = vrot.slane %v1443_v45, 6  ;;  %v1789_v28 = vrot.slane %v1788_v62, 4  ;;  %v4605_v49 = vpop.xlane.xlu0 %2248 }
 0x521   : > { %v1374_v20 = vadd.f32 %v4995_v19, %v1367_v11  ;;  %v1600_v16 = vadd.f32 1e-12, %v4576_v50  ;;  %v1472_v48 = vrot.slane %v1471_v33, 2  ;;  %v1976_v44 = vmul.f32 1.442695, %v4295_v52 }
 0x522   : > { %v1669_v17 = vmul.f32 1.442695, %v1668_v1  ;;  %v1741_v51 = vrot.slane %v1740_v35, 4  ;;  %v1445_v6 = vsel %vm994_vm15, %v1444_v63, 0.0  ;;  %v1814_v47 = vsel %vm963_vm13, 0.0, %v4330_v30 }
 0x523   : > { %v1375_v60 = vmul.f32 %v4460_v27, %v1374_v20  ;;  %3015 = vrcp.f32 %v1600_v16  ;;  %v1473_v56 = vadd.f32 %v1472_v48, %v1471_v33  ;;  %v1446_v52 = vadd.f32 %v1445_v6, %v1443_v45 }
 0x524   : > { %3017 = vpow2.f32 %v1669_v17  ;;  %v3014_v2 = vpop.eup %3013  ;;  %v1742_v46 = vsel %vm1000_vm2, %v1741_v51, 0.0  ;;  %v1790_v27 = vadd.f32 %v1789_v28, %v1788_v62  ;;  %v1817_v58 = vrot.slane %v1814_v47, 7 }
 0x525   : > { %v1376_v39 = vmul.f32 %v1375_v60, %v1352_v8  ;;  %v1474_v7 = vrot.slane %v1473_v56, 1  ;;  %v1520_v61 = vmul.f32 %v3014_v2, %v4281_v18  ;;  %v1743_v57 = vadd.f32 %v1742_v46, %v1740_v35  ;;  %v1434_v60 = vpop.xlane.xlu0 %1433  ;;  %v2632_v46 = vld [vmem:[#allocation19 + $0xd] ss:$0 sm:$0xff] }
 0x526   : > { %v1447_v36 = vrot.slane %v1446_v52, 4  ;;  %v1791_v41 = vrot.slane %v1790_v27, 2  ;;  %3019 = vpow2.f32 %v1976_v44  ;;  %v4996_v4 = vrot.slane %v4215_v3, %v4148_v13 }
 0x527   : > { %v1377_v23 = vadd.f32 %v1376_v39, %v1295_v53  ;;  %v1475_v12 = vadd.f32 %v1474_v7, %v1473_v56  ;;  %v1523_v26 = vrot.slane %v1520_v61, 7  ;;  %v1551_v30 = vsel %vm594_vm1, %v1520_v61, 0.0 }
 0x528   : > { %v1750_v54 = vadd.f32 %v4996_v4, %v1743_v57  ;;  %v1448_v10 = vsel %vm1000_vm2, %v1447_v36, 0.0  ;;  %v1552_v18 = vrot.slane %v1551_v30, 4  ;;  %v1792_v59 = vadd.f32 %v1791_v41, %v1790_v27  ;;  %v4998_v4 = vld [vmem:[#allocation35_spill] sm:$0xff] }
 0x529   : > { %v1818_v53 = vsel %vm988_vm14, %v1817_v58, 0.0  ;;  %v1449_v38 = vadd.f32 %v1448_v10, %v1446_v52  ;;  %v1476_v29 = vadd.f32 %v1475_v12, %v4229_v25  ;;  %v1524_v32 = vsel %vm988_vm14, %v1523_v26, 0.0  ;;  %v3061_v10 = vld [vmem:[#allocation3 + $0x6] sm:$0x1] }
 0x52a   : > { %v1751_v11 = vmul.f32 1.442695, %v1750_v54  ;;  %v1525_v34 = vadd.f32 %v1524_v32, %v1520_v61  ;;  %v1553_v22 = vadd.f32 %v1552_v18, %v1551_v30  ;;  %v1793_v1 = vrot.slane %v1792_v59, 1 }
 0x52b   : > { %v1819_v40 = vadd.f32 %v1818_v53, %v1814_v47  ;;  %v4997_v42 = vrot.slane %v4229_v25, %v4148_v13  ;;  %1477 = vst.msk [vmem:[#allocation3 + $0x5] sm:$0x1] %vm561_vm10, %v1476_v29  ;;  %v1870_v33 = vsel %vm594_vm1, %v1814_v47, 0.0  ;;  %v1896_v5 = vsel %vm963_vm13, 0.0, %v4334_v55 }
 0x52c   : > { %3021 = vpow2.f32 %v1751_v11  ;;  %v1526_v20 = vrot.slane %v1525_v34, 6  ;;  %v1554_v16 = vrot.slane %v1553_v22, 2  ;;  %v1794_v17 = vadd.f32 %v1793_v1, %v1792_v59 }
 0x52d   : > { %v1456_v45 = vadd.f32 %v4997_v42, %v1449_v38  ;;  %v3016_v19 = vpop.eup %3015  ;;  %v1820_v35 = vrot.slane %v1819_v40, 6  ;;  %v1871_v62 = vrot.slane %v1870_v33, 4  ;;  %v1899_v44 = vrot.slane %v1896_v5, 7 }
 0x52e   : > { %v4622_v63 = vpop.eup %3017  ;;  %v1602_v25 = vmul.f32 %v3016_v19, %v4284_v0  ;;  %v1527_v51 = vsel %vm994_vm15, %v1526_v20, 0.0  ;;  %v1555_v28 = vadd.f32 %v1554_v16, %v1553_v22  ;;  %v1795_v8 = vadd.f32 %v1794_v17, %v4215_v3  ;;  %v4999_v22 = vld [vmem:[#allocation36_spill] sm:$0xff] }
 0x52f   : > { %v1457_v48 = vmul.f32 %v4472_v31, %v1456_v45  ;;  %v1682_v55 = vadd.f32 1e-12, %v4622_v63  ;;  %v1528_v56 = vadd.f32 %v1527_v51, %v1525_v34  ;;  %v1821_v52 = vsel %vm994_vm15, %v1820_v35, 0.0 }
 0x530   : > { %v1605_v47 = vrot.slane %v1602_v25, 7  ;;  %v1633_v2 = vsel %vm594_vm1, %v1602_v25, 0.0  ;;  %v4631_v39 = vpop.eup %3019  ;;  %v1556_v31 = vrot.slane %v1555_v28, 1  ;;  %1796 = vst.msk [vmem:[#allocation2 + $0x9] sm:$0x1] %vm561_vm10, %v1795_v8  ;;  %v1822_v61 = vadd.f32 %v1821_v52, %v1819_v40 }
 0x531   : > { %v1458_v6 = vmul.f32 %v1457_v48, %v1434_v60  ;;  %v1634_v0 = vrot.slane %v1633_v2, 4  ;;  %3023 = vrcp.f32 %v1682_v55  ;;  %v1529_v7 = vrot.slane %v1528_v56, 4 }
 0x532   : > { %v1606_v3 = vsel %vm988_vm14, %v1605_v47, 0.0  ;;  %v1557_v57 = vadd.f32 %v1556_v31, %v1555_v28  ;;  %v1872_v41 = vadd.f32 %v1871_v62, %v1870_v33  ;;  %v1823_v26 = vrot.slane %v1822_v61, 4  ;;  %v5000_v62 = vld [vmem:[#allocation37_spill] sm:$0xff] }
 0x533   : > { %v1459_v27 = vadd.f32 %v1458_v6, %v1377_v23  ;;  %v1607_v58 = vadd.f32 %v1606_v3, %v1602_v25  ;;  %v1635_v36 = vadd.f32 %v1634_v0, %v1633_v2  ;;  %v1530_v12 = vsel %vm1000_vm2, %v1529_v7, 0.0  ;;  %v3062_v7 = vld [vmem:[#allocation3 + $0x7] sm:$0x1] }
 0x534   : > { %v1900_v30 = vsel %vm988_vm14, %v1899_v44, 0.0  ;;  %v4643_v54 = vmul.f32 %v2632_v46, %v4998_v4  ;;  %v1531_v23 = vadd.f32 %v1530_v12, %v1528_v56  ;;  %v1558_v18 = vadd.f32 %v3061_v10, %v1557_v57  ;;  %v2633_v57 = vld [vmem:[#allocation19 + $0xe] ss:$0 sm:$0xff] }
 0x535   : > { %v1608_v59 = vrot.slane %v1607_v58, 6  ;;  %v1636_v53 = vrot.slane %v1635_v36, 2  ;;  %v1824_v29 = vsel %vm1000_vm2, %v1823_v26, 0.0  ;;  %v1873_v32 = vrot.slane %v1872_v41, 2  ;;  %v5002_v26 = vld [vmem:[#allocation39_spill] sm:$0xff] }
 0x536   : > { %v4645_v38 = vpop.eup %3021  ;;  %v1901_v11 = vadd.f32 %v1900_v30, %v1896_v5  ;;  %v1952_v34 = vsel %vm594_vm1, %v1896_v5, 0.0  ;;  %v1538_v1 = vadd.f32 %v4999_v22, %v1531_v23  ;;  %1559 = vst.msk [vmem:[#allocation3 + $0x6] sm:$0x1] %vm561_vm10, %v1558_v18  ;;  %v1825_v19 = vadd.f32 %v1824_v29, %v1822_v61  ;;  %v1516_v5 = vpop.xlane.xlu1 %1515 }
 0x537   : > { %v1609_v40 = vsel %vm994_vm15, %v1608_v59, 0.0  ;;  %v1637_v42 = vadd.f32 %v1636_v53, %v1635_v36  ;;  %v1764_v45 = vadd.f32 1e-12, %v4645_v38  ;;  %v1874_v20 = vadd.f32 %v1873_v32, %v1872_v41  ;;  %v3063_v41 = vld [vmem:[#allocation2 + $0xa] sm:$0x1] }
 0x538   : > { %v1610_v33 = vadd.f32 %v1609_v40, %v1607_v58  ;;  %v1902_v16 = vrot.slane %v1901_v11, 6  ;;  %v1539_v17 = vmul.f32 %v4544_v43, %v1538_v1  ;;  %v1953_v48 = vrot.slane %v1952_v34, 4  ;;  %v5001_v43 = vld [vmem:[#allocation42_spill] sm:$0xff]  ;;  %v1598_v1 = vpop.xlane.xlu0 %1597  ;;  %v5003_v40 = vld [vmem:[#allocation40_spill] sm:$0xff] }
 0x539   : > { %v1638_v35 = vrot.slane %v1637_v42, 1  ;;  %3025 = vrcp.f32 %v1764_v45  ;;  %v1832_v44 = vadd.f32 %v5000_v62, %v1825_v19  ;;  %v1875_v60 = vrot.slane %v1874_v20, 1 }
 0x53a   : > { %v1611_v25 = vrot.slane %v1610_v33, 4  ;;  %v1903_v51 = vsel %vm994_vm15, %v1902_v16, 0.0  ;;  %v1540_v55 = vmul.f32 %v1539_v17, %v1516_v5  ;;  %v1954_v56 = vadd.f32 %v1953_v48, %v1952_v34  ;;  %v5004_v48 = vld [vmem:[#allocation43_spill] sm:$0xff] }
 0x53b   : > { %v3024_v28 = vpop.eup %3023  ;;  %v1639_v8 = vadd.f32 %v1638_v35, %v1637_v42  ;;  %v1904_v6 = vadd.f32 %v1903_v51, %v1901_v11  ;;  %v1833_v31 = vmul.f32 1.442695, %v1832_v44  ;;  %v1876_v0 = vadd.f32 %v1875_v60, %v1874_v20 }
 0x53c   : > { %v1612_v47 = vsel %vm1000_vm2, %v1611_v25, 0.0  ;;  %v1684_v2 = vmul.f32 %v3024_v28, %v5001_v43  ;;  %v1541_v52 = vadd.f32 %v1540_v55, %v1459_v27  ;;  %v1955_v27 = vrot.slane %v1954_v56, 2 }
 0x53d   : > { %v1613_v46 = vadd.f32 %v1612_v47, %v1610_v33  ;;  %v1640_v3 = vadd.f32 %v3062_v7, %v1639_v8  ;;  %v1905_v61 = vrot.slane %v1904_v6, 4  ;;  %3027 = vpow2.f32 %v1833_v31  ;;  %v3064_v47 = vld [vmem:[#allocation2 + $0xb] sm:$0x1] }
 0x53e   : > { %v1687_v58 = vrot.slane %v1684_v2, 7  ;;  %v1715_v36 = vsel %vm594_vm1, %v1684_v2, 0.0  ;;  %v1877_v12 = vadd.f32 %v3063_v41, %v1876_v0  ;;  %v1978_v53 = vsel %vm963_vm13, 0.0, %v4631_v39 }
 0x53f   : > { %v1620_v30 = vadd.f32 %v5002_v26, %v1613_v46  ;;  %1641 = vst.msk [vmem:[#allocation3 + $0x7] sm:$0x1] %vm561_vm10, %v1640_v3  ;;  %v1716_v23 = vrot.slane %v1715_v36, 4  ;;  %v1906_v10 = vsel %vm1000_vm2, %v1905_v61, 0.0  ;;  %v2139_v29 = vmul.f32 %v2633_v57, %v4998_v4 }
 0x540   : > { %v1688_v18 = vsel %vm988_vm14, %v1687_v58, 0.0  ;;  %1878 = vst.msk [vmem:[#allocation2 + $0xa] sm:$0x1] %vm561_vm10, %v1877_v12  ;;  %v1907_v59 = vadd.f32 %v1906_v10, %v1904_v6  ;;  %v1956_v22 = vadd.f32 %v1955_v27, %v1954_v56  ;;  %v1981_v45 = vrot.slane %v1978_v53, 7 }
 0x541   : > { %v1621_v32 = vmul.f32 %v4576_v50, %v1620_v30  ;;  %v1689_v11 = vadd.f32 %v1688_v18, %v1684_v2  ;;  %v1717_v34 = vadd.f32 %v1716_v23, %v1715_v36  ;;  %v2034_v33 = vsel %vm594_vm1, %v1978_v53, 0.0  ;;  %v3065_v30 = vld [vmem:[#allocation3 + $0x8] sm:$0x1]  ;;  %v1768_v18 = vld [vmem:[#allocation3 + $0x9] sm:$0x1] }
 0x542   : > { %v1914_v42 = vadd.f32 %v5003_v40, %v1907_v59  ;;  %v2058_v19 = vmul.f32 1.442695, %v4643_v54  ;;  %v1957_v39 = vrot.slane %v1956_v22, 1  ;;  %v1982_v50 = vsel %vm988_vm14, %v1981_v45, 0.0  ;;  %v2634_v40 = vld [vmem:[#allocation19 + $0xf] ss:$0 sm:$0xff] }
 0x543   : > { %v3026_v20 = vpop.eup %3025  ;;  %v1622_v16 = vmul.f32 %v1621_v32, %v1598_v1  ;;  %v1690_v17 = vrot.slane %v1689_v11, 6  ;;  %v1718_v35 = vrot.slane %v1717_v34, 2  ;;  %v2035_v62 = vrot.slane %v2034_v33, 4  ;;  %v5005_v32 = vld [vmem:[#allocation41_spill] sm:$0xff] }
 0x544   : > { %v1766_v5 = vmul.f32 %v3026_v20, %v5004_v48  ;;  %v1915_v25 = vmul.f32 1.442695, %v1914_v42  ;;  %v1958_v28 = vadd.f32 %v1957_v39, %v1956_v22  ;;  %v1983_v2 = vadd.f32 %v1982_v50, %v1978_v53 }
 0x545   : > { %v4681_v44 = vadd.f32 %v1622_v16, %v1541_v52  ;;  %v1691_v60 = vsel %vm994_vm15, %v1690_v17, 0.0  ;;  %v1719_v51 = vadd.f32 %v1718_v35, %v1717_v34  ;;  %v2036_v46 = vadd.f32 %v2035_v62, %v2034_v33  ;;  %v1680_v35 = vpop.xlane.xlu1 %1679 }
 0x546   : > { %v1692_v54 = vadd.f32 %v1691_v60, %v1689_v11  ;;  %v1769_v55 = vrot.slane %v1766_v5, 7  ;;  %v1797_v8 = vsel %vm594_vm1, %v1766_v5, 0.0  ;;  %3029 = vpow2.f32 %v1915_v25 }
 0x547   : > { %v1720_v6 = vrot.slane %v1719_v51, 1  ;;  %v1798_v56 = vrot.slane %v1797_v8, 4  ;;  %v1959_v43 = vadd.f32 %v3064_v47, %v1958_v28  ;;  %v4686_v31 = vpop.eup %3027  ;;  %3031 = vpow2.f32 %v2058_v19 }
 0x548   : > { %v1693_v0 = vrot.slane %v1692_v54, 4  ;;  %v1770_v52 = vsel %vm988_vm14, %v1769_v55, 0.0  ;;  %v1846_v57 = vadd.f32 1e-12, %v4686_v31  ;;  %v1984_v36 = vrot.slane %v1983_v2, 6 }
 0x549   : > { %v1721_v7 = vadd.f32 %v1720_v6, %v1719_v51  ;;  %v1771_v3 = vadd.f32 %v1770_v52, %v1766_v5  ;;  %v1799_v61 = vadd.f32 %v1798_v56, %v1797_v8  ;;  %1960 = vst.msk [vmem:[#allocation2 + $0xb] sm:$0x1] %vm561_vm10, %v1959_v43  ;;  %v2037_v41 = vrot.slane %v2036_v46, 2  ;;  %v5006_v52 = vld [vmem:[#allocation38_spill] sm:$0xff] }
 0x54a   : > { %v1694_v58 = vsel %vm1000_vm2, %v1693_v0, 0.0  ;;  %v2140_v12 = vmul.f32 1.442695, %v2139_v29  ;;  %3033 = vrcp.f32 %v1846_v57  ;;  %v1985_v59 = vsel %vm994_vm15, %v1984_v36, 0.0  ;;  %v1980_v29 = vld [vmem:[#allocation2 + $0xc] sm:$0x1] }
 0x54b   : > { %v1695_v26 = vadd.f32 %v1694_v58, %v1692_v54  ;;  %v1722_v23 = vadd.f32 %v3065_v30, %v1721_v7  ;;  %v1772_v10 = vrot.slane %v1771_v3, 6  ;;  %v1800_v27 = vrot.slane %v1799_v61, 2  ;;  %v4720_v7 = vld [vmem:[#allocation3 + $0xb] sm:$0x1] }
 0x54c   : > { %v2038_v53 = vadd.f32 %v2037_v41, %v2036_v46  ;;  %v1986_v1 = vadd.f32 %v1985_v59, %v1983_v2  ;;  %3035 = vpow2.f32 %v2140_v12  ;;  %v1782_v19 = vrot.slane %v1768_v18, %v4148_v13 }
 0x54d   : > { %v1702_v11 = vadd.f32 %v5005_v32, %v1695_v26  ;;  %1723 = vst.msk [vmem:[#allocation3 + $0x8] sm:$0x1] %vm561_vm10, %v1722_v23  ;;  %v1773_v34 = vsel %vm994_vm15, %v1772_v10, 0.0  ;;  %v1801_v22 = vadd.f32 %v1800_v27, %v1799_v61  ;;  %v1994_v48 = vrot.slane %v1980_v29, %v4148_v13  ;;  %v1762_v23 = vpop.xlane.xlu0 %1761  ;;  %v2062_v27 = vld [vmem:[#allocation2 + $0xd] sm:$0x1] }
 0x54e   : > { %v1774_v42 = vadd.f32 %v1773_v34, %v1771_v3  ;;  %v2039_v45 = vrot.slane %v2038_v53, 1  ;;  %v1987_v16 = vrot.slane %v1986_v1, 4  ;;  %v2221_v25 = vmul.f32 %v2634_v40, %v4998_v4  ;;  %v4712_v4 = vld [vmem:[#allocation3 + $0xa] sm:$0x1] }
 0x54f   : > { %v1703_v33 = vmul.f32 %v4622_v63, %v1702_v11  ;;  %v1802_v20 = vrot.slane %v1801_v22, 1  ;;  %v1845_v46 = vmul.f32 %v4467_v37, %v5006_v52  ;;  %v1927_v57 = vmul.f32 %v4519_v24, %v5006_v52 }
 0x550   : > { %v4702_v17 = vpop.eup %3029  ;;  %v1775_v39 = vrot.slane %v1774_v42, 4  ;;  %v2040_v5 = vadd.f32 %v2039_v45, %v2038_v53  ;;  %v1988_v63 = vsel %vm1000_vm2, %v1987_v16, 0.0  ;;  %v2222_v8 = vmul.f32 1.442695, %v2221_v25 }
 0x551   : > { %v1704_v50 = vmul.f32 %v1703_v33, %v1680_v35  ;;  %v1803_v62 = vadd.f32 %v1802_v20, %v1801_v22  ;;  %v1928_v60 = vadd.f32 1e-12, %v4702_v17  ;;  %v3032_v51 = vpop.eup %3031  ;;  %v1989_v54 = vadd.f32 %v1988_v63, %v1986_v1 }
 0x552   : > { %v1776_v28 = vsel %vm1000_vm2, %v1775_v39, 0.0  ;;  %v2041_v55 = vadd.f32 %v2040_v5, %v1980_v29  ;;  %v2060_v2 = vsel %vm963_vm13, 0.0, %v3032_v51  ;;  %v1864_v26 = vrot.slane %v4712_v4, %v4148_v13  ;;  %v4735_v29 = vld [vmem:[#allocation2 + $0xe] sm:$0x1] }
 0x553   : > { %v1705_v6 = vadd.f32 %v1704_v50, %v4681_v44  ;;  %v1777_v56 = vadd.f32 %v1776_v28, %v1774_v42  ;;  %v1804_v47 = vadd.f32 %v1803_v62, %v1768_v18  ;;  %3037 = vrcp.f32 %v1928_v60 }
 0x554   : > { %v1996_v43 = vadd.f32 %v1994_v48, %v1989_v54  ;;  %2042 = vst.msk [vmem:[#allocation2 + $0xc] sm:$0x1] %vm561_vm10, %v2041_v55  ;;  %3039 = vpow2.f32 %v2222_v8  ;;  %v2063_v44 = vrot.slane %v2060_v2, 7  ;;  %v2116_v3 = vsel %vm594_vm1, %v2060_v2, 0.0  ;;  %v3034_v61 = vpop.eup %3033 }
 0x555   : > { %v1784_v0 = vadd.f32 %v1782_v19, %v1777_v56  ;;  %1805 = vst.msk [vmem:[#allocation3 + $0x9] sm:$0x1] %vm561_vm10, %v1804_v47  ;;  %v2117_v36 = vrot.slane %v2116_v3, 4  ;;  %v1848_v12 = vmul.f32 %v3034_v61, %v1845_v46  ;;  %v1946_v10 = vrot.slane %v4720_v7, %v4148_v13 }
 0x556   : > { %v1997_v58 = vmul.f32 1.442695, %v1996_v43  ;;  %v2064_v37 = vsel %vm988_vm14, %v2063_v44, 0.0  ;;  %v3036_v30 = vpop.eup %3035  ;;  %v2076_v45 = vrot.slane %v2062_v27, %v4148_v13  ;;  %v2158_v25 = vrot.slane %v4735_v29, %v4148_v13 }
 0x557   : > { %v1785_v41 = vmul.f32 %v4645_v38, %v1784_v0  ;;  %v2065_v18 = vadd.f32 %v2064_v37, %v2060_v2  ;;  %v2118_v24 = vadd.f32 %v2117_v36, %v2116_v3  ;;  %v1851_v53 = vrot.slane %v1848_v12, 7 }
 0x558   : > { %3041 = vpow2.f32 %v1997_v58  ;;  %v1879_v38 = vsel %vm594_vm1, %v1848_v12, 0.0  ;;  %v2142_v32 = vsel %vm963_vm13, 0.0, %v3036_v30 }
 0x559   : > { %v1786_v59 = vmul.f32 %v1785_v41, %v1762_v23  ;;  %v1880_v11 = vrot.slane %v1879_v38, 4  ;;  %v2066_v34 = vrot.slane %v2065_v18, 6  ;;  %v2119_v22 = vrot.slane %v2118_v24, 2 }
 0x55a   : > { %v2145_v1 = vrot.slane %v2142_v32, 7  ;;  %v1852_v42 = vsel %vm988_vm14, %v1851_v53, 0.0  ;;  %v2198_v33 = vsel %vm594_vm1, %v2142_v32, 0.0 }
 0x55b   : > { %v4737_v40 = vadd.f32 %v1786_v59, %v1705_v6  ;;  %v1853_v19 = vadd.f32 %v1852_v42, %v1848_v12  ;;  %v1881_v20 = vadd.f32 %v1880_v11, %v1879_v38  ;;  %v2067_v16 = vsel %vm994_vm15, %v2066_v34, 0.0 }
 0x55c   : > { %v2120_v35 = vadd.f32 %v2119_v22, %v2118_v24  ;;  %v2068_v48 = vadd.f32 %v2067_v16, %v2065_v18  ;;  %v2146_v5 = vsel %vm988_vm14, %v2145_v1, 0.0  ;;  %v2199_v50 = vrot.slane %v2198_v33, 4 }
 0x55d   : > { %v3038_v39 = vpop.eup %3037  ;;  %v1854_v60 = vrot.slane %v1853_v19, 6  ;;  %v1882_v63 = vrot.slane %v1881_v20, 2  ;;  %v2147_v55 = vadd.f32 %v2146_v5, %v2142_v32 }
 0x55e   : > { %v3040_v62 = vpop.eup %3039  ;;  %v1930_v51 = vmul.f32 %v3038_v39, %v1927_v57  ;;  %v2121_v28 = vrot.slane %v2120_v35, 1  ;;  %v2069_v54 = vrot.slane %v2068_v48, 4  ;;  %v2200_v8 = vadd.f32 %v2199_v50, %v2198_v33 }
 0x55f   : > { %v2224_v6 = vsel %vm963_vm13, 0.0, %v3040_v62  ;;  %v1855_v56 = vsel %vm994_vm15, %v1854_v60, 0.0  ;;  %v1883_v47 = vadd.f32 %v1882_v63, %v1881_v20  ;;  %v2148_v41 = vrot.slane %v2147_v55, 6 }
 0x560   : > { %v1933_v43 = vrot.slane %v1930_v51, 7  ;;  %v1961_v2 = vsel %vm594_vm1, %v1930_v51, 0.0  ;;  %v1856_v0 = vadd.f32 %v1855_v56, %v1853_v19  ;;  %v2070_v44 = vsel %vm1000_vm2, %v2069_v54, 0.0 }
 0x561   : > { %v1962_v46 = vrot.slane %v1961_v2, 4  ;;  %v2122_v3 = vadd.f32 %v2121_v28, %v2120_v35  ;;  %v1884_v57 = vrot.slane %v1883_v47, 1  ;;  %v2071_v36 = vadd.f32 %v2070_v44, %v2068_v48 }
 0x562   : > { %v4756_v61 = vpop.eup %3041  ;;  %v1934_v58 = vsel %vm988_vm14, %v1933_v43, 0.0  ;;  %v1857_v12 = vrot.slane %v1856_v0, 4  ;;  %v2149_v53 = vsel %vm994_vm15, %v2148_v41, 0.0  ;;  %v2201_v33 = vrot.slane %v2200_v8, 2  ;;  %v2226_v41 = vld [vmem:[#allocation2 + $0xf] sm:$0x1] }
 0x563   : > { %v1935_v37 = vadd.f32 %v1934_v58, %v1930_v51  ;;  %v1963_v30 = vadd.f32 %v1962_v46, %v1961_v2  ;;  %v2010_v23 = vadd.f32 1e-12, %v4756_v61  ;;  %v1885_v18 = vadd.f32 %v1884_v57, %v1883_v47 }
 0x564   : > { %v2078_v24 = vadd.f32 %v2076_v45, %v2071_v36  ;;  %v2123_v59 = vadd.f32 %v2122_v3, %v2062_v27  ;;  %v1858_v38 = vsel %vm1000_vm2, %v1857_v12, 0.0  ;;  %v2150_v42 = vadd.f32 %v2149_v53, %v2147_v55 }
 0x565   : > { %v1936_v32 = vrot.slane %v1935_v37, 6  ;;  %v1964_v11 = vrot.slane %v1963_v30, 2  ;;  %3043 = vrcp.f32 %v2010_v23  ;;  %v1859_v34 = vadd.f32 %v1858_v38, %v1856_v0 }
 0x566   : > { %v1886_v22 = vadd.f32 %v1885_v18, %v4712_v4  ;;  %v2079_v1 = vmul.f32 1.442695, %v2078_v24  ;;  %2124 = vst.msk [vmem:[#allocation2 + $0xd] sm:$0x1] %vm561_vm10, %v2123_v59  ;;  %v2227_v19 = vrot.slane %v2224_v6, 7  ;;  %v2151_v35 = vrot.slane %v2150_v42, 4  ;;  %v1926_v18 = vpop.xlane.xlu0 %1925 }
 0x567   : > { %v1937_v45 = vsel %vm994_vm15, %v1936_v32, 0.0  ;;  %v1965_v27 = vadd.f32 %v1964_v11, %v1963_v30  ;;  %v1866_v20 = vadd.f32 %v1864_v26, %v1859_v34  ;;  %v2202_v48 = vadd.f32 %v2201_v33, %v2200_v8  ;;  %v1844_v26 = vpop.xlane.xlu1 %1843 }
 0x568   : > { %1887 = vst.msk [vmem:[#allocation3 + $0xa] sm:$0x1] %vm561_vm10, %v1886_v22  ;;  %v1938_v16 = vadd.f32 %v1937_v45, %v1935_v37  ;;  %3045 = vpow2.f32 %v2079_v1  ;;  %v2228_v5 = vsel %vm988_vm14, %v2227_v19, 0.0  ;;  %v2280_v50 = vsel %vm594_vm1, %v2224_v6, 0.0 }
 0x569   : > { %v1966_v39 = vrot.slane %v1965_v27, 1  ;;  %v1867_v62 = vmul.f32 %v4686_v31, %v1866_v20  ;;  %v2152_v63 = vsel %vm1000_vm2, %v2151_v35, 0.0  ;;  %v2229_v4 = vadd.f32 %v2228_v5, %v2224_v6 }
 0x56a   : > { %v1939_v60 = vrot.slane %v1938_v16, 4  ;;  %v2153_v28 = vadd.f32 %v2152_v63, %v2150_v42  ;;  %v2203_v54 = vrot.slane %v2202_v48, 1  ;;  %v2281_v55 = vrot.slane %v2280_v50, 4 }
 0x56b   : > { %v1967_v51 = vadd.f32 %v1966_v39, %v1965_v27  ;;  %v1868_v56 = vmul.f32 %v1867_v62, %v1844_v26  ;;  %v2230_v47 = vrot.slane %v2229_v4, 6  ;;  %v2009_v46 = vmul.f32 %v4541_v21, %v5006_v52 }
 0x56c   : > { %v1940_v8 = vsel %vm1000_vm2, %v1939_v60, 0.0  ;;  %v2160_v31 = vadd.f32 %v2158_v25, %v2153_v28  ;;  %v2204_v0 = vadd.f32 %v2203_v54, %v2202_v48  ;;  %v2282_v3 = vadd.f32 %v2281_v55, %v2280_v50  ;;  %v2014_v48 = vld [vmem:[#allocation3 + $0xc] sm:$0x1] }
 0x56d   : > { %v1941_v43 = vadd.f32 %v1940_v8, %v1938_v16  ;;  %v1968_v2 = vadd.f32 %v1967_v51, %v4720_v7  ;;  %v1869_v6 = vadd.f32 %v1868_v56, %v4737_v40  ;;  %v2231_v44 = vsel %vm994_vm15, %v2230_v47, 0.0 }
 0x56e   : > { %v2161_v36 = vmul.f32 1.442695, %v2160_v31  ;;  %v2205_v25 = vadd.f32 %v2204_v0, %v4735_v29  ;;  %v2232_v12 = vadd.f32 %v2231_v44, %v2229_v4  ;;  %v2283_v37 = vrot.slane %v2282_v3, 2 }
 0x56f   : > { %v3044_v57 = vpop.eup %3043  ;;  %v1948_v58 = vadd.f32 %v1946_v10, %v1941_v43  ;;  %1969 = vst.msk [vmem:[#allocation3 + $0xb] sm:$0x1] %vm561_vm10, %v1968_v2  ;;  %v2240_v24 = vrot.slane %v2226_v41, %v4148_v13  ;;  %v2028_v4 = vrot.slane %v2014_v48, %v4148_v13  ;;  %v2091_v28 = vmul.f32 %v4565_v14, %v5006_v52 }
 0x570   : > { %v2012_v40 = vmul.f32 %v3044_v57, %v2009_v46  ;;  %3047 = vpow2.f32 %v2161_v36  ;;  %2206 = vst.msk [vmem:[#allocation2 + $0xe] sm:$0x1] %vm561_vm10, %v2205_v25  ;;  %v2233_v30 = vrot.slane %v2232_v12, 4  ;;  %v2284_v59 = vadd.f32 %v2283_v37, %v2282_v3  ;;  %v2008_v46 = vpop.xlane.xlu1 %2007  ;;  %v5007_v36 = vld [vmem:[#allocation34_spill] sm:$0xff] }
 0x571   : > { %v1949_v21 = vmul.f32 %v4702_v17, %v1948_v58  ;;  %v2635_v25 = vmul.f32 -1.442695, %v5007_v36 }
 0x572   : > { %v4797_v23 = vpop.eup %3045  ;;  %v2015_v7 = vrot.slane %v2012_v40, 7  ;;  %v2043_v10 = vsel %vm594_vm1, %v2012_v40, 0.0  ;;  %v2234_v17 = vsel %vm1000_vm2, %v2233_v30, 0.0  ;;  %v2285_v34 = vrot.slane %v2284_v59, 1 }
 0x573   : > { %v1950_v29 = vmul.f32 %v1949_v21, %v1926_v18  ;;  %v2044_v53 = vrot.slane %v2043_v10, 4  ;;  %v2092_v38 = vadd.f32 1e-12, %v4797_v23  ;;  %v2235_v11 = vadd.f32 %v2234_v17, %v2232_v12 }
 0x574   : > { %v2016_v32 = vsel %vm988_vm14, %v2015_v7, 0.0  ;;  %v2286_v27 = vadd.f32 %v2285_v34, %v2284_v59 }
 0x575   : > { %v1951_v22 = vadd.f32 %v1950_v29, %v1869_v6  ;;  %v2017_v1 = vadd.f32 %v2016_v32, %v2012_v40  ;;  %v2045_v42 = vadd.f32 %v2044_v53, %v2043_v10  ;;  %3049 = vrcp.f32 %v2092_v38  ;;  %v2096_v29 = vld [vmem:[#allocation3 + $0xd] sm:$0x1] }
 0x576   : > { %v2242_v45 = vadd.f32 %v2240_v24, %v2235_v11  ;;  %v2287_v16 = vadd.f32 %v2286_v27, %v2226_v41  ;;  %v2173_v41 = vmul.f32 %v4590_v15, %v5006_v52 }
 0x577   : > { %v2018_v33 = vrot.slane %v2017_v1, 6  ;;  %v2046_v19 = vrot.slane %v2045_v42, 2 }
 0x578   : > { %v2243_v20 = vmul.f32 1.442695, %v2242_v45  ;;  %2288 = vst.msk [vmem:[#allocation2 + $0xf] sm:$0x1] %vm561_vm10, %v2287_v16  ;;  %v2255_v45 = vmul.f32 %v4605_v49, %v5006_v52 }
 0x579   : > { %v2019_v35 = vsel %vm994_vm15, %v2018_v33, 0.0  ;;  %v2047_v39 = vadd.f32 %v2046_v19, %v2045_v42 }
 0x57a   : > { %v2020_v5 = vadd.f32 %v2019_v35, %v2017_v1  ;;  %3051 = vpow2.f32 %v2243_v20  ;;  %v4809_v50 = vpop.eup %3047  ;;  %v2110_v35 = vrot.slane %v2096_v29, %v4148_v13 }
 0x57b   : > { %v2048_v62 = vrot.slane %v2047_v39, 1  ;;  %v2174_v63 = vadd.f32 1e-12, %v4809_v50 }
 0x57c   : > { %v2021_v60 = vrot.slane %v2020_v5, 4 }
 0x57d   : > { %v2049_v26 = vadd.f32 %v2048_v62, %v2047_v39  ;;  %3053 = vrcp.f32 %v2174_v63  ;;  %v2178_v39 = vld [vmem:[#allocation3 + $0xe] sm:$0x1] }
 0x57e   : > { %v2022_v51 = vsel %vm1000_vm2, %v2021_v60, 0.0  ;;  %v2192_v52 = vrot.slane %v2178_v39, %v4148_v13 }
 0x57f   : > { %v3050_v54 = vpop.eup %3049  ;;  %v2023_v55 = vadd.f32 %v2022_v51, %v2020_v5  ;;  %v2050_v56 = vadd.f32 %v2049_v26, %v2014_v48 }
 0x580   : > { %v2094_v8 = vmul.f32 %v3050_v54, %v2091_v28 }
 0x581   : > { %v2030_v47 = vadd.f32 %v2028_v4, %v2023_v55  ;;  %2051 = vst.msk [vmem:[#allocation3 + $0xc] sm:$0x1] %vm561_vm10, %v2050_v56 }
 0x582   : > { %v2097_v43 = vrot.slane %v2094_v8, 7  ;;  %v2125_v2 = vsel %vm594_vm1, %v2094_v8, 0.0 }
 0x583   : > { %v2031_v31 = vmul.f32 %v4756_v61, %v2030_v47  ;;  %v2126_v0 = vrot.slane %v2125_v2, 4 }
 0x584   : > { %v4820_v6 = vpop.eup %3051  ;;  %v2098_v14 = vsel %vm988_vm14, %v2097_v43, 0.0 }
 0x585   : > { %v2032_v44 = vmul.f32 %v2031_v31, %v2008_v46  ;;  %v2099_v3 = vadd.f32 %v2098_v14, %v2094_v8  ;;  %v2127_v57 = vadd.f32 %v2126_v0, %v2125_v2  ;;  %v2256_v58 = vadd.f32 1e-12, %v4820_v6 }
 0x587   : > { %v4828_v12 = vadd.f32 %v2032_v44, %v1951_v22  ;;  %v2100_v61 = vrot.slane %v2099_v3, 6  ;;  %v2128_v40 = vrot.slane %v2127_v57, 2  ;;  %3055 = vrcp.f32 %v2256_v58  ;;  %v3054_v37 = vpop.eup %3053 }
 0x588   : > { %v2176_v18 = vmul.f32 %v3054_v37, %v2173_v41  ;;  %3057 = vpow2.f32 %v2635_v25  ;;  %v2090_v25 = vpop.xlane.xlu0 %2089 }
 0x589   : > { %v2101_v21 = vsel %vm994_vm15, %v2100_v61, 0.0  ;;  %v2129_v30 = vadd.f32 %v2128_v40, %v2127_v57 }
 0x58a   : > { %v2102_v7 = vadd.f32 %v2101_v21, %v2099_v3  ;;  %v2179_v24 = vrot.slane %v2176_v18, 7  ;;  %v2207_v59 = vsel %vm594_vm1, %v2176_v18, 0.0  ;;  %v2260_v3 = vld [vmem:[#allocation3 + $0xf] sm:$0x1] }
 0x58b   : > { %v2130_v10 = vrot.slane %v2129_v30, 1  ;;  %v2208_v15 = vrot.slane %v2207_v59, 4  ;;  %v2274_v37 = vrot.slane %v2260_v3, %v4148_v13 }
 0x58c   : > { %v2103_v53 = vrot.slane %v2102_v7, 4  ;;  %v2180_v17 = vsel %vm988_vm14, %v2179_v24, 0.0 }
 0x58d   : > { %v2131_v38 = vadd.f32 %v2130_v10, %v2129_v30  ;;  %v2181_v32 = vadd.f32 %v2180_v17, %v2176_v18  ;;  %v2209_v11 = vadd.f32 %v2208_v15, %v2207_v59  ;;  %v2172_v10 = vpop.xlane.xlu1 %2171 }
 0x58e   : > { %v2104_v22 = vsel %vm1000_vm2, %v2103_v53, 0.0  ;;  %v2254_v53 = vpop.xlane.xlu0 %2253 }
 0x58f   : > { %v2132_v34 = vadd.f32 %v2131_v38, %v2096_v29  ;;  %v2182_v1 = vrot.slane %v2181_v32, 6  ;;  %v2210_v42 = vrot.slane %v2209_v11, 2  ;;  %v2105_v16 = vadd.f32 %v2104_v22, %v2102_v7 }
 0x591   : > { %v3056_v27 = vpop.eup %3055  ;;  %2133 = vst.msk [vmem:[#allocation3 + $0xd] sm:$0x1] %vm561_vm10, %v2132_v34  ;;  %v2183_v33 = vsel %vm994_vm15, %v2182_v1, 0.0  ;;  %v2211_v19 = vadd.f32 %v2210_v42, %v2209_v11  ;;  %v2112_v28 = vadd.f32 %v2110_v35, %v2105_v16 }
 0x592   : > { %v2258_v20 = vmul.f32 %v3056_v27, %v2255_v45  ;;  %v2184_v48 = vadd.f32 %v2183_v33, %v2181_v32  ;;  %v3058_v63 = vpop.eup %3057  ;;  %v3066_v32 = vld [vmem:[%s3920_s1] sm:$0xff]  ;;  %s3386_s1 = sshll.u32 %s3504_s26, 4  ;;  %s3387_s1 = int_to_ptr.vmem [resolvable:$false] %s3386_s1 }
 0x593   : > { %v2212_v5 = vrot.slane %v2211_v19, 1  ;;  %v2301_v8 = vadd.f32 1.0, %v3058_v63  ;;  %v2113_v0 = vmul.f32 %v4797_v23, %v2112_v28  ;;  %s3388_s13 = scalar_lea.vmem %s3387_s1, 256  ;;  %p3389_p10 = scmp.lt.s32.totalorder %s4871_s14, %s3387_s1 }
 0x594   : > { %v2261_v62 = vrot.slane %v2258_v20, 7  ;;  %v2289_v60 = vsel %vm594_vm1, %v2258_v20, 0.0  ;;  %v2185_v4 = vrot.slane %v2184_v48, 4  ;;  %p3390_p13 = scmp.lt.s32.totalorder %s3388_s13, %s3382_s12 }
 0x595   : > { %v2290_v49 = vrot.slane %v2289_v60, 4  ;;  %v2213_v26 = vadd.f32 %v2212_v5, %v2211_v19  ;;  %3059 = vrcp.f32 %v2301_v8  ;;  %v2114_v61 = vmul.f32 %v2113_v0, %v2090_v25 }
 0x596   : > { %v2262_v51 = vsel %vm988_vm14, %v2261_v62, 0.0  ;;  %v2186_v54 = vsel %vm1000_vm2, %v2185_v4, 0.0  ;;  %p3391_p2 = por %p3390_p13, %p3389_p10 }
 0x597   : > { %v2263_v55 = vadd.f32 %v2262_v51, %v2258_v20  ;;  %v2291_v56 = vadd.f32 %v2290_v49, %v2289_v60  ;;  %v2187_v47 = vadd.f32 %v2186_v54, %v2184_v48  ;;  %v2214_v43 = vadd.f32 %v2213_v26, %v2178_v39 }
 0x598   : > { %v2115_v30 = vadd.f32 %v2114_v61, %v4828_v12  ;;  %p3392_p8 = pnand %p3391_p2, %p3385_p7 }
 0x599   : > { %v2264_v2 = vrot.slane %v2263_v55, 6  ;;  %v2292_v31 = vrot.slane %v2291_v56, 2  ;;  %2215 = vst.msk [vmem:[#allocation3 + $0xe] sm:$0x1] %vm561_vm10, %v2214_v43  ;;  %v2194_v46 = vadd.f32 %v2192_v52, %v2187_v47 }
 0x59b   : > { %v2265_v14 = vsel %vm994_vm15, %v2264_v2, 0.0  ;;  %v2293_v44 = vadd.f32 %v2292_v31, %v2291_v56  ;;  %v2195_v40 = vmul.f32 %v4809_v50, %v2194_v46 }
 0x59c   : > { %v2266_v57 = vadd.f32 %v2265_v14, %v2263_v55 }
 0x59d   : > { %v2294_v58 = vrot.slane %v2293_v44, 1  ;;  %v2196_v24 = vmul.f32 %v2195_v40, %v2172_v10 }
 0x59e   : > { %v2267_v41 = vrot.slane %v2266_v57, 4 }
 0x59f   : > { %v2295_v21 = vadd.f32 %v2294_v58, %v2293_v44  ;;  %v2197_v29 = vadd.f32 %v2196_v24, %v2115_v30  ;;  %v3060_v13 = vpop.eup %3059 }
 0x5a0   : > { %v2268_v23 = vsel %vm1000_vm2, %v2267_v41, 0.0  ;;  %v2304_v15 = vmul.f32 %v3060_v13, %v5007_v36 }
 0x5a1   : > { %v2269_v18 = vadd.f32 %v2268_v23, %v2266_v57  ;;  %v2296_v7 = vadd.f32 %v2295_v21, %v2260_v3 }
 0x5a3   : > { %v2276_v59 = vadd.f32 %v2274_v37, %v2269_v18  ;;  %2297 = vst.msk [vmem:[#allocation3 + $0xf] sm:$0x1] %vm561_vm10, %v2296_v7 }
 0x5a5   : > { %v2277_v50 = vmul.f32 %v4820_v6, %v2276_v59 }
 0x5a7   : > { %v2278_v9 = vmul.f32 %v2277_v50, %v2254_v53 }
 0x5a9   : > { %v2279_v12 = vadd.f32 %v2278_v9, %v2197_v29 }
 0x5ab   : > { %v2305_v38 = vmul.f32 %v2304_v15, %v2279_v12 }
 0x5ad   : > { %2719 = vmatmul.mubr.msk.f32.vlgmr.msra.gmra.mrb[2].mxu1 %vm594_vm1, %v2305_v38 }
 0x680   : > { %v2383_v17 = vpop.f32.mrb[2].mxu1 }
 0x681   : > { %v2387_v11 = vadd.f32 %v3066_v32, %v2383_v17  ;;  %v2720_v34 = vpop.f32.mrb[3].mxu1 }
 0x683   : > { %2388 = vst.msk [vmem:[%s553_s27] sm:$0xff] %vm597_vm0, %v2387_v11 }
 0x684   : > { %3395 = shalt.err (!%p3392_p8)
}
 0x685   : > { %s3396_s29 = scalar_lea.hbm %s4869_s23, 128  ;;  %s3400_s28 = scalar_lea.hbm %s5009_s15, 256 }
 0x686   : > { %p3397_p9 = scmp.ne.s32.totalorder %s4869_s23, %s3396_s29  ;;  %p3401_p3 = scmp.lt.u32.totalorder %s4869_s23, %s5009_s15 }
 0x687   : > { %p3402_p1 = scmp.lt.u32.totalorder %s3400_s28, %s3396_s29  ;;  %p3404_p11 = scmp.lt.u32.totalorder %s3396_s29, %s4869_s23 }
 0x688   : > { %p3398_p4 = pnand %p3397_p9, %p5010_p0 }
 0x689   : > { %p3403_p12 = por %p3402_p1, %p3401_p3 }
 0x68a   : > { %p3399_p6 = pneg %p3398_p4 }
 0x68b   : > { %p3405_p5 = por %p3404_p11, %p3403_p12 }
 0x68d   : > { %p3406_p7 = pnand %p3405_p5, %p3399_p6 }
 0x68f   : > { %3409 = shalt.err (!%p3406_p7)
}
 0x690   : > { %2823 = dma.vmem_to_hbm [thread:$0]  (%p5010_p0), %s4871_s14, 128, %s4869_s23, %s2390_s3  }
 0x691 PF: > { %s2416_s12 = sand.u32 1, %s3464_s17   ;;  %p5011_p10 = scmp.ne.s32.totalorder %s4965_s25, 0 }
 0x692   : > { %p5012_p13 = scmp.ge.s32.totalorder %s3484_s22, 2  ;;  %s2417_s1 = scalar_lea.sflag [#allocation7], %s2416_s12 }
 0x694   : > { %p2861_p2 = pnand %p5012_p13, %p5011_p10 }
 0x696   : > { %3459 = dma.done.wait (!%p2861_p2), %s2417_s1, 128  }
 0x697   : > { %3461 = vsyncadd (!%p2861_p2), %s2417_s1, 4294967168  ;;  %s32_s22 = sadd.s32 1, %s3484_s22   ;;  %s5013_s17 = smov %s3468_s18 }
 0x698   : > { %p29_p8 = scmp.ge.s32.totalorder %s32_s22, 4   ;;  %s5014_s18 = smov %s3472_s19 }
 0x699   : > { %s5015_s19 = smov %s3864_s11  ;;  %s5016_s20 = smov %s3480_s21 }
 0x69a   : > { %s5017_s21 = smov %s5019_s24  ;;  %31 = sbr.rel (!%p29_p8) target bundleno = 16 (0x10), region = 183 }
 0x6a1   :  { %2422 = vsyncpa [#allocation6], 1 }
 0x6a2   :  { %2424 = vsyncpa [#allocation6 + $0x1], 1 }
 0x6a3   :  { %2425 = vsyncpa [#allocation9], 1 }
 0x6a4   :  { %2426 = vsyncpa [#allocation12], 1 }
 0x6a5   :  { %2427 = vsyncpa [#allocation15], 1 }
 0x6a6   :  { %2428 = vsyncpa [#allocation18], 1 }
 0x6a7   :  { %2429 = vsyncpa [#allocation21], 1 }
 0x6a8   :  { %2430 = vsyncpa [#allocation7], 1 }
 0x6a9   :  { %2432 = vsyncpa [#allocation7 + $0x1], 1 }

</bundles_post_ra>
